<compile_context>
chip_gen: v5e
topology: v5e:2x2
jax: 0.10.0
libtpu: 0.0.40
codegen_flags: <defaults>
</compile_context>

<pallas_src>
import functools

import jax
import jax.numpy as jnp
from jax import lax
from jax.experimental import pallas as pl
from jax.experimental.pallas import tpu as pltpu


def _compute_vmem_limit():
    """Generation-aware scoped-VMEM budget (~5/8 of physical, capped)."""
    cap = 128 * 1024 * 1024
    try:
        info = pltpu.get_tpu_info()
        cap = int(getattr(info, "vmem_capacity_bytes", cap))
    except Exception:
        pass
    return int(min(cap * 5 // 8, 96 * 1024 * 1024))


_VMEM_LIMIT = _compute_vmem_limit()


def _pick_tile(dim, pref, align=8):
    """Largest divisor of `dim` that is <= pref (prefer multiples of `align`).

    Never falls back to the full dimension when dim > pref (avoids silent
    full-array blocks / VMEM blow-ups for non-divisible sizes)."""
    if dim <= pref:
        return dim
    best = 1
    for d in range(pref, 0, -1):
        if dim % d == 0:
            if d % align == 0:
                return d
            if best == 1:
                best = d
    return best


def _largest_divisor_leq(n, cap):
    cap = max(1, min(n, cap))
    for d in range(cap, 0, -1):
        if n % d == 0:
            return d
    return 1


# ----------------------------------------------------------------------------
# Tiled dense:  (M, K) @ (K, N) + (1, N)  with K-axis accumulation (bf16 in/out)
# ----------------------------------------------------------------------------

def _matmul_kernel(x_ref, w_ref, b_ref, o_ref, acc_ref):
    @pl.when(pl.program_id(2) == 0)
    def _():
        acc_ref[...] = jnp.zeros_like(acc_ref)

    acc_ref[...] += jnp.dot(x_ref[...], w_ref[...],
                            preferred_element_type=jnp.float32)

    @pl.when(pl.program_id(2) == pl.num_programs(2) - 1)
    def _():
        o_ref[...] = (acc_ref[...] + b_ref[...]).astype(o_ref.dtype)


def dense(x2d, w, b2d, *, out_dtype=jnp.bfloat16,
          tile_m=1024, tile_n=256, tile_k=512):
    """(M, K) @ (K, N) + (1, N) -> (M, N); bf16 operands, f32 VMEM accumulator."""
    M, K = x2d.shape
    N = w.shape[1]
    TM = _pick_tile(M, tile_m, align=8)
    TN = _pick_tile(N, tile_n, align=128)
    TK = _pick_tile(K, tile_k, align=128)
    out_bytes = M * N * jnp.dtype(out_dtype).itemsize
    return pl.pallas_call(
        _matmul_kernel,
        grid=(M // TM, N // TN, K // TK),
        in_specs=[
            pl.BlockSpec((TM, TK), lambda i, j, k: (i, k)),
            pl.BlockSpec((TK, TN), lambda i, j, k: (k, j)),
            pl.BlockSpec((1, TN), lambda i, j, k: (0, j)),
        ],
        out_specs=pl.BlockSpec((TM, TN), lambda i, j, k: (i, j)),
        out_shape=jax.ShapeDtypeStruct((M, N), out_dtype),
        scratch_shapes=[pltpu.VMEM((TM, TN), jnp.float32)],
        compiler_params=pltpu.CompilerParams(
            dimension_semantics=("parallel", "parallel", "arbitrary"),
            vmem_limit_bytes=_VMEM_LIMIT),
        cost_estimate=pl.CostEstimate(
            flops=2 * M * N * K,
            bytes_accessed=2 * (M * K + K * N) + 4 * N + out_bytes,
            transcendentals=0),
    )(x2d, w, b2d)


# ----------------------------------------------------------------------------
# Multi-head self-attention (Realformer) — one batch element per grid step.
# Rel-pos bias is rebuilt in-kernel from (nRel, A) SMEM tables + a resident
# (L, L) int32 bucket map; preScores are carried in bf16; layer 0 skips them.
# ----------------------------------------------------------------------------

def _attn_kernel(qkv_ref, tab_ref, relk_tab_ref, relb_tab_ref, *rest,
                 nheads, dk, nrel, use_pre):
    if use_pre:
        pre_ref, z_ref, sc_ref = rest
    else:
        pre_ref = None
        z_ref, sc_ref = rest

    H = nheads * dk
    tab = tab_ref[...]                      # (L, L) int32 distance buckets (resident)
    z_heads = []
    # TODO(synk): for very long sequences, move the head axis onto the grid
    # (grid=(B, A)) and/or repack qkv to (B, 3, A, L, dk) for 128-lane-aligned
    # head slices; kept per-batch here for simplicity.
    for h in range(nheads):                 # A is small (4); static unroll
        q = qkv_ref[:, h * dk:(h + 1) * dk]
        k = qkv_ref[:, H + h * dk:H + (h + 1) * dk]
        v = qkv_ref[:, 2 * H + h * dk:2 * H + (h + 1) * dk]
        # QK^T via dot_general (no explicit transpose); 1/sqrt(dk) folded into wq.
        s = lax.dot_general(q, k, (((1,), (1,)), ((), ())),
                            preferred_element_type=jnp.float32)        # (L, L) f32
        # relative-position mult/add bias generated in-kernel (select/accumulate
        # over the nRel buckets; scalars come from the tiny SMEM tables).
        sb = s
        for r in range(nrel):
            sb = jnp.where(tab == r,
                           s * relk_tab_ref[r, h] + relb_tab_ref[r, h],
                           sb)
        s = sb
        if use_pre:
            s = s + pre_ref[h].astype(jnp.float32)  # Realformer residual scores
        sc_ref[h] = s.astype(sc_ref.dtype)          # preScores for the next layer
        # softmax over keys (f32 on the VPU; reciprocal goes to the EUP)
        m = jnp.max(s, axis=-1, keepdims=True)
        e = jnp.exp(s - m)
        p = e * pl.reciprocal(jnp.sum(e, axis=-1, keepdims=True), approx=True)
        z_heads.append(jnp.dot(p.astype(jnp.bfloat16), v,
                               preferred_element_type=jnp.float32))
    # single lane-dense (L, H) store of all heads
    z_ref[...] = jnp.concatenate(z_heads, axis=-1).astype(z_ref.dtype)


def mh_attention(qkv, tab, relK_emb, relB_emb, pre, nheads, dk, nrel):
    """qkv: (B, L, 3H) bf16; tab: (L, L) int32; relK/relB: (nRel, A) f32;
    pre: (B, A, L, L) bf16 or None (layer 0)."""
    B, L, H3 = qkv.shape
    A = nheads
    H = nheads * dk
    use_pre = pre is not None
    kernel = functools.partial(_attn_kernel, nheads=nheads, dk=dk, nrel=nrel,
                               use_pre=use_pre)
    in_specs = [
        pl.BlockSpec((None, L, H3), lambda b: (b, 0, 0)),
        # constant block index -> DMA'd once, stays resident in VMEM
        pl.BlockSpec((L, L), lambda b: (0, 0)),
        # tiny per-layer bias tables live in SMEM (scalar reads in-kernel)
        pl.BlockSpec(memory_space=pltpu.MemorySpace.SMEM),
        pl.BlockSpec(memory_space=pltpu.MemorySpace.SMEM),
    ]
    args = [qkv, tab, relK_emb, relB_emb]
    if use_pre:
        in_specs.append(pl.BlockSpec((None, A, L, L), lambda b: (b, 0, 0, 0)))
        args.append(pre)
    z, scores = pl.pallas_call(
        kernel,
        grid=(B,),
        in_specs=in_specs,
        out_specs=[
            pl.BlockSpec((None, L, H), lambda b: (b, 0, 0)),
            pl.BlockSpec((None, A, L, L), lambda b: (b, 0, 0, 0)),
        ],
        out_shape=[
            jax.ShapeDtypeStruct((B, L, H), jnp.bfloat16),
            jax.ShapeDtypeStruct((B, A, L, L), jnp.bfloat16),
        ],
        compiler_params=pltpu.CompilerParams(
            dimension_semantics=("parallel",),
            vmem_limit_bytes=_VMEM_LIMIT),
        cost_estimate=pl.CostEstimate(
            flops=4 * B * A * L * L * dk + 10 * B * A * L * L,
            bytes_accessed=(2 * B * L * 3 * H + 4 * L * L
                            + (2 if use_pre else 0) * B * A * L * L
                            + 2 * B * A * L * L + 2 * B * L * H),
            transcendentals=B * A * L * (L + 1)),
    )(*args)
    return z, scores


# ----------------------------------------------------------------------------
# FFN_Realformer with the attention output projection fused in, row-tiled
# ----------------------------------------------------------------------------

def _ffn_kernel(x_ref, z_ref, wo_ref, bo_ref, g1_ref, be1_ref, w1_ref, b1_ref,
                w2_ref, b2_ref, g2_ref, be2_ref, o_ref):
    def ln(v, g, b):
        mu = jnp.mean(v, axis=-1, keepdims=True)
        var = jnp.mean((v - mu) ** 2, axis=-1, keepdims=True)
        return (v - mu) * lax.rsqrt(var + 1e-5) * g + b

    # fused output projection: zo = z @ wo + bo   (bf16 operands, f32 accumulate)
    zo = jnp.dot(z_ref[...], wo_ref[...],
                 preferred_element_type=jnp.float32) + bo_ref[...]
    z1 = ln(x_ref[...].astype(jnp.float32) + zo, g1_ref[...], be1_ref[...])
    hdn = jnp.maximum(
        jnp.dot(z1.astype(jnp.bfloat16), w1_ref[...],
                preferred_element_type=jnp.float32) + b1_ref[...],
        0.0).astype(jnp.bfloat16)           # bound the largest live intermediate
    f = jnp.dot(hdn, w2_ref[...], preferred_element_type=jnp.float32) + b2_ref[...]
    o_ref[...] = ln(z1 + f, g2_ref[...], be2_ref[...]).astype(o_ref.dtype)


def ffn_realformer(x2d, z2d, lyr, *, tile_m=512):
    M, E = x2d.shape
    H = z2d.shape[1]
    TM = _pick_tile(M, tile_m, align=8)

    def full(shape):
        return pl.BlockSpec(shape, lambda i, _n=len(shape): (0,) * _n)

    # TODO(synk): mark the constant-index weight blocks single-buffered
    # (pipeline_mode=pl.Buffered(1)) to free duplicate VMEM buffers once that
    # knob is verified on this jax build.
    return pl.pallas_call(
        _ffn_kernel,
        grid=(M // TM,),
        in_specs=[
            pl.BlockSpec((TM, E), lambda i: (i, 0)),
            pl.BlockSpec((TM, H), lambda i: (i, 0)),
            full((H, E)), full((1, E)),            # wo (bf16), bo
            full((1, E)), full((1, E)),            # g1, be1
            full((E, 4 * E)), full((1, 4 * E)),    # w1 (bf16), b1
            full((4 * E, E)), full((1, E)),        # w2 (bf16), b2
            full((1, E)), full((1, E)),            # g2, be2
        ],
        out_specs=pl.BlockSpec((TM, E), lambda i: (i, 0)),
        out_shape=jax.ShapeDtypeStruct((M, E), jnp.bfloat16),
        compiler_params=pltpu.CompilerParams(
            dimension_semantics=("parallel",),
            vmem_limit_bytes=_VMEM_LIMIT),
    )(x2d, z2d, lyr['wo'], lyr['bo'], lyr['g1'], lyr['be1'],
      lyr['w1'], lyr['b1'], lyr['w2'], lyr['b2'], lyr['g2'], lyr['be2'])


# ----------------------------------------------------------------------------
# Fused tail: mean-pool + L2 normalize, pseudo-label-wise attention, MLP(E,1)
# (multiple batch elements per grid step)
# ----------------------------------------------------------------------------

def _head_kernel(x_ref, wl_ref, bl_ref, fcw_ref, fcb_ref,
                 pvec_ref, logit_ref, attn_ref):
    x = x_ref[...].astype(jnp.float32)                         # (BB, L, E)

    # pVec = L2-normalized mean over the sequence
    p = jnp.mean(x, axis=1, keepdims=True)                     # (BB, 1, E)
    nrm = jnp.sqrt(jnp.sum(p * p, axis=-1, keepdims=True))     # (BB, 1, 1)
    pvec_ref[...] = p / jnp.maximum(nrm, 1e-12)

    # DeepPseudoLabelwiseAttention (L = -1): softmax over the sequence axis
    s = jnp.einsum('ble,ec->blc', x, wl_ref[...],
                   preferred_element_type=jnp.float32) + bl_ref[...]
    m = jnp.max(s, axis=1, keepdims=True)
    e = jnp.exp(s - m)
    a = e * pl.reciprocal(jnp.sum(e, axis=1, keepdims=True), approx=True)
    attn_ref[...] = a                                          # (BB, L, C)
    # ctx = a^T @ x per batch element; ctx never leaves VMEM
    ctx = jnp.einsum('blc,ble->bce', a, x,
                     preferred_element_type=jnp.float32)       # (BB, C, E)
    logit_ref[...] = jnp.einsum('bce,eo->bco', ctx, fcw_ref[...],
                                preferred_element_type=jnp.float32) + fcb_ref[...]


def dpla_head(x, wl, bl, fcw, fcb):
    B, L, E = x.shape
    C = wl.shape[1]
    # pack as many batch elements per grid step as fit comfortably (~4 MiB)
    per_b = L * E * 6 + L * C * 8 + C * E * 4 + 64
    BB = _largest_divisor_leq(B, max(1, (4 * 1024 * 1024) // per_b))
    pvec, logits, attn = pl.pallas_call(
        _head_kernel,
        grid=(B // BB,),
        in_specs=[
            pl.BlockSpec((BB, L, E), lambda b: (b, 0, 0)),
            pl.BlockSpec((E, C), lambda b: (0, 0)),
            pl.BlockSpec((1, C), lambda b: (0, 0)),
            pl.BlockSpec((E, 1), lambda b: (0, 0)),
            pl.BlockSpec((1, 1), lambda b: (0, 0)),
        ],
        out_specs=[
            pl.BlockSpec((BB, 1, E), lambda b: (b, 0, 0)),
            pl.BlockSpec((BB, C, 1), lambda b: (b, 0, 0)),
            pl.BlockSpec((BB, L, C), lambda b: (b, 0, 0)),
        ],
        out_shape=[
            jax.ShapeDtypeStruct((B, 1, E), jnp.float32),
            jax.ShapeDtypeStruct((B, C, 1), jnp.float32),
            jax.ShapeDtypeStruct((B, L, C), jnp.float32),
        ],
        compiler_params=pltpu.CompilerParams(
            dimension_semantics=("parallel",),
            vmem_limit_bytes=_VMEM_LIMIT),
    )(x, wl, bl, fcw, fcb)
    return pvec.reshape(B, E), logits, attn


# ----------------------------------------------------------------------------
# Parameter init (deterministic, synthetic) + glue
# ----------------------------------------------------------------------------

def init_params(key, *, tknNum, embSize, classNum, layers=4, H=256, A=4,
                maxRelativeDist=7):
    dk = H // A
    scale = 1.0 / float(dk) ** 0.5
    keys = iter(jax.random.split(key, 8 + 16 * layers))

    def nrm(shape, s=0.02):
        return (s * jax.random.normal(next(keys), shape)).astype(jnp.float32)

    nRel = 2 * maxRelativeDist + 1
    p = {
        # MXU-feeding weights are stored in bf16 in HBM (halves weight DMA);
        # biases, LayerNorm params, rel-bias tables and head weights stay f32.
        'emb_w': nrm((tknNum, embSize), 1.0).astype(jnp.bfloat16),
        'emb_zero_bias': jnp.zeros((1, embSize), jnp.float32),
        'dpla_w': nrm((embSize, classNum)),
        'dpla_b': jnp.zeros((1, classNum), jnp.float32),
        'fc_w': nrm((embSize, 1)),
        'fc_b': jnp.zeros((1, 1), jnp.float32),
        'layers': [],
    }
    for _ in range(layers):
        wq, wk, wv = nrm((embSize, H)), nrm((embSize, H)), nrm((embSize, H))
        bq = jnp.zeros((1, H), jnp.float32)
        bk = jnp.zeros((1, H), jnp.float32)
        bv = jnp.zeros((1, H), jnp.float32)
        p['layers'].append({
            # fused QKV projection; 1/sqrt(dk) attention scale folded into Q part
            'wqkv': jnp.concatenate([wq * scale, wk, wv],
                                    axis=1).astype(jnp.bfloat16),
            'bqkv': jnp.concatenate([bq * scale, bk, bv], axis=1),
            'wo': nrm((H, embSize)).astype(jnp.bfloat16),
            'bo': jnp.zeros((1, embSize), jnp.float32),
            'relK_emb': 1.0 + nrm((nRel, A)),   # multiplicative rel-pos bias ~ 1
            'relB_emb': nrm((nRel, A)),         # additive rel-pos bias
            'g1': jnp.ones((1, embSize), jnp.float32),
            'be1': jnp.zeros((1, embSize), jnp.float32),
            'w1': nrm((embSize, 4 * embSize)).astype(jnp.bfloat16),
            'b1': jnp.zeros((1, 4 * embSize), jnp.float32),
            'w2': nrm((4 * embSize, embSize)).astype(jnp.bfloat16),
            'b2': jnp.zeros((1, embSize), jnp.float32),
            'g2': jnp.ones((1, embSize), jnp.float32),
            'be2': jnp.zeros((1, embSize), jnp.float32),
        })
    return p


def relative_position_bucket(seqLen, maxR):
    """Layer-invariant (L, L) int32 distance-bucket map (computed once)."""
    idx = jnp.arange(seqLen)
    dist = jnp.abs(idx[:, None] - idx[None, :]).astype(jnp.float32)
    dist = jnp.where(dist > maxR,
                     maxR + jnp.log2(jnp.maximum(dist - maxR, 1.0)),
                     dist)
    return jnp.clip(dist, 0, 2 * maxR).astype(jnp.int32)


def kgpdplam_forward(params, kgp, *, A=4, H=256, maxRelativeDist=7):
    """kgp ('tokenizedKgpSeqArr'): (B, L, tknNum) float k-gram-profile matrix."""
    dk = H // A
    B, L, V = kgp.shape
    E = params['emb_w'].shape[1]
    nRel = 2 * maxRelativeDist + 1

    # x = kgp @ embedding.weight  (embDropout -> identity at inference)
    x = dense(kgp.astype(jnp.bfloat16).reshape(B * L, V),
              params['emb_w'], params['emb_zero_bias'])          # bf16 (B*L, E)

    # distance-bucket table hoisted out of the layer loop (layer-invariant)
    tab = relative_position_bucket(L, maxRelativeDist)           # (L, L) int32

    # TransformerLayers_Realformer backbone (maskPAD=None, preScores carried bf16;
    # layer 0 skips the preScores read entirely)
    pre = None
    for lyr in params['layers']:
        qkv = dense(x, lyr['wqkv'], lyr['bqkv']).reshape(B, L, 3 * H)   # bf16
        z, pre = mh_attention(qkv, tab, lyr['relK_emb'], lyr['relB_emb'],
                              pre, A, dk, nRel)                  # z bf16, pre bf16
        # output projection (wo, bo) is fused into the FFN kernel
        x = ffn_realformer(x, z.reshape(B * L, H), lyr)          # bf16 (B*L, E)

    x3d = x.reshape(B, L, E)
    # fused tail: pVec (mean + L2 norm), labelwise attention, MLP(E,1) logits
    pvec, logits3, attn_lc = dpla_head(x3d, params['dpla_w'], params['dpla_b'],
                                       params['fc_w'], params['fc_b'])
    logits = logits3.reshape(B, -1)                              # squeeze(dim=2)
    attn = jnp.transpose(attn_lc, (0, 2, 1))                     # (B, C, L)

    return {'y_logit': logits, 'p_vector': pvec, 'attn': attn}


# ----------------------------------------------------------------------------
if __name__ == "__main__":
    key = jax.random.PRNGKey(0)
    B, seqLen, tknNum, embSize, classNum = 2, 8, 32, 64, 6

    k_params, k_data = jax.random.split(key)
    params = init_params(k_params, tknNum=tknNum, embSize=embSize,
                         classNum=classNum, layers=4, H=256, A=4,
                         maxRelativeDist=7)
    # 'tokenizedKgpSeqArr' is a dense float (B, L, tknNum) profile matrix
    kgp = jax.random.uniform(k_data, (B, seqLen, tknNum), dtype=jnp.float32)

    fwd = jax.jit(functools.partial(kgpdplam_forward, A=4, H=256,
                                    maxRelativeDist=7))
    out = fwd(params, kgp)
    out = jax.block_until_ready(out)

    assert out['y_logit'].shape == (B, classNum)
    assert out['p_vector'].shape == (B, embSize)
    assert out['attn'].shape == (B, classNum, seqLen)
    assert bool(jnp.all(jnp.isfinite(out['y_logit'])))
    assert bool(jnp.all(jnp.isfinite(out['p_vector'])))
    assert bool(jnp.all(jnp.isfinite(out['attn'])))

    print("KERNEL_OK")
</pallas_src>

<mosaic_0001>
module attributes {stable_mosaic.version = 11 : i64} {
  func.func @_matmul_kernel(%arg0: i32, %arg1: i32, %arg2: i32, %arg3: memref<16x32xbf16, #tpu.memory_space<vmem>>, %arg4: memref<32x64xbf16, #tpu.memory_space<vmem>>, %arg5: memref<1x64xf32, #tpu.memory_space<vmem>>, %arg6: memref<16x64xbf16, #tpu.memory_space<vmem>>, %arg7: memref<16x64xf32, #tpu.memory_space<vmem>>) attributes {dimension_semantics = [#tpu.dimension_semantics<parallel>, #tpu.dimension_semantics<parallel>, #tpu.dimension_semantics<arbitrary>], iteration_bounds = array<i64: 1, 1, 1>, scalar_prefetch = 0 : i64, scratch_operands = 1 : i64, tpu.core_type = #tpu.core_type<tc>, window_params = [{transform_indices = @transform_0, window_bounds = array<i64: 16, 32>}, {transform_indices = @transform_1, window_bounds = array<i64: 32, 64>}, {transform_indices = @transform_2, window_bounds = array<i64: 1, 64>}, {transform_indices = @transform_3, window_bounds = array<i64: 16, 64>}]} {
    %c0_i32 = arith.constant 0 : i32
    %0 = arith.cmpi eq, %arg2, %c0_i32 : i32
    %1 = arith.extui %0 : i1 to i32
    %c0_i32_0 = arith.constant 0 : i32
    %2 = arith.cmpi ne, %1, %c0_i32_0 : i32
    scf.if %2 {
      %cst_10 = arith.constant 0.000000e+00 : f32
      %12 = vector.broadcast %cst_10 : f32 to vector<16x64xf32>
      %c0_11 = arith.constant 0 : index
      %c0_12 = arith.constant 0 : index
      %13 = vector.load %arg7[%c0_11, %c0_12] : memref<16x64xf32, #tpu.memory_space<vmem>>, vector<16x64xf32>
      tpu.vector_store %arg7[%c0_11, %c0_12], %12 {strides = array<i32>} : memref<16x64xf32, #tpu.memory_space<vmem>>, vector<16x64xf32>,
    } else {
    }
    %c0 = arith.constant 0 : index
    %c0_1 = arith.constant 0 : index
    %3 = vector.load %arg7[%c0, %c0_1] : memref<16x64xf32, #tpu.memory_space<vmem>>, vector<16x64xf32>
    %c0_2 = arith.constant 0 : index
    %c0_3 = arith.constant 0 : index
    %4 = vector.load %arg3[%c0_2, %c0_3] : memref<16x32xbf16, #tpu.memory_space<vmem>>, vector<16x32xbf16>
    %c0_4 = arith.constant 0 : index
    %c0_5 = arith.constant 0 : index
    %5 = vector.load %arg4[%c0_4, %c0_5] : memref<32x64xbf16, #tpu.memory_space<vmem>>, vector<32x64xbf16>
    %cst = arith.constant dense<0.000000e+00> : vector<16x64xf32>
    %6 = tpu.matmul %4, %5, %cst {dimension_numbers = #tpu.dot_dimension_numbers<[1], [0], [0], [1], [0, 0, 1, 1], [], []>} : vector<16x32xbf16>, vector<32x64xbf16>, vector<16x64xf32> -> vector<16x64xf32>
    %7 = arith.addf %3, %6 : vector<16x64xf32>
    %c0_6 = arith.constant 0 : index
    %c0_7 = arith.constant 0 : index
    %8 = vector.load %arg7[%c0_6, %c0_7] : memref<16x64xf32, #tpu.memory_space<vmem>>, vector<16x64xf32>
    tpu.vector_store %arg7[%c0_6, %c0_7], %7 {strides = array<i32>} : memref<16x64xf32, #tpu.memory_space<vmem>>, vector<16x64xf32>,
    %c0_i32_8 = arith.constant 0 : i32
    %9 = arith.cmpi eq, %arg2, %c0_i32_8 : i32
    %10 = arith.extui %9 : i1 to i32
    %c0_i32_9 = arith.constant 0 : i32
    %11 = arith.cmpi ne, %10, %c0_i32_9 : i32
    scf.if %11 {
      %c0_10 = arith.constant 0 : index
      %c0_11 = arith.constant 0 : index
      %12 = vector.load %arg7[%c0_10, %c0_11] : memref<16x64xf32, #tpu.memory_space<vmem>>, vector<16x64xf32>
      %c0_12 = arith.constant 0 : index
      %c0_13 = arith.constant 0 : index
      %13 = vector.load %arg5[%c0_12, %c0_13] : memref<1x64xf32, #tpu.memory_space<vmem>>, vector<1x64xf32>
      %14 = vector.broadcast %13 : vector<1x64xf32> to vector<16x64xf32>
      %15 = arith.addf %12, %14 : vector<16x64xf32>
      %16 = arith.truncf %15 : vector<16x64xf32> to vector<16x64xbf16>
      %c0_14 = arith.constant 0 : index
      %c0_15 = arith.constant 0 : index
      %17 = vector.load %arg6[%c0_14, %c0_15] : memref<16x64xbf16, #tpu.memory_space<vmem>>, vector<16x64xbf16>
      tpu.vector_store %arg6[%c0_14, %c0_15], %16 {strides = array<i32>} : memref<16x64xbf16, #tpu.memory_space<vmem>>, vector<16x64xbf16>,
    } else {
    }
    return
  }
  func.func @transform_0(%arg0: i32, %arg1: i32, %arg2: i32) -> (i32, i32) {
    %c0_i32 = arith.constant 0 : i32
    return %arg0, %arg2 : i32, i32
  }
  func.func @transform_1(%arg0: i32, %arg1: i32, %arg2: i32) -> (i32, i32) {
    %c0_i32 = arith.constant 0 : i32
    return %arg2, %arg1 : i32, i32
  }
  func.func @transform_2(%arg0: i32, %arg1: i32, %arg2: i32) -> (i32, i32) {
    %c0_i32 = arith.constant 0 : i32
    %c0_i32_0 = arith.constant 0 : i32
    return %c0_i32, %arg1 : i32, i32
  }
  func.func @transform_3(%arg0: i32, %arg1: i32, %arg2: i32) -> (i32, i32) {
    %c0_i32 = arith.constant 0 : i32
    return %arg0, %arg1 : i32, i32
  }
}

module attributes {stable_mosaic.version = 11 : i64} {
  func.func @_matmul_kernel(%arg0: i32, %arg1: i32, %arg2: i32, %arg3: memref<16x64xbf16, #tpu.memory_space<vmem>>, %arg4: memref<64x256xbf16, #tpu.memory_space<vmem>>, %arg5: memref<1x256xf32, #tpu.memory_space<vmem>>, %arg6: memref<16x256xbf16, #tpu.memory_space<vmem>>, %arg7: memref<16x256xf32, #tpu.memory_space<vmem>>) attributes {dimension_semantics = [#tpu.dimension_semantics<parallel>, #tpu.dimension_semantics<parallel>, #tpu.dimension_semantics<arbitrary>], iteration_bounds = array<i64: 1, 3, 1>, scalar_prefetch = 0 : i64, scratch_operands = 1 : i64, tpu.core_type = #tpu.core_type<tc>, window_params = [{transform_indices = @transform_0, window_bounds = array<i64: 16, 64>}, {transform_indices = @transform_1, window_bounds = array<i64: 64, 256>}, {transform_indices = @transform_2, window_bounds = array<i64: 1, 256>}, {transform_indices = @transform_3, window_bounds = array<i64: 16, 256>}]} {
    %c0_i32 = arith.constant 0 : i32
    %0 = arith.cmpi eq, %arg2, %c0_i32 : i32
    %1 = arith.extui %0 : i1 to i32
    %c0_i32_0 = arith.constant 0 : i32
    %2 = arith.cmpi ne, %1, %c0_i32_0 : i32
    scf.if %2 {
      %cst_10 = arith.constant 0.000000e+00 : f32
      %12 = vector.broadcast %cst_10 : f32 to vector<16x256xf32>
      %c0_11 = arith.constant 0 : index
      %c0_12 = arith.constant 0 : index
      %13 = vector.load %arg7[%c0_11, %c0_12] : memref<16x256xf32, #tpu.memory_space<vmem>>, vector<16x256xf32>
      tpu.vector_store %arg7[%c0_11, %c0_12], %12 {strides = array<i32>} : memref<16x256xf32, #tpu.memory_space<vmem>>, vector<16x256xf32>,
    } else {
    }
    %c0 = arith.constant 0 : index
    %c0_1 = arith.constant 0 : index
    %3 = vector.load %arg7[%c0, %c0_1] : memref<16x256xf32, #tpu.memory_space<vmem>>, vector<16x256xf32>
    %c0_2 = arith.constant 0 : index
    %c0_3 = arith.constant 0 : index
    %4 = vector.load %arg3[%c0_2, %c0_3] : memref<16x64xbf16, #tpu.memory_space<vmem>>, vector<16x64xbf16>
    %c0_4 = arith.constant 0 : index
    %c0_5 = arith.constant 0 : index
    %5 = vector.load %arg4[%c0_4, %c0_5] : memref<64x256xbf16, #tpu.memory_space<vmem>>, vector<64x256xbf16>
    %cst = arith.constant dense<0.000000e+00> : vector<16x256xf32>
    %6 = tpu.matmul %4, %5, %cst {dimension_numbers = #tpu.dot_dimension_numbers<[1], [0], [0], [1], [0, 0, 1, 1], [], []>} : vector<16x64xbf16>, vector<64x256xbf16>, vector<16x256xf32> -> vector<16x256xf32>
    %7 = arith.addf %3, %6 : vector<16x256xf32>
    %c0_6 = arith.constant 0 : index
    %c0_7 = arith.constant 0 : index
    %8 = vector.load %arg7[%c0_6, %c0_7] : memref<16x256xf32, #tpu.memory_space<vmem>>, vector<16x256xf32>
    tpu.vector_store %arg7[%c0_6, %c0_7], %7 {strides = array<i32>} : memref<16x256xf32, #tpu.memory_space<vmem>>, vector<16x256xf32>,
    %c0_i32_8 = arith.constant 0 : i32
    %9 = arith.cmpi eq, %arg2, %c0_i32_8 : i32
    %10 = arith.extui %9 : i1 to i32
    %c0_i32_9 = arith.constant 0 : i32
    %11 = arith.cmpi ne, %10, %c0_i32_9 : i32
    scf.if %11 {
      %c0_10 = arith.constant 0 : index
      %c0_11 = arith.constant 0 : index
      %12 = vector.load %arg7[%c0_10, %c0_11] : memref<16x256xf32, #tpu.memory_space<vmem>>, vector<16x256xf32>
      %c0_12 = arith.constant 0 : index
      %c0_13 = arith.constant 0 : index
      %13 = vector.load %arg5[%c0_12, %c0_13] : memref<1x256xf32, #tpu.memory_space<vmem>>, vector<1x256xf32>
      %14 = vector.broadcast %13 : vector<1x256xf32> to vector<16x256xf32>
      %15 = arith.addf %12, %14 : vector<16x256xf32>
      %16 = arith.truncf %15 : vector<16x256xf32> to vector<16x256xbf16>
      %c0_14 = arith.constant 0 : index
      %c0_15 = arith.constant 0 : index
      %17 = vector.load %arg6[%c0_14, %c0_15] : memref<16x256xbf16, #tpu.memory_space<vmem>>, vector<16x256xbf16>
      tpu.vector_store %arg6[%c0_14, %c0_15], %16 {strides = array<i32>} : memref<16x256xbf16, #tpu.memory_space<vmem>>, vector<16x256xbf16>,
    } else {
    }
    return
  }
  func.func @transform_0(%arg0: i32, %arg1: i32, %arg2: i32) -> (i32, i32) {
    %c0_i32 = arith.constant 0 : i32
    return %arg0, %arg2 : i32, i32
  }
  func.func @transform_1(%arg0: i32, %arg1: i32, %arg2: i32) -> (i32, i32) {
    %c0_i32 = arith.constant 0 : i32
    return %arg2, %arg1 : i32, i32
  }
  func.func @transform_2(%arg0: i32, %arg1: i32, %arg2: i32) -> (i32, i32) {
    %c0_i32 = arith.constant 0 : i32
    %c0_i32_0 = arith.constant 0 : i32
    return %c0_i32, %arg1 : i32, i32
  }
  func.func @transform_3(%arg0: i32, %arg1: i32, %arg2: i32) -> (i32, i32) {
    %c0_i32 = arith.constant 0 : i32
    return %arg0, %arg1 : i32, i32
  }
}

module attributes {stable_mosaic.version = 11 : i64} {
  func.func @_attn_kernel(%arg0: i32, %arg1: memref<1x8x768xbf16, #tpu.memory_space<vmem>>, %arg2: memref<8x8xi32, #tpu.memory_space<vmem>>, %arg3: memref<15x4xf32, #tpu.memory_space<smem>>, %arg4: memref<15x4xf32, #tpu.memory_space<smem>>, %arg5: memref<1x8x256xbf16, #tpu.memory_space<vmem>>, %arg6: memref<1x4x8x8xbf16, #tpu.memory_space<vmem>>) attributes {dimension_semantics = [#tpu.dimension_semantics<parallel>], iteration_bounds = array<i64: 2>, scalar_prefetch = 0 : i64, scratch_operands = 0 : i64, tpu.core_type = #tpu.core_type<tc>, window_params = [{transform_indices = @transform_0, window_bounds = array<i64: 1, 8, 768>}, {pipeline_mode = #tpu.pipeline_mode<synchronous>, transform_indices = @transform_1, window_bounds = array<i64: 8, 8>}, {transform_indices = @transform_2, window_bounds = array<i64: 15, 4>}, {transform_indices = @transform_3, window_bounds = array<i64: 15, 4>}, {transform_indices = @transform_4, window_bounds = array<i64: 1, 8, 256>}, {transform_indices = @transform_5, window_bounds = array<i64: 1, 4, 8, 8>}]} {
    %c0 = arith.constant 0 : index
    %c0_0 = arith.constant 0 : index
    %0 = vector.load %arg2[%c0, %c0_0] : memref<8x8xi32, #tpu.memory_space<vmem>>, vector<8x8xi32>
    %c0_1 = arith.constant 0 : index
    %c0_2 = arith.constant 0 : index
    %c0_3 = arith.constant 0 : index
    %1 = vector.load %arg1[%c0_1, %c0_2, %c0_3] : memref<1x8x768xbf16, #tpu.memory_space<vmem>>, vector<1x8x64xbf16>
    %2 = vector.shape_cast %1 : vector<1x8x64xbf16> to vector<8x64xbf16>
    %c0_4 = arith.constant 0 : index
    %c0_5 = arith.constant 0 : index
    %c256 = arith.constant 256 : index
    %3 = vector.load %arg1[%c0_4, %c0_5, %c256] : memref<1x8x768xbf16, #tpu.memory_space<vmem>>, vector<1x8x64xbf16>
    %4 = vector.shape_cast %3 : vector<1x8x64xbf16> to vector<8x64xbf16>
    %c0_6 = arith.constant 0 : index
    %c0_7 = arith.constant 0 : index
    %c512 = arith.constant 512 : index
    %5 = vector.load %arg1[%c0_6, %c0_7, %c512] : memref<1x8x768xbf16, #tpu.memory_space<vmem>>, vector<1x8x64xbf16>
    %6 = vector.shape_cast %5 : vector<1x8x64xbf16> to vector<8x64xbf16>
    %cst = arith.constant dense<0.000000e+00> : vector<8x8xf32>
    %7 = tpu.matmul %2, %4, %cst {dimension_numbers = #tpu.dot_dimension_numbers<[1], [1], [0], [0], [0, 0, 1, 0], [], []>} : vector<8x64xbf16>, vector<8x64xbf16>, vector<8x8xf32> -> vector<8x8xf32>
    %c0_i32 = arith.constant 0 : i32
    %8 = vector.broadcast %c0_i32 : i32 to vector<8x8xi32>
    %9 = arith.cmpi eq, %0, %8 : vector<8x8xi32>
    %c0_8 = arith.constant 0 : index
    %c0_9 = arith.constant 0 : index
    %10 = memref.load %arg3[%c0_8, %c0_9] : memref<15x4xf32, #tpu.memory_space<smem>>
    %11 = vector.broadcast %10 : f32 to vector<8x8xf32>
    %12 = arith.mulf %7, %11 : vector<8x8xf32>
    %c0_10 = arith.constant 0 : index
    %c0_11 = arith.constant 0 : index
    %13 = memref.load %arg4[%c0_10, %c0_11] : memref<15x4xf32, #tpu.memory_space<smem>>
    %14 = vector.broadcast %13 : f32 to vector<8x8xf32>
    %15 = arith.addf %12, %14 : vector<8x8xf32>
    %16 = arith.select %9, %15, %7 : vector<8x8xi1>, vector<8x8xf32>
    %c1_i32 = arith.constant 1 : i32
    %17 = vector.broadcast %c1_i32 : i32 to vector<8x8xi32>
    %18 = arith.cmpi eq, %0, %17 : vector<8x8xi32>
    %c1 = arith.constant 1 : index
    %c0_12 = arith.constant 0 : index
    %19 = memref.load %arg3[%c1, %c0_12] : memref<15x4xf32, #tpu.memory_space<smem>>
    %20 = vector.broadcast %19 : f32 to vector<8x8xf32>
    %21 = arith.mulf %7, %20 : vector<8x8xf32>
    %c1_13 = arith.constant 1 : index
    %c0_14 = arith.constant 0 : index
    %22 = memref.load %arg4[%c1_13, %c0_14] : memref<15x4xf32, #tpu.memory_space<smem>>
    %23 = vector.broadcast %22 : f32 to vector<8x8xf32>
    %24 = arith.addf %21, %23 : vector<8x8xf32>
    %25 = arith.select %18, %24, %16 : vector<8x8xi1>, vector<8x8xf32>
    %c2_i32 = arith.constant 2 : i32
    %26 = vector.broadcast %c2_i32 : i32 to vector<8x8xi32>
    %27 = arith.cmpi eq, %0, %26 : vector<8x8xi32>
    %c2 = arith.constant 2 : index
    %c0_15 = arith.constant 0 : index
    %28 = memref.load %arg3[%c2, %c0_15] : memref<15x4xf32, #tpu.memory_space<smem>>
    %29 = vector.broadcast %28 : f32 to vector<8x8xf32>
    %30 = arith.mulf %7, %29 : vector<8x8xf32>
    %c2_16 = arith.constant 2 : index
    %c0_17 = arith.constant 0 : index
    %31 = memref.load %arg4[%c2_16, %c0_17] : memref<15x4xf32, #tpu.memory_space<smem>>
    %32 = vector.broadcast %31 : f32 to vector<8x8xf32>
    %33 = arith.addf %30, %32 : vector<8x8xf32>
    %34 = arith.select %27, %33, %25 : vector<8x8xi1>, vector<8x8xf32>
    %c3_i32 = arith.constant 3 : i32
    %35 = vector.broadcast %c3_i32 : i32 to vector<8x8xi32>
    %36 = arith.cmpi eq, %0, %35 : vector<8x8xi32>
    %c3 = arith.constant 3 : index
    %c0_18 = arith.constant 0 : index
    %37 = memref.load %arg3[%c3, %c0_18] : memref<15x4xf32, #tpu.memory_space<smem>>
    %38 = vector.broadcast %37 : f32 to vector<8x8xf32>
    %39 = arith.mulf %7, %38 : vector<8x8xf32>
    %c3_19 = arith.constant 3 : index
    %c0_20 = arith.constant 0 : index
    %40 = memref.load %arg4[%c3_19, %c0_20] : memref<15x4xf32, #tpu.memory_space<smem>>
    %41 = vector.broadcast %40 : f32 to vector<8x8xf32>
    %42 = arith.addf %39, %41 : vector<8x8xf32>
    %43 = arith.select %36, %42, %34 : vector<8x8xi1>, vector<8x8xf32>
    %c4_i32 = arith.constant 4 : i32
    %44 = vector.broadcast %c4_i32 : i32 to vector<8x8xi32>
    %45 = arith.cmpi eq, %0, %44 : vector<8x8xi32>
    %c4 = arith.constant 4 : index
    %c0_21 = arith.constant 0 : index
    %46 = memref.load %arg3[%c4, %c0_21] : memref<15x4xf32, #tpu.memory_space<smem>>
    %47 = vector.broadcast %46 : f32 to vector<8x8xf32>
    %48 = arith.mulf %7, %47 : vector<8x8xf32>
    %c4_22 = arith.constant 4 : index
    %c0_23 = arith.constant 0 : index
    %49 = memref.load %arg4[%c4_22, %c0_23] : memref<15x4xf32, #tpu.memory_space<smem>>
    %50 = vector.broadcast %49 : f32 to vector<8x8xf32>
    %51 = arith.addf %48, %50 : vector<8x8xf32>
    %52 = arith.select %45, %51, %43 : vector<8x8xi1>, vector<8x8xf32>
    %c5_i32 = arith.constant 5 : i32
    %53 = vector.broadcast %c5_i32 : i32 to vector<8x8xi32>
    %54 = arith.cmpi eq, %0, %53 : vector<8x8xi32>
    %c5 = arith.constant 5 : index
    %c0_24 = arith.constant 0 : index
    %55 = memref.load %arg3[%c5, %c0_24] : memref<15x4xf32, #tpu.memory_space<smem>>
    %56 = vector.broadcast %55 : f32 to vector<8x8xf32>
    %57 = arith.mulf %7, %56 : vector<8x8xf32>
    %c5_25 = arith.constant 5 : index
    %c0_26 = arith.constant 0 : index
    %58 = memref.load %arg4[%c5_25, %c0_26] : memref<15x4xf32, #tpu.memory_space<smem>>
    %59 = vector.broadcast %58 : f32 to vector<8x8xf32>
    %60 = arith.addf %57, %59 : vector<8x8xf32>
    %61 = arith.select %54, %60, %52 : vector<8x8xi1>, vector<8x8xf32>
    %c6_i32 = arith.constant 6 : i32
    %62 = vector.broadcast %c6_i32 : i32 to vector<8x8xi32>
    %63 = arith.cmpi eq, %0, %62 : vector<8x8xi32>
    %c6 = arith.constant 6 : index
    %c0_27 = arith.constant 0 : index
    %64 = memref.load %arg3[%c6, %c0_27] : memref<15x4xf32, #tpu.memory_space<smem>>
    %65 = vector.broadcast %64 : f32 to vector<8x8xf32>
    %66 = arith.mulf %7, %65 : vector<8x8xf32>
    %c6_28 = arith.constant 6 : index
    %c0_29 = arith.constant 0 : index
    %67 = memref.load %arg4[%c6_28, %c0_29] : memref<15x4xf32, #tpu.memory_space<smem>>
    %68 = vector.broadcast %67 : f32 to vector<8x8xf32>
    %69 = arith.addf %66, %68 : vector<8x8xf32>
    %70 = arith.select %63, %69, %61 : vector<8x8xi1>, vector<8x8xf32>
    %c7_i32 = arith.constant 7 : i32
    %71 = vector.broadcast %c7_i32 : i32 to vector<8x8xi32>
    %72 = arith.cmpi eq, %0, %71 : vector<8x8xi32>
    %c7 = arith.constant 7 : index
    %c0_30 = arith.constant 0 : index
    %73 = memref.load %arg3[%c7, %c0_30] : memref<15x4xf32, #tpu.memory_space<smem>>
    %74 = vector.broadcast %73 : f32 to vector<8x8xf32>
    %75 = arith.mulf %7, %74 : vector<8x8xf32>
    %c7_31 = arith.constant 7 : index
    %c0_32 = arith.constant 0 : index
    %76 = memref.load %arg4[%c7_31, %c0_32] : memref<15x4xf32, #tpu.memory_space<smem>>
    %77 = vector.broadcast %76 : f32 to vector<8x8xf32>
    %78 = arith.addf %75, %77 : vector<8x8xf32>
    %79 = arith.select %72, %78, %70 : vector<8x8xi1>, vector<8x8xf32>
    %c8_i32 = arith.constant 8 : i32
    %80 = vector.broadcast %c8_i32 : i32 to vector<8x8xi32>
    %81 = arith.cmpi eq, %0, %80 : vector<8x8xi32>
    %c8 = arith.constant 8 : index
    %c0_33 = arith.constant 0 : index
    %82 = memref.load %arg3[%c8, %c0_33] : memref<15x4xf32, #tpu.memory_space<smem>>
    %83 = vector.broadcast %82 : f32 to vector<8x8xf32>
    %84 = arith.mulf %7, %83 : vector<8x8xf32>
    %c8_34 = arith.constant 8 : index
    %c0_35 = arith.constant 0 : index
    %85 = memref.load %arg4[%c8_34, %c0_35] : memref<15x4xf32, #tpu.memory_space<smem>>
    %86 = vector.broadcast %85 : f32 to vector<8x8xf32>
    %87 = arith.addf %84, %86 : vector<8x8xf32>
    %88 = arith.select %81, %87, %79 : vector<8x8xi1>, vector<8x8xf32>
    %c9_i32 = arith.constant 9 : i32
    %89 = vector.broadcast %c9_i32 : i32 to vector<8x8xi32>
    %90 = arith.cmpi eq, %0, %89 : vector<8x8xi32>
    %c9 = arith.constant 9 : index
    %c0_36 = arith.constant 0 : index
    %91 = memref.load %arg3[%c9, %c0_36] : memref<15x4xf32, #tpu.memory_space<smem>>
    %92 = vector.broadcast %91 : f32 to vector<8x8xf32>
    %93 = arith.mulf %7, %92 : vector<8x8xf32>
    %c9_37 = arith.constant 9 : index
    %c0_38 = arith.constant 0 : index
    %94 = memref.load %arg4[%c9_37, %c0_38] : memref<15x4xf32, #tpu.memory_space<smem>>
    %95 = vector.broadcast %94 : f32 to vector<8x8xf32>
    %96 = arith.addf %93, %95 : vector<8x8xf32>
    %97 = arith.select %90, %96, %88 : vector<8x8xi1>, vector<8x8xf32>
    %c10_i32 = arith.constant 10 : i32
    %98 = vector.broadcast %c10_i32 : i32 to vector<8x8xi32>
    %99 = arith.cmpi eq, %0, %98 : vector<8x8xi32>
    %c10 = arith.constant 10 : index
    %c0_39 = arith.constant 0 : index
    %100 = memref.load %arg3[%c10, %c0_39] : memref<15x4xf32, #tpu.memory_space<smem>>
    %101 = vector.broadcast %100 : f32 to vector<8x8xf32>
    %102 = arith.mulf %7, %101 : vector<8x8xf32>
    %c10_40 = arith.constant 10 : index
    %c0_41 = arith.constant 0 : index
    %103 = memref.load %arg4[%c10_40, %c0_41] : memref<15x4xf32, #tpu.memory_space<smem>>
    %104 = vector.broadcast %103 : f32 to vector<8x8xf32>
    %105 = arith.addf %102, %104 : vector<8x8xf32>
    %106 = arith.select %99, %105, %97 : vector<8x8xi1>, vector<8x8xf32>
    %c11_i32 = arith.constant 11 : i32
    %107 = vector.broadcast %c11_i32 : i32 to vector<8x8xi32>
    %108 = arith.cmpi eq, %0, %107 : vector<8x8xi32>
    %c11 = arith.constant 11 : index
    %c0_42 = arith.constant 0 : index
    %109 = memref.load %arg3[%c11, %c0_42] : memref<15x4xf32, #tpu.memory_space<smem>>
    %110 = vector.broadcast %109 : f32 to vector<8x8xf32>
    %111 = arith.mulf %7, %110 : vector<8x8xf32>
    %c11_43 = arith.constant 11 : index
    %c0_44 = arith.constant 0 : index
    %112 = memref.load %arg4[%c11_43, %c0_44] : memref<15x4xf32, #tpu.memory_space<smem>>
    %113 = vector.broadcast %112 : f32 to vector<8x8xf32>
    %114 = arith.addf %111, %113 : vector<8x8xf32>
    %115 = arith.select %108, %114, %106 : vector<8x8xi1>, vector<8x8xf32>
    %c12_i32 = arith.constant 12 : i32
    %116 = vector.broadcast %c12_i32 : i32 to vector<8x8xi32>
    %117 = arith.cmpi eq, %0, %116 : vector<8x8xi32>
    %c12 = arith.constant 12 : index
    %c0_45 = arith.constant 0 : index
    %118 = memref.load %arg3[%c12, %c0_45] : memref<15x4xf32, #tpu.memory_space<smem>>
    %119 = vector.broadcast %118 : f32 to vector<8x8xf32>
    %120 = arith.mulf %7, %119 : vector<8x8xf32>
    %c12_46 = arith.constant 12 : index
    %c0_47 = arith.constant 0 : index
    %121 = memref.load %arg4[%c12_46, %c0_47] : memref<15x4xf32, #tpu.memory_space<smem>>
    %122 = vector.broadcast %121 : f32 to vector<8x8xf32>
    %123 = arith.addf %120, %122 : vector<8x8xf32>
    %124 = arith.select %117, %123, %115 : vector<8x8xi1>, vector<8x8xf32>
    %c13_i32 = arith.constant 13 : i32
    %125 = vector.broadcast %c13_i32 : i32 to vector<8x8xi32>
    %126 = arith.cmpi eq, %0, %125 : vector<8x8xi32>
    %c13 = arith.constant 13 : index
    %c0_48 = arith.constant 0 : index
    %127 = memref.load %arg3[%c13, %c0_48] : memref<15x4xf32, #tpu.memory_space<smem>>
    %128 = vector.broadcast %127 : f32 to vector<8x8xf32>
    %129 = arith.mulf %7, %128 : vector<8x8xf32>
    %c13_49 = arith.constant 13 : index
    %c0_50 = arith.constant 0 : index
    %130 = memref.load %arg4[%c13_49, %c0_50] : memref<15x4xf32, #tpu.memory_space<smem>>
    %131 = vector.broadcast %130 : f32 to vector<8x8xf32>
    %132 = arith.addf %129, %131 : vector<8x8xf32>
    %133 = arith.select %126, %132, %124 : vector<8x8xi1>, vector<8x8xf32>
    %c14_i32 = arith.constant 14 : i32
    %134 = vector.broadcast %c14_i32 : i32 to vector<8x8xi32>
    %135 = arith.cmpi eq, %0, %134 : vector<8x8xi32>
    %c14 = arith.constant 14 : index
    %c0_51 = arith.constant 0 : index
    %136 = memref.load %arg3[%c14, %c0_51] : memref<15x4xf32, #tpu.memory_space<smem>>
    %137 = vector.broadcast %136 : f32 to vector<8x8xf32>
    %138 = arith.mulf %7, %137 : vector<8x8xf32>
    %c14_52 = arith.constant 14 : index
    %c0_53 = arith.constant 0 : index
    %139 = memref.load %arg4[%c14_52, %c0_53] : memref<15x4xf32, #tpu.memory_space<smem>>
    %140 = vector.broadcast %139 : f32 to vector<8x8xf32>
    %141 = arith.addf %138, %140 : vector<8x8xf32>
    %142 = arith.select %135, %141, %133 : vector<8x8xi1>, vector<8x8xf32>
    %143 = arith.truncf %142 : vector<8x8xf32> to vector<8x8xbf16>
    %c0_54 = arith.constant 0 : index
    %c0_55 = arith.constant 0 : index
    %c0_56 = arith.constant 0 : index
    %c0_57 = arith.constant 0 : index
    %144 = vector.load %arg6[%c0_54, %c0_55, %c0_56, %c0_57] : memref<1x4x8x8xbf16, #tpu.memory_space<vmem>>, vector<1x1x8x8xbf16>
    %145 = vector.shape_cast %144 : vector<1x1x8x8xbf16> to vector<8x8xbf16>
    %146 = vector.shape_cast %143 : vector<8x8xbf16> to vector<1x1x8x8xbf16>
    tpu.vector_store %arg6[%c0_54, %c0_55, %c0_56, %c0_57], %146 {strides = array<i32>} : memref<1x4x8x8xbf16, #tpu.memory_space<vmem>>, vector<1x1x8x8xbf16>,
    %cst_58 = arith.constant dense<0xFF800000> : vector<8xf32>
    %147 = vector.multi_reduction <maximumf>, %142, %cst_58 [1] : vector<8x8xf32> to vector<8xf32>
    %148 = vector.shape_cast %147 : vector<8xf32> to vector<8x1xf32>
    %149 = vector.broadcast %148 : vector<8x1xf32> to vector<8x8xf32>
    %150 = arith.subf %142, %149 : vector<8x8xf32>
    %151 = math.exp %150 : vector<8x8xf32>
    %cst_59 = arith.constant dense<0.000000e+00> : vector<8xf32>
    %152 = vector.multi_reduction <add>, %151, %cst_59 [1] : vector<8x8xf32> to vector<8xf32>
    %153 = vector.shape_cast %152 : vector<8xf32> to vector<8x1xf32>
    %154 = tpu.reciprocal %153 {approx = true} : vector<8x1xf32> -> vector<8x1xf32>
    %155 = vector.broadcast %154 : vector<8x1xf32> to vector<8x8xf32>
    %156 = arith.mulf %151, %155 : vector<8x8xf32>
    %157 = arith.truncf %156 : vector<8x8xf32> to vector<8x8xbf16>
    %cst_60 = arith.constant dense<0.000000e+00> : vector<8x64xf32>
    %158 = tpu.matmul %157, %6, %cst_60 {dimension_numbers = #tpu.dot_dimension_numbers<[1], [0], [0], [1], [0, 0, 1, 1], [], []>} : vector<8x8xbf16>, vector<8x64xbf16>, vector<8x64xf32> -> vector<8x64xf32>
    %c0_61 = arith.constant 0 : index
    %c0_62 = arith.constant 0 : index
    %c64 = arith.constant 64 : index
    %159 = vector.load %arg1[%c0_61, %c0_62, %c64] : memref<1x8x768xbf16, #tpu.memory_space<vmem>>, vector<1x8x64xbf16>
    %160 = vector.shape_cast %159 : vector<1x8x64xbf16> to vector<8x64xbf16>
    %c0_63 = arith.constant 0 : index
    %c0_64 = arith.constant 0 : index
    %c320 = arith.constant 320 : index
    %161 = vector.load %arg1[%c0_63, %c0_64, %c320] : memref<1x8x768xbf16, #tpu.memory_space<vmem>>, vector<1x8x64xbf16>
    %162 = vector.shape_cast %161 : vector<1x8x64xbf16> to vector<8x64xbf16>
    %c0_65 = arith.constant 0 : index
    %c0_66 = arith.constant 0 : index
    %c576 = arith.constant 576 : index
    %163 = vector.load %arg1[%c0_65, %c0_66, %c576] : memref<1x8x768xbf16, #tpu.memory_space<vmem>>, vector<1x8x64xbf16>
    %164 = vector.shape_cast %163 : vector<1x8x64xbf16> to vector<8x64xbf16>
    %cst_67 = arith.constant dense<0.000000e+00> : vector<8x8xf32>
    %165 = tpu.matmul %160, %162, %cst_67 {dimension_numbers = #tpu.dot_dimension_numbers<[1], [1], [0], [0], [0, 0, 1, 0], [], []>} : vector<8x64xbf16>, vector<8x64xbf16>, vector<8x8xf32> -> vector<8x8xf32>
    %c0_i32_68 = arith.constant 0 : i32
    %166 = vector.broadcast %c0_i32_68 : i32 to vector<8x8xi32>
    %167 = arith.cmpi eq, %0, %166 : vector<8x8xi32>
    %c0_69 = arith.constant 0 : index
    %c1_70 = arith.constant 1 : index
    %168 = memref.load %arg3[%c0_69, %c1_70] : memref<15x4xf32, #tpu.memory_space<smem>>
    %169 = vector.broadcast %168 : f32 to vector<8x8xf32>
    %170 = arith.mulf %165, %169 : vector<8x8xf32>
    %c0_71 = arith.constant 0 : index
    %c1_72 = arith.constant 1 : index
    %171 = memref.load %arg4[%c0_71, %c1_72] : memref<15x4xf32, #tpu.memory_space<smem>>
    %172 = vector.broadcast %171 : f32 to vector<8x8xf32>
    %173 = arith.addf %170, %172 : vector<8x8xf32>
    %174 = arith.select %167, %173, %165 : vector<8x8xi1>, vector<8x8xf32>
    %c1_i32_73 = arith.constant 1 : i32
    %175 = vector.broadcast %c1_i32_73 : i32 to vector<8x8xi32>
    %176 = arith.cmpi eq, %0, %175 : vector<8x8xi32>
    %c1_74 = arith.constant 1 : index
    %c1_75 = arith.constant 1 : index
    %177 = memref.load %arg3[%c1_74, %c1_75] : memref<15x4xf32, #tpu.memory_space<smem>>
    %178 = vector.broadcast %177 : f32 to vector<8x8xf32>
    %179 = arith.mulf %165, %178 : vector<8x8xf32>
    %c1_76 = arith.constant 1 : index
    %c1_77 = arith.constant 1 : index
    %180 = memref.load %arg4[%c1_76, %c1_77] : memref<15x4xf32, #tpu.memory_space<smem>>
    %181 = vector.broadcast %180 : f32 to vector<8x8xf32>
    %182 = arith.addf %179, %181 : vector<8x8xf32>
    %183 = arith.select %176, %182, %174 : vector<8x8xi1>, vector<8x8xf32>
    %c2_i32_78 = arith.constant 2 : i32
    %184 = vector.broadcast %c2_i32_78 : i32 to vector<8x8xi32>
    %185 = arith.cmpi eq, %0, %184 : vector<8x8xi32>
    %c2_79 = arith.constant 2 : index
    %c1_80 = arith.constant 1 : index
    %186 = memref.load %arg3[%c2_79, %c1_80] : memref<15x4xf32, #tpu.memory_space<smem>>
    %187 = vector.broadcast %186 : f32 to vector<8x8xf32>
    %188 = arith.mulf %165, %187 : vector<8x8xf32>
    %c2_81 = arith.constant 2 : index
    %c1_82 = arith.constant 1 : index
    %189 = memref.load %arg4[%c2_81, %c1_82] : memref<15x4xf32, #tpu.memory_space<smem>>
    %190 = vector.broadcast %189 : f32 to vector<8x8xf32>
    %191 = arith.addf %188, %190 : vector<8x8xf32>
    %192 = arith.select %185, %191, %183 : vector<8x8xi1>, vector<8x8xf32>
    %c3_i32_83 = arith.constant 3 : i32
    %193 = vector.broadcast %c3_i32_83 : i32 to vector<8x8xi32>
    %194 = arith.cmpi eq, %0, %193 : vector<8x8xi32>
    %c3_84 = arith.constant 3 : index
    %c1_85 = arith.constant 1 : index
    %195 = memref.load %arg3[%c3_84, %c1_85] : memref<15x4xf32, #tpu.memory_space<smem>>
    %196 = vector.broadcast %195 : f32 to vector<8x8xf32>
    %197 = arith.mulf %165, %196 : vector<8x8xf32>
    %c3_86 = arith.constant 3 : index
    %c1_87 = arith.constant 1 : index
    %198 = memref.load %arg4[%c3_86, %c1_87] : memref<15x4xf32, #tpu.memory_space<smem>>
    %199 = vector.broadcast %198 : f32 to vector<8x8xf32>
    %200 = arith.addf %197, %199 : vector<8x8xf32>
    %201 = arith.select %194, %200, %192 : vector<8x8xi1>, vector<8x8xf32>
    %c4_i32_88 = arith.constant 4 : i32
    %202 = vector.broadcast %c4_i32_88 : i32 to vector<8x8xi32>
    %203 = arith.cmpi eq, %0, %202 : vector<8x8xi32>
    %c4_89 = arith.constant 4 : index
    %c1_90 = arith.constant 1 : index
    %204 = memref.load %arg3[%c4_89, %c1_90] : memref<15x4xf32, #tpu.memory_space<smem>>
    %205 = vector.broadcast %204 : f32 to vector<8x8xf32>
    %206 = arith.mulf %165, %205 : vector<8x8xf32>
    %c4_91 = arith.constant 4 : index
    %c1_92 = arith.constant 1 : index
    %207 = memref.load %arg4[%c4_91, %c1_92] : memref<15x4xf32, #tpu.memory_space<smem>>
    %208 = vector.broadcast %207 : f32 to vector<8x8xf32>
    %209 = arith.addf %206, %208 : vector<8x8xf32>
    %210 = arith.select %203, %209, %201 : vector<8x8xi1>, vector<8x8xf32>
    %c5_i32_93 = arith.constant 5 : i32
    %211 = vector.broadcast %c5_i32_93 : i32 to vector<8x8xi32>
    %212 = arith.cmpi eq, %0, %211 : vector<8x8xi32>
    %c5_94 = arith.constant 5 : index
    %c1_95 = arith.constant 1 : index
    %213 = memref.load %arg3[%c5_94, %c1_95] : memref<15x4xf32, #tpu.memory_space<smem>>
    %214 = vector.broadcast %213 : f32 to vector<8x8xf32>
    %215 = arith.mulf %165, %214 : vector<8x8xf32>
    %c5_96 = arith.constant 5 : index
    %c1_97 = arith.constant 1 : index
    %216 = memref.load %arg4[%c5_96, %c1_97] : memref<15x4xf32, #tpu.memory_space<smem>>
    %217 = vector.broadcast %216 : f32 to vector<8x8xf32>
    %218 = arith.addf %215, %217 : vector<8x8xf32>
    %219 = arith.select %212, %218, %210 : vector<8x8xi1>, vector<8x8xf32>
    %c6_i32_98 = arith.constant 6 : i32
    %220 = vector.broadcast %c6_i32_98 : i32 to vector<8x8xi32>
    %221 = arith.cmpi eq, %0, %220 : vector<8x8xi32>
    %c6_99 = arith.constant 6 : index
    %c1_100 = arith.constant 1 : index
    %222 = memref.load %arg3[%c6_99, %c1_100] : memref<15x4xf32, #tpu.memory_space<smem>>
    %223 = vector.broadcast %222 : f32 to vector<8x8xf32>
    %224 = arith.mulf %165, %223 : vector<8x8xf32>
    %c6_101 = arith.constant 6 : index
    %c1_102 = arith.constant 1 : index
    %225 = memref.load %arg4[%c6_101, %c1_102] : memref<15x4xf32, #tpu.memory_space<smem>>
    %226 = vector.broadcast %225 : f32 to vector<8x8xf32>
    %227 = arith.addf %224, %226 : vector<8x8xf32>
    %228 = arith.select %221, %227, %219 : vector<8x8xi1>, vector<8x8xf32>
    %c7_i32_103 = arith.constant 7 : i32
    %229 = vector.broadcast %c7_i32_103 : i32 to vector<8x8xi32>
    %230 = arith.cmpi eq, %0, %229 : vector<8x8xi32>
    %c7_104 = arith.constant 7 : index
    %c1_105 = arith.constant 1 : index
    %231 = memref.load %arg3[%c7_104, %c1_105] : memref<15x4xf32, #tpu.memory_space<smem>>
    %232 = vector.broadcast %231 : f32 to vector<8x8xf32>
    %233 = arith.mulf %165, %232 : vector<8x8xf32>
    %c7_106 = arith.constant 7 : index
    %c1_107 = arith.constant 1 : index
    %234 = memref.load %arg4[%c7_106, %c1_107] : memref<15x4xf32, #tpu.memory_space<smem>>
    %235 = vector.broadcast %234 : f32 to vector<8x8xf32>
    %236 = arith.addf %233, %235 : vector<8x8xf32>
    %237 = arith.select %230, %236, %228 : vector<8x8xi1>, vector<8x8xf32>
    %c8_i32_108 = arith.constant 8 : i32
    %238 = vector.broadcast %c8_i32_108 : i32 to vector<8x8xi32>
    %239 = arith.cmpi eq, %0, %238 : vector<8x8xi32>
    %c8_109 = arith.constant 8 : index
    %c1_110 = arith.constant 1 : index
    %240 = memref.load %arg3[%c8_109, %c1_110] : memref<15x4xf32, #tpu.memory_space<smem>>
    %241 = vector.broadcast %240 : f32 to vector<8x8xf32>
    %242 = arith.mulf %165, %241 : vector<8x8xf32>
    %c8_111 = arith.constant 8 : index
    %c1_112 = arith.constant 1 : index
    %243 = memref.load %arg4[%c8_111, %c1_112] : memref<15x4xf32, #tpu.memory_space<smem>>
    %244 = vector.broadcast %243 : f32 to vector<8x8xf32>
    %245 = arith.addf %242, %244 : vector<8x8xf32>
    %246 = arith.select %239, %245, %237 : vector<8x8xi1>, vector<8x8xf32>
    %c9_i32_113 = arith.constant 9 : i32
    %247 = vector.broadcast %c9_i32_113 : i32 to vector<8x8xi32>
    %248 = arith.cmpi eq, %0, %247 : vector<8x8xi32>
    %c9_114 = arith.constant 9 : index
    %c1_115 = arith.constant 1 : index
    %249 = memref.load %arg3[%c9_114, %c1_115] : memref<15x4xf32, #tpu.memory_space<smem>>
    %250 = vector.broadcast %249 : f32 to vector<8x8xf32>
    %251 = arith.mulf %165, %250 : vector<8x8xf32>
    %c9_116 = arith.constant 9 : index
    %c1_117 = arith.constant 1 : index
    %252 = memref.load %arg4[%c9_116, %c1_117] : memref<15x4xf32, #tpu.memory_space<smem>>
    %253 = vector.broadcast %252 : f32 to vector<8x8xf32>
    %254 = arith.addf %251, %253 : vector<8x8xf32>
    %255 = arith.select %248, %254, %246 : vector<8x8xi1>, vector<8x8xf32>
    %c10_i32_118 = arith.constant 10 : i32
    %256 = vector.broadcast %c10_i32_118 : i32 to vector<8x8xi32>
    %257 = arith.cmpi eq, %0, %256 : vector<8x8xi32>
    %c10_119 = arith.constant 10 : index
    %c1_120 = arith.constant 1 : index
    %258 = memref.load %arg3[%c10_119, %c1_120] : memref<15x4xf32, #tpu.memory_space<smem>>
    %259 = vector.broadcast %258 : f32 to vector<8x8xf32>
    %260 = arith.mulf %165, %259 : vector<8x8xf32>
    %c10_121 = arith.constant 10 : index
    %c1_122 = arith.constant 1 : index
    %261 = memref.load %arg4[%c10_121, %c1_122] : memref<15x4xf32, #tpu.memory_space<smem>>
    %262 = vector.broadcast %261 : f32 to vector<8x8xf32>
    %263 = arith.addf %260, %262 : vector<8x8xf32>
    %264 = arith.select %257, %263, %255 : vector<8x8xi1>, vector<8x8xf32>
    %c11_i32_123 = arith.constant 11 : i32
    %265 = vector.broadcast %c11_i32_123 : i32 to vector<8x8xi32>
    %266 = arith.cmpi eq, %0, %265 : vector<8x8xi32>
    %c11_124 = arith.constant 11 : index
    %c1_125 = arith.constant 1 : index
    %267 = memref.load %arg3[%c11_124, %c1_125] : memref<15x4xf32, #tpu.memory_space<smem>>
    %268 = vector.broadcast %267 : f32 to vector<8x8xf32>
    %269 = arith.mulf %165, %268 : vector<8x8xf32>
    %c11_126 = arith.constant 11 : index
    %c1_127 = arith.constant 1 : index
    %270 = memref.load %arg4[%c11_126, %c1_127] : memref<15x4xf32, #tpu.memory_space<smem>>
    %271 = vector.broadcast %270 : f32 to vector<8x8xf32>
    %272 = arith.addf %269, %271 : vector<8x8xf32>
    %273 = arith.select %266, %272, %264 : vector<8x8xi1>, vector<8x8xf32>
    %c12_i32_128 = arith.constant 12 : i32
    %274 = vector.broadcast %c12_i32_128 : i32 to vector<8x8xi32>
    %275 = arith.cmpi eq, %0, %274 : vector<8x8xi32>
    %c12_129 = arith.constant 12 : index
    %c1_130 = arith.constant 1 : index
    %276 = memref.load %arg3[%c12_129, %c1_130] : memref<15x4xf32, #tpu.memory_space<smem>>
    %277 = vector.broadcast %276 : f32 to vector<8x8xf32>
    %278 = arith.mulf %165, %277 : vector<8x8xf32>
    %c12_131 = arith.constant 12 : index
    %c1_132 = arith.constant 1 : index
    %279 = memref.load %arg4[%c12_131, %c1_132] : memref<15x4xf32, #tpu.memory_space<smem>>
    %280 = vector.broadcast %279 : f32 to vector<8x8xf32>
    %281 = arith.addf %278, %280 : vector<8x8xf32>
    %282 = arith.select %275, %281, %273 : vector<8x8xi1>, vector<8x8xf32>
    %c13_i32_133 = arith.constant 13 : i32
    %283 = vector.broadcast %c13_i32_133 : i32 to vector<8x8xi32>
    %284 = arith.cmpi eq, %0, %283 : vector<8x8xi32>
    %c13_134 = arith.constant 13 : index
    %c1_135 = arith.constant 1 : index
    %285 = memref.load %arg3[%c13_134, %c1_135] : memref<15x4xf32, #tpu.memory_space<smem>>
    %286 = vector.broadcast %285 : f32 to vector<8x8xf32>
    %287 = arith.mulf %165, %286 : vector<8x8xf32>
    %c13_136 = arith.constant 13 : index
    %c1_137 = arith.constant 1 : index
    %288 = memref.load %arg4[%c13_136, %c1_137] : memref<15x4xf32, #tpu.memory_space<smem>>
    %289 = vector.broadcast %288 : f32 to vector<8x8xf32>
    %290 = arith.addf %287, %289 : vector<8x8xf32>
    %291 = arith.select %284, %290, %282 : vector<8x8xi1>, vector<8x8xf32>
    %c14_i32_138 = arith.constant 14 : i32
    %292 = vector.broadcast %c14_i32_138 : i32 to vector<8x8xi32>
    %293 = arith.cmpi eq, %0, %292 : vector<8x8xi32>
    %c14_139 = arith.constant 14 : index
    %c1_140 = arith.constant 1 : index
    %294 = memref.load %arg3[%c14_139, %c1_140] : memref<15x4xf32, #tpu.memory_space<smem>>
    %295 = vector.broadcast %294 : f32 to vector<8x8xf32>
    %296 = arith.mulf %165, %295 : vector<8x8xf32>
    %c14_141 = arith.constant 14 : index
    %c1_142 = arith.constant 1 : index
    %297 = memref.load %arg4[%c14_141, %c1_142] : memref<15x4xf32, #tpu.memory_space<smem>>
    %298 = vector.broadcast %297 : f32 to vector<8x8xf32>
    %299 = arith.addf %296, %298 : vector<8x8xf32>
    %300 = arith.select %293, %299, %291 : vector<8x8xi1>, vector<8x8xf32>
    %301 = arith.truncf %300 : vector<8x8xf32> to vector<8x8xbf16>
    %c0_143 = arith.constant 0 : index
    %c1_144 = arith.constant 1 : index
    %c0_145 = arith.constant 0 : index
    %c0_146 = arith.constant 0 : index
    %302 = vector.load %arg6[%c0_143, %c1_144, %c0_145, %c0_146] : memref<1x4x8x8xbf16, #tpu.memory_space<vmem>>, vector<1x1x8x8xbf16>
    %303 = vector.shape_cast %302 : vector<1x1x8x8xbf16> to vector<8x8xbf16>
    %304 = vector.shape_cast %301 : vector<8x8xbf16> to vector<1x1x8x8xbf16>
    tpu.vector_store %arg6[%c0_143, %c1_144, %c0_145, %c0_146], %304 {strides = array<i32>} : memref<1x4x8x8xbf16, #tpu.memory_space<vmem>>, vector<1x1x8x8xbf16>,
    %cst_147 = arith.constant dense<0xFF800000> : vector<8xf32>
    %305 = vector.multi_reduction <maximumf>, %300, %cst_147 [1] : vector<8x8xf32> to vector<8xf32>
    %306 = vector.shape_cast %305 : vector<8xf32> to vector<8x1xf32>
    %307 = vector.broadcast %306 : vector<8x1xf32> to vector<8x8xf32>
    %308 = arith.subf %300, %307 : vector<8x8xf32>
    %309 = math.exp %308 : vector<8x8xf32>
    %cst_148 = arith.constant dense<0.000000e+00> : vector<8xf32>
    %310 = vector.multi_reduction <add>, %309, %cst_148 [1] : vector<8x8xf32> to vector<8xf32>
    %311 = vector.shape_cast %310 : vector<8xf32> to vector<8x1xf32>
    %312 = tpu.reciprocal %311 {approx = true} : vector<8x1xf32> -> vector<8x1xf32>
    %313 = vector.broadcast %312 : vector<8x1xf32> to vector<8x8xf32>
    %314 = arith.mulf %309, %313 : vector<8x8xf32>
    %315 = arith.truncf %314 : vector<8x8xf32> to vector<8x8xbf16>
    %cst_149 = arith.constant dense<0.000000e+00> : vector<8x64xf32>
    %316 = tpu.matmul %315, %164, %cst_149 {dimension_numbers = #tpu.dot_dimension_numbers<[1], [0], [0], [1], [0, 0, 1, 1], [], []>} : vector<8x8xbf16>, vector<8x64xbf16>, vector<8x64xf32> -> vector<8x64xf32>
    %c0_150 = arith.constant 0 : index
    %c0_151 = arith.constant 0 : index
    %c128 = arith.constant 128 : index
    %317 = vector.load %arg1[%c0_150, %c0_151, %c128] : memref<1x8x768xbf16, #tpu.memory_space<vmem>>, vector<1x8x64xbf16>
    %318 = vector.shape_cast %317 : vector<1x8x64xbf16> to vector<8x64xbf16>
    %c0_152 = arith.constant 0 : index
    %c0_153 = arith.constant 0 : index
    %c384 = arith.constant 384 : index
    %319 = vector.load %arg1[%c0_152, %c0_153, %c384] : memref<1x8x768xbf16, #tpu.memory_space<vmem>>, vector<1x8x64xbf16>
    %320 = vector.shape_cast %319 : vector<1x8x64xbf16> to vector<8x64xbf16>
    %c0_154 = arith.constant 0 : index
    %c0_155 = arith.constant 0 : index
    %c640 = arith.constant 640 : index
    %321 = vector.load %arg1[%c0_154, %c0_155, %c640] : memref<1x8x768xbf16, #tpu.memory_space<vmem>>, vector<1x8x64xbf16>
    %322 = vector.shape_cast %321 : vector<1x8x64xbf16> to vector<8x64xbf16>
    %cst_156 = arith.constant dense<0.000000e+00> : vector<8x8xf32>
    %323 = tpu.matmul %318, %320, %cst_156 {dimension_numbers = #tpu.dot_dimension_numbers<[1], [1], [0], [0], [0, 0, 1, 0], [], []>} : vector<8x64xbf16>, vector<8x64xbf16>, vector<8x8xf32> -> vector<8x8xf32>
    %c0_i32_157 = arith.constant 0 : i32
    %324 = vector.broadcast %c0_i32_157 : i32 to vector<8x8xi32>
    %325 = arith.cmpi eq, %0, %324 : vector<8x8xi32>
    %c0_158 = arith.constant 0 : index
    %c2_159 = arith.constant 2 : index
    %326 = memref.load %arg3[%c0_158, %c2_159] : memref<15x4xf32, #tpu.memory_space<smem>>
    %327 = vector.broadcast %326 : f32 to vector<8x8xf32>
    %328 = arith.mulf %323, %327 : vector<8x8xf32>
    %c0_160 = arith.constant 0 : index
    %c2_161 = arith.constant 2 : index
    %329 = memref.load %arg4[%c0_160, %c2_161] : memref<15x4xf32, #tpu.memory_space<smem>>
    %330 = vector.broadcast %329 : f32 to vector<8x8xf32>
    %331 = arith.addf %328, %330 : vector<8x8xf32>
    %332 = arith.select %325, %331, %323 : vector<8x8xi1>, vector<8x8xf32>
    %c1_i32_162 = arith.constant 1 : i32
    %333 = vector.broadcast %c1_i32_162 : i32 to vector<8x8xi32>
    %334 = arith.cmpi eq, %0, %333 : vector<8x8xi32>
    %c1_163 = arith.constant 1 : index
    %c2_164 = arith.constant 2 : index
    %335 = memref.load %arg3[%c1_163, %c2_164] : memref<15x4xf32, #tpu.memory_space<smem>>
    %336 = vector.broadcast %335 : f32 to vector<8x8xf32>
    %337 = arith.mulf %323, %336 : vector<8x8xf32>
    %c1_165 = arith.constant 1 : index
    %c2_166 = arith.constant 2 : index
    %338 = memref.load %arg4[%c1_165, %c2_166] : memref<15x4xf32, #tpu.memory_space<smem>>
    %339 = vector.broadcast %338 : f32 to vector<8x8xf32>
    %340 = arith.addf %337, %339 : vector<8x8xf32>
    %341 = arith.select %334, %340, %332 : vector<8x8xi1>, vector<8x8xf32>
    %c2_i32_167 = arith.constant 2 : i32
    %342 = vector.broadcast %c2_i32_167 : i32 to vector<8x8xi32>
    %343 = arith.cmpi eq, %0, %342 : vector<8x8xi32>
    %c2_168 = arith.constant 2 : index
    %c2_169 = arith.constant 2 : index
    %344 = memref.load %arg3[%c2_168, %c2_169] : memref<15x4xf32, #tpu.memory_space<smem>>
    %345 = vector.broadcast %344 : f32 to vector<8x8xf32>
    %346 = arith.mulf %323, %345 : vector<8x8xf32>
    %c2_170 = arith.constant 2 : index
    %c2_171 = arith.constant 2 : index
    %347 = memref.load %arg4[%c2_170, %c2_171] : memref<15x4xf32, #tpu.memory_space<smem>>
    %348 = vector.broadcast %347 : f32 to vector<8x8xf32>
    %349 = arith.addf %346, %348 : vector<8x8xf32>
    %350 = arith.select %343, %349, %341 : vector<8x8xi1>, vector<8x8xf32>
    %c3_i32_172 = arith.constant 3 : i32
    %351 = vector.broadcast %c3_i32_172 : i32 to vector<8x8xi32>
    %352 = arith.cmpi eq, %0, %351 : vector<8x8xi32>
    %c3_173 = arith.constant 3 : index
    %c2_174 = arith.constant 2 : index
    %353 = memref.load %arg3[%c3_173, %c2_174] : memref<15x4xf32, #tpu.memory_space<smem>>
    %354 = vector.broadcast %353 : f32 to vector<8x8xf32>
    %355 = arith.mulf %323, %354 : vector<8x8xf32>
    %c3_175 = arith.constant 3 : index
    %c2_176 = arith.constant 2 : index
    %356 = memref.load %arg4[%c3_175, %c2_176] : memref<15x4xf32, #tpu.memory_space<smem>>
    %357 = vector.broadcast %356 : f32 to vector<8x8xf32>
    %358 = arith.addf %355, %357 : vector<8x8xf32>
    %359 = arith.select %352, %358, %350 : vector<8x8xi1>, vector<8x8xf32>
    %c4_i32_177 = arith.constant 4 : i32
    %360 = vector.broadcast %c4_i32_177 : i32 to vector<8x8xi32>
    %361 = arith.cmpi eq, %0, %360 : vector<8x8xi32>
    %c4_178 = arith.constant 4 : index
    %c2_179 = arith.constant 2 : index
    %362 = memref.load %arg3[%c4_178, %c2_179] : memref<15x4xf32, #tpu.memory_space<smem>>
    %363 = vector.broadcast %362 : f32 to vector<8x8xf32>
    %364 = arith.mulf %323, %363 : vector<8x8xf32>
    %c4_180 = arith.constant 4 : index
    %c2_181 = arith.constant 2 : index
    %365 = memref.load %arg4[%c4_180, %c2_181] : memref<15x4xf32, #tpu.memory_space<smem>>
    %366 = vector.broadcast %365 : f32 to vector<8x8xf32>
    %367 = arith.addf %364, %366 : vector<8x8xf32>
    %368 = arith.select %361, %367, %359 : vector<8x8xi1>, vector<8x8xf32>
    %c5_i32_182 = arith.constant 5 : i32
    %369 = vector.broadcast %c5_i32_182 : i32 to vector<8x8xi32>
    %370 = arith.cmpi eq, %0, %369 : vector<8x8xi32>
    %c5_183 = arith.constant 5 : index
    %c2_184 = arith.constant 2 : index
    %371 = memref.load %arg3[%c5_183, %c2_184] : memref<15x4xf32, #tpu.memory_space<smem>>
    %372 = vector.broadcast %371 : f32 to vector<8x8xf32>
    %373 = arith.mulf %323, %372 : vector<8x8xf32>
    %c5_185 = arith.constant 5 : index
    %c2_186 = arith.constant 2 : index
    %374 = memref.load %arg4[%c5_185, %c2_186] : memref<15x4xf32, #tpu.memory_space<smem>>
    %375 = vector.broadcast %374 : f32 to vector<8x8xf32>
    %376 = arith.addf %373, %375 : vector<8x8xf32>
    %377 = arith.select %370, %376, %368 : vector<8x8xi1>, vector<8x8xf32>
    %c6_i32_187 = arith.constant 6 : i32
    %378 = vector.broadcast %c6_i32_187 : i32 to vector<8x8xi32>
    %379 = arith.cmpi eq, %0, %378 : vector<8x8xi32>
    %c6_188 = arith.constant 6 : index
    %c2_189 = arith.constant 2 : index
    %380 = memref.load %arg3[%c6_188, %c2_189] : memref<15x4xf32, #tpu.memory_space<smem>>
    %381 = vector.broadcast %380 : f32 to vector<8x8xf32>
    %382 = arith.mulf %323, %381 : vector<8x8xf32>
    %c6_190 = arith.constant 6 : index
    %c2_191 = arith.constant 2 : index
    %383 = memref.load %arg4[%c6_190, %c2_191] : memref<15x4xf32, #tpu.memory_space<smem>>
    %384 = vector.broadcast %383 : f32 to vector<8x8xf32>
    %385 = arith.addf %382, %384 : vector<8x8xf32>
    %386 = arith.select %379, %385, %377 : vector<8x8xi1>, vector<8x8xf32>
    %c7_i32_192 = arith.constant 7 : i32
    %387 = vector.broadcast %c7_i32_192 : i32 to vector<8x8xi32>
    %388 = arith.cmpi eq, %0, %387 : vector<8x8xi32>
    %c7_193 = arith.constant 7 : index
    %c2_194 = arith.constant 2 : index
    %389 = memref.load %arg3[%c7_193, %c2_194] : memref<15x4xf32, #tpu.memory_space<smem>>
    %390 = vector.broadcast %389 : f32 to vector<8x8xf32>
    %391 = arith.mulf %323, %390 : vector<8x8xf32>
    %c7_195 = arith.constant 7 : index
    %c2_196 = arith.constant 2 : index
    %392 = memref.load %arg4[%c7_195, %c2_196] : memref<15x4xf32, #tpu.memory_space<smem>>
    %393 = vector.broadcast %392 : f32 to vector<8x8xf32>
    %394 = arith.addf %391, %393 : vector<8x8xf32>
    %395 = arith.select %388, %394, %386 : vector<8x8xi1>, vector<8x8xf32>
    %c8_i32_197 = arith.constant 8 : i32
    %396 = vector.broadcast %c8_i32_197 : i32 to vector<8x8xi32>
    %397 = arith.cmpi eq, %0, %396 : vector<8x8xi32>
    %c8_198 = arith.constant 8 : index
    %c2_199 = arith.constant 2 : index
    %398 = memref.load %arg3[%c8_198, %c2_199] : memref<15x4xf32, #tpu.memory_space<smem>>
    %399 = vector.broadcast %398 : f32 to vector<8x8xf32>
    %400 = arith.mulf %323, %399 : vector<8x8xf32>
    %c8_200 = arith.constant 8 : index
    %c2_201 = arith.constant 2 : index
    %401 = memref.load %arg4[%c8_200, %c2_201] : memref<15x4xf32, #tpu.memory_space<smem>>
    %402 = vector.broadcast %401 : f32 to vector<8x8xf32>
    %403 = arith.addf %400, %402 : vector<8x8xf32>
    %404 = arith.select %397, %403, %395 : vector<8x8xi1>, vector<8x8xf32>
    %c9_i32_202 = arith.constant 9 : i32
    %405 = vector.broadcast %c9_i32_202 : i32 to vector<8x8xi32>
    %406 = arith.cmpi eq, %0, %405 : vector<8x8xi32>
    %c9_203 = arith.constant 9 : index
    %c2_204 = arith.constant 2 : index
    %407 = memref.load %arg3[%c9_203, %c2_204] : memref<15x4xf32, #tpu.memory_space<smem>>
    %408 = vector.broadcast %407 : f32 to vector<8x8xf32>
    %409 = arith.mulf %323, %408 : vector<8x8xf32>
    %c9_205 = arith.constant 9 : index
    %c2_206 = arith.constant 2 : index
    %410 = memref.load %arg4[%c9_205, %c2_206] : memref<15x4xf32, #tpu.memory_space<smem>>
    %411 = vector.broadcast %410 : f32 to vector<8x8xf32>
    %412 = arith.addf %409, %411 : vector<8x8xf32>
    %413 = arith.select %406, %412, %404 : vector<8x8xi1>, vector<8x8xf32>
    %c10_i32_207 = arith.constant 10 : i32
    %414 = vector.broadcast %c10_i32_207 : i32 to vector<8x8xi32>
    %415 = arith.cmpi eq, %0, %414 : vector<8x8xi32>
    %c10_208 = arith.constant 10 : index
    %c2_209 = arith.constant 2 : index
    %416 = memref.load %arg3[%c10_208, %c2_209] : memref<15x4xf32, #tpu.memory_space<smem>>
    %417 = vector.broadcast %416 : f32 to vector<8x8xf32>
    %418 = arith.mulf %323, %417 : vector<8x8xf32>
    %c10_210 = arith.constant 10 : index
    %c2_211 = arith.constant 2 : index
    %419 = memref.load %arg4[%c10_210, %c2_211] : memref<15x4xf32, #tpu.memory_space<smem>>
    %420 = vector.broadcast %419 : f32 to vector<8x8xf32>
    %421 = arith.addf %418, %420 : vector<8x8xf32>
    %422 = arith.select %415, %421, %413 : vector<8x8xi1>, vector<8x8xf32>
    %c11_i32_212 = arith.constant 11 : i32
    %423 = vector.broadcast %c11_i32_212 : i32 to vector<8x8xi32>
    %424 = arith.cmpi eq, %0, %423 : vector<8x8xi32>
    %c11_213 = arith.constant 11 : index
    %c2_214 = arith.constant 2 : index
    %425 = memref.load %arg3[%c11_213, %c2_214] : memref<15x4xf32, #tpu.memory_space<smem>>
    %426 = vector.broadcast %425 : f32 to vector<8x8xf32>
    %427 = arith.mulf %323, %426 : vector<8x8xf32>
    %c11_215 = arith.constant 11 : index
    %c2_216 = arith.constant 2 : index
    %428 = memref.load %arg4[%c11_215, %c2_216] : memref<15x4xf32, #tpu.memory_space<smem>>
    %429 = vector.broadcast %428 : f32 to vector<8x8xf32>
    %430 = arith.addf %427, %429 : vector<8x8xf32>
    %431 = arith.select %424, %430, %422 : vector<8x8xi1>, vector<8x8xf32>
    %c12_i32_217 = arith.constant 12 : i32
    %432 = vector.broadcast %c12_i32_217 : i32 to vector<8x8xi32>
    %433 = arith.cmpi eq, %0, %432 : vector<8x8xi32>
    %c12_218 = arith.constant 12 : index
    %c2_219 = arith.constant 2 : index
    %434 = memref.load %arg3[%c12_218, %c2_219] : memref<15x4xf32, #tpu.memory_space<smem>>
    %435 = vector.broadcast %434 : f32 to vector<8x8xf32>
    %436 = arith.mulf %323, %435 : vector<8x8xf32>
    %c12_220 = arith.constant 12 : index
    %c2_221 = arith.constant 2 : index
    %437 = memref.load %arg4[%c12_220, %c2_221] : memref<15x4xf32, #tpu.memory_space<smem>>
    %438 = vector.broadcast %437 : f32 to vector<8x8xf32>
    %439 = arith.addf %436, %438 : vector<8x8xf32>
    %440 = arith.select %433, %439, %431 : vector<8x8xi1>, vector<8x8xf32>
    %c13_i32_222 = arith.constant 13 : i32
    %441 = vector.broadcast %c13_i32_222 : i32 to vector<8x8xi32>
    %442 = arith.cmpi eq, %0, %441 : vector<8x8xi32>
    %c13_223 = arith.constant 13 : index
    %c2_224 = arith.constant 2 : index
    %443 = memref.load %arg3[%c13_223, %c2_224] : memref<15x4xf32, #tpu.memory_space<smem>>
    %444 = vector.broadcast %443 : f32 to vector<8x8xf32>
    %445 = arith.mulf %323, %444 : vector<8x8xf32>
    %c13_225 = arith.constant 13 : index
    %c2_226 = arith.constant 2 : index
    %446 = memref.load %arg4[%c13_225, %c2_226] : memref<15x4xf32, #tpu.memory_space<smem>>
    %447 = vector.broadcast %446 : f32 to vector<8x8xf32>
    %448 = arith.addf %445, %447 : vector<8x8xf32>
    %449 = arith.select %442, %448, %440 : vector<8x8xi1>, vector<8x8xf32>
    %c14_i32_227 = arith.constant 14 : i32
    %450 = vector.broadcast %c14_i32_227 : i32 to vector<8x8xi32>
    %451 = arith.cmpi eq, %0, %450 : vector<8x8xi32>
    %c14_228 = arith.constant 14 : index
    %c2_229 = arith.constant 2 : index
    %452 = memref.load %arg3[%c14_228, %c2_229] : memref<15x4xf32, #tpu.memory_space<smem>>
    %453 = vector.broadcast %452 : f32 to vector<8x8xf32>
    %454 = arith.mulf %323, %453 : vector<8x8xf32>
    %c14_230 = arith.constant 14 : index
    %c2_231 = arith.constant 2 : index
    %455 = memref.load %arg4[%c14_230, %c2_231] : memref<15x4xf32, #tpu.memory_space<smem>>
    %456 = vector.broadcast %455 : f32 to vector<8x8xf32>
    %457 = arith.addf %454, %456 : vector<8x8xf32>
    %458 = arith.select %451, %457, %449 : vector<8x8xi1>, vector<8x8xf32>
    %459 = arith.truncf %458 : vector<8x8xf32> to vector<8x8xbf16>
    %c0_232 = arith.constant 0 : index
    %c2_233 = arith.constant 2 : index
    %c0_234 = arith.constant 0 : index
    %c0_235 = arith.constant 0 : index
    %460 = vector.load %arg6[%c0_232, %c2_233, %c0_234, %c0_235] : memref<1x4x8x8xbf16, #tpu.memory_space<vmem>>, vector<1x1x8x8xbf16>
    %461 = vector.shape_cast %460 : vector<1x1x8x8xbf16> to vector<8x8xbf16>
    %462 = vector.shape_cast %459 : vector<8x8xbf16> to vector<1x1x8x8xbf16>
    tpu.vector_store %arg6[%c0_232, %c2_233, %c0_234, %c0_235], %462 {strides = array<i32>} : memref<1x4x8x8xbf16, #tpu.memory_space<vmem>>, vector<1x1x8x8xbf16>,
    %cst_236 = arith.constant dense<0xFF800000> : vector<8xf32>
    %463 = vector.multi_reduction <maximumf>, %458, %cst_236 [1] : vector<8x8xf32> to vector<8xf32>
    %464 = vector.shape_cast %463 : vector<8xf32> to vector<8x1xf32>
    %465 = vector.broadcast %464 : vector<8x1xf32> to vector<8x8xf32>
    %466 = arith.subf %458, %465 : vector<8x8xf32>
    %467 = math.exp %466 : vector<8x8xf32>
    %cst_237 = arith.constant dense<0.000000e+00> : vector<8xf32>
    %468 = vector.multi_reduction <add>, %467, %cst_237 [1] : vector<8x8xf32> to vector<8xf32>
    %469 = vector.shape_cast %468 : vector<8xf32> to vector<8x1xf32>
    %470 = tpu.reciprocal %469 {approx = true} : vector<8x1xf32> -> vector<8x1xf32>
    %471 = vector.broadcast %470 : vector<8x1xf32> to vector<8x8xf32>
    %472 = arith.mulf %467, %471 : vector<8x8xf32>
    %473 = arith.truncf %472 : vector<8x8xf32> to vector<8x8xbf16>
    %cst_238 = arith.constant dense<0.000000e+00> : vector<8x64xf32>
    %474 = tpu.matmul %473, %322, %cst_238 {dimension_numbers = #tpu.dot_dimension_numbers<[1], [0], [0], [1], [0, 0, 1, 1], [], []>} : vector<8x8xbf16>, vector<8x64xbf16>, vector<8x64xf32> -> vector<8x64xf32>
    %c0_239 = arith.constant 0 : index
    %c0_240 = arith.constant 0 : index
    %c192 = arith.constant 192 : index
    %475 = vector.load %arg1[%c0_239, %c0_240, %c192] : memref<1x8x768xbf16, #tpu.memory_space<vmem>>, vector<1x8x64xbf16>
    %476 = vector.shape_cast %475 : vector<1x8x64xbf16> to vector<8x64xbf16>
    %c0_241 = arith.constant 0 : index
    %c0_242 = arith.constant 0 : index
    %c448 = arith.constant 448 : index
    %477 = vector.load %arg1[%c0_241, %c0_242, %c448] : memref<1x8x768xbf16, #tpu.memory_space<vmem>>, vector<1x8x64xbf16>
    %478 = vector.shape_cast %477 : vector<1x8x64xbf16> to vector<8x64xbf16>
    %c0_243 = arith.constant 0 : index
    %c0_244 = arith.constant 0 : index
    %c704 = arith.constant 704 : index
    %479 = vector.load %arg1[%c0_243, %c0_244, %c704] : memref<1x8x768xbf16, #tpu.memory_space<vmem>>, vector<1x8x64xbf16>
    %480 = vector.shape_cast %479 : vector<1x8x64xbf16> to vector<8x64xbf16>
    %cst_245 = arith.constant dense<0.000000e+00> : vector<8x8xf32>
    %481 = tpu.matmul %476, %478, %cst_245 {dimension_numbers = #tpu.dot_dimension_numbers<[1], [1], [0], [0], [0, 0, 1, 0], [], []>} : vector<8x64xbf16>, vector<8x64xbf16>, vector<8x8xf32> -> vector<8x8xf32>
    %c0_i32_246 = arith.constant 0 : i32
    %482 = vector.broadcast %c0_i32_246 : i32 to vector<8x8xi32>
    %483 = arith.cmpi eq, %0, %482 : vector<8x8xi32>
    %c0_247 = arith.constant 0 : index
    %c3_248 = arith.constant 3 : index
    %484 = memref.load %arg3[%c0_247, %c3_248] : memref<15x4xf32, #tpu.memory_space<smem>>
    %485 = vector.broadcast %484 : f32 to vector<8x8xf32>
    %486 = arith.mulf %481, %485 : vector<8x8xf32>
    %c0_249 = arith.constant 0 : index
    %c3_250 = arith.constant 3 : index
    %487 = memref.load %arg4[%c0_249, %c3_250] : memref<15x4xf32, #tpu.memory_space<smem>>
    %488 = vector.broadcast %487 : f32 to vector<8x8xf32>
    %489 = arith.addf %486, %488 : vector<8x8xf32>
    %490 = arith.select %483, %489, %481 : vector<8x8xi1>, vector<8x8xf32>
    %c1_i32_251 = arith.constant 1 : i32
    %491 = vector.broadcast %c1_i32_251 : i32 to vector<8x8xi32>
    %492 = arith.cmpi eq, %0, %491 : vector<8x8xi32>
    %c1_252 = arith.constant 1 : index
    %c3_253 = arith.constant 3 : index
    %493 = memref.load %arg3[%c1_252, %c3_253] : memref<15x4xf32, #tpu.memory_space<smem>>
    %494 = vector.broadcast %493 : f32 to vector<8x8xf32>
    %495 = arith.mulf %481, %494 : vector<8x8xf32>
    %c1_254 = arith.constant 1 : index
    %c3_255 = arith.constant 3 : index
    %496 = memref.load %arg4[%c1_254, %c3_255] : memref<15x4xf32, #tpu.memory_space<smem>>
    %497 = vector.broadcast %496 : f32 to vector<8x8xf32>
    %498 = arith.addf %495, %497 : vector<8x8xf32>
    %499 = arith.select %492, %498, %490 : vector<8x8xi1>, vector<8x8xf32>
    %c2_i32_256 = arith.constant 2 : i32
    %500 = vector.broadcast %c2_i32_256 : i32 to vector<8x8xi32>
    %501 = arith.cmpi eq, %0, %500 : vector<8x8xi32>
    %c2_257 = arith.constant 2 : index
    %c3_258 = arith.constant 3 : index
    %502 = memref.load %arg3[%c2_257, %c3_258] : memref<15x4xf32, #tpu.memory_space<smem>>
    %503 = vector.broadcast %502 : f32 to vector<8x8xf32>
    %504 = arith.mulf %481, %503 : vector<8x8xf32>
    %c2_259 = arith.constant 2 : index
    %c3_260 = arith.constant 3 : index
    %505 = memref.load %arg4[%c2_259, %c3_260] : memref<15x4xf32, #tpu.memory_space<smem>>
    %506 = vector.broadcast %505 : f32 to vector<8x8xf32>
    %507 = arith.addf %504, %506 : vector<8x8xf32>
    %508 = arith.select %501, %507, %499 : vector<8x8xi1>, vector<8x8xf32>
    %c3_i32_261 = arith.constant 3 : i32
    %509 = vector.broadcast %c3_i32_261 : i32 to vector<8x8xi32>
    %510 = arith.cmpi eq, %0, %509 : vector<8x8xi32>
    %c3_262 = arith.constant 3 : index
    %c3_263 = arith.constant 3 : index
    %511 = memref.load %arg3[%c3_262, %c3_263] : memref<15x4xf32, #tpu.memory_space<smem>>
    %512 = vector.broadcast %511 : f32 to vector<8x8xf32>
    %513 = arith.mulf %481, %512 : vector<8x8xf32>
    %c3_264 = arith.constant 3 : index
    %c3_265 = arith.constant 3 : index
    %514 = memref.load %arg4[%c3_264, %c3_265] : memref<15x4xf32, #tpu.memory_space<smem>>
    %515 = vector.broadcast %514 : f32 to vector<8x8xf32>
    %516 = arith.addf %513, %515 : vector<8x8xf32>
    %517 = arith.select %510, %516, %508 : vector<8x8xi1>, vector<8x8xf32>
    %c4_i32_266 = arith.constant 4 : i32
    %518 = vector.broadcast %c4_i32_266 : i32 to vector<8x8xi32>
    %519 = arith.cmpi eq, %0, %518 : vector<8x8xi32>
    %c4_267 = arith.constant 4 : index
    %c3_268 = arith.constant 3 : index
    %520 = memref.load %arg3[%c4_267, %c3_268] : memref<15x4xf32, #tpu.memory_space<smem>>
    %521 = vector.broadcast %520 : f32 to vector<8x8xf32>
    %522 = arith.mulf %481, %521 : vector<8x8xf32>
    %c4_269 = arith.constant 4 : index
    %c3_270 = arith.constant 3 : index
    %523 = memref.load %arg4[%c4_269, %c3_270] : memref<15x4xf32, #tpu.memory_space<smem>>
    %524 = vector.broadcast %523 : f32 to vector<8x8xf32>
    %525 = arith.addf %522, %524 : vector<8x8xf32>
    %526 = arith.select %519, %525, %517 : vector<8x8xi1>, vector<8x8xf32>
    %c5_i32_271 = arith.constant 5 : i32
    %527 = vector.broadcast %c5_i32_271 : i32 to vector<8x8xi32>
    %528 = arith.cmpi eq, %0, %527 : vector<8x8xi32>
    %c5_272 = arith.constant 5 : index
    %c3_273 = arith.constant 3 : index
    %529 = memref.load %arg3[%c5_272, %c3_273] : memref<15x4xf32, #tpu.memory_space<smem>>
    %530 = vector.broadcast %529 : f32 to vector<8x8xf32>
    %531 = arith.mulf %481, %530 : vector<8x8xf32>
    %c5_274 = arith.constant 5 : index
    %c3_275 = arith.constant 3 : index
    %532 = memref.load %arg4[%c5_274, %c3_275] : memref<15x4xf32, #tpu.memory_space<smem>>
    %533 = vector.broadcast %532 : f32 to vector<8x8xf32>
    %534 = arith.addf %531, %533 : vector<8x8xf32>
    %535 = arith.select %528, %534, %526 : vector<8x8xi1>, vector<8x8xf32>
    %c6_i32_276 = arith.constant 6 : i32
    %536 = vector.broadcast %c6_i32_276 : i32 to vector<8x8xi32>
    %537 = arith.cmpi eq, %0, %536 : vector<8x8xi32>
    %c6_277 = arith.constant 6 : index
    %c3_278 = arith.constant 3 : index
    %538 = memref.load %arg3[%c6_277, %c3_278] : memref<15x4xf32, #tpu.memory_space<smem>>
    %539 = vector.broadcast %538 : f32 to vector<8x8xf32>
    %540 = arith.mulf %481, %539 : vector<8x8xf32>
    %c6_279 = arith.constant 6 : index
    %c3_280 = arith.constant 3 : index
    %541 = memref.load %arg4[%c6_279, %c3_280] : memref<15x4xf32, #tpu.memory_space<smem>>
    %542 = vector.broadcast %541 : f32 to vector<8x8xf32>
    %543 = arith.addf %540, %542 : vector<8x8xf32>
    %544 = arith.select %537, %543, %535 : vector<8x8xi1>, vector<8x8xf32>
    %c7_i32_281 = arith.constant 7 : i32
    %545 = vector.broadcast %c7_i32_281 : i32 to vector<8x8xi32>
    %546 = arith.cmpi eq, %0, %545 : vector<8x8xi32>
    %c7_282 = arith.constant 7 : index
    %c3_283 = arith.constant 3 : index
    %547 = memref.load %arg3[%c7_282, %c3_283] : memref<15x4xf32, #tpu.memory_space<smem>>
    %548 = vector.broadcast %547 : f32 to vector<8x8xf32>
    %549 = arith.mulf %481, %548 : vector<8x8xf32>
    %c7_284 = arith.constant 7 : index
    %c3_285 = arith.constant 3 : index
    %550 = memref.load %arg4[%c7_284, %c3_285] : memref<15x4xf32, #tpu.memory_space<smem>>
    %551 = vector.broadcast %550 : f32 to vector<8x8xf32>
    %552 = arith.addf %549, %551 : vector<8x8xf32>
    %553 = arith.select %546, %552, %544 : vector<8x8xi1>, vector<8x8xf32>
    %c8_i32_286 = arith.constant 8 : i32
    %554 = vector.broadcast %c8_i32_286 : i32 to vector<8x8xi32>
    %555 = arith.cmpi eq, %0, %554 : vector<8x8xi32>
    %c8_287 = arith.constant 8 : index
    %c3_288 = arith.constant 3 : index
    %556 = memref.load %arg3[%c8_287, %c3_288] : memref<15x4xf32, #tpu.memory_space<smem>>
    %557 = vector.broadcast %556 : f32 to vector<8x8xf32>
    %558 = arith.mulf %481, %557 : vector<8x8xf32>
    %c8_289 = arith.constant 8 : index
    %c3_290 = arith.constant 3 : index
    %559 = memref.load %arg4[%c8_289, %c3_290] : memref<15x4xf32, #tpu.memory_space<smem>>
    %560 = vector.broadcast %559 : f32 to vector<8x8xf32>
    %561 = arith.addf %558, %560 : vector<8x8xf32>
    %562 = arith.select %555, %561, %553 : vector<8x8xi1>, vector<8x8xf32>
    %c9_i32_291 = arith.constant 9 : i32
    %563 = vector.broadcast %c9_i32_291 : i32 to vector<8x8xi32>
    %564 = arith.cmpi eq, %0, %563 : vector<8x8xi32>
    %c9_292 = arith.constant 9 : index
    %c3_293 = arith.constant 3 : index
    %565 = memref.load %arg3[%c9_292, %c3_293] : memref<15x4xf32, #tpu.memory_space<smem>>
    %566 = vector.broadcast %565 : f32 to vector<8x8xf32>
    %567 = arith.mulf %481, %566 : vector<8x8xf32>
    %c9_294 = arith.constant 9 : index
    %c3_295 = arith.constant 3 : index
    %568 = memref.load %arg4[%c9_294, %c3_295] : memref<15x4xf32, #tpu.memory_space<smem>>
    %569 = vector.broadcast %568 : f32 to vector<8x8xf32>
    %570 = arith.addf %567, %569 : vector<8x8xf32>
    %571 = arith.select %564, %570, %562 : vector<8x8xi1>, vector<8x8xf32>
    %c10_i32_296 = arith.constant 10 : i32
    %572 = vector.broadcast %c10_i32_296 : i32 to vector<8x8xi32>
    %573 = arith.cmpi eq, %0, %572 : vector<8x8xi32>
    %c10_297 = arith.constant 10 : index
    %c3_298 = arith.constant 3 : index
    %574 = memref.load %arg3[%c10_297, %c3_298] : memref<15x4xf32, #tpu.memory_space<smem>>
    %575 = vector.broadcast %574 : f32 to vector<8x8xf32>
    %576 = arith.mulf %481, %575 : vector<8x8xf32>
    %c10_299 = arith.constant 10 : index
    %c3_300 = arith.constant 3 : index
    %577 = memref.load %arg4[%c10_299, %c3_300] : memref<15x4xf32, #tpu.memory_space<smem>>
    %578 = vector.broadcast %577 : f32 to vector<8x8xf32>
    %579 = arith.addf %576, %578 : vector<8x8xf32>
    %580 = arith.select %573, %579, %571 : vector<8x8xi1>, vector<8x8xf32>
    %c11_i32_301 = arith.constant 11 : i32
    %581 = vector.broadcast %c11_i32_301 : i32 to vector<8x8xi32>
    %582 = arith.cmpi eq, %0, %581 : vector<8x8xi32>
    %c11_302 = arith.constant 11 : index
    %c3_303 = arith.constant 3 : index
    %583 = memref.load %arg3[%c11_302, %c3_303] : memref<15x4xf32, #tpu.memory_space<smem>>
    %584 = vector.broadcast %583 : f32 to vector<8x8xf32>
    %585 = arith.mulf %481, %584 : vector<8x8xf32>
    %c11_304 = arith.constant 11 : index
    %c3_305 = arith.constant 3 : index
    %586 = memref.load %arg4[%c11_304, %c3_305] : memref<15x4xf32, #tpu.memory_space<smem>>
    %587 = vector.broadcast %586 : f32 to vector<8x8xf32>
    %588 = arith.addf %585, %587 : vector<8x8xf32>
    %589 = arith.select %582, %588, %580 : vector<8x8xi1>, vector<8x8xf32>
    %c12_i32_306 = arith.constant 12 : i32
    %590 = vector.broadcast %c12_i32_306 : i32 to vector<8x8xi32>
    %591 = arith.cmpi eq, %0, %590 : vector<8x8xi32>
    %c12_307 = arith.constant 12 : index
    %c3_308 = arith.constant 3 : index
    %592 = memref.load %arg3[%c12_307, %c3_308] : memref<15x4xf32, #tpu.memory_space<smem>>
    %593 = vector.broadcast %592 : f32 to vector<8x8xf32>
    %594 = arith.mulf %481, %593 : vector<8x8xf32>
    %c12_309 = arith.constant 12 : index
    %c3_310 = arith.constant 3 : index
    %595 = memref.load %arg4[%c12_309, %c3_310] : memref<15x4xf32, #tpu.memory_space<smem>>
    %596 = vector.broadcast %595 : f32 to vector<8x8xf32>
    %597 = arith.addf %594, %596 : vector<8x8xf32>
    %598 = arith.select %591, %597, %589 : vector<8x8xi1>, vector<8x8xf32>
    %c13_i32_311 = arith.constant 13 : i32
    %599 = vector.broadcast %c13_i32_311 : i32 to vector<8x8xi32>
    %600 = arith.cmpi eq, %0, %599 : vector<8x8xi32>
    %c13_312 = arith.constant 13 : index
    %c3_313 = arith.constant 3 : index
    %601 = memref.load %arg3[%c13_312, %c3_313] : memref<15x4xf32, #tpu.memory_space<smem>>
    %602 = vector.broadcast %601 : f32 to vector<8x8xf32>
    %603 = arith.mulf %481, %602 : vector<8x8xf32>
    %c13_314 = arith.constant 13 : index
    %c3_315 = arith.constant 3 : index
    %604 = memref.load %arg4[%c13_314, %c3_315] : memref<15x4xf32, #tpu.memory_space<smem>>
    %605 = vector.broadcast %604 : f32 to vector<8x8xf32>
    %606 = arith.addf %603, %605 : vector<8x8xf32>
    %607 = arith.select %600, %606, %598 : vector<8x8xi1>, vector<8x8xf32>
    %c14_i32_316 = arith.constant 14 : i32
    %608 = vector.broadcast %c14_i32_316 : i32 to vector<8x8xi32>
    %609 = arith.cmpi eq, %0, %608 : vector<8x8xi32>
    %c14_317 = arith.constant 14 : index
    %c3_318 = arith.constant 3 : index
    %610 = memref.load %arg3[%c14_317, %c3_318] : memref<15x4xf32, #tpu.memory_space<smem>>
    %611 = vector.broadcast %610 : f32 to vector<8x8xf32>
    %612 = arith.mulf %481, %611 : vector<8x8xf32>
    %c14_319 = arith.constant 14 : index
    %c3_320 = arith.constant 3 : index
    %613 = memref.load %arg4[%c14_319, %c3_320] : memref<15x4xf32, #tpu.memory_space<smem>>
    %614 = vector.broadcast %613 : f32 to vector<8x8xf32>
    %615 = arith.addf %612, %614 : vector<8x8xf32>
    %616 = arith.select %609, %615, %607 : vector<8x8xi1>, vector<8x8xf32>
    %617 = arith.truncf %616 : vector<8x8xf32> to vector<8x8xbf16>
    %c0_321 = arith.constant 0 : index
    %c3_322 = arith.constant 3 : index
    %c0_323 = arith.constant 0 : index
    %c0_324 = arith.constant 0 : index
    %618 = vector.load %arg6[%c0_321, %c3_322, %c0_323, %c0_324] : memref<1x4x8x8xbf16, #tpu.memory_space<vmem>>, vector<1x1x8x8xbf16>
    %619 = vector.shape_cast %618 : vector<1x1x8x8xbf16> to vector<8x8xbf16>
    %620 = vector.shape_cast %617 : vector<8x8xbf16> to vector<1x1x8x8xbf16>
    tpu.vector_store %arg6[%c0_321, %c3_322, %c0_323, %c0_324], %620 {strides = array<i32>} : memref<1x4x8x8xbf16, #tpu.memory_space<vmem>>, vector<1x1x8x8xbf16>,
    %cst_325 = arith.constant dense<0xFF800000> : vector<8xf32>
    %621 = vector.multi_reduction <maximumf>, %616, %cst_325 [1] : vector<8x8xf32> to vector<8xf32>
    %622 = vector.shape_cast %621 : vector<8xf32> to vector<8x1xf32>
    %623 = vector.broadcast %622 : vector<8x1xf32> to vector<8x8xf32>
    %624 = arith.subf %616, %623 : vector<8x8xf32>
    %625 = math.exp %624 : vector<8x8xf32>
    %cst_326 = arith.constant dense<0.000000e+00> : vector<8xf32>
    %626 = vector.multi_reduction <add>, %625, %cst_326 [1] : vector<8x8xf32> to vector<8xf32>
    %627 = vector.shape_cast %626 : vector<8xf32> to vector<8x1xf32>
    %628 = tpu.reciprocal %627 {approx = true} : vector<8x1xf32> -> vector<8x1xf32>
    %629 = vector.broadcast %628 : vector<8x1xf32> to vector<8x8xf32>
    %630 = arith.mulf %625, %629 : vector<8x8xf32>
    %631 = arith.truncf %630 : vector<8x8xf32> to vector<8x8xbf16>
    %cst_327 = arith.constant dense<0.000000e+00> : vector<8x64xf32>
    %632 = tpu.matmul %631, %480, %cst_327 {dimension_numbers = #tpu.dot_dimension_numbers<[1], [0], [0], [1], [0, 0, 1, 1], [], []>} : vector<8x8xbf16>, vector<8x64xbf16>, vector<8x64xf32> -> vector<8x64xf32>
    %633 = tpu.concatenate %158, %316, %474, %632 in 1 : vector<8x64xf32>, vector<8x64xf32>, vector<8x64xf32>, vector<8x64xf32> -> vector<8x256xf32>
    %634 = arith.truncf %633 : vector<8x256xf32> to vector<8x256xbf16>
    %c0_328 = arith.constant 0 : index
    %c0_329 = arith.constant 0 : index
    %c0_330 = arith.constant 0 : index
    %635 = vector.load %arg5[%c0_328, %c0_329, %c0_330] : memref<1x8x256xbf16, #tpu.memory_space<vmem>>, vector<1x8x256xbf16>
    %636 = vector.shape_cast %635 : vector<1x8x256xbf16> to vector<8x256xbf16>
    %637 = vector.shape_cast %634 : vector<8x256xbf16> to vector<1x8x256xbf16>
    tpu.vector_store %arg5[%c0_328, %c0_329, %c0_330], %637 {strides = array<i32>} : memref<1x8x256xbf16, #tpu.memory_space<vmem>>, vector<1x8x256xbf16>,
    return
  }
  func.func @transform_0(%arg0: i32) -> (i32, i32, i32) {
    %c0_i32 = arith.constant 0 : i32
    %c0_i32_0 = arith.constant 0 : i32
    %c0_i32_1 = arith.constant 0 : i32
    return %arg0, %c0_i32, %c0_i32_0 : i32, i32, i32
  }
  func.func @transform_1(%arg0: i32) -> (i32, i32) {
    %c0_i32 = arith.constant 0 : i32
    %c0_i32_0 = arith.constant 0 : i32
    %c0_i32_1 = arith.constant 0 : i32
    return %c0_i32, %c0_i32_0 : i32, i32
  }
  func.func @transform_2(%arg0: i32) -> (i32, i32) {
    %c0_i32 = arith.constant 0 : i32
    %c0_i32_0 = arith.constant 0 : i32
    %c0_i32_1 = arith.constant 0 : i32
    return %c0_i32, %c0_i32_0 : i32, i32
  }
  func.func @transform_3(%arg0: i32) -> (i32, i32) {
    %c0_i32 = arith.constant 0 : i32
    %c0_i32_0 = arith.constant 0 : i32
    %c0_i32_1 = arith.constant 0 : i32
    return %c0_i32, %c0_i32_0 : i32, i32
  }
  func.func @transform_4(%arg0: i32) -> (i32, i32, i32) {
    %c0_i32 = arith.constant 0 : i32
    %c0_i32_0 = arith.constant 0 : i32
    %c0_i32_1 = arith.constant 0 : i32
    return %arg0, %c0_i32, %c0_i32_0 : i32, i32, i32
  }
  func.func @transform_5(%arg0: i32) -> (i32, i32, i32, i32) {
    %c0_i32 = arith.constant 0 : i32
    %c0_i32_0 = arith.constant 0 : i32
    %c0_i32_1 = arith.constant 0 : i32
    %c0_i32_2 = arith.constant 0 : i32
    return %arg0, %c0_i32, %c0_i32_0, %c0_i32_1 : i32, i32, i32, i32
  }
}

module attributes {stable_mosaic.version = 11 : i64} {
  func.func @_ffn_kernel(%arg0: i32, %arg1: memref<16x64xbf16, #tpu.memory_space<vmem>>, %arg2: memref<16x256xbf16, #tpu.memory_space<vmem>>, %arg3: memref<256x64xbf16, #tpu.memory_space<vmem>>, %arg4: memref<1x64xf32, #tpu.memory_space<vmem>>, %arg5: memref<1x64xf32, #tpu.memory_space<vmem>>, %arg6: memref<1x64xf32, #tpu.memory_space<vmem>>, %arg7: memref<64x256xbf16, #tpu.memory_space<vmem>>, %arg8: memref<1x256xf32, #tpu.memory_space<vmem>>, %arg9: memref<256x64xbf16, #tpu.memory_space<vmem>>, %arg10: memref<1x64xf32, #tpu.memory_space<vmem>>, %arg11: memref<1x64xf32, #tpu.memory_space<vmem>>, %arg12: memref<1x64xf32, #tpu.memory_space<vmem>>, %arg13: memref<16x64xbf16, #tpu.memory_space<vmem>>) attributes {dimension_semantics = [#tpu.dimension_semantics<parallel>], iteration_bounds = array<i64: 1>, scalar_prefetch = 0 : i64, scratch_operands = 0 : i64, tpu.core_type = #tpu.core_type<tc>, window_params = [{transform_indices = @transform_0, window_bounds = array<i64: 16, 64>}, {transform_indices = @transform_1, window_bounds = array<i64: 16, 256>}, {pipeline_mode = #tpu.pipeline_mode<synchronous>, transform_indices = @transform_2, window_bounds = array<i64: 256, 64>}, {pipeline_mode = #tpu.pipeline_mode<synchronous>, transform_indices = @transform_3, window_bounds = array<i64: 1, 64>}, {pipeline_mode = #tpu.pipeline_mode<synchronous>, transform_indices = @transform_4, window_bounds = array<i64: 1, 64>}, {pipeline_mode = #tpu.pipeline_mode<synchronous>, transform_indices = @transform_5, window_bounds = array<i64: 1, 64>}, {pipeline_mode = #tpu.pipeline_mode<synchronous>, transform_indices = @transform_6, window_bounds = array<i64: 64, 256>}, {pipeline_mode = #tpu.pipeline_mode<synchronous>, transform_indices = @transform_7, window_bounds = array<i64: 1, 256>}, {pipeline_mode = #tpu.pipeline_mode<synchronous>, transform_indices = @transform_8, window_bounds = array<i64: 256, 64>}, {pipeline_mode = #tpu.pipeline_mode<synchronous>, transform_indices = @transform_9, window_bounds = array<i64: 1, 64>}, {pipeline_mode = #tpu.pipeline_mode<synchronous>, transform_indices = @transform_10, window_bounds = array<i64: 1, 64>}, {pipeline_mode = #tpu.pipeline_mode<synchronous>, transform_indices = @transform_11, window_bounds = array<i64: 1, 64>}, {transform_indices = @transform_12, window_bounds = array<i64: 16, 64>}]} {
    %c0 = arith.constant 0 : index
    %c0_0 = arith.constant 0 : index
    %0 = vector.load %arg2[%c0, %c0_0] : memref<16x256xbf16, #tpu.memory_space<vmem>>, vector<16x256xbf16>
    %c0_1 = arith.constant 0 : index
    %c0_2 = arith.constant 0 : index
    %1 = vector.load %arg3[%c0_1, %c0_2] : memref<256x64xbf16, #tpu.memory_space<vmem>>, vector<256x64xbf16>
    %cst = arith.constant dense<0.000000e+00> : vector<16x64xf32>
    %2 = tpu.matmul %0, %1, %cst {dimension_numbers = #tpu.dot_dimension_numbers<[1], [0], [0], [1], [0, 0, 1, 1], [], []>} : vector<16x256xbf16>, vector<256x64xbf16>, vector<16x64xf32> -> vector<16x64xf32>
    %c0_3 = arith.constant 0 : index
    %c0_4 = arith.constant 0 : index
    %3 = vector.load %arg4[%c0_3, %c0_4] : memref<1x64xf32, #tpu.memory_space<vmem>>, vector<1x64xf32>
    %4 = vector.broadcast %3 : vector<1x64xf32> to vector<16x64xf32>
    %5 = arith.addf %2, %4 : vector<16x64xf32>
    %c0_5 = arith.constant 0 : index
    %c0_6 = arith.constant 0 : index
    %6 = vector.load %arg1[%c0_5, %c0_6] : memref<16x64xbf16, #tpu.memory_space<vmem>>, vector<16x64xbf16>
    %7 = arith.extf %6 : vector<16x64xbf16> to vector<16x64xf32>
    %8 = arith.addf %7, %5 : vector<16x64xf32>
    %c0_7 = arith.constant 0 : index
    %c0_8 = arith.constant 0 : index
    %9 = vector.load %arg5[%c0_7, %c0_8] : memref<1x64xf32, #tpu.memory_space<vmem>>, vector<1x64xf32>
    %c0_9 = arith.constant 0 : index
    %c0_10 = arith.constant 0 : index
    %10 = vector.load %arg6[%c0_9, %c0_10] : memref<1x64xf32, #tpu.memory_space<vmem>>, vector<1x64xf32>
    %cst_11 = arith.constant dense<0.000000e+00> : vector<16xf32>
    %11 = vector.multi_reduction <add>, %8, %cst_11 [1] : vector<16x64xf32> to vector<16xf32>
    %12 = vector.shape_cast %11 : vector<16xf32> to vector<16x1xf32>
    %cst_12 = arith.constant 6.400000e+01 : f32
    %13 = vector.broadcast %cst_12 : f32 to vector<16x1xf32>
    %14 = arith.divf %12, %13 : vector<16x1xf32>
    %15 = vector.broadcast %14 : vector<16x1xf32> to vector<16x64xf32>
    %16 = arith.subf %8, %15 : vector<16x64xf32>
    %17 = arith.mulf %16, %16 : vector<16x64xf32>
    %cst_13 = arith.constant dense<0.000000e+00> : vector<16xf32>
    %18 = vector.multi_reduction <add>, %17, %cst_13 [1] : vector<16x64xf32> to vector<16xf32>
    %19 = vector.shape_cast %18 : vector<16xf32> to vector<16x1xf32>
    %cst_14 = arith.constant 6.400000e+01 : f32
    %20 = vector.broadcast %cst_14 : f32 to vector<16x1xf32>
    %21 = arith.divf %19, %20 : vector<16x1xf32>
    %22 = vector.broadcast %14 : vector<16x1xf32> to vector<16x64xf32>
    %23 = arith.subf %8, %22 : vector<16x64xf32>
    %cst_15 = arith.constant 9.99999974E-6 : f32
    %24 = vector.broadcast %cst_15 : f32 to vector<16x1xf32>
    %25 = arith.addf %21, %24 : vector<16x1xf32>
    %26 = math.rsqrt %25 : vector<16x1xf32>
    %27 = vector.broadcast %26 : vector<16x1xf32> to vector<16x64xf32>
    %28 = arith.mulf %23, %27 : vector<16x64xf32>
    %29 = vector.broadcast %9 : vector<1x64xf32> to vector<16x64xf32>
    %30 = arith.mulf %28, %29 : vector<16x64xf32>
    %31 = vector.broadcast %10 : vector<1x64xf32> to vector<16x64xf32>
    %32 = arith.addf %30, %31 : vector<16x64xf32>
    %33 = arith.truncf %32 : vector<16x64xf32> to vector<16x64xbf16>
    %c0_16 = arith.constant 0 : index
    %c0_17 = arith.constant 0 : index
    %34 = vector.load %arg7[%c0_16, %c0_17] : memref<64x256xbf16, #tpu.memory_space<vmem>>, vector<64x256xbf16>
    %cst_18 = arith.constant dense<0.000000e+00> : vector<16x256xf32>
    %35 = tpu.matmul %33, %34, %cst_18 {dimension_numbers = #tpu.dot_dimension_numbers<[1], [0], [0], [1], [0, 0, 1, 1], [], []>} : vector<16x64xbf16>, vector<64x256xbf16>, vector<16x256xf32> -> vector<16x256xf32>
    %c0_19 = arith.constant 0 : index
    %c0_20 = arith.constant 0 : index
    %36 = vector.load %arg8[%c0_19, %c0_20] : memref<1x256xf32, #tpu.memory_space<vmem>>, vector<1x256xf32>
    %37 = vector.broadcast %36 : vector<1x256xf32> to vector<16x256xf32>
    %38 = arith.addf %35, %37 : vector<16x256xf32>
    %cst_21 = arith.constant 0.000000e+00 : f32
    %39 = vector.broadcast %cst_21 : f32 to vector<16x256xf32>
    %40 = arith.maximumf %38, %39 : vector<16x256xf32>
    %41 = arith.truncf %40 : vector<16x256xf32> to vector<16x256xbf16>
    %c0_22 = arith.constant 0 : index
    %c0_23 = arith.constant 0 : index
    %42 = vector.load %arg9[%c0_22, %c0_23] : memref<256x64xbf16, #tpu.memory_space<vmem>>, vector<256x64xbf16>
    %cst_24 = arith.constant dense<0.000000e+00> : vector<16x64xf32>
    %43 = tpu.matmul %41, %42, %cst_24 {dimension_numbers = #tpu.dot_dimension_numbers<[1], [0], [0], [1], [0, 0, 1, 1], [], []>} : vector<16x256xbf16>, vector<256x64xbf16>, vector<16x64xf32> -> vector<16x64xf32>
    %c0_25 = arith.constant 0 : index
    %c0_26 = arith.constant 0 : index
    %44 = vector.load %arg10[%c0_25, %c0_26] : memref<1x64xf32, #tpu.memory_space<vmem>>, vector<1x64xf32>
    %45 = vector.broadcast %44 : vector<1x64xf32> to vector<16x64xf32>
    %46 = arith.addf %43, %45 : vector<16x64xf32>
    %47 = arith.addf %32, %46 : vector<16x64xf32>
    %c0_27 = arith.constant 0 : index
    %c0_28 = arith.constant 0 : index
    %48 = vector.load %arg11[%c0_27, %c0_28] : memref<1x64xf32, #tpu.memory_space<vmem>>, vector<1x64xf32>
    %c0_29 = arith.constant 0 : index
    %c0_30 = arith.constant 0 : index
    %49 = vector.load %arg12[%c0_29, %c0_30] : memref<1x64xf32, #tpu.memory_space<vmem>>, vector<1x64xf32>
    %cst_31 = arith.constant dense<0.000000e+00> : vector<16xf32>
    %50 = vector.multi_reduction <add>, %47, %cst_31 [1] : vector<16x64xf32> to vector<16xf32>
    %51 = vector.shape_cast %50 : vector<16xf32> to vector<16x1xf32>
    %cst_32 = arith.constant 6.400000e+01 : f32
    %52 = vector.broadcast %cst_32 : f32 to vector<16x1xf32>
    %53 = arith.divf %51, %52 : vector<16x1xf32>
    %54 = vector.broadcast %53 : vector<16x1xf32> to vector<16x64xf32>
    %55 = arith.subf %47, %54 : vector<16x64xf32>
    %56 = arith.mulf %55, %55 : vector<16x64xf32>
    %cst_33 = arith.constant dense<0.000000e+00> : vector<16xf32>
    %57 = vector.multi_reduction <add>, %56, %cst_33 [1] : vector<16x64xf32> to vector<16xf32>
    %58 = vector.shape_cast %57 : vector<16xf32> to vector<16x1xf32>
    %cst_34 = arith.constant 6.400000e+01 : f32
    %59 = vector.broadcast %cst_34 : f32 to vector<16x1xf32>
    %60 = arith.divf %58, %59 : vector<16x1xf32>
    %61 = vector.broadcast %53 : vector<16x1xf32> to vector<16x64xf32>
    %62 = arith.subf %47, %61 : vector<16x64xf32>
    %cst_35 = arith.constant 9.99999974E-6 : f32
    %63 = vector.broadcast %cst_35 : f32 to vector<16x1xf32>
    %64 = arith.addf %60, %63 : vector<16x1xf32>
    %65 = math.rsqrt %64 : vector<16x1xf32>
    %66 = vector.broadcast %65 : vector<16x1xf32> to vector<16x64xf32>
    %67 = arith.mulf %62, %66 : vector<16x64xf32>
    %68 = vector.broadcast %48 : vector<1x64xf32> to vector<16x64xf32>
    %69 = arith.mulf %67, %68 : vector<16x64xf32>
    %70 = vector.broadcast %49 : vector<1x64xf32> to vector<16x64xf32>
    %71 = arith.addf %69, %70 : vector<16x64xf32>
    %72 = arith.truncf %71 : vector<16x64xf32> to vector<16x64xbf16>
    %c0_36 = arith.constant 0 : index
    %c0_37 = arith.constant 0 : index
    %73 = vector.load %arg13[%c0_36, %c0_37] : memref<16x64xbf16, #tpu.memory_space<vmem>>, vector<16x64xbf16>
    tpu.vector_store %arg13[%c0_36, %c0_37], %72 {strides = array<i32>} : memref<16x64xbf16, #tpu.memory_space<vmem>>, vector<16x64xbf16>,
    return
  }
  func.func @transform_0(%arg0: i32) -> (i32, i32) {
    %c0_i32 = arith.constant 0 : i32
    %c0_i32_0 = arith.constant 0 : i32
    return %arg0, %c0_i32 : i32, i32
  }
  func.func @transform_1(%arg0: i32) -> (i32, i32) {
    %c0_i32 = arith.constant 0 : i32
    %c0_i32_0 = arith.constant 0 : i32
    return %arg0, %c0_i32 : i32, i32
  }
  func.func @transform_2(%arg0: i32) -> (i32, i32) {
    %c0_i32 = arith.constant 0 : i32
    %c0_i32_0 = arith.constant 0 : i32
    %c0_i32_1 = arith.constant 0 : i32
    return %c0_i32, %c0_i32_0 : i32, i32
  }
  func.func @transform_3(%arg0: i32) -> (i32, i32) {
    %c0_i32 = arith.constant 0 : i32
    %c0_i32_0 = arith.constant 0 : i32
    %c0_i32_1 = arith.constant 0 : i32
    return %c0_i32, %c0_i32_0 : i32, i32
  }
  func.func @transform_4(%arg0: i32) -> (i32, i32) {
    %c0_i32 = arith.constant 0 : i32
    %c0_i32_0 = arith.constant 0 : i32
    %c0_i32_1 = arith.constant 0 : i32
    return %c0_i32, %c0_i32_0 : i32, i32
  }
  func.func @transform_5(%arg0: i32) -> (i32, i32) {
    %c0_i32 = arith.constant 0 : i32
    %c0_i32_0 = arith.constant 0 : i32
    %c0_i32_1 = arith.constant 0 : i32
    return %c0_i32, %c0_i32_0 : i32, i32
  }
  func.func @transform_6(%arg0: i32) -> (i32, i32) {
    %c0_i32 = arith.constant 0 : i32
    %c0_i32_0 = arith.constant 0 : i32
    %c0_i32_1 = arith.constant 0 : i32
    return %c0_i32, %c0_i32_0 : i32, i32
  }
  func.func @transform_7(%arg0: i32) -> (i32, i32) {
    %c0_i32 = arith.constant 0 : i32
    %c0_i32_0 = arith.constant 0 : i32
    %c0_i32_1 = arith.constant 0 : i32
    return %c0_i32, %c0_i32_0 : i32, i32
  }
  func.func @transform_8(%arg0: i32) -> (i32, i32) {
    %c0_i32 = arith.constant 0 : i32
    %c0_i32_0 = arith.constant 0 : i32
    %c0_i32_1 = arith.constant 0 : i32
    return %c0_i32, %c0_i32_0 : i32, i32
  }
  func.func @transform_9(%arg0: i32) -> (i32, i32) {
    %c0_i32 = arith.constant 0 : i32
    %c0_i32_0 = arith.constant 0 : i32
    %c0_i32_1 = arith.constant 0 : i32
    return %c0_i32, %c0_i32_0 : i32, i32
  }
  func.func @transform_10(%arg0: i32) -> (i32, i32) {
    %c0_i32 = arith.constant 0 : i32
    %c0_i32_0 = arith.constant 0 : i32
    %c0_i32_1 = arith.constant 0 : i32
    return %c0_i32, %c0_i32_0 : i32, i32
  }
  func.func @transform_11(%arg0: i32) -> (i32, i32) {
    %c0_i32 = arith.constant 0 : i32
    %c0_i32_0 = arith.constant 0 : i32
    %c0_i32_1 = arith.constant 0 : i32
    return %c0_i32, %c0_i32_0 : i32, i32
  }
  func.func @transform_12(%arg0: i32) -> (i32, i32) {
    %c0_i32 = arith.constant 0 : i32
    %c0_i32_0 = arith.constant 0 : i32
    return %arg0, %c0_i32 : i32, i32
  }
}

module attributes {stable_mosaic.version = 11 : i64} {
  func.func @_matmul_kernel(%arg0: i32, %arg1: i32, %arg2: i32, %arg3: memref<16x64xbf16, #tpu.memory_space<vmem>>, %arg4: memref<64x256xbf16, #tpu.memory_space<vmem>>, %arg5: memref<1x256xf32, #tpu.memory_space<vmem>>, %arg6: memref<16x256xbf16, #tpu.memory_space<vmem>>, %arg7: memref<16x256xf32, #tpu.memory_space<vmem>>) attributes {dimension_semantics = [#tpu.dimension_semantics<parallel>, #tpu.dimension_semantics<parallel>, #tpu.dimension_semantics<arbitrary>], iteration_bounds = array<i64: 1, 3, 1>, scalar_prefetch = 0 : i64, scratch_operands = 1 : i64, tpu.core_type = #tpu.core_type<tc>, window_params = [{transform_indices = @transform_0, window_bounds = array<i64: 16, 64>}, {transform_indices = @transform_1, window_bounds = array<i64: 64, 256>}, {transform_indices = @transform_2, window_bounds = array<i64: 1, 256>}, {transform_indices = @transform_3, window_bounds = array<i64: 16, 256>}]} {
    %c0_i32 = arith.constant 0 : i32
    %0 = arith.cmpi eq, %arg2, %c0_i32 : i32
    %1 = arith.extui %0 : i1 to i32
    %c0_i32_0 = arith.constant 0 : i32
    %2 = arith.cmpi ne, %1, %c0_i32_0 : i32
    scf.if %2 {
      %cst_10 = arith.constant 0.000000e+00 : f32
      %12 = vector.broadcast %cst_10 : f32 to vector<16x256xf32>
      %c0_11 = arith.constant 0 : index
      %c0_12 = arith.constant 0 : index
      %13 = vector.load %arg7[%c0_11, %c0_12] : memref<16x256xf32, #tpu.memory_space<vmem>>, vector<16x256xf32>
      tpu.vector_store %arg7[%c0_11, %c0_12], %12 {strides = array<i32>} : memref<16x256xf32, #tpu.memory_space<vmem>>, vector<16x256xf32>,
    } else {
    }
    %c0 = arith.constant 0 : index
    %c0_1 = arith.constant 0 : index
    %3 = vector.load %arg7[%c0, %c0_1] : memref<16x256xf32, #tpu.memory_space<vmem>>, vector<16x256xf32>
    %c0_2 = arith.constant 0 : index
    %c0_3 = arith.constant 0 : index
    %4 = vector.load %arg3[%c0_2, %c0_3] : memref<16x64xbf16, #tpu.memory_space<vmem>>, vector<16x64xbf16>
    %c0_4 = arith.constant 0 : index
    %c0_5 = arith.constant 0 : index
    %5 = vector.load %arg4[%c0_4, %c0_5] : memref<64x256xbf16, #tpu.memory_space<vmem>>, vector<64x256xbf16>
    %cst = arith.constant dense<0.000000e+00> : vector<16x256xf32>
    %6 = tpu.matmul %4, %5, %cst {dimension_numbers = #tpu.dot_dimension_numbers<[1], [0], [0], [1], [0, 0, 1, 1], [], []>} : vector<16x64xbf16>, vector<64x256xbf16>, vector<16x256xf32> -> vector<16x256xf32>
    %7 = arith.addf %3, %6 : vector<16x256xf32>
    %c0_6 = arith.constant 0 : index
    %c0_7 = arith.constant 0 : index
    %8 = vector.load %arg7[%c0_6, %c0_7] : memref<16x256xf32, #tpu.memory_space<vmem>>, vector<16x256xf32>
    tpu.vector_store %arg7[%c0_6, %c0_7], %7 {strides = array<i32>} : memref<16x256xf32, #tpu.memory_space<vmem>>, vector<16x256xf32>,
    %c0_i32_8 = arith.constant 0 : i32
    %9 = arith.cmpi eq, %arg2, %c0_i32_8 : i32
    %10 = arith.extui %9 : i1 to i32
    %c0_i32_9 = arith.constant 0 : i32
    %11 = arith.cmpi ne, %10, %c0_i32_9 : i32
    scf.if %11 {
      %c0_10 = arith.constant 0 : index
      %c0_11 = arith.constant 0 : index
      %12 = vector.load %arg7[%c0_10, %c0_11] : memref<16x256xf32, #tpu.memory_space<vmem>>, vector<16x256xf32>
      %c0_12 = arith.constant 0 : index
      %c0_13 = arith.constant 0 : index
      %13 = vector.load %arg5[%c0_12, %c0_13] : memref<1x256xf32, #tpu.memory_space<vmem>>, vector<1x256xf32>
      %14 = vector.broadcast %13 : vector<1x256xf32> to vector<16x256xf32>
      %15 = arith.addf %12, %14 : vector<16x256xf32>
      %16 = arith.truncf %15 : vector<16x256xf32> to vector<16x256xbf16>
      %c0_14 = arith.constant 0 : index
      %c0_15 = arith.constant 0 : index
      %17 = vector.load %arg6[%c0_14, %c0_15] : memref<16x256xbf16, #tpu.memory_space<vmem>>, vector<16x256xbf16>
      tpu.vector_store %arg6[%c0_14, %c0_15], %16 {strides = array<i32>} : memref<16x256xbf16, #tpu.memory_space<vmem>>, vector<16x256xbf16>,
    } else {
    }
    return
  }
  func.func @transform_0(%arg0: i32, %arg1: i32, %arg2: i32) -> (i32, i32) {
    %c0_i32 = arith.constant 0 : i32
    return %arg0, %arg2 : i32, i32
  }
  func.func @transform_1(%arg0: i32, %arg1: i32, %arg2: i32) -> (i32, i32) {
    %c0_i32 = arith.constant 0 : i32
    return %arg2, %arg1 : i32, i32
  }
  func.func @transform_2(%arg0: i32, %arg1: i32, %arg2: i32) -> (i32, i32) {
    %c0_i32 = arith.constant 0 : i32
    %c0_i32_0 = arith.constant 0 : i32
    return %c0_i32, %arg1 : i32, i32
  }
  func.func @transform_3(%arg0: i32, %arg1: i32, %arg2: i32) -> (i32, i32) {
    %c0_i32 = arith.constant 0 : i32
    return %arg0, %arg1 : i32, i32
  }
}

module attributes {stable_mosaic.version = 11 : i64} {
  func.func @_attn_kernel(%arg0: i32, %arg1: memref<1x8x768xbf16, #tpu.memory_space<vmem>>, %arg2: memref<8x8xi32, #tpu.memory_space<vmem>>, %arg3: memref<15x4xf32, #tpu.memory_space<smem>>, %arg4: memref<15x4xf32, #tpu.memory_space<smem>>, %arg5: memref<1x4x8x8xbf16, #tpu.memory_space<vmem>>, %arg6: memref<1x8x256xbf16, #tpu.memory_space<vmem>>, %arg7: memref<1x4x8x8xbf16, #tpu.memory_space<vmem>>) attributes {dimension_semantics = [#tpu.dimension_semantics<parallel>], iteration_bounds = array<i64: 2>, scalar_prefetch = 0 : i64, scratch_operands = 0 : i64, tpu.core_type = #tpu.core_type<tc>, window_params = [{transform_indices = @transform_0, window_bounds = array<i64: 1, 8, 768>}, {pipeline_mode = #tpu.pipeline_mode<synchronous>, transform_indices = @transform_1, window_bounds = array<i64: 8, 8>}, {transform_indices = @transform_2, window_bounds = array<i64: 15, 4>}, {transform_indices = @transform_3, window_bounds = array<i64: 15, 4>}, {transform_indices = @transform_4, window_bounds = array<i64: 1, 4, 8, 8>}, {transform_indices = @transform_5, window_bounds = array<i64: 1, 8, 256>}, {transform_indices = @transform_6, window_bounds = array<i64: 1, 4, 8, 8>}]} {
    %c0 = arith.constant 0 : index
    %c0_0 = arith.constant 0 : index
    %0 = vector.load %arg2[%c0, %c0_0] : memref<8x8xi32, #tpu.memory_space<vmem>>, vector<8x8xi32>
    %c0_1 = arith.constant 0 : index
    %c0_2 = arith.constant 0 : index
    %c0_3 = arith.constant 0 : index
    %1 = vector.load %arg1[%c0_1, %c0_2, %c0_3] : memref<1x8x768xbf16, #tpu.memory_space<vmem>>, vector<1x8x64xbf16>
    %2 = vector.shape_cast %1 : vector<1x8x64xbf16> to vector<8x64xbf16>
    %c0_4 = arith.constant 0 : index
    %c0_5 = arith.constant 0 : index
    %c256 = arith.constant 256 : index
    %3 = vector.load %arg1[%c0_4, %c0_5, %c256] : memref<1x8x768xbf16, #tpu.memory_space<vmem>>, vector<1x8x64xbf16>
    %4 = vector.shape_cast %3 : vector<1x8x64xbf16> to vector<8x64xbf16>
    %c0_6 = arith.constant 0 : index
    %c0_7 = arith.constant 0 : index
    %c512 = arith.constant 512 : index
    %5 = vector.load %arg1[%c0_6, %c0_7, %c512] : memref<1x8x768xbf16, #tpu.memory_space<vmem>>, vector<1x8x64xbf16>
    %6 = vector.shape_cast %5 : vector<1x8x64xbf16> to vector<8x64xbf16>
    %cst = arith.constant dense<0.000000e+00> : vector<8x8xf32>
    %7 = tpu.matmul %2, %4, %cst {dimension_numbers = #tpu.dot_dimension_numbers<[1], [1], [0], [0], [0, 0, 1, 0], [], []>} : vector<8x64xbf16>, vector<8x64xbf16>, vector<8x8xf32> -> vector<8x8xf32>
    %c0_i32 = arith.constant 0 : i32
    %8 = vector.broadcast %c0_i32 : i32 to vector<8x8xi32>
    %9 = arith.cmpi eq, %0, %8 : vector<8x8xi32>
    %c0_8 = arith.constant 0 : index
    %c0_9 = arith.constant 0 : index
    %10 = memref.load %arg3[%c0_8, %c0_9] : memref<15x4xf32, #tpu.memory_space<smem>>
    %11 = vector.broadcast %10 : f32 to vector<8x8xf32>
    %12 = arith.mulf %7, %11 : vector<8x8xf32>
    %c0_10 = arith.constant 0 : index
    %c0_11 = arith.constant 0 : index
    %13 = memref.load %arg4[%c0_10, %c0_11] : memref<15x4xf32, #tpu.memory_space<smem>>
    %14 = vector.broadcast %13 : f32 to vector<8x8xf32>
    %15 = arith.addf %12, %14 : vector<8x8xf32>
    %16 = arith.select %9, %15, %7 : vector<8x8xi1>, vector<8x8xf32>
    %c1_i32 = arith.constant 1 : i32
    %17 = vector.broadcast %c1_i32 : i32 to vector<8x8xi32>
    %18 = arith.cmpi eq, %0, %17 : vector<8x8xi32>
    %c1 = arith.constant 1 : index
    %c0_12 = arith.constant 0 : index
    %19 = memref.load %arg3[%c1, %c0_12] : memref<15x4xf32, #tpu.memory_space<smem>>
    %20 = vector.broadcast %19 : f32 to vector<8x8xf32>
    %21 = arith.mulf %7, %20 : vector<8x8xf32>
    %c1_13 = arith.constant 1 : index
    %c0_14 = arith.constant 0 : index
    %22 = memref.load %arg4[%c1_13, %c0_14] : memref<15x4xf32, #tpu.memory_space<smem>>
    %23 = vector.broadcast %22 : f32 to vector<8x8xf32>
    %24 = arith.addf %21, %23 : vector<8x8xf32>
    %25 = arith.select %18, %24, %16 : vector<8x8xi1>, vector<8x8xf32>
    %c2_i32 = arith.constant 2 : i32
    %26 = vector.broadcast %c2_i32 : i32 to vector<8x8xi32>
    %27 = arith.cmpi eq, %0, %26 : vector<8x8xi32>
    %c2 = arith.constant 2 : index
    %c0_15 = arith.constant 0 : index
    %28 = memref.load %arg3[%c2, %c0_15] : memref<15x4xf32, #tpu.memory_space<smem>>
    %29 = vector.broadcast %28 : f32 to vector<8x8xf32>
    %30 = arith.mulf %7, %29 : vector<8x8xf32>
    %c2_16 = arith.constant 2 : index
    %c0_17 = arith.constant 0 : index
    %31 = memref.load %arg4[%c2_16, %c0_17] : memref<15x4xf32, #tpu.memory_space<smem>>
    %32 = vector.broadcast %31 : f32 to vector<8x8xf32>
    %33 = arith.addf %30, %32 : vector<8x8xf32>
    %34 = arith.select %27, %33, %25 : vector<8x8xi1>, vector<8x8xf32>
    %c3_i32 = arith.constant 3 : i32
    %35 = vector.broadcast %c3_i32 : i32 to vector<8x8xi32>
    %36 = arith.cmpi eq, %0, %35 : vector<8x8xi32>
    %c3 = arith.constant 3 : index
    %c0_18 = arith.constant 0 : index
    %37 = memref.load %arg3[%c3, %c0_18] : memref<15x4xf32, #tpu.memory_space<smem>>
    %38 = vector.broadcast %37 : f32 to vector<8x8xf32>
    %39 = arith.mulf %7, %38 : vector<8x8xf32>
    %c3_19 = arith.constant 3 : index
    %c0_20 = arith.constant 0 : index
    %40 = memref.load %arg4[%c3_19, %c0_20] : memref<15x4xf32, #tpu.memory_space<smem>>
    %41 = vector.broadcast %40 : f32 to vector<8x8xf32>
    %42 = arith.addf %39, %41 : vector<8x8xf32>
    %43 = arith.select %36, %42, %34 : vector<8x8xi1>, vector<8x8xf32>
    %c4_i32 = arith.constant 4 : i32
    %44 = vector.broadcast %c4_i32 : i32 to vector<8x8xi32>
    %45 = arith.cmpi eq, %0, %44 : vector<8x8xi32>
    %c4 = arith.constant 4 : index
    %c0_21 = arith.constant 0 : index
    %46 = memref.load %arg3[%c4, %c0_21] : memref<15x4xf32, #tpu.memory_space<smem>>
    %47 = vector.broadcast %46 : f32 to vector<8x8xf32>
    %48 = arith.mulf %7, %47 : vector<8x8xf32>
    %c4_22 = arith.constant 4 : index
    %c0_23 = arith.constant 0 : index
    %49 = memref.load %arg4[%c4_22, %c0_23] : memref<15x4xf32, #tpu.memory_space<smem>>
    %50 = vector.broadcast %49 : f32 to vector<8x8xf32>
    %51 = arith.addf %48, %50 : vector<8x8xf32>
    %52 = arith.select %45, %51, %43 : vector<8x8xi1>, vector<8x8xf32>
    %c5_i32 = arith.constant 5 : i32
    %53 = vector.broadcast %c5_i32 : i32 to vector<8x8xi32>
    %54 = arith.cmpi eq, %0, %53 : vector<8x8xi32>
    %c5 = arith.constant 5 : index
    %c0_24 = arith.constant 0 : index
    %55 = memref.load %arg3[%c5, %c0_24] : memref<15x4xf32, #tpu.memory_space<smem>>
    %56 = vector.broadcast %55 : f32 to vector<8x8xf32>
    %57 = arith.mulf %7, %56 : vector<8x8xf32>
    %c5_25 = arith.constant 5 : index
    %c0_26 = arith.constant 0 : index
    %58 = memref.load %arg4[%c5_25, %c0_26] : memref<15x4xf32, #tpu.memory_space<smem>>
    %59 = vector.broadcast %58 : f32 to vector<8x8xf32>
    %60 = arith.addf %57, %59 : vector<8x8xf32>
    %61 = arith.select %54, %60, %52 : vector<8x8xi1>, vector<8x8xf32>
    %c6_i32 = arith.constant 6 : i32
    %62 = vector.broadcast %c6_i32 : i32 to vector<8x8xi32>
    %63 = arith.cmpi eq, %0, %62 : vector<8x8xi32>
    %c6 = arith.constant 6 : index
    %c0_27 = arith.constant 0 : index
    %64 = memref.load %arg3[%c6, %c0_27] : memref<15x4xf32, #tpu.memory_space<smem>>
    %65 = vector.broadcast %64 : f32 to vector<8x8xf32>
    %66 = arith.mulf %7, %65 : vector<8x8xf32>
    %c6_28 = arith.constant 6 : index
    %c0_29 = arith.constant 0 : index
    %67 = memref.load %arg4[%c6_28, %c0_29] : memref<15x4xf32, #tpu.memory_space<smem>>
    %68 = vector.broadcast %67 : f32 to vector<8x8xf32>
    %69 = arith.addf %66, %68 : vector<8x8xf32>
    %70 = arith.select %63, %69, %61 : vector<8x8xi1>, vector<8x8xf32>
    %c7_i32 = arith.constant 7 : i32
    %71 = vector.broadcast %c7_i32 : i32 to vector<8x8xi32>
    %72 = arith.cmpi eq, %0, %71 : vector<8x8xi32>
    %c7 = arith.constant 7 : index
    %c0_30 = arith.constant 0 : index
    %73 = memref.load %arg3[%c7, %c0_30] : memref<15x4xf32, #tpu.memory_space<smem>>
    %74 = vector.broadcast %73 : f32 to vector<8x8xf32>
    %75 = arith.mulf %7, %74 : vector<8x8xf32>
    %c7_31 = arith.constant 7 : index
    %c0_32 = arith.constant 0 : index
    %76 = memref.load %arg4[%c7_31, %c0_32] : memref<15x4xf32, #tpu.memory_space<smem>>
    %77 = vector.broadcast %76 : f32 to vector<8x8xf32>
    %78 = arith.addf %75, %77 : vector<8x8xf32>
    %79 = arith.select %72, %78, %70 : vector<8x8xi1>, vector<8x8xf32>
    %c8_i32 = arith.constant 8 : i32
    %80 = vector.broadcast %c8_i32 : i32 to vector<8x8xi32>
    %81 = arith.cmpi eq, %0, %80 : vector<8x8xi32>
    %c8 = arith.constant 8 : index
    %c0_33 = arith.constant 0 : index
    %82 = memref.load %arg3[%c8, %c0_33] : memref<15x4xf32, #tpu.memory_space<smem>>
    %83 = vector.broadcast %82 : f32 to vector<8x8xf32>
    %84 = arith.mulf %7, %83 : vector<8x8xf32>
    %c8_34 = arith.constant 8 : index
    %c0_35 = arith.constant 0 : index
    %85 = memref.load %arg4[%c8_34, %c0_35] : memref<15x4xf32, #tpu.memory_space<smem>>
    %86 = vector.broadcast %85 : f32 to vector<8x8xf32>
    %87 = arith.addf %84, %86 : vector<8x8xf32>
    %88 = arith.select %81, %87, %79 : vector<8x8xi1>, vector<8x8xf32>
    %c9_i32 = arith.constant 9 : i32
    %89 = vector.broadcast %c9_i32 : i32 to vector<8x8xi32>
    %90 = arith.cmpi eq, %0, %89 : vector<8x8xi32>
    %c9 = arith.constant 9 : index
    %c0_36 = arith.constant 0 : index
    %91 = memref.load %arg3[%c9, %c0_36] : memref<15x4xf32, #tpu.memory_space<smem>>
    %92 = vector.broadcast %91 : f32 to vector<8x8xf32>
    %93 = arith.mulf %7, %92 : vector<8x8xf32>
    %c9_37 = arith.constant 9 : index
    %c0_38 = arith.constant 0 : index
    %94 = memref.load %arg4[%c9_37, %c0_38] : memref<15x4xf32, #tpu.memory_space<smem>>
    %95 = vector.broadcast %94 : f32 to vector<8x8xf32>
    %96 = arith.addf %93, %95 : vector<8x8xf32>
    %97 = arith.select %90, %96, %88 : vector<8x8xi1>, vector<8x8xf32>
    %c10_i32 = arith.constant 10 : i32
    %98 = vector.broadcast %c10_i32 : i32 to vector<8x8xi32>
    %99 = arith.cmpi eq, %0, %98 : vector<8x8xi32>
    %c10 = arith.constant 10 : index
    %c0_39 = arith.constant 0 : index
    %100 = memref.load %arg3[%c10, %c0_39] : memref<15x4xf32, #tpu.memory_space<smem>>
    %101 = vector.broadcast %100 : f32 to vector<8x8xf32>
    %102 = arith.mulf %7, %101 : vector<8x8xf32>
    %c10_40 = arith.constant 10 : index
    %c0_41 = arith.constant 0 : index
    %103 = memref.load %arg4[%c10_40, %c0_41] : memref<15x4xf32, #tpu.memory_space<smem>>
    %104 = vector.broadcast %103 : f32 to vector<8x8xf32>
    %105 = arith.addf %102, %104 : vector<8x8xf32>
    %106 = arith.select %99, %105, %97 : vector<8x8xi1>, vector<8x8xf32>
    %c11_i32 = arith.constant 11 : i32
    %107 = vector.broadcast %c11_i32 : i32 to vector<8x8xi32>
    %108 = arith.cmpi eq, %0, %107 : vector<8x8xi32>
    %c11 = arith.constant 11 : index
    %c0_42 = arith.constant 0 : index
    %109 = memref.load %arg3[%c11, %c0_42] : memref<15x4xf32, #tpu.memory_space<smem>>
    %110 = vector.broadcast %109 : f32 to vector<8x8xf32>
    %111 = arith.mulf %7, %110 : vector<8x8xf32>
    %c11_43 = arith.constant 11 : index
    %c0_44 = arith.constant 0 : index
    %112 = memref.load %arg4[%c11_43, %c0_44] : memref<15x4xf32, #tpu.memory_space<smem>>
    %113 = vector.broadcast %112 : f32 to vector<8x8xf32>
    %114 = arith.addf %111, %113 : vector<8x8xf32>
    %115 = arith.select %108, %114, %106 : vector<8x8xi1>, vector<8x8xf32>
    %c12_i32 = arith.constant 12 : i32
    %116 = vector.broadcast %c12_i32 : i32 to vector<8x8xi32>
    %117 = arith.cmpi eq, %0, %116 : vector<8x8xi32>
    %c12 = arith.constant 12 : index
    %c0_45 = arith.constant 0 : index
    %118 = memref.load %arg3[%c12, %c0_45] : memref<15x4xf32, #tpu.memory_space<smem>>
    %119 = vector.broadcast %118 : f32 to vector<8x8xf32>
    %120 = arith.mulf %7, %119 : vector<8x8xf32>
    %c12_46 = arith.constant 12 : index
    %c0_47 = arith.constant 0 : index
    %121 = memref.load %arg4[%c12_46, %c0_47] : memref<15x4xf32, #tpu.memory_space<smem>>
    %122 = vector.broadcast %121 : f32 to vector<8x8xf32>
    %123 = arith.addf %120, %122 : vector<8x8xf32>
    %124 = arith.select %117, %123, %115 : vector<8x8xi1>, vector<8x8xf32>
    %c13_i32 = arith.constant 13 : i32
    %125 = vector.broadcast %c13_i32 : i32 to vector<8x8xi32>
    %126 = arith.cmpi eq, %0, %125 : vector<8x8xi32>
    %c13 = arith.constant 13 : index
    %c0_48 = arith.constant 0 : index
    %127 = memref.load %arg3[%c13, %c0_48] : memref<15x4xf32, #tpu.memory_space<smem>>
    %128 = vector.broadcast %127 : f32 to vector<8x8xf32>
    %129 = arith.mulf %7, %128 : vector<8x8xf32>
    %c13_49 = arith.constant 13 : index
    %c0_50 = arith.constant 0 : index
    %130 = memref.load %arg4[%c13_49, %c0_50] : memref<15x4xf32, #tpu.memory_space<smem>>
    %131 = vector.broadcast %130 : f32 to vector<8x8xf32>
    %132 = arith.addf %129, %131 : vector<8x8xf32>
    %133 = arith.select %126, %132, %124 : vector<8x8xi1>, vector<8x8xf32>
    %c14_i32 = arith.constant 14 : i32
    %134 = vector.broadcast %c14_i32 : i32 to vector<8x8xi32>
    %135 = arith.cmpi eq, %0, %134 : vector<8x8xi32>
    %c14 = arith.constant 14 : index
    %c0_51 = arith.constant 0 : index
    %136 = memref.load %arg3[%c14, %c0_51] : memref<15x4xf32, #tpu.memory_space<smem>>
    %137 = vector.broadcast %136 : f32 to vector<8x8xf32>
    %138 = arith.mulf %7, %137 : vector<8x8xf32>
    %c14_52 = arith.constant 14 : index
    %c0_53 = arith.constant 0 : index
    %139 = memref.load %arg4[%c14_52, %c0_53] : memref<15x4xf32, #tpu.memory_space<smem>>
    %140 = vector.broadcast %139 : f32 to vector<8x8xf32>
    %141 = arith.addf %138, %140 : vector<8x8xf32>
    %142 = arith.select %135, %141, %133 : vector<8x8xi1>, vector<8x8xf32>
    %c0_54 = arith.constant 0 : index
    %c0_55 = arith.constant 0 : index
    %c0_56 = arith.constant 0 : index
    %c0_57 = arith.constant 0 : index
    %143 = vector.load %arg5[%c0_54, %c0_55, %c0_56, %c0_57] : memref<1x4x8x8xbf16, #tpu.memory_space<vmem>>, vector<1x1x8x8xbf16>
    %144 = vector.shape_cast %143 : vector<1x1x8x8xbf16> to vector<8x8xbf16>
    %145 = arith.extf %144 : vector<8x8xbf16> to vector<8x8xf32>
    %146 = arith.addf %142, %145 : vector<8x8xf32>
    %147 = arith.truncf %146 : vector<8x8xf32> to vector<8x8xbf16>
    %c0_58 = arith.constant 0 : index
    %c0_59 = arith.constant 0 : index
    %c0_60 = arith.constant 0 : index
    %c0_61 = arith.constant 0 : index
    %148 = vector.load %arg7[%c0_58, %c0_59, %c0_60, %c0_61] : memref<1x4x8x8xbf16, #tpu.memory_space<vmem>>, vector<1x1x8x8xbf16>
    %149 = vector.shape_cast %148 : vector<1x1x8x8xbf16> to vector<8x8xbf16>
    %150 = vector.shape_cast %147 : vector<8x8xbf16> to vector<1x1x8x8xbf16>
    tpu.vector_store %arg7[%c0_58, %c0_59, %c0_60, %c0_61], %150 {strides = array<i32>} : memref<1x4x8x8xbf16, #tpu.memory_space<vmem>>, vector<1x1x8x8xbf16>,
    %cst_62 = arith.constant dense<0xFF800000> : vector<8xf32>
    %151 = vector.multi_reduction <maximumf>, %146, %cst_62 [1] : vector<8x8xf32> to vector<8xf32>
    %152 = vector.shape_cast %151 : vector<8xf32> to vector<8x1xf32>
    %153 = vector.broadcast %152 : vector<8x1xf32> to vector<8x8xf32>
    %154 = arith.subf %146, %153 : vector<8x8xf32>
    %155 = math.exp %154 : vector<8x8xf32>
    %cst_63 = arith.constant dense<0.000000e+00> : vector<8xf32>
    %156 = vector.multi_reduction <add>, %155, %cst_63 [1] : vector<8x8xf32> to vector<8xf32>
    %157 = vector.shape_cast %156 : vector<8xf32> to vector<8x1xf32>
    %158 = tpu.reciprocal %157 {approx = true} : vector<8x1xf32> -> vector<8x1xf32>
    %159 = vector.broadcast %158 : vector<8x1xf32> to vector<8x8xf32>
    %160 = arith.mulf %155, %159 : vector<8x8xf32>
    %161 = arith.truncf %160 : vector<8x8xf32> to vector<8x8xbf16>
    %cst_64 = arith.constant dense<0.000000e+00> : vector<8x64xf32>
    %162 = tpu.matmul %161, %6, %cst_64 {dimension_numbers = #tpu.dot_dimension_numbers<[1], [0], [0], [1], [0, 0, 1, 1], [], []>} : vector<8x8xbf16>, vector<8x64xbf16>, vector<8x64xf32> -> vector<8x64xf32>
    %c0_65 = arith.constant 0 : index
    %c0_66 = arith.constant 0 : index
    %c64 = arith.constant 64 : index
    %163 = vector.load %arg1[%c0_65, %c0_66, %c64] : memref<1x8x768xbf16, #tpu.memory_space<vmem>>, vector<1x8x64xbf16>
    %164 = vector.shape_cast %163 : vector<1x8x64xbf16> to vector<8x64xbf16>
    %c0_67 = arith.constant 0 : index
    %c0_68 = arith.constant 0 : index
    %c320 = arith.constant 320 : index
    %165 = vector.load %arg1[%c0_67, %c0_68, %c320] : memref<1x8x768xbf16, #tpu.memory_space<vmem>>, vector<1x8x64xbf16>
    %166 = vector.shape_cast %165 : vector<1x8x64xbf16> to vector<8x64xbf16>
    %c0_69 = arith.constant 0 : index
    %c0_70 = arith.constant 0 : index
    %c576 = arith.constant 576 : index
    %167 = vector.load %arg1[%c0_69, %c0_70, %c576] : memref<1x8x768xbf16, #tpu.memory_space<vmem>>, vector<1x8x64xbf16>
    %168 = vector.shape_cast %167 : vector<1x8x64xbf16> to vector<8x64xbf16>
    %cst_71 = arith.constant dense<0.000000e+00> : vector<8x8xf32>
    %169 = tpu.matmul %164, %166, %cst_71 {dimension_numbers = #tpu.dot_dimension_numbers<[1], [1], [0], [0], [0, 0, 1, 0], [], []>} : vector<8x64xbf16>, vector<8x64xbf16>, vector<8x8xf32> -> vector<8x8xf32>
    %c0_i32_72 = arith.constant 0 : i32
    %170 = vector.broadcast %c0_i32_72 : i32 to vector<8x8xi32>
    %171 = arith.cmpi eq, %0, %170 : vector<8x8xi32>
    %c0_73 = arith.constant 0 : index
    %c1_74 = arith.constant 1 : index
    %172 = memref.load %arg3[%c0_73, %c1_74] : memref<15x4xf32, #tpu.memory_space<smem>>
    %173 = vector.broadcast %172 : f32 to vector<8x8xf32>
    %174 = arith.mulf %169, %173 : vector<8x8xf32>
    %c0_75 = arith.constant 0 : index
    %c1_76 = arith.constant 1 : index
    %175 = memref.load %arg4[%c0_75, %c1_76] : memref<15x4xf32, #tpu.memory_space<smem>>
    %176 = vector.broadcast %175 : f32 to vector<8x8xf32>
    %177 = arith.addf %174, %176 : vector<8x8xf32>
    %178 = arith.select %171, %177, %169 : vector<8x8xi1>, vector<8x8xf32>
    %c1_i32_77 = arith.constant 1 : i32
    %179 = vector.broadcast %c1_i32_77 : i32 to vector<8x8xi32>
    %180 = arith.cmpi eq, %0, %179 : vector<8x8xi32>
    %c1_78 = arith.constant 1 : index
    %c1_79 = arith.constant 1 : index
    %181 = memref.load %arg3[%c1_78, %c1_79] : memref<15x4xf32, #tpu.memory_space<smem>>
    %182 = vector.broadcast %181 : f32 to vector<8x8xf32>
    %183 = arith.mulf %169, %182 : vector<8x8xf32>
    %c1_80 = arith.constant 1 : index
    %c1_81 = arith.constant 1 : index
    %184 = memref.load %arg4[%c1_80, %c1_81] : memref<15x4xf32, #tpu.memory_space<smem>>
    %185 = vector.broadcast %184 : f32 to vector<8x8xf32>
    %186 = arith.addf %183, %185 : vector<8x8xf32>
    %187 = arith.select %180, %186, %178 : vector<8x8xi1>, vector<8x8xf32>
    %c2_i32_82 = arith.constant 2 : i32
    %188 = vector.broadcast %c2_i32_82 : i32 to vector<8x8xi32>
    %189 = arith.cmpi eq, %0, %188 : vector<8x8xi32>
    %c2_83 = arith.constant 2 : index
    %c1_84 = arith.constant 1 : index
    %190 = memref.load %arg3[%c2_83, %c1_84] : memref<15x4xf32, #tpu.memory_space<smem>>
    %191 = vector.broadcast %190 : f32 to vector<8x8xf32>
    %192 = arith.mulf %169, %191 : vector<8x8xf32>
    %c2_85 = arith.constant 2 : index
    %c1_86 = arith.constant 1 : index
    %193 = memref.load %arg4[%c2_85, %c1_86] : memref<15x4xf32, #tpu.memory_space<smem>>
    %194 = vector.broadcast %193 : f32 to vector<8x8xf32>
    %195 = arith.addf %192, %194 : vector<8x8xf32>
    %196 = arith.select %189, %195, %187 : vector<8x8xi1>, vector<8x8xf32>
    %c3_i32_87 = arith.constant 3 : i32
    %197 = vector.broadcast %c3_i32_87 : i32 to vector<8x8xi32>
    %198 = arith.cmpi eq, %0, %197 : vector<8x8xi32>
    %c3_88 = arith.constant 3 : index
    %c1_89 = arith.constant 1 : index
    %199 = memref.load %arg3[%c3_88, %c1_89] : memref<15x4xf32, #tpu.memory_space<smem>>
    %200 = vector.broadcast %199 : f32 to vector<8x8xf32>
    %201 = arith.mulf %169, %200 : vector<8x8xf32>
    %c3_90 = arith.constant 3 : index
    %c1_91 = arith.constant 1 : index
    %202 = memref.load %arg4[%c3_90, %c1_91] : memref<15x4xf32, #tpu.memory_space<smem>>
    %203 = vector.broadcast %202 : f32 to vector<8x8xf32>
    %204 = arith.addf %201, %203 : vector<8x8xf32>
    %205 = arith.select %198, %204, %196 : vector<8x8xi1>, vector<8x8xf32>
    %c4_i32_92 = arith.constant 4 : i32
    %206 = vector.broadcast %c4_i32_92 : i32 to vector<8x8xi32>
    %207 = arith.cmpi eq, %0, %206 : vector<8x8xi32>
    %c4_93 = arith.constant 4 : index
    %c1_94 = arith.constant 1 : index
    %208 = memref.load %arg3[%c4_93, %c1_94] : memref<15x4xf32, #tpu.memory_space<smem>>
    %209 = vector.broadcast %208 : f32 to vector<8x8xf32>
    %210 = arith.mulf %169, %209 : vector<8x8xf32>
    %c4_95 = arith.constant 4 : index
    %c1_96 = arith.constant 1 : index
    %211 = memref.load %arg4[%c4_95, %c1_96] : memref<15x4xf32, #tpu.memory_space<smem>>
    %212 = vector.broadcast %211 : f32 to vector<8x8xf32>
    %213 = arith.addf %210, %212 : vector<8x8xf32>
    %214 = arith.select %207, %213, %205 : vector<8x8xi1>, vector<8x8xf32>
    %c5_i32_97 = arith.constant 5 : i32
    %215 = vector.broadcast %c5_i32_97 : i32 to vector<8x8xi32>
    %216 = arith.cmpi eq, %0, %215 : vector<8x8xi32>
    %c5_98 = arith.constant 5 : index
    %c1_99 = arith.constant 1 : index
    %217 = memref.load %arg3[%c5_98, %c1_99] : memref<15x4xf32, #tpu.memory_space<smem>>
    %218 = vector.broadcast %217 : f32 to vector<8x8xf32>
    %219 = arith.mulf %169, %218 : vector<8x8xf32>
    %c5_100 = arith.constant 5 : index
    %c1_101 = arith.constant 1 : index
    %220 = memref.load %arg4[%c5_100, %c1_101] : memref<15x4xf32, #tpu.memory_space<smem>>
    %221 = vector.broadcast %220 : f32 to vector<8x8xf32>
    %222 = arith.addf %219, %221 : vector<8x8xf32>
    %223 = arith.select %216, %222, %214 : vector<8x8xi1>, vector<8x8xf32>
    %c6_i32_102 = arith.constant 6 : i32
    %224 = vector.broadcast %c6_i32_102 : i32 to vector<8x8xi32>
    %225 = arith.cmpi eq, %0, %224 : vector<8x8xi32>
    %c6_103 = arith.constant 6 : index
    %c1_104 = arith.constant 1 : index
    %226 = memref.load %arg3[%c6_103, %c1_104] : memref<15x4xf32, #tpu.memory_space<smem>>
    %227 = vector.broadcast %226 : f32 to vector<8x8xf32>
    %228 = arith.mulf %169, %227 : vector<8x8xf32>
    %c6_105 = arith.constant 6 : index
    %c1_106 = arith.constant 1 : index
    %229 = memref.load %arg4[%c6_105, %c1_106] : memref<15x4xf32, #tpu.memory_space<smem>>
    %230 = vector.broadcast %229 : f32 to vector<8x8xf32>
    %231 = arith.addf %228, %230 : vector<8x8xf32>
    %232 = arith.select %225, %231, %223 : vector<8x8xi1>, vector<8x8xf32>
    %c7_i32_107 = arith.constant 7 : i32
    %233 = vector.broadcast %c7_i32_107 : i32 to vector<8x8xi32>
    %234 = arith.cmpi eq, %0, %233 : vector<8x8xi32>
    %c7_108 = arith.constant 7 : index
    %c1_109 = arith.constant 1 : index
    %235 = memref.load %arg3[%c7_108, %c1_109] : memref<15x4xf32, #tpu.memory_space<smem>>
    %236 = vector.broadcast %235 : f32 to vector<8x8xf32>
    %237 = arith.mulf %169, %236 : vector<8x8xf32>
    %c7_110 = arith.constant 7 : index
    %c1_111 = arith.constant 1 : index
    %238 = memref.load %arg4[%c7_110, %c1_111] : memref<15x4xf32, #tpu.memory_space<smem>>
    %239 = vector.broadcast %238 : f32 to vector<8x8xf32>
    %240 = arith.addf %237, %239 : vector<8x8xf32>
    %241 = arith.select %234, %240, %232 : vector<8x8xi1>, vector<8x8xf32>
    %c8_i32_112 = arith.constant 8 : i32
    %242 = vector.broadcast %c8_i32_112 : i32 to vector<8x8xi32>
    %243 = arith.cmpi eq, %0, %242 : vector<8x8xi32>
    %c8_113 = arith.constant 8 : index
    %c1_114 = arith.constant 1 : index
    %244 = memref.load %arg3[%c8_113, %c1_114] : memref<15x4xf32, #tpu.memory_space<smem>>
    %245 = vector.broadcast %244 : f32 to vector<8x8xf32>
    %246 = arith.mulf %169, %245 : vector<8x8xf32>
    %c8_115 = arith.constant 8 : index
    %c1_116 = arith.constant 1 : index
    %247 = memref.load %arg4[%c8_115, %c1_116] : memref<15x4xf32, #tpu.memory_space<smem>>
    %248 = vector.broadcast %247 : f32 to vector<8x8xf32>
    %249 = arith.addf %246, %248 : vector<8x8xf32>
    %250 = arith.select %243, %249, %241 : vector<8x8xi1>, vector<8x8xf32>
    %c9_i32_117 = arith.constant 9 : i32
    %251 = vector.broadcast %c9_i32_117 : i32 to vector<8x8xi32>
    %252 = arith.cmpi eq, %0, %251 : vector<8x8xi32>
    %c9_118 = arith.constant 9 : index
    %c1_119 = arith.constant 1 : index
    %253 = memref.load %arg3[%c9_118, %c1_119] : memref<15x4xf32, #tpu.memory_space<smem>>
    %254 = vector.broadcast %253 : f32 to vector<8x8xf32>
    %255 = arith.mulf %169, %254 : vector<8x8xf32>
    %c9_120 = arith.constant 9 : index
    %c1_121 = arith.constant 1 : index
    %256 = memref.load %arg4[%c9_120, %c1_121] : memref<15x4xf32, #tpu.memory_space<smem>>
    %257 = vector.broadcast %256 : f32 to vector<8x8xf32>
    %258 = arith.addf %255, %257 : vector<8x8xf32>
    %259 = arith.select %252, %258, %250 : vector<8x8xi1>, vector<8x8xf32>
    %c10_i32_122 = arith.constant 10 : i32
    %260 = vector.broadcast %c10_i32_122 : i32 to vector<8x8xi32>
    %261 = arith.cmpi eq, %0, %260 : vector<8x8xi32>
    %c10_123 = arith.constant 10 : index
    %c1_124 = arith.constant 1 : index
    %262 = memref.load %arg3[%c10_123, %c1_124] : memref<15x4xf32, #tpu.memory_space<smem>>
    %263 = vector.broadcast %262 : f32 to vector<8x8xf32>
    %264 = arith.mulf %169, %263 : vector<8x8xf32>
    %c10_125 = arith.constant 10 : index
    %c1_126 = arith.constant 1 : index
    %265 = memref.load %arg4[%c10_125, %c1_126] : memref<15x4xf32, #tpu.memory_space<smem>>
    %266 = vector.broadcast %265 : f32 to vector<8x8xf32>
    %267 = arith.addf %264, %266 : vector<8x8xf32>
    %268 = arith.select %261, %267, %259 : vector<8x8xi1>, vector<8x8xf32>
    %c11_i32_127 = arith.constant 11 : i32
    %269 = vector.broadcast %c11_i32_127 : i32 to vector<8x8xi32>
    %270 = arith.cmpi eq, %0, %269 : vector<8x8xi32>
    %c11_128 = arith.constant 11 : index
    %c1_129 = arith.constant 1 : index
    %271 = memref.load %arg3[%c11_128, %c1_129] : memref<15x4xf32, #tpu.memory_space<smem>>
    %272 = vector.broadcast %271 : f32 to vector<8x8xf32>
    %273 = arith.mulf %169, %272 : vector<8x8xf32>
    %c11_130 = arith.constant 11 : index
    %c1_131 = arith.constant 1 : index
    %274 = memref.load %arg4[%c11_130, %c1_131] : memref<15x4xf32, #tpu.memory_space<smem>>
    %275 = vector.broadcast %274 : f32 to vector<8x8xf32>
    %276 = arith.addf %273, %275 : vector<8x8xf32>
    %277 = arith.select %270, %276, %268 : vector<8x8xi1>, vector<8x8xf32>
    %c12_i32_132 = arith.constant 12 : i32
    %278 = vector.broadcast %c12_i32_132 : i32 to vector<8x8xi32>
    %279 = arith.cmpi eq, %0, %278 : vector<8x8xi32>
    %c12_133 = arith.constant 12 : index
    %c1_134 = arith.constant 1 : index
    %280 = memref.load %arg3[%c12_133, %c1_134] : memref<15x4xf32, #tpu.memory_space<smem>>
    %281 = vector.broadcast %280 : f32 to vector<8x8xf32>
    %282 = arith.mulf %169, %281 : vector<8x8xf32>
    %c12_135 = arith.constant 12 : index
    %c1_136 = arith.constant 1 : index
    %283 = memref.load %arg4[%c12_135, %c1_136] : memref<15x4xf32, #tpu.memory_space<smem>>
    %284 = vector.broadcast %283 : f32 to vector<8x8xf32>
    %285 = arith.addf %282, %284 : vector<8x8xf32>
    %286 = arith.select %279, %285, %277 : vector<8x8xi1>, vector<8x8xf32>
    %c13_i32_137 = arith.constant 13 : i32
    %287 = vector.broadcast %c13_i32_137 : i32 to vector<8x8xi32>
    %288 = arith.cmpi eq, %0, %287 : vector<8x8xi32>
    %c13_138 = arith.constant 13 : index
    %c1_139 = arith.constant 1 : index
    %289 = memref.load %arg3[%c13_138, %c1_139] : memref<15x4xf32, #tpu.memory_space<smem>>
    %290 = vector.broadcast %289 : f32 to vector<8x8xf32>
    %291 = arith.mulf %169, %290 : vector<8x8xf32>
    %c13_140 = arith.constant 13 : index
    %c1_141 = arith.constant 1 : index
    %292 = memref.load %arg4[%c13_140, %c1_141] : memref<15x4xf32, #tpu.memory_space<smem>>
    %293 = vector.broadcast %292 : f32 to vector<8x8xf32>
    %294 = arith.addf %291, %293 : vector<8x8xf32>
    %295 = arith.select %288, %294, %286 : vector<8x8xi1>, vector<8x8xf32>
    %c14_i32_142 = arith.constant 14 : i32
    %296 = vector.broadcast %c14_i32_142 : i32 to vector<8x8xi32>
    %297 = arith.cmpi eq, %0, %296 : vector<8x8xi32>
    %c14_143 = arith.constant 14 : index
    %c1_144 = arith.constant 1 : index
    %298 = memref.load %arg3[%c14_143, %c1_144] : memref<15x4xf32, #tpu.memory_space<smem>>
    %299 = vector.broadcast %298 : f32 to vector<8x8xf32>
    %300 = arith.mulf %169, %299 : vector<8x8xf32>
    %c14_145 = arith.constant 14 : index
    %c1_146 = arith.constant 1 : index
    %301 = memref.load %arg4[%c14_145, %c1_146] : memref<15x4xf32, #tpu.memory_space<smem>>
    %302 = vector.broadcast %301 : f32 to vector<8x8xf32>
    %303 = arith.addf %300, %302 : vector<8x8xf32>
    %304 = arith.select %297, %303, %295 : vector<8x8xi1>, vector<8x8xf32>
    %c0_147 = arith.constant 0 : index
    %c1_148 = arith.constant 1 : index
    %c0_149 = arith.constant 0 : index
    %c0_150 = arith.constant 0 : index
    %305 = vector.load %arg5[%c0_147, %c1_148, %c0_149, %c0_150] : memref<1x4x8x8xbf16, #tpu.memory_space<vmem>>, vector<1x1x8x8xbf16>
    %306 = vector.shape_cast %305 : vector<1x1x8x8xbf16> to vector<8x8xbf16>
    %307 = arith.extf %306 : vector<8x8xbf16> to vector<8x8xf32>
    %308 = arith.addf %304, %307 : vector<8x8xf32>
    %309 = arith.truncf %308 : vector<8x8xf32> to vector<8x8xbf16>
    %c0_151 = arith.constant 0 : index
    %c1_152 = arith.constant 1 : index
    %c0_153 = arith.constant 0 : index
    %c0_154 = arith.constant 0 : index
    %310 = vector.load %arg7[%c0_151, %c1_152, %c0_153, %c0_154] : memref<1x4x8x8xbf16, #tpu.memory_space<vmem>>, vector<1x1x8x8xbf16>
    %311 = vector.shape_cast %310 : vector<1x1x8x8xbf16> to vector<8x8xbf16>
    %312 = vector.shape_cast %309 : vector<8x8xbf16> to vector<1x1x8x8xbf16>
    tpu.vector_store %arg7[%c0_151, %c1_152, %c0_153, %c0_154], %312 {strides = array<i32>} : memref<1x4x8x8xbf16, #tpu.memory_space<vmem>>, vector<1x1x8x8xbf16>,
    %cst_155 = arith.constant dense<0xFF800000> : vector<8xf32>
    %313 = vector.multi_reduction <maximumf>, %308, %cst_155 [1] : vector<8x8xf32> to vector<8xf32>
    %314 = vector.shape_cast %313 : vector<8xf32> to vector<8x1xf32>
    %315 = vector.broadcast %314 : vector<8x1xf32> to vector<8x8xf32>
    %316 = arith.subf %308, %315 : vector<8x8xf32>
    %317 = math.exp %316 : vector<8x8xf32>
    %cst_156 = arith.constant dense<0.000000e+00> : vector<8xf32>
    %318 = vector.multi_reduction <add>, %317, %cst_156 [1] : vector<8x8xf32> to vector<8xf32>
    %319 = vector.shape_cast %318 : vector<8xf32> to vector<8x1xf32>
    %320 = tpu.reciprocal %319 {approx = true} : vector<8x1xf32> -> vector<8x1xf32>
    %321 = vector.broadcast %320 : vector<8x1xf32> to vector<8x8xf32>
    %322 = arith.mulf %317, %321 : vector<8x8xf32>
    %323 = arith.truncf %322 : vector<8x8xf32> to vector<8x8xbf16>
    %cst_157 = arith.constant dense<0.000000e+00> : vector<8x64xf32>
    %324 = tpu.matmul %323, %168, %cst_157 {dimension_numbers = #tpu.dot_dimension_numbers<[1], [0], [0], [1], [0, 0, 1, 1], [], []>} : vector<8x8xbf16>, vector<8x64xbf16>, vector<8x64xf32> -> vector<8x64xf32>
    %c0_158 = arith.constant 0 : index
    %c0_159 = arith.constant 0 : index
    %c128 = arith.constant 128 : index
    %325 = vector.load %arg1[%c0_158, %c0_159, %c128] : memref<1x8x768xbf16, #tpu.memory_space<vmem>>, vector<1x8x64xbf16>
    %326 = vector.shape_cast %325 : vector<1x8x64xbf16> to vector<8x64xbf16>
    %c0_160 = arith.constant 0 : index
    %c0_161 = arith.constant 0 : index
    %c384 = arith.constant 384 : index
    %327 = vector.load %arg1[%c0_160, %c0_161, %c384] : memref<1x8x768xbf16, #tpu.memory_space<vmem>>, vector<1x8x64xbf16>
    %328 = vector.shape_cast %327 : vector<1x8x64xbf16> to vector<8x64xbf16>
    %c0_162 = arith.constant 0 : index
    %c0_163 = arith.constant 0 : index
    %c640 = arith.constant 640 : index
    %329 = vector.load %arg1[%c0_162, %c0_163, %c640] : memref<1x8x768xbf16, #tpu.memory_space<vmem>>, vector<1x8x64xbf16>
    %330 = vector.shape_cast %329 : vector<1x8x64xbf16> to vector<8x64xbf16>
    %cst_164 = arith.constant dense<0.000000e+00> : vector<8x8xf32>
    %331 = tpu.matmul %326, %328, %cst_164 {dimension_numbers = #tpu.dot_dimension_numbers<[1], [1], [0], [0], [0, 0, 1, 0], [], []>} : vector<8x64xbf16>, vector<8x64xbf16>, vector<8x8xf32> -> vector<8x8xf32>
    %c0_i32_165 = arith.constant 0 : i32
    %332 = vector.broadcast %c0_i32_165 : i32 to vector<8x8xi32>
    %333 = arith.cmpi eq, %0, %332 : vector<8x8xi32>
    %c0_166 = arith.constant 0 : index
    %c2_167 = arith.constant 2 : index
    %334 = memref.load %arg3[%c0_166, %c2_167] : memref<15x4xf32, #tpu.memory_space<smem>>
    %335 = vector.broadcast %334 : f32 to vector<8x8xf32>
    %336 = arith.mulf %331, %335 : vector<8x8xf32>
    %c0_168 = arith.constant 0 : index
    %c2_169 = arith.constant 2 : index
    %337 = memref.load %arg4[%c0_168, %c2_169] : memref<15x4xf32, #tpu.memory_space<smem>>
    %338 = vector.broadcast %337 : f32 to vector<8x8xf32>
    %339 = arith.addf %336, %338 : vector<8x8xf32>
    %340 = arith.select %333, %339, %331 : vector<8x8xi1>, vector<8x8xf32>
    %c1_i32_170 = arith.constant 1 : i32
    %341 = vector.broadcast %c1_i32_170 : i32 to vector<8x8xi32>
    %342 = arith.cmpi eq, %0, %341 : vector<8x8xi32>
    %c1_171 = arith.constant 1 : index
    %c2_172 = arith.constant 2 : index
    %343 = memref.load %arg3[%c1_171, %c2_172] : memref<15x4xf32, #tpu.memory_space<smem>>
    %344 = vector.broadcast %343 : f32 to vector<8x8xf32>
    %345 = arith.mulf %331, %344 : vector<8x8xf32>
    %c1_173 = arith.constant 1 : index
    %c2_174 = arith.constant 2 : index
    %346 = memref.load %arg4[%c1_173, %c2_174] : memref<15x4xf32, #tpu.memory_space<smem>>
    %347 = vector.broadcast %346 : f32 to vector<8x8xf32>
    %348 = arith.addf %345, %347 : vector<8x8xf32>
    %349 = arith.select %342, %348, %340 : vector<8x8xi1>, vector<8x8xf32>
    %c2_i32_175 = arith.constant 2 : i32
    %350 = vector.broadcast %c2_i32_175 : i32 to vector<8x8xi32>
    %351 = arith.cmpi eq, %0, %350 : vector<8x8xi32>
    %c2_176 = arith.constant 2 : index
    %c2_177 = arith.constant 2 : index
    %352 = memref.load %arg3[%c2_176, %c2_177] : memref<15x4xf32, #tpu.memory_space<smem>>
    %353 = vector.broadcast %352 : f32 to vector<8x8xf32>
    %354 = arith.mulf %331, %353 : vector<8x8xf32>
    %c2_178 = arith.constant 2 : index
    %c2_179 = arith.constant 2 : index
    %355 = memref.load %arg4[%c2_178, %c2_179] : memref<15x4xf32, #tpu.memory_space<smem>>
    %356 = vector.broadcast %355 : f32 to vector<8x8xf32>
    %357 = arith.addf %354, %356 : vector<8x8xf32>
    %358 = arith.select %351, %357, %349 : vector<8x8xi1>, vector<8x8xf32>
    %c3_i32_180 = arith.constant 3 : i32
    %359 = vector.broadcast %c3_i32_180 : i32 to vector<8x8xi32>
    %360 = arith.cmpi eq, %0, %359 : vector<8x8xi32>
    %c3_181 = arith.constant 3 : index
    %c2_182 = arith.constant 2 : index
    %361 = memref.load %arg3[%c3_181, %c2_182] : memref<15x4xf32, #tpu.memory_space<smem>>
    %362 = vector.broadcast %361 : f32 to vector<8x8xf32>
    %363 = arith.mulf %331, %362 : vector<8x8xf32>
    %c3_183 = arith.constant 3 : index
    %c2_184 = arith.constant 2 : index
    %364 = memref.load %arg4[%c3_183, %c2_184] : memref<15x4xf32, #tpu.memory_space<smem>>
    %365 = vector.broadcast %364 : f32 to vector<8x8xf32>
    %366 = arith.addf %363, %365 : vector<8x8xf32>
    %367 = arith.select %360, %366, %358 : vector<8x8xi1>, vector<8x8xf32>
    %c4_i32_185 = arith.constant 4 : i32
    %368 = vector.broadcast %c4_i32_185 : i32 to vector<8x8xi32>
    %369 = arith.cmpi eq, %0, %368 : vector<8x8xi32>
    %c4_186 = arith.constant 4 : index
    %c2_187 = arith.constant 2 : index
    %370 = memref.load %arg3[%c4_186, %c2_187] : memref<15x4xf32, #tpu.memory_space<smem>>
    %371 = vector.broadcast %370 : f32 to vector<8x8xf32>
    %372 = arith.mulf %331, %371 : vector<8x8xf32>
    %c4_188 = arith.constant 4 : index
    %c2_189 = arith.constant 2 : index
    %373 = memref.load %arg4[%c4_188, %c2_189] : memref<15x4xf32, #tpu.memory_space<smem>>
    %374 = vector.broadcast %373 : f32 to vector<8x8xf32>
    %375 = arith.addf %372, %374 : vector<8x8xf32>
    %376 = arith.select %369, %375, %367 : vector<8x8xi1>, vector<8x8xf32>
    %c5_i32_190 = arith.constant 5 : i32
    %377 = vector.broadcast %c5_i32_190 : i32 to vector<8x8xi32>
    %378 = arith.cmpi eq, %0, %377 : vector<8x8xi32>
    %c5_191 = arith.constant 5 : index
    %c2_192 = arith.constant 2 : index
    %379 = memref.load %arg3[%c5_191, %c2_192] : memref<15x4xf32, #tpu.memory_space<smem>>
    %380 = vector.broadcast %379 : f32 to vector<8x8xf32>
    %381 = arith.mulf %331, %380 : vector<8x8xf32>
    %c5_193 = arith.constant 5 : index
    %c2_194 = arith.constant 2 : index
    %382 = memref.load %arg4[%c5_193, %c2_194] : memref<15x4xf32, #tpu.memory_space<smem>>
    %383 = vector.broadcast %382 : f32 to vector<8x8xf32>
    %384 = arith.addf %381, %383 : vector<8x8xf32>
    %385 = arith.select %378, %384, %376 : vector<8x8xi1>, vector<8x8xf32>
    %c6_i32_195 = arith.constant 6 : i32
    %386 = vector.broadcast %c6_i32_195 : i32 to vector<8x8xi32>
    %387 = arith.cmpi eq, %0, %386 : vector<8x8xi32>
    %c6_196 = arith.constant 6 : index
    %c2_197 = arith.constant 2 : index
    %388 = memref.load %arg3[%c6_196, %c2_197] : memref<15x4xf32, #tpu.memory_space<smem>>
    %389 = vector.broadcast %388 : f32 to vector<8x8xf32>
    %390 = arith.mulf %331, %389 : vector<8x8xf32>
    %c6_198 = arith.constant 6 : index
    %c2_199 = arith.constant 2 : index
    %391 = memref.load %arg4[%c6_198, %c2_199] : memref<15x4xf32, #tpu.memory_space<smem>>
    %392 = vector.broadcast %391 : f32 to vector<8x8xf32>
    %393 = arith.addf %390, %392 : vector<8x8xf32>
    %394 = arith.select %387, %393, %385 : vector<8x8xi1>, vector<8x8xf32>
    %c7_i32_200 = arith.constant 7 : i32
    %395 = vector.broadcast %c7_i32_200 : i32 to vector<8x8xi32>
    %396 = arith.cmpi eq, %0, %395 : vector<8x8xi32>
    %c7_201 = arith.constant 7 : index
    %c2_202 = arith.constant 2 : index
    %397 = memref.load %arg3[%c7_201, %c2_202] : memref<15x4xf32, #tpu.memory_space<smem>>
    %398 = vector.broadcast %397 : f32 to vector<8x8xf32>
    %399 = arith.mulf %331, %398 : vector<8x8xf32>
    %c7_203 = arith.constant 7 : index
    %c2_204 = arith.constant 2 : index
    %400 = memref.load %arg4[%c7_203, %c2_204] : memref<15x4xf32, #tpu.memory_space<smem>>
    %401 = vector.broadcast %400 : f32 to vector<8x8xf32>
    %402 = arith.addf %399, %401 : vector<8x8xf32>
    %403 = arith.select %396, %402, %394 : vector<8x8xi1>, vector<8x8xf32>
    %c8_i32_205 = arith.constant 8 : i32
    %404 = vector.broadcast %c8_i32_205 : i32 to vector<8x8xi32>
    %405 = arith.cmpi eq, %0, %404 : vector<8x8xi32>
    %c8_206 = arith.constant 8 : index
    %c2_207 = arith.constant 2 : index
    %406 = memref.load %arg3[%c8_206, %c2_207] : memref<15x4xf32, #tpu.memory_space<smem>>
    %407 = vector.broadcast %406 : f32 to vector<8x8xf32>
    %408 = arith.mulf %331, %407 : vector<8x8xf32>
    %c8_208 = arith.constant 8 : index
    %c2_209 = arith.constant 2 : index
    %409 = memref.load %arg4[%c8_208, %c2_209] : memref<15x4xf32, #tpu.memory_space<smem>>
    %410 = vector.broadcast %409 : f32 to vector<8x8xf32>
    %411 = arith.addf %408, %410 : vector<8x8xf32>
    %412 = arith.select %405, %411, %403 : vector<8x8xi1>, vector<8x8xf32>
    %c9_i32_210 = arith.constant 9 : i32
    %413 = vector.broadcast %c9_i32_210 : i32 to vector<8x8xi32>
    %414 = arith.cmpi eq, %0, %413 : vector<8x8xi32>
    %c9_211 = arith.constant 9 : index
    %c2_212 = arith.constant 2 : index
    %415 = memref.load %arg3[%c9_211, %c2_212] : memref<15x4xf32, #tpu.memory_space<smem>>
    %416 = vector.broadcast %415 : f32 to vector<8x8xf32>
    %417 = arith.mulf %331, %416 : vector<8x8xf32>
    %c9_213 = arith.constant 9 : index
    %c2_214 = arith.constant 2 : index
    %418 = memref.load %arg4[%c9_213, %c2_214] : memref<15x4xf32, #tpu.memory_space<smem>>
    %419 = vector.broadcast %418 : f32 to vector<8x8xf32>
    %420 = arith.addf %417, %419 : vector<8x8xf32>
    %421 = arith.select %414, %420, %412 : vector<8x8xi1>, vector<8x8xf32>
    %c10_i32_215 = arith.constant 10 : i32
    %422 = vector.broadcast %c10_i32_215 : i32 to vector<8x8xi32>
    %423 = arith.cmpi eq, %0, %422 : vector<8x8xi32>
    %c10_216 = arith.constant 10 : index
    %c2_217 = arith.constant 2 : index
    %424 = memref.load %arg3[%c10_216, %c2_217] : memref<15x4xf32, #tpu.memory_space<smem>>
    %425 = vector.broadcast %424 : f32 to vector<8x8xf32>
    %426 = arith.mulf %331, %425 : vector<8x8xf32>
    %c10_218 = arith.constant 10 : index
    %c2_219 = arith.constant 2 : index
    %427 = memref.load %arg4[%c10_218, %c2_219] : memref<15x4xf32, #tpu.memory_space<smem>>
    %428 = vector.broadcast %427 : f32 to vector<8x8xf32>
    %429 = arith.addf %426, %428 : vector<8x8xf32>
    %430 = arith.select %423, %429, %421 : vector<8x8xi1>, vector<8x8xf32>
    %c11_i32_220 = arith.constant 11 : i32
    %431 = vector.broadcast %c11_i32_220 : i32 to vector<8x8xi32>
    %432 = arith.cmpi eq, %0, %431 : vector<8x8xi32>
    %c11_221 = arith.constant 11 : index
    %c2_222 = arith.constant 2 : index
    %433 = memref.load %arg3[%c11_221, %c2_222] : memref<15x4xf32, #tpu.memory_space<smem>>
    %434 = vector.broadcast %433 : f32 to vector<8x8xf32>
    %435 = arith.mulf %331, %434 : vector<8x8xf32>
    %c11_223 = arith.constant 11 : index
    %c2_224 = arith.constant 2 : index
    %436 = memref.load %arg4[%c11_223, %c2_224] : memref<15x4xf32, #tpu.memory_space<smem>>
    %437 = vector.broadcast %436 : f32 to vector<8x8xf32>
    %438 = arith.addf %435, %437 : vector<8x8xf32>
    %439 = arith.select %432, %438, %430 : vector<8x8xi1>, vector<8x8xf32>
    %c12_i32_225 = arith.constant 12 : i32
    %440 = vector.broadcast %c12_i32_225 : i32 to vector<8x8xi32>
    %441 = arith.cmpi eq, %0, %440 : vector<8x8xi32>
    %c12_226 = arith.constant 12 : index
    %c2_227 = arith.constant 2 : index
    %442 = memref.load %arg3[%c12_226, %c2_227] : memref<15x4xf32, #tpu.memory_space<smem>>
    %443 = vector.broadcast %442 : f32 to vector<8x8xf32>
    %444 = arith.mulf %331, %443 : vector<8x8xf32>
    %c12_228 = arith.constant 12 : index
    %c2_229 = arith.constant 2 : index
    %445 = memref.load %arg4[%c12_228, %c2_229] : memref<15x4xf32, #tpu.memory_space<smem>>
    %446 = vector.broadcast %445 : f32 to vector<8x8xf32>
    %447 = arith.addf %444, %446 : vector<8x8xf32>
    %448 = arith.select %441, %447, %439 : vector<8x8xi1>, vector<8x8xf32>
    %c13_i32_230 = arith.constant 13 : i32
    %449 = vector.broadcast %c13_i32_230 : i32 to vector<8x8xi32>
    %450 = arith.cmpi eq, %0, %449 : vector<8x8xi32>
    %c13_231 = arith.constant 13 : index
    %c2_232 = arith.constant 2 : index
    %451 = memref.load %arg3[%c13_231, %c2_232] : memref<15x4xf32, #tpu.memory_space<smem>>
    %452 = vector.broadcast %451 : f32 to vector<8x8xf32>
    %453 = arith.mulf %331, %452 : vector<8x8xf32>
    %c13_233 = arith.constant 13 : index
    %c2_234 = arith.constant 2 : index
    %454 = memref.load %arg4[%c13_233, %c2_234] : memref<15x4xf32, #tpu.memory_space<smem>>
    %455 = vector.broadcast %454 : f32 to vector<8x8xf32>
    %456 = arith.addf %453, %455 : vector<8x8xf32>
    %457 = arith.select %450, %456, %448 : vector<8x8xi1>, vector<8x8xf32>
    %c14_i32_235 = arith.constant 14 : i32
    %458 = vector.broadcast %c14_i32_235 : i32 to vector<8x8xi32>
    %459 = arith.cmpi eq, %0, %458 : vector<8x8xi32>
    %c14_236 = arith.constant 14 : index
    %c2_237 = arith.constant 2 : index
    %460 = memref.load %arg3[%c14_236, %c2_237] : memref<15x4xf32, #tpu.memory_space<smem>>
    %461 = vector.broadcast %460 : f32 to vector<8x8xf32>
    %462 = arith.mulf %331, %461 : vector<8x8xf32>
    %c14_238 = arith.constant 14 : index
    %c2_239 = arith.constant 2 : index
    %463 = memref.load %arg4[%c14_238, %c2_239] : memref<15x4xf32, #tpu.memory_space<smem>>
    %464 = vector.broadcast %463 : f32 to vector<8x8xf32>
    %465 = arith.addf %462, %464 : vector<8x8xf32>
    %466 = arith.select %459, %465, %457 : vector<8x8xi1>, vector<8x8xf32>
    %c0_240 = arith.constant 0 : index
    %c2_241 = arith.constant 2 : index
    %c0_242 = arith.constant 0 : index
    %c0_243 = arith.constant 0 : index
    %467 = vector.load %arg5[%c0_240, %c2_241, %c0_242, %c0_243] : memref<1x4x8x8xbf16, #tpu.memory_space<vmem>>, vector<1x1x8x8xbf16>
    %468 = vector.shape_cast %467 : vector<1x1x8x8xbf16> to vector<8x8xbf16>
    %469 = arith.extf %468 : vector<8x8xbf16> to vector<8x8xf32>
    %470 = arith.addf %466, %469 : vector<8x8xf32>
    %471 = arith.truncf %470 : vector<8x8xf32> to vector<8x8xbf16>
    %c0_244 = arith.constant 0 : index
    %c2_245 = arith.constant 2 : index
    %c0_246 = arith.constant 0 : index
    %c0_247 = arith.constant 0 : index
    %472 = vector.load %arg7[%c0_244, %c2_245, %c0_246, %c0_247] : memref<1x4x8x8xbf16, #tpu.memory_space<vmem>>, vector<1x1x8x8xbf16>
    %473 = vector.shape_cast %472 : vector<1x1x8x8xbf16> to vector<8x8xbf16>
    %474 = vector.shape_cast %471 : vector<8x8xbf16> to vector<1x1x8x8xbf16>
    tpu.vector_store %arg7[%c0_244, %c2_245, %c0_246, %c0_247], %474 {strides = array<i32>} : memref<1x4x8x8xbf16, #tpu.memory_space<vmem>>, vector<1x1x8x8xbf16>,
    %cst_248 = arith.constant dense<0xFF800000> : vector<8xf32>
    %475 = vector.multi_reduction <maximumf>, %470, %cst_248 [1] : vector<8x8xf32> to vector<8xf32>
    %476 = vector.shape_cast %475 : vector<8xf32> to vector<8x1xf32>
    %477 = vector.broadcast %476 : vector<8x1xf32> to vector<8x8xf32>
    %478 = arith.subf %470, %477 : vector<8x8xf32>
    %479 = math.exp %478 : vector<8x8xf32>
    %cst_249 = arith.constant dense<0.000000e+00> : vector<8xf32>
    %480 = vector.multi_reduction <add>, %479, %cst_249 [1] : vector<8x8xf32> to vector<8xf32>
    %481 = vector.shape_cast %480 : vector<8xf32> to vector<8x1xf32>
    %482 = tpu.reciprocal %481 {approx = true} : vector<8x1xf32> -> vector<8x1xf32>
    %483 = vector.broadcast %482 : vector<8x1xf32> to vector<8x8xf32>
    %484 = arith.mulf %479, %483 : vector<8x8xf32>
    %485 = arith.truncf %484 : vector<8x8xf32> to vector<8x8xbf16>
    %cst_250 = arith.constant dense<0.000000e+00> : vector<8x64xf32>
    %486 = tpu.matmul %485, %330, %cst_250 {dimension_numbers = #tpu.dot_dimension_numbers<[1], [0], [0], [1], [0, 0, 1, 1], [], []>} : vector<8x8xbf16>, vector<8x64xbf16>, vector<8x64xf32> -> vector<8x64xf32>
    %c0_251 = arith.constant 0 : index
    %c0_252 = arith.constant 0 : index
    %c192 = arith.constant 192 : index
    %487 = vector.load %arg1[%c0_251, %c0_252, %c192] : memref<1x8x768xbf16, #tpu.memory_space<vmem>>, vector<1x8x64xbf16>
    %488 = vector.shape_cast %487 : vector<1x8x64xbf16> to vector<8x64xbf16>
    %c0_253 = arith.constant 0 : index
    %c0_254 = arith.constant 0 : index
    %c448 = arith.constant 448 : index
    %489 = vector.load %arg1[%c0_253, %c0_254, %c448] : memref<1x8x768xbf16, #tpu.memory_space<vmem>>, vector<1x8x64xbf16>
    %490 = vector.shape_cast %489 : vector<1x8x64xbf16> to vector<8x64xbf16>
    %c0_255 = arith.constant 0 : index
    %c0_256 = arith.constant 0 : index
    %c704 = arith.constant 704 : index
    %491 = vector.load %arg1[%c0_255, %c0_256, %c704] : memref<1x8x768xbf16, #tpu.memory_space<vmem>>, vector<1x8x64xbf16>
    %492 = vector.shape_cast %491 : vector<1x8x64xbf16> to vector<8x64xbf16>
    %cst_257 = arith.constant dense<0.000000e+00> : vector<8x8xf32>
    %493 = tpu.matmul %488, %490, %cst_257 {dimension_numbers = #tpu.dot_dimension_numbers<[1], [1], [0], [0], [0, 0, 1, 0], [], []>} : vector<8x64xbf16>, vector<8x64xbf16>, vector<8x8xf32> -> vector<8x8xf32>
    %c0_i32_258 = arith.constant 0 : i32
    %494 = vector.broadcast %c0_i32_258 : i32 to vector<8x8xi32>
    %495 = arith.cmpi eq, %0, %494 : vector<8x8xi32>
    %c0_259 = arith.constant 0 : index
    %c3_260 = arith.constant 3 : index
    %496 = memref.load %arg3[%c0_259, %c3_260] : memref<15x4xf32, #tpu.memory_space<smem>>
    %497 = vector.broadcast %496 : f32 to vector<8x8xf32>
    %498 = arith.mulf %493, %497 : vector<8x8xf32>
    %c0_261 = arith.constant 0 : index
    %c3_262 = arith.constant 3 : index
    %499 = memref.load %arg4[%c0_261, %c3_262] : memref<15x4xf32, #tpu.memory_space<smem>>
    %500 = vector.broadcast %499 : f32 to vector<8x8xf32>
    %501 = arith.addf %498, %500 : vector<8x8xf32>
    %502 = arith.select %495, %501, %493 : vector<8x8xi1>, vector<8x8xf32>
    %c1_i32_263 = arith.constant 1 : i32
    %503 = vector.broadcast %c1_i32_263 : i32 to vector<8x8xi32>
    %504 = arith.cmpi eq, %0, %503 : vector<8x8xi32>
    %c1_264 = arith.constant 1 : index
    %c3_265 = arith.constant 3 : index
    %505 = memref.load %arg3[%c1_264, %c3_265] : memref<15x4xf32, #tpu.memory_space<smem>>
    %506 = vector.broadcast %505 : f32 to vector<8x8xf32>
    %507 = arith.mulf %493, %506 : vector<8x8xf32>
    %c1_266 = arith.constant 1 : index
    %c3_267 = arith.constant 3 : index
    %508 = memref.load %arg4[%c1_266, %c3_267] : memref<15x4xf32, #tpu.memory_space<smem>>
    %509 = vector.broadcast %508 : f32 to vector<8x8xf32>
    %510 = arith.addf %507, %509 : vector<8x8xf32>
    %511 = arith.select %504, %510, %502 : vector<8x8xi1>, vector<8x8xf32>
    %c2_i32_268 = arith.constant 2 : i32
    %512 = vector.broadcast %c2_i32_268 : i32 to vector<8x8xi32>
    %513 = arith.cmpi eq, %0, %512 : vector<8x8xi32>
    %c2_269 = arith.constant 2 : index
    %c3_270 = arith.constant 3 : index
    %514 = memref.load %arg3[%c2_269, %c3_270] : memref<15x4xf32, #tpu.memory_space<smem>>
    %515 = vector.broadcast %514 : f32 to vector<8x8xf32>
    %516 = arith.mulf %493, %515 : vector<8x8xf32>
    %c2_271 = arith.constant 2 : index
    %c3_272 = arith.constant 3 : index
    %517 = memref.load %arg4[%c2_271, %c3_272] : memref<15x4xf32, #tpu.memory_space<smem>>
    %518 = vector.broadcast %517 : f32 to vector<8x8xf32>
    %519 = arith.addf %516, %518 : vector<8x8xf32>
    %520 = arith.select %513, %519, %511 : vector<8x8xi1>, vector<8x8xf32>
    %c3_i32_273 = arith.constant 3 : i32
    %521 = vector.broadcast %c3_i32_273 : i32 to vector<8x8xi32>
    %522 = arith.cmpi eq, %0, %521 : vector<8x8xi32>
    %c3_274 = arith.constant 3 : index
    %c3_275 = arith.constant 3 : index
    %523 = memref.load %arg3[%c3_274, %c3_275] : memref<15x4xf32, #tpu.memory_space<smem>>
    %524 = vector.broadcast %523 : f32 to vector<8x8xf32>
    %525 = arith.mulf %493, %524 : vector<8x8xf32>
    %c3_276 = arith.constant 3 : index
    %c3_277 = arith.constant 3 : index
    %526 = memref.load %arg4[%c3_276, %c3_277] : memref<15x4xf32, #tpu.memory_space<smem>>
    %527 = vector.broadcast %526 : f32 to vector<8x8xf32>
    %528 = arith.addf %525, %527 : vector<8x8xf32>
    %529 = arith.select %522, %528, %520 : vector<8x8xi1>, vector<8x8xf32>
    %c4_i32_278 = arith.constant 4 : i32
    %530 = vector.broadcast %c4_i32_278 : i32 to vector<8x8xi32>
    %531 = arith.cmpi eq, %0, %530 : vector<8x8xi32>
    %c4_279 = arith.constant 4 : index
    %c3_280 = arith.constant 3 : index
    %532 = memref.load %arg3[%c4_279, %c3_280] : memref<15x4xf32, #tpu.memory_space<smem>>
    %533 = vector.broadcast %532 : f32 to vector<8x8xf32>
    %534 = arith.mulf %493, %533 : vector<8x8xf32>
    %c4_281 = arith.constant 4 : index
    %c3_282 = arith.constant 3 : index
    %535 = memref.load %arg4[%c4_281, %c3_282] : memref<15x4xf32, #tpu.memory_space<smem>>
    %536 = vector.broadcast %535 : f32 to vector<8x8xf32>
    %537 = arith.addf %534, %536 : vector<8x8xf32>
    %538 = arith.select %531, %537, %529 : vector<8x8xi1>, vector<8x8xf32>
    %c5_i32_283 = arith.constant 5 : i32
    %539 = vector.broadcast %c5_i32_283 : i32 to vector<8x8xi32>
    %540 = arith.cmpi eq, %0, %539 : vector<8x8xi32>
    %c5_284 = arith.constant 5 : index
    %c3_285 = arith.constant 3 : index
    %541 = memref.load %arg3[%c5_284, %c3_285] : memref<15x4xf32, #tpu.memory_space<smem>>
    %542 = vector.broadcast %541 : f32 to vector<8x8xf32>
    %543 = arith.mulf %493, %542 : vector<8x8xf32>
    %c5_286 = arith.constant 5 : index
    %c3_287 = arith.constant 3 : index
    %544 = memref.load %arg4[%c5_286, %c3_287] : memref<15x4xf32, #tpu.memory_space<smem>>
    %545 = vector.broadcast %544 : f32 to vector<8x8xf32>
    %546 = arith.addf %543, %545 : vector<8x8xf32>
    %547 = arith.select %540, %546, %538 : vector<8x8xi1>, vector<8x8xf32>
    %c6_i32_288 = arith.constant 6 : i32
    %548 = vector.broadcast %c6_i32_288 : i32 to vector<8x8xi32>
    %549 = arith.cmpi eq, %0, %548 : vector<8x8xi32>
    %c6_289 = arith.constant 6 : index
    %c3_290 = arith.constant 3 : index
    %550 = memref.load %arg3[%c6_289, %c3_290] : memref<15x4xf32, #tpu.memory_space<smem>>
    %551 = vector.broadcast %550 : f32 to vector<8x8xf32>
    %552 = arith.mulf %493, %551 : vector<8x8xf32>
    %c6_291 = arith.constant 6 : index
    %c3_292 = arith.constant 3 : index
    %553 = memref.load %arg4[%c6_291, %c3_292] : memref<15x4xf32, #tpu.memory_space<smem>>
    %554 = vector.broadcast %553 : f32 to vector<8x8xf32>
    %555 = arith.addf %552, %554 : vector<8x8xf32>
    %556 = arith.select %549, %555, %547 : vector<8x8xi1>, vector<8x8xf32>
    %c7_i32_293 = arith.constant 7 : i32
    %557 = vector.broadcast %c7_i32_293 : i32 to vector<8x8xi32>
    %558 = arith.cmpi eq, %0, %557 : vector<8x8xi32>
    %c7_294 = arith.constant 7 : index
    %c3_295 = arith.constant 3 : index
    %559 = memref.load %arg3[%c7_294, %c3_295] : memref<15x4xf32, #tpu.memory_space<smem>>
    %560 = vector.broadcast %559 : f32 to vector<8x8xf32>
    %561 = arith.mulf %493, %560 : vector<8x8xf32>
    %c7_296 = arith.constant 7 : index
    %c3_297 = arith.constant 3 : index
    %562 = memref.load %arg4[%c7_296, %c3_297] : memref<15x4xf32, #tpu.memory_space<smem>>
    %563 = vector.broadcast %562 : f32 to vector<8x8xf32>
    %564 = arith.addf %561, %563 : vector<8x8xf32>
    %565 = arith.select %558, %564, %556 : vector<8x8xi1>, vector<8x8xf32>
    %c8_i32_298 = arith.constant 8 : i32
    %566 = vector.broadcast %c8_i32_298 : i32 to vector<8x8xi32>
    %567 = arith.cmpi eq, %0, %566 : vector<8x8xi32>
    %c8_299 = arith.constant 8 : index
    %c3_300 = arith.constant 3 : index
    %568 = memref.load %arg3[%c8_299, %c3_300] : memref<15x4xf32, #tpu.memory_space<smem>>
    %569 = vector.broadcast %568 : f32 to vector<8x8xf32>
    %570 = arith.mulf %493, %569 : vector<8x8xf32>
    %c8_301 = arith.constant 8 : index
    %c3_302 = arith.constant 3 : index
    %571 = memref.load %arg4[%c8_301, %c3_302] : memref<15x4xf32, #tpu.memory_space<smem>>
    %572 = vector.broadcast %571 : f32 to vector<8x8xf32>
    %573 = arith.addf %570, %572 : vector<8x8xf32>
    %574 = arith.select %567, %573, %565 : vector<8x8xi1>, vector<8x8xf32>
    %c9_i32_303 = arith.constant 9 : i32
    %575 = vector.broadcast %c9_i32_303 : i32 to vector<8x8xi32>
    %576 = arith.cmpi eq, %0, %575 : vector<8x8xi32>
    %c9_304 = arith.constant 9 : index
    %c3_305 = arith.constant 3 : index
    %577 = memref.load %arg3[%c9_304, %c3_305] : memref<15x4xf32, #tpu.memory_space<smem>>
    %578 = vector.broadcast %577 : f32 to vector<8x8xf32>
    %579 = arith.mulf %493, %578 : vector<8x8xf32>
    %c9_306 = arith.constant 9 : index
    %c3_307 = arith.constant 3 : index
    %580 = memref.load %arg4[%c9_306, %c3_307] : memref<15x4xf32, #tpu.memory_space<smem>>
    %581 = vector.broadcast %580 : f32 to vector<8x8xf32>
    %582 = arith.addf %579, %581 : vector<8x8xf32>
    %583 = arith.select %576, %582, %574 : vector<8x8xi1>, vector<8x8xf32>
    %c10_i32_308 = arith.constant 10 : i32
    %584 = vector.broadcast %c10_i32_308 : i32 to vector<8x8xi32>
    %585 = arith.cmpi eq, %0, %584 : vector<8x8xi32>
    %c10_309 = arith.constant 10 : index
    %c3_310 = arith.constant 3 : index
    %586 = memref.load %arg3[%c10_309, %c3_310] : memref<15x4xf32, #tpu.memory_space<smem>>
    %587 = vector.broadcast %586 : f32 to vector<8x8xf32>
    %588 = arith.mulf %493, %587 : vector<8x8xf32>
    %c10_311 = arith.constant 10 : index
    %c3_312 = arith.constant 3 : index
    %589 = memref.load %arg4[%c10_311, %c3_312] : memref<15x4xf32, #tpu.memory_space<smem>>
    %590 = vector.broadcast %589 : f32 to vector<8x8xf32>
    %591 = arith.addf %588, %590 : vector<8x8xf32>
    %592 = arith.select %585, %591, %583 : vector<8x8xi1>, vector<8x8xf32>
    %c11_i32_313 = arith.constant 11 : i32
    %593 = vector.broadcast %c11_i32_313 : i32 to vector<8x8xi32>
    %594 = arith.cmpi eq, %0, %593 : vector<8x8xi32>
    %c11_314 = arith.constant 11 : index
    %c3_315 = arith.constant 3 : index
    %595 = memref.load %arg3[%c11_314, %c3_315] : memref<15x4xf32, #tpu.memory_space<smem>>
    %596 = vector.broadcast %595 : f32 to vector<8x8xf32>
    %597 = arith.mulf %493, %596 : vector<8x8xf32>
    %c11_316 = arith.constant 11 : index
    %c3_317 = arith.constant 3 : index
    %598 = memref.load %arg4[%c11_316, %c3_317] : memref<15x4xf32, #tpu.memory_space<smem>>
    %599 = vector.broadcast %598 : f32 to vector<8x8xf32>
    %600 = arith.addf %597, %599 : vector<8x8xf32>
    %601 = arith.select %594, %600, %592 : vector<8x8xi1>, vector<8x8xf32>
    %c12_i32_318 = arith.constant 12 : i32
    %602 = vector.broadcast %c12_i32_318 : i32 to vector<8x8xi32>
    %603 = arith.cmpi eq, %0, %602 : vector<8x8xi32>
    %c12_319 = arith.constant 12 : index
    %c3_320 = arith.constant 3 : index
    %604 = memref.load %arg3[%c12_319, %c3_320] : memref<15x4xf32, #tpu.memory_space<smem>>
    %605 = vector.broadcast %604 : f32 to vector<8x8xf32>
    %606 = arith.mulf %493, %605 : vector<8x8xf32>
    %c12_321 = arith.constant 12 : index
    %c3_322 = arith.constant 3 : index
    %607 = memref.load %arg4[%c12_321, %c3_322] : memref<15x4xf32, #tpu.memory_space<smem>>
    %608 = vector.broadcast %607 : f32 to vector<8x8xf32>
    %609 = arith.addf %606, %608 : vector<8x8xf32>
    %610 = arith.select %603, %609, %601 : vector<8x8xi1>, vector<8x8xf32>
    %c13_i32_323 = arith.constant 13 : i32
    %611 = vector.broadcast %c13_i32_323 : i32 to vector<8x8xi32>
    %612 = arith.cmpi eq, %0, %611 : vector<8x8xi32>
    %c13_324 = arith.constant 13 : index
    %c3_325 = arith.constant 3 : index
    %613 = memref.load %arg3[%c13_324, %c3_325] : memref<15x4xf32, #tpu.memory_space<smem>>
    %614 = vector.broadcast %613 : f32 to vector<8x8xf32>
    %615 = arith.mulf %493, %614 : vector<8x8xf32>
    %c13_326 = arith.constant 13 : index
    %c3_327 = arith.constant 3 : index
    %616 = memref.load %arg4[%c13_326, %c3_327] : memref<15x4xf32, #tpu.memory_space<smem>>
    %617 = vector.broadcast %616 : f32 to vector<8x8xf32>
    %618 = arith.addf %615, %617 : vector<8x8xf32>
    %619 = arith.select %612, %618, %610 : vector<8x8xi1>, vector<8x8xf32>
    %c14_i32_328 = arith.constant 14 : i32
    %620 = vector.broadcast %c14_i32_328 : i32 to vector<8x8xi32>
    %621 = arith.cmpi eq, %0, %620 : vector<8x8xi32>
    %c14_329 = arith.constant 14 : index
    %c3_330 = arith.constant 3 : index
    %622 = memref.load %arg3[%c14_329, %c3_330] : memref<15x4xf32, #tpu.memory_space<smem>>
    %623 = vector.broadcast %622 : f32 to vector<8x8xf32>
    %624 = arith.mulf %493, %623 : vector<8x8xf32>
    %c14_331 = arith.constant 14 : index
    %c3_332 = arith.constant 3 : index
    %625 = memref.load %arg4[%c14_331, %c3_332] : memref<15x4xf32, #tpu.memory_space<smem>>
    %626 = vector.broadcast %625 : f32 to vector<8x8xf32>
    %627 = arith.addf %624, %626 : vector<8x8xf32>
    %628 = arith.select %621, %627, %619 : vector<8x8xi1>, vector<8x8xf32>
    %c0_333 = arith.constant 0 : index
    %c3_334 = arith.constant 3 : index
    %c0_335 = arith.constant 0 : index
    %c0_336 = arith.constant 0 : index
    %629 = vector.load %arg5[%c0_333, %c3_334, %c0_335, %c0_336] : memref<1x4x8x8xbf16, #tpu.memory_space<vmem>>, vector<1x1x8x8xbf16>
    %630 = vector.shape_cast %629 : vector<1x1x8x8xbf16> to vector<8x8xbf16>
    %631 = arith.extf %630 : vector<8x8xbf16> to vector<8x8xf32>
    %632 = arith.addf %628, %631 : vector<8x8xf32>
    %633 = arith.truncf %632 : vector<8x8xf32> to vector<8x8xbf16>
    %c0_337 = arith.constant 0 : index
    %c3_338 = arith.constant 3 : index
    %c0_339 = arith.constant 0 : index
    %c0_340 = arith.constant 0 : index
    %634 = vector.load %arg7[%c0_337, %c3_338, %c0_339, %c0_340] : memref<1x4x8x8xbf16, #tpu.memory_space<vmem>>, vector<1x1x8x8xbf16>
    %635 = vector.shape_cast %634 : vector<1x1x8x8xbf16> to vector<8x8xbf16>
    %636 = vector.shape_cast %633 : vector<8x8xbf16> to vector<1x1x8x8xbf16>
    tpu.vector_store %arg7[%c0_337, %c3_338, %c0_339, %c0_340], %636 {strides = array<i32>} : memref<1x4x8x8xbf16, #tpu.memory_space<vmem>>, vector<1x1x8x8xbf16>,
    %cst_341 = arith.constant dense<0xFF800000> : vector<8xf32>
    %637 = vector.multi_reduction <maximumf>, %632, %cst_341 [1] : vector<8x8xf32> to vector<8xf32>
    %638 = vector.shape_cast %637 : vector<8xf32> to vector<8x1xf32>
    %639 = vector.broadcast %638 : vector<8x1xf32> to vector<8x8xf32>
    %640 = arith.subf %632, %639 : vector<8x8xf32>
    %641 = math.exp %640 : vector<8x8xf32>
    %cst_342 = arith.constant dense<0.000000e+00> : vector<8xf32>
    %642 = vector.multi_reduction <add>, %641, %cst_342 [1] : vector<8x8xf32> to vector<8xf32>
    %643 = vector.shape_cast %642 : vector<8xf32> to vector<8x1xf32>
    %644 = tpu.reciprocal %643 {approx = true} : vector<8x1xf32> -> vector<8x1xf32>
    %645 = vector.broadcast %644 : vector<8x1xf32> to vector<8x8xf32>
    %646 = arith.mulf %641, %645 : vector<8x8xf32>
    %647 = arith.truncf %646 : vector<8x8xf32> to vector<8x8xbf16>
    %cst_343 = arith.constant dense<0.000000e+00> : vector<8x64xf32>
    %648 = tpu.matmul %647, %492, %cst_343 {dimension_numbers = #tpu.dot_dimension_numbers<[1], [0], [0], [1], [0, 0, 1, 1], [], []>} : vector<8x8xbf16>, vector<8x64xbf16>, vector<8x64xf32> -> vector<8x64xf32>
    %649 = tpu.concatenate %162, %324, %486, %648 in 1 : vector<8x64xf32>, vector<8x64xf32>, vector<8x64xf32>, vector<8x64xf32> -> vector<8x256xf32>
    %650 = arith.truncf %649 : vector<8x256xf32> to vector<8x256xbf16>
    %c0_344 = arith.constant 0 : index
    %c0_345 = arith.constant 0 : index
    %c0_346 = arith.constant 0 : index
    %651 = vector.load %arg6[%c0_344, %c0_345, %c0_346] : memref<1x8x256xbf16, #tpu.memory_space<vmem>>, vector<1x8x256xbf16>
    %652 = vector.shape_cast %651 : vector<1x8x256xbf16> to vector<8x256xbf16>
    %653 = vector.shape_cast %650 : vector<8x256xbf16> to vector<1x8x256xbf16>
    tpu.vector_store %arg6[%c0_344, %c0_345, %c0_346], %653 {strides = array<i32>} : memref<1x8x256xbf16, #tpu.memory_space<vmem>>, vector<1x8x256xbf16>,
    return
  }
  func.func @transform_0(%arg0: i32) -> (i32, i32, i32) {
    %c0_i32 = arith.constant 0 : i32
    %c0_i32_0 = arith.constant 0 : i32
    %c0_i32_1 = arith.constant 0 : i32
    return %arg0, %c0_i32, %c0_i32_0 : i32, i32, i32
  }
  func.func @transform_1(%arg0: i32) -> (i32, i32) {
    %c0_i32 = arith.constant 0 : i32
    %c0_i32_0 = arith.constant 0 : i32
    %c0_i32_1 = arith.constant 0 : i32
    return %c0_i32, %c0_i32_0 : i32, i32
  }
  func.func @transform_2(%arg0: i32) -> (i32, i32) {
    %c0_i32 = arith.constant 0 : i32
    %c0_i32_0 = arith.constant 0 : i32
    %c0_i32_1 = arith.constant 0 : i32
    return %c0_i32, %c0_i32_0 : i32, i32
  }
  func.func @transform_3(%arg0: i32) -> (i32, i32) {
    %c0_i32 = arith.constant 0 : i32
    %c0_i32_0 = arith.constant 0 : i32
    %c0_i32_1 = arith.constant 0 : i32
    return %c0_i32, %c0_i32_0 : i32, i32
  }
  func.func @transform_4(%arg0: i32) -> (i32, i32, i32, i32) {
    %c0_i32 = arith.constant 0 : i32
    %c0_i32_0 = arith.constant 0 : i32
    %c0_i32_1 = arith.constant 0 : i32
    %c0_i32_2 = arith.constant 0 : i32
    return %arg0, %c0_i32, %c0_i32_0, %c0_i32_1 : i32, i32, i32, i32
  }
  func.func @transform_5(%arg0: i32) -> (i32, i32, i32) {
    %c0_i32 = arith.constant 0 : i32
    %c0_i32_0 = arith.constant 0 : i32
    %c0_i32_1 = arith.constant 0 : i32
    return %arg0, %c0_i32, %c0_i32_0 : i32, i32, i32
  }
  func.func @transform_6(%arg0: i32) -> (i32, i32, i32, i32) {
    %c0_i32 = arith.constant 0 : i32
    %c0_i32_0 = arith.constant 0 : i32
    %c0_i32_1 = arith.constant 0 : i32
    %c0_i32_2 = arith.constant 0 : i32
    return %arg0, %c0_i32, %c0_i32_0, %c0_i32_1 : i32, i32, i32, i32
  }
}

module attributes {stable_mosaic.version = 11 : i64} {
  func.func @_attn_kernel(%arg0: i32, %arg1: memref<1x8x768xbf16, #tpu.memory_space<vmem>>, %arg2: memref<8x8xi32, #tpu.memory_space<vmem>>, %arg3: memref<15x4xf32, #tpu.memory_space<smem>>, %arg4: memref<15x4xf32, #tpu.memory_space<smem>>, %arg5: memref<1x4x8x8xbf16, #tpu.memory_space<vmem>>, %arg6: memref<1x8x256xbf16, #tpu.memory_space<vmem>>, %arg7: memref<1x4x8x8xbf16, #tpu.memory_space<vmem>>) attributes {dimension_semantics = [#tpu.dimension_semantics<parallel>], iteration_bounds = array<i64: 2>, scalar_prefetch = 0 : i64, scratch_operands = 0 : i64, tpu.core_type = #tpu.core_type<tc>, window_params = [{transform_indices = @transform_0, window_bounds = array<i64: 1, 8, 768>}, {pipeline_mode = #tpu.pipeline_mode<synchronous>, transform_indices = @transform_1, window_bounds = array<i64: 8, 8>}, {transform_indices = @transform_2, window_bounds = array<i64: 15, 4>}, {transform_indices = @transform_3, window_bounds = array<i64: 15, 4>}, {transform_indices = @transform_4, window_bounds = array<i64: 1, 4, 8, 8>}, {transform_indices = @transform_5, window_bounds = array<i64: 1, 8, 256>}, {transform_indices = @transform_6, window_bounds = array<i64: 1, 4, 8, 8>}]} {
    %c0 = arith.constant 0 : index
    %c0_0 = arith.constant 0 : index
    %0 = vector.load %arg2[%c0, %c0_0] : memref<8x8xi32, #tpu.memory_space<vmem>>, vector<8x8xi32>
    %c0_1 = arith.constant 0 : index
    %c0_2 = arith.constant 0 : index
    %c0_3 = arith.constant 0 : index
    %1 = vector.load %arg1[%c0_1, %c0_2, %c0_3] : memref<1x8x768xbf16, #tpu.memory_space<vmem>>, vector<1x8x64xbf16>
    %2 = vector.shape_cast %1 : vector<1x8x64xbf16> to vector<8x64xbf16>
    %c0_4 = arith.constant 0 : index
    %c0_5 = arith.constant 0 : index
    %c256 = arith.constant 256 : index
    %3 = vector.load %arg1[%c0_4, %c0_5, %c256] : memref<1x8x768xbf16, #tpu.memory_space<vmem>>, vector<1x8x64xbf16>
    %4 = vector.shape_cast %3 : vector<1x8x64xbf16> to vector<8x64xbf16>
    %c0_6 = arith.constant 0 : index
    %c0_7 = arith.constant 0 : index
    %c512 = arith.constant 512 : index
    %5 = vector.load %arg1[%c0_6, %c0_7, %c512] : memref<1x8x768xbf16, #tpu.memory_space<vmem>>, vector<1x8x64xbf16>
    %6 = vector.shape_cast %5 : vector<1x8x64xbf16> to vector<8x64xbf16>
    %cst = arith.constant dense<0.000000e+00> : vector<8x8xf32>
    %7 = tpu.matmul %2, %4, %cst {dimension_numbers = #tpu.dot_dimension_numbers<[1], [1], [0], [0], [0, 0, 1, 0], [], []>} : vector<8x64xbf16>, vector<8x64xbf16>, vector<8x8xf32> -> vector<8x8xf32>
    %c0_i32 = arith.constant 0 : i32
    %8 = vector.broadcast %c0_i32 : i32 to vector<8x8xi32>
    %9 = arith.cmpi eq, %0, %8 : vector<8x8xi32>
    %c0_8 = arith.constant 0 : index
    %c0_9 = arith.constant 0 : index
    %10 = memref.load %arg3[%c0_8, %c0_9] : memref<15x4xf32, #tpu.memory_space<smem>>
    %11 = vector.broadcast %10 : f32 to vector<8x8xf32>
    %12 = arith.mulf %7, %11 : vector<8x8xf32>
    %c0_10 = arith.constant 0 : index
    %c0_11 = arith.constant 0 : index
    %13 = memref.load %arg4[%c0_10, %c0_11] : memref<15x4xf32, #tpu.memory_space<smem>>
    %14 = vector.broadcast %13 : f32 to vector<8x8xf32>
    %15 = arith.addf %12, %14 : vector<8x8xf32>
    %16 = arith.select %9, %15, %7 : vector<8x8xi1>, vector<8x8xf32>
    %c1_i32 = arith.constant 1 : i32
    %17 = vector.broadcast %c1_i32 : i32 to vector<8x8xi32>
    %18 = arith.cmpi eq, %0, %17 : vector<8x8xi32>
    %c1 = arith.constant 1 : index
    %c0_12 = arith.constant 0 : index
    %19 = memref.load %arg3[%c1, %c0_12] : memref<15x4xf32, #tpu.memory_space<smem>>
    %20 = vector.broadcast %19 : f32 to vector<8x8xf32>
    %21 = arith.mulf %7, %20 : vector<8x8xf32>
    %c1_13 = arith.constant 1 : index
    %c0_14 = arith.constant 0 : index
    %22 = memref.load %arg4[%c1_13, %c0_14] : memref<15x4xf32, #tpu.memory_space<smem>>
    %23 = vector.broadcast %22 : f32 to vector<8x8xf32>
    %24 = arith.addf %21, %23 : vector<8x8xf32>
    %25 = arith.select %18, %24, %16 : vector<8x8xi1>, vector<8x8xf32>
    %c2_i32 = arith.constant 2 : i32
    %26 = vector.broadcast %c2_i32 : i32 to vector<8x8xi32>
    %27 = arith.cmpi eq, %0, %26 : vector<8x8xi32>
    %c2 = arith.constant 2 : index
    %c0_15 = arith.constant 0 : index
    %28 = memref.load %arg3[%c2, %c0_15] : memref<15x4xf32, #tpu.memory_space<smem>>
    %29 = vector.broadcast %28 : f32 to vector<8x8xf32>
    %30 = arith.mulf %7, %29 : vector<8x8xf32>
    %c2_16 = arith.constant 2 : index
    %c0_17 = arith.constant 0 : index
    %31 = memref.load %arg4[%c2_16, %c0_17] : memref<15x4xf32, #tpu.memory_space<smem>>
    %32 = vector.broadcast %31 : f32 to vector<8x8xf32>
    %33 = arith.addf %30, %32 : vector<8x8xf32>
    %34 = arith.select %27, %33, %25 : vector<8x8xi1>, vector<8x8xf32>
    %c3_i32 = arith.constant 3 : i32
    %35 = vector.broadcast %c3_i32 : i32 to vector<8x8xi32>
    %36 = arith.cmpi eq, %0, %35 : vector<8x8xi32>
    %c3 = arith.constant 3 : index
    %c0_18 = arith.constant 0 : index
    %37 = memref.load %arg3[%c3, %c0_18] : memref<15x4xf32, #tpu.memory_space<smem>>
    %38 = vector.broadcast %37 : f32 to vector<8x8xf32>
    %39 = arith.mulf %7, %38 : vector<8x8xf32>
    %c3_19 = arith.constant 3 : index
    %c0_20 = arith.constant 0 : index
    %40 = memref.load %arg4[%c3_19, %c0_20] : memref<15x4xf32, #tpu.memory_space<smem>>
    %41 = vector.broadcast %40 : f32 to vector<8x8xf32>
    %42 = arith.addf %39, %41 : vector<8x8xf32>
    %43 = arith.select %36, %42, %34 : vector<8x8xi1>, vector<8x8xf32>
    %c4_i32 = arith.constant 4 : i32
    %44 = vector.broadcast %c4_i32 : i32 to vector<8x8xi32>
    %45 = arith.cmpi eq, %0, %44 : vector<8x8xi32>
    %c4 = arith.constant 4 : index
    %c0_21 = arith.constant 0 : index
    %46 = memref.load %arg3[%c4, %c0_21] : memref<15x4xf32, #tpu.memory_space<smem>>
    %47 = vector.broadcast %46 : f32 to vector<8x8xf32>
    %48 = arith.mulf %7, %47 : vector<8x8xf32>
    %c4_22 = arith.constant 4 : index
    %c0_23 = arith.constant 0 : index
    %49 = memref.load %arg4[%c4_22, %c0_23] : memref<15x4xf32, #tpu.memory_space<smem>>
    %50 = vector.broadcast %49 : f32 to vector<8x8xf32>
    %51 = arith.addf %48, %50 : vector<8x8xf32>
    %52 = arith.select %45, %51, %43 : vector<8x8xi1>, vector<8x8xf32>
    %c5_i32 = arith.constant 5 : i32
    %53 = vector.broadcast %c5_i32 : i32 to vector<8x8xi32>
    %54 = arith.cmpi eq, %0, %53 : vector<8x8xi32>
    %c5 = arith.constant 5 : index
    %c0_24 = arith.constant 0 : index
    %55 = memref.load %arg3[%c5, %c0_24] : memref<15x4xf32, #tpu.memory_space<smem>>
    %56 = vector.broadcast %55 : f32 to vector<8x8xf32>
    %57 = arith.mulf %7, %56 : vector<8x8xf32>
    %c5_25 = arith.constant 5 : index
    %c0_26 = arith.constant 0 : index
    %58 = memref.load %arg4[%c5_25, %c0_26] : memref<15x4xf32, #tpu.memory_space<smem>>
    %59 = vector.broadcast %58 : f32 to vector<8x8xf32>
    %60 = arith.addf %57, %59 : vector<8x8xf32>
    %61 = arith.select %54, %60, %52 : vector<8x8xi1>, vector<8x8xf32>
    %c6_i32 = arith.constant 6 : i32
    %62 = vector.broadcast %c6_i32 : i32 to vector<8x8xi32>
    %63 = arith.cmpi eq, %0, %62 : vector<8x8xi32>
    %c6 = arith.constant 6 : index
    %c0_27 = arith.constant 0 : index
    %64 = memref.load %arg3[%c6, %c0_27] : memref<15x4xf32, #tpu.memory_space<smem>>
    %65 = vector.broadcast %64 : f32 to vector<8x8xf32>
    %66 = arith.mulf %7, %65 : vector<8x8xf32>
    %c6_28 = arith.constant 6 : index
    %c0_29 = arith.constant 0 : index
    %67 = memref.load %arg4[%c6_28, %c0_29] : memref<15x4xf32, #tpu.memory_space<smem>>
    %68 = vector.broadcast %67 : f32 to vector<8x8xf32>
    %69 = arith.addf %66, %68 : vector<8x8xf32>
    %70 = arith.select %63, %69, %61 : vector<8x8xi1>, vector<8x8xf32>
    %c7_i32 = arith.constant 7 : i32
    %71 = vector.broadcast %c7_i32 : i32 to vector<8x8xi32>
    %72 = arith.cmpi eq, %0, %71 : vector<8x8xi32>
    %c7 = arith.constant 7 : index
    %c0_30 = arith.constant 0 : index
    %73 = memref.load %arg3[%c7, %c0_30] : memref<15x4xf32, #tpu.memory_space<smem>>
    %74 = vector.broadcast %73 : f32 to vector<8x8xf32>
    %75 = arith.mulf %7, %74 : vector<8x8xf32>
    %c7_31 = arith.constant 7 : index
    %c0_32 = arith.constant 0 : index
    %76 = memref.load %arg4[%c7_31, %c0_32] : memref<15x4xf32, #tpu.memory_space<smem>>
    %77 = vector.broadcast %76 : f32 to vector<8x8xf32>
    %78 = arith.addf %75, %77 : vector<8x8xf32>
    %79 = arith.select %72, %78, %70 : vector<8x8xi1>, vector<8x8xf32>
    %c8_i32 = arith.constant 8 : i32
    %80 = vector.broadcast %c8_i32 : i32 to vector<8x8xi32>
    %81 = arith.cmpi eq, %0, %80 : vector<8x8xi32>
    %c8 = arith.constant 8 : index
    %c0_33 = arith.constant 0 : index
    %82 = memref.load %arg3[%c8, %c0_33] : memref<15x4xf32, #tpu.memory_space<smem>>
    %83 = vector.broadcast %82 : f32 to vector<8x8xf32>
    %84 = arith.mulf %7, %83 : vector<8x8xf32>
    %c8_34 = arith.constant 8 : index
    %c0_35 = arith.constant 0 : index
    %85 = memref.load %arg4[%c8_34, %c0_35] : memref<15x4xf32, #tpu.memory_space<smem>>
    %86 = vector.broadcast %85 : f32 to vector<8x8xf32>
    %87 = arith.addf %84, %86 : vector<8x8xf32>
    %88 = arith.select %81, %87, %79 : vector<8x8xi1>, vector<8x8xf32>
    %c9_i32 = arith.constant 9 : i32
    %89 = vector.broadcast %c9_i32 : i32 to vector<8x8xi32>
    %90 = arith.cmpi eq, %0, %89 : vector<8x8xi32>
    %c9 = arith.constant 9 : index
    %c0_36 = arith.constant 0 : index
    %91 = memref.load %arg3[%c9, %c0_36] : memref<15x4xf32, #tpu.memory_space<smem>>
    %92 = vector.broadcast %91 : f32 to vector<8x8xf32>
    %93 = arith.mulf %7, %92 : vector<8x8xf32>
    %c9_37 = arith.constant 9 : index
    %c0_38 = arith.constant 0 : index
    %94 = memref.load %arg4[%c9_37, %c0_38] : memref<15x4xf32, #tpu.memory_space<smem>>
    %95 = vector.broadcast %94 : f32 to vector<8x8xf32>
    %96 = arith.addf %93, %95 : vector<8x8xf32>
    %97 = arith.select %90, %96, %88 : vector<8x8xi1>, vector<8x8xf32>
    %c10_i32 = arith.constant 10 : i32
    %98 = vector.broadcast %c10_i32 : i32 to vector<8x8xi32>
    %99 = arith.cmpi eq, %0, %98 : vector<8x8xi32>
    %c10 = arith.constant 10 : index
    %c0_39 = arith.constant 0 : index
    %100 = memref.load %arg3[%c10, %c0_39] : memref<15x4xf32, #tpu.memory_space<smem>>
    %101 = vector.broadcast %100 : f32 to vector<8x8xf32>
    %102 = arith.mulf %7, %101 : vector<8x8xf32>
    %c10_40 = arith.constant 10 : index
    %c0_41 = arith.constant 0 : index
    %103 = memref.load %arg4[%c10_40, %c0_41] : memref<15x4xf32, #tpu.memory_space<smem>>
    %104 = vector.broadcast %103 : f32 to vector<8x8xf32>
    %105 = arith.addf %102, %104 : vector<8x8xf32>
    %106 = arith.select %99, %105, %97 : vector<8x8xi1>, vector<8x8xf32>
    %c11_i32 = arith.constant 11 : i32
    %107 = vector.broadcast %c11_i32 : i32 to vector<8x8xi32>
    %108 = arith.cmpi eq, %0, %107 : vector<8x8xi32>
    %c11 = arith.constant 11 : index
    %c0_42 = arith.constant 0 : index
    %109 = memref.load %arg3[%c11, %c0_42] : memref<15x4xf32, #tpu.memory_space<smem>>
    %110 = vector.broadcast %109 : f32 to vector<8x8xf32>
    %111 = arith.mulf %7, %110 : vector<8x8xf32>
    %c11_43 = arith.constant 11 : index
    %c0_44 = arith.constant 0 : index
    %112 = memref.load %arg4[%c11_43, %c0_44] : memref<15x4xf32, #tpu.memory_space<smem>>
    %113 = vector.broadcast %112 : f32 to vector<8x8xf32>
    %114 = arith.addf %111, %113 : vector<8x8xf32>
    %115 = arith.select %108, %114, %106 : vector<8x8xi1>, vector<8x8xf32>
    %c12_i32 = arith.constant 12 : i32
    %116 = vector.broadcast %c12_i32 : i32 to vector<8x8xi32>
    %117 = arith.cmpi eq, %0, %116 : vector<8x8xi32>
    %c12 = arith.constant 12 : index
    %c0_45 = arith.constant 0 : index
    %118 = memref.load %arg3[%c12, %c0_45] : memref<15x4xf32, #tpu.memory_space<smem>>
    %119 = vector.broadcast %118 : f32 to vector<8x8xf32>
    %120 = arith.mulf %7, %119 : vector<8x8xf32>
    %c12_46 = arith.constant 12 : index
    %c0_47 = arith.constant 0 : index
    %121 = memref.load %arg4[%c12_46, %c0_47] : memref<15x4xf32, #tpu.memory_space<smem>>
    %122 = vector.broadcast %121 : f32 to vector<8x8xf32>
    %123 = arith.addf %120, %122 : vector<8x8xf32>
    %124 = arith.select %117, %123, %115 : vector<8x8xi1>, vector<8x8xf32>
    %c13_i32 = arith.constant 13 : i32
    %125 = vector.broadcast %c13_i32 : i32 to vector<8x8xi32>
    %126 = arith.cmpi eq, %0, %125 : vector<8x8xi32>
    %c13 = arith.constant 13 : index
    %c0_48 = arith.constant 0 : index
    %127 = memref.load %arg3[%c13, %c0_48] : memref<15x4xf32, #tpu.memory_space<smem>>
    %128 = vector.broadcast %127 : f32 to vector<8x8xf32>
    %129 = arith.mulf %7, %128 : vector<8x8xf32>
    %c13_49 = arith.constant 13 : index
    %c0_50 = arith.constant 0 : index
    %130 = memref.load %arg4[%c13_49, %c0_50] : memref<15x4xf32, #tpu.memory_space<smem>>
    %131 = vector.broadcast %130 : f32 to vector<8x8xf32>
    %132 = arith.addf %129, %131 : vector<8x8xf32>
    %133 = arith.select %126, %132, %124 : vector<8x8xi1>, vector<8x8xf32>
    %c14_i32 = arith.constant 14 : i32
    %134 = vector.broadcast %c14_i32 : i32 to vector<8x8xi32>
    %135 = arith.cmpi eq, %0, %134 : vector<8x8xi32>
    %c14 = arith.constant 14 : index
    %c0_51 = arith.constant 0 : index
    %136 = memref.load %arg3[%c14, %c0_51] : memref<15x4xf32, #tpu.memory_space<smem>>
    %137 = vector.broadcast %136 : f32 to vector<8x8xf32>
    %138 = arith.mulf %7, %137 : vector<8x8xf32>
    %c14_52 = arith.constant 14 : index
    %c0_53 = arith.constant 0 : index
    %139 = memref.load %arg4[%c14_52, %c0_53] : memref<15x4xf32, #tpu.memory_space<smem>>
    %140 = vector.broadcast %139 : f32 to vector<8x8xf32>
    %141 = arith.addf %138, %140 : vector<8x8xf32>
    %142 = arith.select %135, %141, %133 : vector<8x8xi1>, vector<8x8xf32>
    %c0_54 = arith.constant 0 : index
    %c0_55 = arith.constant 0 : index
    %c0_56 = arith.constant 0 : index
    %c0_57 = arith.constant 0 : index
    %143 = vector.load %arg5[%c0_54, %c0_55, %c0_56, %c0_57] : memref<1x4x8x8xbf16, #tpu.memory_space<vmem>>, vector<1x1x8x8xbf16>
    %144 = vector.shape_cast %143 : vector<1x1x8x8xbf16> to vector<8x8xbf16>
    %145 = arith.extf %144 : vector<8x8xbf16> to vector<8x8xf32>
    %146 = arith.addf %142, %145 : vector<8x8xf32>
    %147 = arith.truncf %146 : vector<8x8xf32> to vector<8x8xbf16>
    %c0_58 = arith.constant 0 : index
    %c0_59 = arith.constant 0 : index
    %c0_60 = arith.constant 0 : index
    %c0_61 = arith.constant 0 : index
    %148 = vector.load %arg7[%c0_58, %c0_59, %c0_60, %c0_61] : memref<1x4x8x8xbf16, #tpu.memory_space<vmem>>, vector<1x1x8x8xbf16>
    %149 = vector.shape_cast %148 : vector<1x1x8x8xbf16> to vector<8x8xbf16>
    %150 = vector.shape_cast %147 : vector<8x8xbf16> to vector<1x1x8x8xbf16>
    tpu.vector_store %arg7[%c0_58, %c0_59, %c0_60, %c0_61], %150 {strides = array<i32>} : memref<1x4x8x8xbf16, #tpu.memory_space<vmem>>, vector<1x1x8x8xbf16>,
    %cst_62 = arith.constant dense<0xFF800000> : vector<8xf32>
    %151 = vector.multi_reduction <maximumf>, %146, %cst_62 [1] : vector<8x8xf32> to vector<8xf32>
    %152 = vector.shape_cast %151 : vector<8xf32> to vector<8x1xf32>
    %153 = vector.broadcast %152 : vector<8x1xf32> to vector<8x8xf32>
    %154 = arith.subf %146, %153 : vector<8x8xf32>
    %155 = math.exp %154 : vector<8x8xf32>
    %cst_63 = arith.constant dense<0.000000e+00> : vector<8xf32>
    %156 = vector.multi_reduction <add>, %155, %cst_63 [1] : vector<8x8xf32> to vector<8xf32>
    %157 = vector.shape_cast %156 : vector<8xf32> to vector<8x1xf32>
    %158 = tpu.reciprocal %157 {approx = true} : vector<8x1xf32> -> vector<8x1xf32>
    %159 = vector.broadcast %158 : vector<8x1xf32> to vector<8x8xf32>
    %160 = arith.mulf %155, %159 : vector<8x8xf32>
    %161 = arith.truncf %160 : vector<8x8xf32> to vector<8x8xbf16>
    %cst_64 = arith.constant dense<0.000000e+00> : vector<8x64xf32>
    %162 = tpu.matmul %161, %6, %cst_64 {dimension_numbers = #tpu.dot_dimension_numbers<[1], [0], [0], [1], [0, 0, 1, 1], [], []>} : vector<8x8xbf16>, vector<8x64xbf16>, vector<8x64xf32> -> vector<8x64xf32>
    %c0_65 = arith.constant 0 : index
    %c0_66 = arith.constant 0 : index
    %c64 = arith.constant 64 : index
    %163 = vector.load %arg1[%c0_65, %c0_66, %c64] : memref<1x8x768xbf16, #tpu.memory_space<vmem>>, vector<1x8x64xbf16>
    %164 = vector.shape_cast %163 : vector<1x8x64xbf16> to vector<8x64xbf16>
    %c0_67 = arith.constant 0 : index
    %c0_68 = arith.constant 0 : index
    %c320 = arith.constant 320 : index
    %165 = vector.load %arg1[%c0_67, %c0_68, %c320] : memref<1x8x768xbf16, #tpu.memory_space<vmem>>, vector<1x8x64xbf16>
    %166 = vector.shape_cast %165 : vector<1x8x64xbf16> to vector<8x64xbf16>
    %c0_69 = arith.constant 0 : index
    %c0_70 = arith.constant 0 : index
    %c576 = arith.constant 576 : index
    %167 = vector.load %arg1[%c0_69, %c0_70, %c576] : memref<1x8x768xbf16, #tpu.memory_space<vmem>>, vector<1x8x64xbf16>
    %168 = vector.shape_cast %167 : vector<1x8x64xbf16> to vector<8x64xbf16>
    %cst_71 = arith.constant dense<0.000000e+00> : vector<8x8xf32>
    %169 = tpu.matmul %164, %166, %cst_71 {dimension_numbers = #tpu.dot_dimension_numbers<[1], [1], [0], [0], [0, 0, 1, 0], [], []>} : vector<8x64xbf16>, vector<8x64xbf16>, vector<8x8xf32> -> vector<8x8xf32>
    %c0_i32_72 = arith.constant 0 : i32
    %170 = vector.broadcast %c0_i32_72 : i32 to vector<8x8xi32>
    %171 = arith.cmpi eq, %0, %170 : vector<8x8xi32>
    %c0_73 = arith.constant 0 : index
    %c1_74 = arith.constant 1 : index
    %172 = memref.load %arg3[%c0_73, %c1_74] : memref<15x4xf32, #tpu.memory_space<smem>>
    %173 = vector.broadcast %172 : f32 to vector<8x8xf32>
    %174 = arith.mulf %169, %173 : vector<8x8xf32>
    %c0_75 = arith.constant 0 : index
    %c1_76 = arith.constant 1 : index
    %175 = memref.load %arg4[%c0_75, %c1_76] : memref<15x4xf32, #tpu.memory_space<smem>>
    %176 = vector.broadcast %175 : f32 to vector<8x8xf32>
    %177 = arith.addf %174, %176 : vector<8x8xf32>
    %178 = arith.select %171, %177, %169 : vector<8x8xi1>, vector<8x8xf32>
    %c1_i32_77 = arith.constant 1 : i32
    %179 = vector.broadcast %c1_i32_77 : i32 to vector<8x8xi32>
    %180 = arith.cmpi eq, %0, %179 : vector<8x8xi32>
    %c1_78 = arith.constant 1 : index
    %c1_79 = arith.constant 1 : index
    %181 = memref.load %arg3[%c1_78, %c1_79] : memref<15x4xf32, #tpu.memory_space<smem>>
    %182 = vector.broadcast %181 : f32 to vector<8x8xf32>
    %183 = arith.mulf %169, %182 : vector<8x8xf32>
    %c1_80 = arith.constant 1 : index
    %c1_81 = arith.constant 1 : index
    %184 = memref.load %arg4[%c1_80, %c1_81] : memref<15x4xf32, #tpu.memory_space<smem>>
    %185 = vector.broadcast %184 : f32 to vector<8x8xf32>
    %186 = arith.addf %183, %185 : vector<8x8xf32>
    %187 = arith.select %180, %186, %178 : vector<8x8xi1>, vector<8x8xf32>
    %c2_i32_82 = arith.constant 2 : i32
    %188 = vector.broadcast %c2_i32_82 : i32 to vector<8x8xi32>
    %189 = arith.cmpi eq, %0, %188 : vector<8x8xi32>
    %c2_83 = arith.constant 2 : index
    %c1_84 = arith.constant 1 : index
    %190 = memref.load %arg3[%c2_83, %c1_84] : memref<15x4xf32, #tpu.memory_space<smem>>
    %191 = vector.broadcast %190 : f32 to vector<8x8xf32>
    %192 = arith.mulf %169, %191 : vector<8x8xf32>
    %c2_85 = arith.constant 2 : index
    %c1_86 = arith.constant 1 : index
    %193 = memref.load %arg4[%c2_85, %c1_86] : memref<15x4xf32, #tpu.memory_space<smem>>
    %194 = vector.broadcast %193 : f32 to vector<8x8xf32>
    %195 = arith.addf %192, %194 : vector<8x8xf32>
    %196 = arith.select %189, %195, %187 : vector<8x8xi1>, vector<8x8xf32>
    %c3_i32_87 = arith.constant 3 : i32
    %197 = vector.broadcast %c3_i32_87 : i32 to vector<8x8xi32>
    %198 = arith.cmpi eq, %0, %197 : vector<8x8xi32>
    %c3_88 = arith.constant 3 : index
    %c1_89 = arith.constant 1 : index
    %199 = memref.load %arg3[%c3_88, %c1_89] : memref<15x4xf32, #tpu.memory_space<smem>>
    %200 = vector.broadcast %199 : f32 to vector<8x8xf32>
    %201 = arith.mulf %169, %200 : vector<8x8xf32>
    %c3_90 = arith.constant 3 : index
    %c1_91 = arith.constant 1 : index
    %202 = memref.load %arg4[%c3_90, %c1_91] : memref<15x4xf32, #tpu.memory_space<smem>>
    %203 = vector.broadcast %202 : f32 to vector<8x8xf32>
    %204 = arith.addf %201, %203 : vector<8x8xf32>
    %205 = arith.select %198, %204, %196 : vector<8x8xi1>, vector<8x8xf32>
    %c4_i32_92 = arith.constant 4 : i32
    %206 = vector.broadcast %c4_i32_92 : i32 to vector<8x8xi32>
    %207 = arith.cmpi eq, %0, %206 : vector<8x8xi32>
    %c4_93 = arith.constant 4 : index
    %c1_94 = arith.constant 1 : index
    %208 = memref.load %arg3[%c4_93, %c1_94] : memref<15x4xf32, #tpu.memory_space<smem>>
    %209 = vector.broadcast %208 : f32 to vector<8x8xf32>
    %210 = arith.mulf %169, %209 : vector<8x8xf32>
    %c4_95 = arith.constant 4 : index
    %c1_96 = arith.constant 1 : index
    %211 = memref.load %arg4[%c4_95, %c1_96] : memref<15x4xf32, #tpu.memory_space<smem>>
    %212 = vector.broadcast %211 : f32 to vector<8x8xf32>
    %213 = arith.addf %210, %212 : vector<8x8xf32>
    %214 = arith.select %207, %213, %205 : vector<8x8xi1>, vector<8x8xf32>
    %c5_i32_97 = arith.constant 5 : i32
    %215 = vector.broadcast %c5_i32_97 : i32 to vector<8x8xi32>
    %216 = arith.cmpi eq, %0, %215 : vector<8x8xi32>
    %c5_98 = arith.constant 5 : index
    %c1_99 = arith.constant 1 : index
    %217 = memref.load %arg3[%c5_98, %c1_99] : memref<15x4xf32, #tpu.memory_space<smem>>
    %218 = vector.broadcast %217 : f32 to vector<8x8xf32>
    %219 = arith.mulf %169, %218 : vector<8x8xf32>
    %c5_100 = arith.constant 5 : index
    %c1_101 = arith.constant 1 : index
    %220 = memref.load %arg4[%c5_100, %c1_101] : memref<15x4xf32, #tpu.memory_space<smem>>
    %221 = vector.broadcast %220 : f32 to vector<8x8xf32>
    %222 = arith.addf %219, %221 : vector<8x8xf32>
    %223 = arith.select %216, %222, %214 : vector<8x8xi1>, vector<8x8xf32>
    %c6_i32_102 = arith.constant 6 : i32
    %224 = vector.broadcast %c6_i32_102 : i32 to vector<8x8xi32>
    %225 = arith.cmpi eq, %0, %224 : vector<8x8xi32>
    %c6_103 = arith.constant 6 : index
    %c1_104 = arith.constant 1 : index
    %226 = memref.load %arg3[%c6_103, %c1_104] : memref<15x4xf32, #tpu.memory_space<smem>>
    %227 = vector.broadcast %226 : f32 to vector<8x8xf32>
    %228 = arith.mulf %169, %227 : vector<8x8xf32>
    %c6_105 = arith.constant 6 : index
    %c1_106 = arith.constant 1 : index
    %229 = memref.load %arg4[%c6_105, %c1_106] : memref<15x4xf32, #tpu.memory_space<smem>>
    %230 = vector.broadcast %229 : f32 to vector<8x8xf32>
    %231 = arith.addf %228, %230 : vector<8x8xf32>
    %232 = arith.select %225, %231, %223 : vector<8x8xi1>, vector<8x8xf32>
    %c7_i32_107 = arith.constant 7 : i32
    %233 = vector.broadcast %c7_i32_107 : i32 to vector<8x8xi32>
    %234 = arith.cmpi eq, %0, %233 : vector<8x8xi32>
    %c7_108 = arith.constant 7 : index
    %c1_109 = arith.constant 1 : index
    %235 = memref.load %arg3[%c7_108, %c1_109] : memref<15x4xf32, #tpu.memory_space<smem>>
    %236 = vector.broadcast %235 : f32 to vector<8x8xf32>
    %237 = arith.mulf %169, %236 : vector<8x8xf32>
    %c7_110 = arith.constant 7 : index
    %c1_111 = arith.constant 1 : index
    %238 = memref.load %arg4[%c7_110, %c1_111] : memref<15x4xf32, #tpu.memory_space<smem>>
    %239 = vector.broadcast %238 : f32 to vector<8x8xf32>
    %240 = arith.addf %237, %239 : vector<8x8xf32>
    %241 = arith.select %234, %240, %232 : vector<8x8xi1>, vector<8x8xf32>
    %c8_i32_112 = arith.constant 8 : i32
    %242 = vector.broadcast %c8_i32_112 : i32 to vector<8x8xi32>
    %243 = arith.cmpi eq, %0, %242 : vector<8x8xi32>
    %c8_113 = arith.constant 8 : index
    %c1_114 = arith.constant 1 : index
    %244 = memref.load %arg3[%c8_113, %c1_114] : memref<15x4xf32, #tpu.memory_space<smem>>
    %245 = vector.broadcast %244 : f32 to vector<8x8xf32>
    %246 = arith.mulf %169, %245 : vector<8x8xf32>
    %c8_115 = arith.constant 8 : index
    %c1_116 = arith.constant 1 : index
    %247 = memref.load %arg4[%c8_115, %c1_116] : memref<15x4xf32, #tpu.memory_space<smem>>
    %248 = vector.broadcast %247 : f32 to vector<8x8xf32>
    %249 = arith.addf %246, %248 : vector<8x8xf32>
    %250 = arith.select %243, %249, %241 : vector<8x8xi1>, vector<8x8xf32>
    %c9_i32_117 = arith.constant 9 : i32
    %251 = vector.broadcast %c9_i32_117 : i32 to vector<8x8xi32>
    %252 = arith.cmpi eq, %0, %251 : vector<8x8xi32>
    %c9_118 = arith.constant 9 : index
    %c1_119 = arith.constant 1 : index
    %253 = memref.load %arg3[%c9_118, %c1_119] : memref<15x4xf32, #tpu.memory_space<smem>>
    %254 = vector.broadcast %253 : f32 to vector<8x8xf32>
    %255 = arith.mulf %169, %254 : vector<8x8xf32>
    %c9_120 = arith.constant 9 : index
    %c1_121 = arith.constant 1 : index
    %256 = memref.load %arg4[%c9_120, %c1_121] : memref<15x4xf32, #tpu.memory_space<smem>>
    %257 = vector.broadcast %256 : f32 to vector<8x8xf32>
    %258 = arith.addf %255, %257 : vector<8x8xf32>
    %259 = arith.select %252, %258, %250 : vector<8x8xi1>, vector<8x8xf32>
    %c10_i32_122 = arith.constant 10 : i32
    %260 = vector.broadcast %c10_i32_122 : i32 to vector<8x8xi32>
    %261 = arith.cmpi eq, %0, %260 : vector<8x8xi32>
    %c10_123 = arith.constant 10 : index
    %c1_124 = arith.constant 1 : index
    %262 = memref.load %arg3[%c10_123, %c1_124] : memref<15x4xf32, #tpu.memory_space<smem>>
    %263 = vector.broadcast %262 : f32 to vector<8x8xf32>
    %264 = arith.mulf %169, %263 : vector<8x8xf32>
    %c10_125 = arith.constant 10 : index
    %c1_126 = arith.constant 1 : index
    %265 = memref.load %arg4[%c10_125, %c1_126] : memref<15x4xf32, #tpu.memory_space<smem>>
    %266 = vector.broadcast %265 : f32 to vector<8x8xf32>
    %267 = arith.addf %264, %266 : vector<8x8xf32>
    %268 = arith.select %261, %267, %259 : vector<8x8xi1>, vector<8x8xf32>
    %c11_i32_127 = arith.constant 11 : i32
    %269 = vector.broadcast %c11_i32_127 : i32 to vector<8x8xi32>
    %270 = arith.cmpi eq, %0, %269 : vector<8x8xi32>
    %c11_128 = arith.constant 11 : index
    %c1_129 = arith.constant 1 : index
    %271 = memref.load %arg3[%c11_128, %c1_129] : memref<15x4xf32, #tpu.memory_space<smem>>
    %272 = vector.broadcast %271 : f32 to vector<8x8xf32>
    %273 = arith.mulf %169, %272 : vector<8x8xf32>
    %c11_130 = arith.constant 11 : index
    %c1_131 = arith.constant 1 : index
    %274 = memref.load %arg4[%c11_130, %c1_131] : memref<15x4xf32, #tpu.memory_space<smem>>
    %275 = vector.broadcast %274 : f32 to vector<8x8xf32>
    %276 = arith.addf %273, %275 : vector<8x8xf32>
    %277 = arith.select %270, %276, %268 : vector<8x8xi1>, vector<8x8xf32>
    %c12_i32_132 = arith.constant 12 : i32
    %278 = vector.broadcast %c12_i32_132 : i32 to vector<8x8xi32>
    %279 = arith.cmpi eq, %0, %278 : vector<8x8xi32>
    %c12_133 = arith.constant 12 : index
    %c1_134 = arith.constant 1 : index
    %280 = memref.load %arg3[%c12_133, %c1_134] : memref<15x4xf32, #tpu.memory_space<smem>>
    %281 = vector.broadcast %280 : f32 to vector<8x8xf32>
    %282 = arith.mulf %169, %281 : vector<8x8xf32>
    %c12_135 = arith.constant 12 : index
    %c1_136 = arith.constant 1 : index
    %283 = memref.load %arg4[%c12_135, %c1_136] : memref<15x4xf32, #tpu.memory_space<smem>>
    %284 = vector.broadcast %283 : f32 to vector<8x8xf32>
    %285 = arith.addf %282, %284 : vector<8x8xf32>
    %286 = arith.select %279, %285, %277 : vector<8x8xi1>, vector<8x8xf32>
    %c13_i32_137 = arith.constant 13 : i32
    %287 = vector.broadcast %c13_i32_137 : i32 to vector<8x8xi32>
    %288 = arith.cmpi eq, %0, %287 : vector<8x8xi32>
    %c13_138 = arith.constant 13 : index
    %c1_139 = arith.constant 1 : index
    %289 = memref.load %arg3[%c13_138, %c1_139] : memref<15x4xf32, #tpu.memory_space<smem>>
    %290 = vector.broadcast %289 : f32 to vector<8x8xf32>
    %291 = arith.mulf %169, %290 : vector<8x8xf32>
    %c13_140 = arith.constant 13 : index
    %c1_141 = arith.constant 1 : index
    %292 = memref.load %arg4[%c13_140, %c1_141] : memref<15x4xf32, #tpu.memory_space<smem>>
    %293 = vector.broadcast %292 : f32 to vector<8x8xf32>
    %294 = arith.addf %291, %293 : vector<8x8xf32>
    %295 = arith.select %288, %294, %286 : vector<8x8xi1>, vector<8x8xf32>
    %c14_i32_142 = arith.constant 14 : i32
    %296 = vector.broadcast %c14_i32_142 : i32 to vector<8x8xi32>
    %297 = arith.cmpi eq, %0, %296 : vector<8x8xi32>
    %c14_143 = arith.constant 14 : index
    %c1_144 = arith.constant 1 : index
    %298 = memref.load %arg3[%c14_143, %c1_144] : memref<15x4xf32, #tpu.memory_space<smem>>
    %299 = vector.broadcast %298 : f32 to vector<8x8xf32>
    %300 = arith.mulf %169, %299 : vector<8x8xf32>
    %c14_145 = arith.constant 14 : index
    %c1_146 = arith.constant 1 : index
    %301 = memref.load %arg4[%c14_145, %c1_146] : memref<15x4xf32, #tpu.memory_space<smem>>
    %302 = vector.broadcast %301 : f32 to vector<8x8xf32>
    %303 = arith.addf %300, %302 : vector<8x8xf32>
    %304 = arith.select %297, %303, %295 : vector<8x8xi1>, vector<8x8xf32>
    %c0_147 = arith.constant 0 : index
    %c1_148 = arith.constant 1 : index
    %c0_149 = arith.constant 0 : index
    %c0_150 = arith.constant 0 : index
    %305 = vector.load %arg5[%c0_147, %c1_148, %c0_149, %c0_150] : memref<1x4x8x8xbf16, #tpu.memory_space<vmem>>, vector<1x1x8x8xbf16>
    %306 = vector.shape_cast %305 : vector<1x1x8x8xbf16> to vector<8x8xbf16>
    %307 = arith.extf %306 : vector<8x8xbf16> to vector<8x8xf32>
    %308 = arith.addf %304, %307 : vector<8x8xf32>
    %309 = arith.truncf %308 : vector<8x8xf32> to vector<8x8xbf16>
    %c0_151 = arith.constant 0 : index
    %c1_152 = arith.constant 1 : index
    %c0_153 = arith.constant 0 : index
    %c0_154 = arith.constant 0 : index
    %310 = vector.load %arg7[%c0_151, %c1_152, %c0_153, %c0_154] : memref<1x4x8x8xbf16, #tpu.memory_space<vmem>>, vector<1x1x8x8xbf16>
    %311 = vector.shape_cast %310 : vector<1x1x8x8xbf16> to vector<8x8xbf16>
    %312 = vector.shape_cast %309 : vector<8x8xbf16> to vector<1x1x8x8xbf16>
    tpu.vector_store %arg7[%c0_151, %c1_152, %c0_153, %c0_154], %312 {strides = array<i32>} : memref<1x4x8x8xbf16, #tpu.memory_space<vmem>>, vector<1x1x8x8xbf16>,
    %cst_155 = arith.constant dense<0xFF800000> : vector<8xf32>
    %313 = vector.multi_reduction <maximumf>, %308, %cst_155 [1] : vector<8x8xf32> to vector<8xf32>
    %314 = vector.shape_cast %313 : vector<8xf32> to vector<8x1xf32>
    %315 = vector.broadcast %314 : vector<8x1xf32> to vector<8x8xf32>
    %316 = arith.subf %308, %315 : vector<8x8xf32>
    %317 = math.exp %316 : vector<8x8xf32>
    %cst_156 = arith.constant dense<0.000000e+00> : vector<8xf32>
    %318 = vector.multi_reduction <add>, %317, %cst_156 [1] : vector<8x8xf32> to vector<8xf32>
    %319 = vector.shape_cast %318 : vector<8xf32> to vector<8x1xf32>
    %320 = tpu.reciprocal %319 {approx = true} : vector<8x1xf32> -> vector<8x1xf32>
    %321 = vector.broadcast %320 : vector<8x1xf32> to vector<8x8xf32>
    %322 = arith.mulf %317, %321 : vector<8x8xf32>
    %323 = arith.truncf %322 : vector<8x8xf32> to vector<8x8xbf16>
    %cst_157 = arith.constant dense<0.000000e+00> : vector<8x64xf32>
    %324 = tpu.matmul %323, %168, %cst_157 {dimension_numbers = #tpu.dot_dimension_numbers<[1], [0], [0], [1], [0, 0, 1, 1], [], []>} : vector<8x8xbf16>, vector<8x64xbf16>, vector<8x64xf32> -> vector<8x64xf32>
    %c0_158 = arith.constant 0 : index
    %c0_159 = arith.constant 0 : index
    %c128 = arith.constant 128 : index
    %325 = vector.load %arg1[%c0_158, %c0_159, %c128] : memref<1x8x768xbf16, #tpu.memory_space<vmem>>, vector<1x8x64xbf16>
    %326 = vector.shape_cast %325 : vector<1x8x64xbf16> to vector<8x64xbf16>
    %c0_160 = arith.constant 0 : index
    %c0_161 = arith.constant 0 : index
    %c384 = arith.constant 384 : index
    %327 = vector.load %arg1[%c0_160, %c0_161, %c384] : memref<1x8x768xbf16, #tpu.memory_space<vmem>>, vector<1x8x64xbf16>
    %328 = vector.shape_cast %327 : vector<1x8x64xbf16> to vector<8x64xbf16>
    %c0_162 = arith.constant 0 : index
    %c0_163 = arith.constant 0 : index
    %c640 = arith.constant 640 : index
    %329 = vector.load %arg1[%c0_162, %c0_163, %c640] : memref<1x8x768xbf16, #tpu.memory_space<vmem>>, vector<1x8x64xbf16>
    %330 = vector.shape_cast %329 : vector<1x8x64xbf16> to vector<8x64xbf16>
    %cst_164 = arith.constant dense<0.000000e+00> : vector<8x8xf32>
    %331 = tpu.matmul %326, %328, %cst_164 {dimension_numbers = #tpu.dot_dimension_numbers<[1], [1], [0], [0], [0, 0, 1, 0], [], []>} : vector<8x64xbf16>, vector<8x64xbf16>, vector<8x8xf32> -> vector<8x8xf32>
    %c0_i32_165 = arith.constant 0 : i32
    %332 = vector.broadcast %c0_i32_165 : i32 to vector<8x8xi32>
    %333 = arith.cmpi eq, %0, %332 : vector<8x8xi32>
    %c0_166 = arith.constant 0 : index
    %c2_167 = arith.constant 2 : index
    %334 = memref.load %arg3[%c0_166, %c2_167] : memref<15x4xf32, #tpu.memory_space<smem>>
    %335 = vector.broadcast %334 : f32 to vector<8x8xf32>
    %336 = arith.mulf %331, %335 : vector<8x8xf32>
    %c0_168 = arith.constant 0 : index
    %c2_169 = arith.constant 2 : index
    %337 = memref.load %arg4[%c0_168, %c2_169] : memref<15x4xf32, #tpu.memory_space<smem>>
    %338 = vector.broadcast %337 : f32 to vector<8x8xf32>
    %339 = arith.addf %336, %338 : vector<8x8xf32>
    %340 = arith.select %333, %339, %331 : vector<8x8xi1>, vector<8x8xf32>
    %c1_i32_170 = arith.constant 1 : i32
    %341 = vector.broadcast %c1_i32_170 : i32 to vector<8x8xi32>
    %342 = arith.cmpi eq, %0, %341 : vector<8x8xi32>
    %c1_171 = arith.constant 1 : index
    %c2_172 = arith.constant 2 : index
    %343 = memref.load %arg3[%c1_171, %c2_172] : memref<15x4xf32, #tpu.memory_space<smem>>
    %344 = vector.broadcast %343 : f32 to vector<8x8xf32>
    %345 = arith.mulf %331, %344 : vector<8x8xf32>
    %c1_173 = arith.constant 1 : index
    %c2_174 = arith.constant 2 : index
    %346 = memref.load %arg4[%c1_173, %c2_174] : memref<15x4xf32, #tpu.memory_space<smem>>
    %347 = vector.broadcast %346 : f32 to vector<8x8xf32>
    %348 = arith.addf %345, %347 : vector<8x8xf32>
    %349 = arith.select %342, %348, %340 : vector<8x8xi1>, vector<8x8xf32>
    %c2_i32_175 = arith.constant 2 : i32
    %350 = vector.broadcast %c2_i32_175 : i32 to vector<8x8xi32>
    %351 = arith.cmpi eq, %0, %350 : vector<8x8xi32>
    %c2_176 = arith.constant 2 : index
    %c2_177 = arith.constant 2 : index
    %352 = memref.load %arg3[%c2_176, %c2_177] : memref<15x4xf32, #tpu.memory_space<smem>>
    %353 = vector.broadcast %352 : f32 to vector<8x8xf32>
    %354 = arith.mulf %331, %353 : vector<8x8xf32>
    %c2_178 = arith.constant 2 : index
    %c2_179 = arith.constant 2 : index
    %355 = memref.load %arg4[%c2_178, %c2_179] : memref<15x4xf32, #tpu.memory_space<smem>>
    %356 = vector.broadcast %355 : f32 to vector<8x8xf32>
    %357 = arith.addf %354, %356 : vector<8x8xf32>
    %358 = arith.select %351, %357, %349 : vector<8x8xi1>, vector<8x8xf32>
    %c3_i32_180 = arith.constant 3 : i32
    %359 = vector.broadcast %c3_i32_180 : i32 to vector<8x8xi32>
    %360 = arith.cmpi eq, %0, %359 : vector<8x8xi32>
    %c3_181 = arith.constant 3 : index
    %c2_182 = arith.constant 2 : index
    %361 = memref.load %arg3[%c3_181, %c2_182] : memref<15x4xf32, #tpu.memory_space<smem>>
    %362 = vector.broadcast %361 : f32 to vector<8x8xf32>
    %363 = arith.mulf %331, %362 : vector<8x8xf32>
    %c3_183 = arith.constant 3 : index
    %c2_184 = arith.constant 2 : index
    %364 = memref.load %arg4[%c3_183, %c2_184] : memref<15x4xf32, #tpu.memory_space<smem>>
    %365 = vector.broadcast %364 : f32 to vector<8x8xf32>
    %366 = arith.addf %363, %365 : vector<8x8xf32>
    %367 = arith.select %360, %366, %358 : vector<8x8xi1>, vector<8x8xf32>
    %c4_i32_185 = arith.constant 4 : i32
    %368 = vector.broadcast %c4_i32_185 : i32 to vector<8x8xi32>
    %369 = arith.cmpi eq, %0, %368 : vector<8x8xi32>
    %c4_186 = arith.constant 4 : index
    %c2_187 = arith.constant 2 : index
    %370 = memref.load %arg3[%c4_186, %c2_187] : memref<15x4xf32, #tpu.memory_space<smem>>
    %371 = vector.broadcast %370 : f32 to vector<8x8xf32>
    %372 = arith.mulf %331, %371 : vector<8x8xf32>
    %c4_188 = arith.constant 4 : index
    %c2_189 = arith.constant 2 : index
    %373 = memref.load %arg4[%c4_188, %c2_189] : memref<15x4xf32, #tpu.memory_space<smem>>
    %374 = vector.broadcast %373 : f32 to vector<8x8xf32>
    %375 = arith.addf %372, %374 : vector<8x8xf32>
    %376 = arith.select %369, %375, %367 : vector<8x8xi1>, vector<8x8xf32>
    %c5_i32_190 = arith.constant 5 : i32
    %377 = vector.broadcast %c5_i32_190 : i32 to vector<8x8xi32>
    %378 = arith.cmpi eq, %0, %377 : vector<8x8xi32>
    %c5_191 = arith.constant 5 : index
    %c2_192 = arith.constant 2 : index
    %379 = memref.load %arg3[%c5_191, %c2_192] : memref<15x4xf32, #tpu.memory_space<smem>>
    %380 = vector.broadcast %379 : f32 to vector<8x8xf32>
    %381 = arith.mulf %331, %380 : vector<8x8xf32>
    %c5_193 = arith.constant 5 : index
    %c2_194 = arith.constant 2 : index
    %382 = memref.load %arg4[%c5_193, %c2_194] : memref<15x4xf32, #tpu.memory_space<smem>>
    %383 = vector.broadcast %382 : f32 to vector<8x8xf32>
    %384 = arith.addf %381, %383 : vector<8x8xf32>
    %385 = arith.select %378, %384, %376 : vector<8x8xi1>, vector<8x8xf32>
    %c6_i32_195 = arith.constant 6 : i32
    %386 = vector.broadcast %c6_i32_195 : i32 to vector<8x8xi32>
    %387 = arith.cmpi eq, %0, %386 : vector<8x8xi32>
    %c6_196 = arith.constant 6 : index
    %c2_197 = arith.constant 2 : index
    %388 = memref.load %arg3[%c6_196, %c2_197] : memref<15x4xf32, #tpu.memory_space<smem>>
    %389 = vector.broadcast %388 : f32 to vector<8x8xf32>
    %390 = arith.mulf %331, %389 : vector<8x8xf32>
    %c6_198 = arith.constant 6 : index
    %c2_199 = arith.constant 2 : index
    %391 = memref.load %arg4[%c6_198, %c2_199] : memref<15x4xf32, #tpu.memory_space<smem>>
    %392 = vector.broadcast %391 : f32 to vector<8x8xf32>
    %393 = arith.addf %390, %392 : vector<8x8xf32>
    %394 = arith.select %387, %393, %385 : vector<8x8xi1>, vector<8x8xf32>
    %c7_i32_200 = arith.constant 7 : i32
    %395 = vector.broadcast %c7_i32_200 : i32 to vector<8x8xi32>
    %396 = arith.cmpi eq, %0, %395 : vector<8x8xi32>
    %c7_201 = arith.constant 7 : index
    %c2_202 = arith.constant 2 : index
    %397 = memref.load %arg3[%c7_201, %c2_202] : memref<15x4xf32, #tpu.memory_space<smem>>
    %398 = vector.broadcast %397 : f32 to vector<8x8xf32>
    %399 = arith.mulf %331, %398 : vector<8x8xf32>
    %c7_203 = arith.constant 7 : index
    %c2_204 = arith.constant 2 : index
    %400 = memref.load %arg4[%c7_203, %c2_204] : memref<15x4xf32, #tpu.memory_space<smem>>
    %401 = vector.broadcast %400 : f32 to vector<8x8xf32>
    %402 = arith.addf %399, %401 : vector<8x8xf32>
    %403 = arith.select %396, %402, %394 : vector<8x8xi1>, vector<8x8xf32>
    %c8_i32_205 = arith.constant 8 : i32
    %404 = vector.broadcast %c8_i32_205 : i32 to vector<8x8xi32>
    %405 = arith.cmpi eq, %0, %404 : vector<8x8xi32>
    %c8_206 = arith.constant 8 : index
    %c2_207 = arith.constant 2 : index
    %406 = memref.load %arg3[%c8_206, %c2_207] : memref<15x4xf32, #tpu.memory_space<smem>>
    %407 = vector.broadcast %406 : f32 to vector<8x8xf32>
    %408 = arith.mulf %331, %407 : vector<8x8xf32>
    %c8_208 = arith.constant 8 : index
    %c2_209 = arith.constant 2 : index
    %409 = memref.load %arg4[%c8_208, %c2_209] : memref<15x4xf32, #tpu.memory_space<smem>>
    %410 = vector.broadcast %409 : f32 to vector<8x8xf32>
    %411 = arith.addf %408, %410 : vector<8x8xf32>
    %412 = arith.select %405, %411, %403 : vector<8x8xi1>, vector<8x8xf32>
    %c9_i32_210 = arith.constant 9 : i32
    %413 = vector.broadcast %c9_i32_210 : i32 to vector<8x8xi32>
    %414 = arith.cmpi eq, %0, %413 : vector<8x8xi32>
    %c9_211 = arith.constant 9 : index
    %c2_212 = arith.constant 2 : index
    %415 = memref.load %arg3[%c9_211, %c2_212] : memref<15x4xf32, #tpu.memory_space<smem>>
    %416 = vector.broadcast %415 : f32 to vector<8x8xf32>
    %417 = arith.mulf %331, %416 : vector<8x8xf32>
    %c9_213 = arith.constant 9 : index
    %c2_214 = arith.constant 2 : index
    %418 = memref.load %arg4[%c9_213, %c2_214] : memref<15x4xf32, #tpu.memory_space<smem>>
    %419 = vector.broadcast %418 : f32 to vector<8x8xf32>
    %420 = arith.addf %417, %419 : vector<8x8xf32>
    %421 = arith.select %414, %420, %412 : vector<8x8xi1>, vector<8x8xf32>
    %c10_i32_215 = arith.constant 10 : i32
    %422 = vector.broadcast %c10_i32_215 : i32 to vector<8x8xi32>
    %423 = arith.cmpi eq, %0, %422 : vector<8x8xi32>
    %c10_216 = arith.constant 10 : index
    %c2_217 = arith.constant 2 : index
    %424 = memref.load %arg3[%c10_216, %c2_217] : memref<15x4xf32, #tpu.memory_space<smem>>
    %425 = vector.broadcast %424 : f32 to vector<8x8xf32>
    %426 = arith.mulf %331, %425 : vector<8x8xf32>
    %c10_218 = arith.constant 10 : index
    %c2_219 = arith.constant 2 : index
    %427 = memref.load %arg4[%c10_218, %c2_219] : memref<15x4xf32, #tpu.memory_space<smem>>
    %428 = vector.broadcast %427 : f32 to vector<8x8xf32>
    %429 = arith.addf %426, %428 : vector<8x8xf32>
    %430 = arith.select %423, %429, %421 : vector<8x8xi1>, vector<8x8xf32>
    %c11_i32_220 = arith.constant 11 : i32
    %431 = vector.broadcast %c11_i32_220 : i32 to vector<8x8xi32>
    %432 = arith.cmpi eq, %0, %431 : vector<8x8xi32>
    %c11_221 = arith.constant 11 : index
    %c2_222 = arith.constant 2 : index
    %433 = memref.load %arg3[%c11_221, %c2_222] : memref<15x4xf32, #tpu.memory_space<smem>>
    %434 = vector.broadcast %433 : f32 to vector<8x8xf32>
    %435 = arith.mulf %331, %434 : vector<8x8xf32>
    %c11_223 = arith.constant 11 : index
    %c2_224 = arith.constant 2 : index
    %436 = memref.load %arg4[%c11_223, %c2_224] : memref<15x4xf32, #tpu.memory_space<smem>>
    %437 = vector.broadcast %436 : f32 to vector<8x8xf32>
    %438 = arith.addf %435, %437 : vector<8x8xf32>
    %439 = arith.select %432, %438, %430 : vector<8x8xi1>, vector<8x8xf32>
    %c12_i32_225 = arith.constant 12 : i32
    %440 = vector.broadcast %c12_i32_225 : i32 to vector<8x8xi32>
    %441 = arith.cmpi eq, %0, %440 : vector<8x8xi32>
    %c12_226 = arith.constant 12 : index
    %c2_227 = arith.constant 2 : index
    %442 = memref.load %arg3[%c12_226, %c2_227] : memref<15x4xf32, #tpu.memory_space<smem>>
    %443 = vector.broadcast %442 : f32 to vector<8x8xf32>
    %444 = arith.mulf %331, %443 : vector<8x8xf32>
    %c12_228 = arith.constant 12 : index
    %c2_229 = arith.constant 2 : index
    %445 = memref.load %arg4[%c12_228, %c2_229] : memref<15x4xf32, #tpu.memory_space<smem>>
    %446 = vector.broadcast %445 : f32 to vector<8x8xf32>
    %447 = arith.addf %444, %446 : vector<8x8xf32>
    %448 = arith.select %441, %447, %439 : vector<8x8xi1>, vector<8x8xf32>
    %c13_i32_230 = arith.constant 13 : i32
    %449 = vector.broadcast %c13_i32_230 : i32 to vector<8x8xi32>
    %450 = arith.cmpi eq, %0, %449 : vector<8x8xi32>
    %c13_231 = arith.constant 13 : index
    %c2_232 = arith.constant 2 : index
    %451 = memref.load %arg3[%c13_231, %c2_232] : memref<15x4xf32, #tpu.memory_space<smem>>
    %452 = vector.broadcast %451 : f32 to vector<8x8xf32>
    %453 = arith.mulf %331, %452 : vector<8x8xf32>
    %c13_233 = arith.constant 13 : index
    %c2_234 = arith.constant 2 : index
    %454 = memref.load %arg4[%c13_233, %c2_234] : memref<15x4xf32, #tpu.memory_space<smem>>
    %455 = vector.broadcast %454 : f32 to vector<8x8xf32>
    %456 = arith.addf %453, %455 : vector<8x8xf32>
    %457 = arith.select %450, %456, %448 : vector<8x8xi1>, vector<8x8xf32>
    %c14_i32_235 = arith.constant 14 : i32
    %458 = vector.broadcast %c14_i32_235 : i32 to vector<8x8xi32>
    %459 = arith.cmpi eq, %0, %458 : vector<8x8xi32>
    %c14_236 = arith.constant 14 : index
    %c2_237 = arith.constant 2 : index
    %460 = memref.load %arg3[%c14_236, %c2_237] : memref<15x4xf32, #tpu.memory_space<smem>>
    %461 = vector.broadcast %460 : f32 to vector<8x8xf32>
    %462 = arith.mulf %331, %461 : vector<8x8xf32>
    %c14_238 = arith.constant 14 : index
    %c2_239 = arith.constant 2 : index
    %463 = memref.load %arg4[%c14_238, %c2_239] : memref<15x4xf32, #tpu.memory_space<smem>>
    %464 = vector.broadcast %463 : f32 to vector<8x8xf32>
    %465 = arith.addf %462, %464 : vector<8x8xf32>
    %466 = arith.select %459, %465, %457 : vector<8x8xi1>, vector<8x8xf32>
    %c0_240 = arith.constant 0 : index
    %c2_241 = arith.constant 2 : index
    %c0_242 = arith.constant 0 : index
    %c0_243 = arith.constant 0 : index
    %467 = vector.load %arg5[%c0_240, %c2_241, %c0_242, %c0_243] : memref<1x4x8x8xbf16, #tpu.memory_space<vmem>>, vector<1x1x8x8xbf16>
    %468 = vector.shape_cast %467 : vector<1x1x8x8xbf16> to vector<8x8xbf16>
    %469 = arith.extf %468 : vector<8x8xbf16> to vector<8x8xf32>
    %470 = arith.addf %466, %469 : vector<8x8xf32>
    %471 = arith.truncf %470 : vector<8x8xf32> to vector<8x8xbf16>
    %c0_244 = arith.constant 0 : index
    %c2_245 = arith.constant 2 : index
    %c0_246 = arith.constant 0 : index
    %c0_247 = arith.constant 0 : index
    %472 = vector.load %arg7[%c0_244, %c2_245, %c0_246, %c0_247] : memref<1x4x8x8xbf16, #tpu.memory_space<vmem>>, vector<1x1x8x8xbf16>
    %473 = vector.shape_cast %472 : vector<1x1x8x8xbf16> to vector<8x8xbf16>
    %474 = vector.shape_cast %471 : vector<8x8xbf16> to vector<1x1x8x8xbf16>
    tpu.vector_store %arg7[%c0_244, %c2_245, %c0_246, %c0_247], %474 {strides = array<i32>} : memref<1x4x8x8xbf16, #tpu.memory_space<vmem>>, vector<1x1x8x8xbf16>,
    %cst_248 = arith.constant dense<0xFF800000> : vector<8xf32>
    %475 = vector.multi_reduction <maximumf>, %470, %cst_248 [1] : vector<8x8xf32> to vector<8xf32>
    %476 = vector.shape_cast %475 : vector<8xf32> to vector<8x1xf32>
    %477 = vector.broadcast %476 : vector<8x1xf32> to vector<8x8xf32>
    %478 = arith.subf %470, %477 : vector<8x8xf32>
    %479 = math.exp %478 : vector<8x8xf32>
    %cst_249 = arith.constant dense<0.000000e+00> : vector<8xf32>
    %480 = vector.multi_reduction <add>, %479, %cst_249 [1] : vector<8x8xf32> to vector<8xf32>
    %481 = vector.shape_cast %480 : vector<8xf32> to vector<8x1xf32>
    %482 = tpu.reciprocal %481 {approx = true} : vector<8x1xf32> -> vector<8x1xf32>
    %483 = vector.broadcast %482 : vector<8x1xf32> to vector<8x8xf32>
    %484 = arith.mulf %479, %483 : vector<8x8xf32>
    %485 = arith.truncf %484 : vector<8x8xf32> to vector<8x8xbf16>
    %cst_250 = arith.constant dense<0.000000e+00> : vector<8x64xf32>
    %486 = tpu.matmul %485, %330, %cst_250 {dimension_numbers = #tpu.dot_dimension_numbers<[1], [0], [0], [1], [0, 0, 1, 1], [], []>} : vector<8x8xbf16>, vector<8x64xbf16>, vector<8x64xf32> -> vector<8x64xf32>
    %c0_251 = arith.constant 0 : index
    %c0_252 = arith.constant 0 : index
    %c192 = arith.constant 192 : index
    %487 = vector.load %arg1[%c0_251, %c0_252, %c192] : memref<1x8x768xbf16, #tpu.memory_space<vmem>>, vector<1x8x64xbf16>
    %488 = vector.shape_cast %487 : vector<1x8x64xbf16> to vector<8x64xbf16>
    %c0_253 = arith.constant 0 : index
    %c0_254 = arith.constant 0 : index
    %c448 = arith.constant 448 : index
    %489 = vector.load %arg1[%c0_253, %c0_254, %c448] : memref<1x8x768xbf16, #tpu.memory_space<vmem>>, vector<1x8x64xbf16>
    %490 = vector.shape_cast %489 : vector<1x8x64xbf16> to vector<8x64xbf16>
    %c0_255 = arith.constant 0 : index
    %c0_256 = arith.constant 0 : index
    %c704 = arith.constant 704 : index
    %491 = vector.load %arg1[%c0_255, %c0_256, %c704] : memref<1x8x768xbf16, #tpu.memory_space<vmem>>, vector<1x8x64xbf16>
    %492 = vector.shape_cast %491 : vector<1x8x64xbf16> to vector<8x64xbf16>
    %cst_257 = arith.constant dense<0.000000e+00> : vector<8x8xf32>
    %493 = tpu.matmul %488, %490, %cst_257 {dimension_numbers = #tpu.dot_dimension_numbers<[1], [1], [0], [0], [0, 0, 1, 0], [], []>} : vector<8x64xbf16>, vector<8x64xbf16>, vector<8x8xf32> -> vector<8x8xf32>
    %c0_i32_258 = arith.constant 0 : i32
    %494 = vector.broadcast %c0_i32_258 : i32 to vector<8x8xi32>
    %495 = arith.cmpi eq, %0, %494 : vector<8x8xi32>
    %c0_259 = arith.constant 0 : index
    %c3_260 = arith.constant 3 : index
    %496 = memref.load %arg3[%c0_259, %c3_260] : memref<15x4xf32, #tpu.memory_space<smem>>
    %497 = vector.broadcast %496 : f32 to vector<8x8xf32>
    %498 = arith.mulf %493, %497 : vector<8x8xf32>
    %c0_261 = arith.constant 0 : index
    %c3_262 = arith.constant 3 : index
    %499 = memref.load %arg4[%c0_261, %c3_262] : memref<15x4xf32, #tpu.memory_space<smem>>
    %500 = vector.broadcast %499 : f32 to vector<8x8xf32>
    %501 = arith.addf %498, %500 : vector<8x8xf32>
    %502 = arith.select %495, %501, %493 : vector<8x8xi1>, vector<8x8xf32>
    %c1_i32_263 = arith.constant 1 : i32
    %503 = vector.broadcast %c1_i32_263 : i32 to vector<8x8xi32>
    %504 = arith.cmpi eq, %0, %503 : vector<8x8xi32>
    %c1_264 = arith.constant 1 : index
    %c3_265 = arith.constant 3 : index
    %505 = memref.load %arg3[%c1_264, %c3_265] : memref<15x4xf32, #tpu.memory_space<smem>>
    %506 = vector.broadcast %505 : f32 to vector<8x8xf32>
    %507 = arith.mulf %493, %506 : vector<8x8xf32>
    %c1_266 = arith.constant 1 : index
    %c3_267 = arith.constant 3 : index
    %508 = memref.load %arg4[%c1_266, %c3_267] : memref<15x4xf32, #tpu.memory_space<smem>>
    %509 = vector.broadcast %508 : f32 to vector<8x8xf32>
    %510 = arith.addf %507, %509 : vector<8x8xf32>
    %511 = arith.select %504, %510, %502 : vector<8x8xi1>, vector<8x8xf32>
    %c2_i32_268 = arith.constant 2 : i32
    %512 = vector.broadcast %c2_i32_268 : i32 to vector<8x8xi32>
    %513 = arith.cmpi eq, %0, %512 : vector<8x8xi32>
    %c2_269 = arith.constant 2 : index
    %c3_270 = arith.constant 3 : index
    %514 = memref.load %arg3[%c2_269, %c3_270] : memref<15x4xf32, #tpu.memory_space<smem>>
    %515 = vector.broadcast %514 : f32 to vector<8x8xf32>
    %516 = arith.mulf %493, %515 : vector<8x8xf32>
    %c2_271 = arith.constant 2 : index
    %c3_272 = arith.constant 3 : index
    %517 = memref.load %arg4[%c2_271, %c3_272] : memref<15x4xf32, #tpu.memory_space<smem>>
    %518 = vector.broadcast %517 : f32 to vector<8x8xf32>
    %519 = arith.addf %516, %518 : vector<8x8xf32>
    %520 = arith.select %513, %519, %511 : vector<8x8xi1>, vector<8x8xf32>
    %c3_i32_273 = arith.constant 3 : i32
    %521 = vector.broadcast %c3_i32_273 : i32 to vector<8x8xi32>
    %522 = arith.cmpi eq, %0, %521 : vector<8x8xi32>
    %c3_274 = arith.constant 3 : index
    %c3_275 = arith.constant 3 : index
    %523 = memref.load %arg3[%c3_274, %c3_275] : memref<15x4xf32, #tpu.memory_space<smem>>
    %524 = vector.broadcast %523 : f32 to vector<8x8xf32>
    %525 = arith.mulf %493, %524 : vector<8x8xf32>
    %c3_276 = arith.constant 3 : index
    %c3_277 = arith.constant 3 : index
    %526 = memref.load %arg4[%c3_276, %c3_277] : memref<15x4xf32, #tpu.memory_space<smem>>
    %527 = vector.broadcast %526 : f32 to vector<8x8xf32>
    %528 = arith.addf %525, %527 : vector<8x8xf32>
    %529 = arith.select %522, %528, %520 : vector<8x8xi1>, vector<8x8xf32>
    %c4_i32_278 = arith.constant 4 : i32
    %530 = vector.broadcast %c4_i32_278 : i32 to vector<8x8xi32>
    %531 = arith.cmpi eq, %0, %530 : vector<8x8xi32>
    %c4_279 = arith.constant 4 : index
    %c3_280 = arith.constant 3 : index
    %532 = memref.load %arg3[%c4_279, %c3_280] : memref<15x4xf32, #tpu.memory_space<smem>>
    %533 = vector.broadcast %532 : f32 to vector<8x8xf32>
    %534 = arith.mulf %493, %533 : vector<8x8xf32>
    %c4_281 = arith.constant 4 : index
    %c3_282 = arith.constant 3 : index
    %535 = memref.load %arg4[%c4_281, %c3_282] : memref<15x4xf32, #tpu.memory_space<smem>>
    %536 = vector.broadcast %535 : f32 to vector<8x8xf32>
    %537 = arith.addf %534, %536 : vector<8x8xf32>
    %538 = arith.select %531, %537, %529 : vector<8x8xi1>, vector<8x8xf32>
    %c5_i32_283 = arith.constant 5 : i32
    %539 = vector.broadcast %c5_i32_283 : i32 to vector<8x8xi32>
    %540 = arith.cmpi eq, %0, %539 : vector<8x8xi32>
    %c5_284 = arith.constant 5 : index
    %c3_285 = arith.constant 3 : index
    %541 = memref.load %arg3[%c5_284, %c3_285] : memref<15x4xf32, #tpu.memory_space<smem>>
    %542 = vector.broadcast %541 : f32 to vector<8x8xf32>
    %543 = arith.mulf %493, %542 : vector<8x8xf32>
    %c5_286 = arith.constant 5 : index
    %c3_287 = arith.constant 3 : index
    %544 = memref.load %arg4[%c5_286, %c3_287] : memref<15x4xf32, #tpu.memory_space<smem>>
    %545 = vector.broadcast %544 : f32 to vector<8x8xf32>
    %546 = arith.addf %543, %545 : vector<8x8xf32>
    %547 = arith.select %540, %546, %538 : vector<8x8xi1>, vector<8x8xf32>
    %c6_i32_288 = arith.constant 6 : i32
    %548 = vector.broadcast %c6_i32_288 : i32 to vector<8x8xi32>
    %549 = arith.cmpi eq, %0, %548 : vector<8x8xi32>
    %c6_289 = arith.constant 6 : index
    %c3_290 = arith.constant 3 : index
    %550 = memref.load %arg3[%c6_289, %c3_290] : memref<15x4xf32, #tpu.memory_space<smem>>
    %551 = vector.broadcast %550 : f32 to vector<8x8xf32>
    %552 = arith.mulf %493, %551 : vector<8x8xf32>
    %c6_291 = arith.constant 6 : index
    %c3_292 = arith.constant 3 : index
    %553 = memref.load %arg4[%c6_291, %c3_292] : memref<15x4xf32, #tpu.memory_space<smem>>
    %554 = vector.broadcast %553 : f32 to vector<8x8xf32>
    %555 = arith.addf %552, %554 : vector<8x8xf32>
    %556 = arith.select %549, %555, %547 : vector<8x8xi1>, vector<8x8xf32>
    %c7_i32_293 = arith.constant 7 : i32
    %557 = vector.broadcast %c7_i32_293 : i32 to vector<8x8xi32>
    %558 = arith.cmpi eq, %0, %557 : vector<8x8xi32>
    %c7_294 = arith.constant 7 : index
    %c3_295 = arith.constant 3 : index
    %559 = memref.load %arg3[%c7_294, %c3_295] : memref<15x4xf32, #tpu.memory_space<smem>>
    %560 = vector.broadcast %559 : f32 to vector<8x8xf32>
    %561 = arith.mulf %493, %560 : vector<8x8xf32>
    %c7_296 = arith.constant 7 : index
    %c3_297 = arith.constant 3 : index
    %562 = memref.load %arg4[%c7_296, %c3_297] : memref<15x4xf32, #tpu.memory_space<smem>>
    %563 = vector.broadcast %562 : f32 to vector<8x8xf32>
    %564 = arith.addf %561, %563 : vector<8x8xf32>
    %565 = arith.select %558, %564, %556 : vector<8x8xi1>, vector<8x8xf32>
    %c8_i32_298 = arith.constant 8 : i32
    %566 = vector.broadcast %c8_i32_298 : i32 to vector<8x8xi32>
    %567 = arith.cmpi eq, %0, %566 : vector<8x8xi32>
    %c8_299 = arith.constant 8 : index
    %c3_300 = arith.constant 3 : index
    %568 = memref.load %arg3[%c8_299, %c3_300] : memref<15x4xf32, #tpu.memory_space<smem>>
    %569 = vector.broadcast %568 : f32 to vector<8x8xf32>
    %570 = arith.mulf %493, %569 : vector<8x8xf32>
    %c8_301 = arith.constant 8 : index
    %c3_302 = arith.constant 3 : index
    %571 = memref.load %arg4[%c8_301, %c3_302] : memref<15x4xf32, #tpu.memory_space<smem>>
    %572 = vector.broadcast %571 : f32 to vector<8x8xf32>
    %573 = arith.addf %570, %572 : vector<8x8xf32>
    %574 = arith.select %567, %573, %565 : vector<8x8xi1>, vector<8x8xf32>
    %c9_i32_303 = arith.constant 9 : i32
    %575 = vector.broadcast %c9_i32_303 : i32 to vector<8x8xi32>
    %576 = arith.cmpi eq, %0, %575 : vector<8x8xi32>
    %c9_304 = arith.constant 9 : index
    %c3_305 = arith.constant 3 : index
    %577 = memref.load %arg3[%c9_304, %c3_305] : memref<15x4xf32, #tpu.memory_space<smem>>
    %578 = vector.broadcast %577 : f32 to vector<8x8xf32>
    %579 = arith.mulf %493, %578 : vector<8x8xf32>
    %c9_306 = arith.constant 9 : index
    %c3_307 = arith.constant 3 : index
    %580 = memref.load %arg4[%c9_306, %c3_307] : memref<15x4xf32, #tpu.memory_space<smem>>
    %581 = vector.broadcast %580 : f32 to vector<8x8xf32>
    %582 = arith.addf %579, %581 : vector<8x8xf32>
    %583 = arith.select %576, %582, %574 : vector<8x8xi1>, vector<8x8xf32>
    %c10_i32_308 = arith.constant 10 : i32
    %584 = vector.broadcast %c10_i32_308 : i32 to vector<8x8xi32>
    %585 = arith.cmpi eq, %0, %584 : vector<8x8xi32>
    %c10_309 = arith.constant 10 : index
    %c3_310 = arith.constant 3 : index
    %586 = memref.load %arg3[%c10_309, %c3_310] : memref<15x4xf32, #tpu.memory_space<smem>>
    %587 = vector.broadcast %586 : f32 to vector<8x8xf32>
    %588 = arith.mulf %493, %587 : vector<8x8xf32>
    %c10_311 = arith.constant 10 : index
    %c3_312 = arith.constant 3 : index
    %589 = memref.load %arg4[%c10_311, %c3_312] : memref<15x4xf32, #tpu.memory_space<smem>>
    %590 = vector.broadcast %589 : f32 to vector<8x8xf32>
    %591 = arith.addf %588, %590 : vector<8x8xf32>
    %592 = arith.select %585, %591, %583 : vector<8x8xi1>, vector<8x8xf32>
    %c11_i32_313 = arith.constant 11 : i32
    %593 = vector.broadcast %c11_i32_313 : i32 to vector<8x8xi32>
    %594 = arith.cmpi eq, %0, %593 : vector<8x8xi32>
    %c11_314 = arith.constant 11 : index
    %c3_315 = arith.constant 3 : index
    %595 = memref.load %arg3[%c11_314, %c3_315] : memref<15x4xf32, #tpu.memory_space<smem>>
    %596 = vector.broadcast %595 : f32 to vector<8x8xf32>
    %597 = arith.mulf %493, %596 : vector<8x8xf32>
    %c11_316 = arith.constant 11 : index
    %c3_317 = arith.constant 3 : index
    %598 = memref.load %arg4[%c11_316, %c3_317] : memref<15x4xf32, #tpu.memory_space<smem>>
    %599 = vector.broadcast %598 : f32 to vector<8x8xf32>
    %600 = arith.addf %597, %599 : vector<8x8xf32>
    %601 = arith.select %594, %600, %592 : vector<8x8xi1>, vector<8x8xf32>
    %c12_i32_318 = arith.constant 12 : i32
    %602 = vector.broadcast %c12_i32_318 : i32 to vector<8x8xi32>
    %603 = arith.cmpi eq, %0, %602 : vector<8x8xi32>
    %c12_319 = arith.constant 12 : index
    %c3_320 = arith.constant 3 : index
    %604 = memref.load %arg3[%c12_319, %c3_320] : memref<15x4xf32, #tpu.memory_space<smem>>
    %605 = vector.broadcast %604 : f32 to vector<8x8xf32>
    %606 = arith.mulf %493, %605 : vector<8x8xf32>
    %c12_321 = arith.constant 12 : index
    %c3_322 = arith.constant 3 : index
    %607 = memref.load %arg4[%c12_321, %c3_322] : memref<15x4xf32, #tpu.memory_space<smem>>
    %608 = vector.broadcast %607 : f32 to vector<8x8xf32>
    %609 = arith.addf %606, %608 : vector<8x8xf32>
    %610 = arith.select %603, %609, %601 : vector<8x8xi1>, vector<8x8xf32>
    %c13_i32_323 = arith.constant 13 : i32
    %611 = vector.broadcast %c13_i32_323 : i32 to vector<8x8xi32>
    %612 = arith.cmpi eq, %0, %611 : vector<8x8xi32>
    %c13_324 = arith.constant 13 : index
    %c3_325 = arith.constant 3 : index
    %613 = memref.load %arg3[%c13_324, %c3_325] : memref<15x4xf32, #tpu.memory_space<smem>>
    %614 = vector.broadcast %613 : f32 to vector<8x8xf32>
    %615 = arith.mulf %493, %614 : vector<8x8xf32>
    %c13_326 = arith.constant 13 : index
    %c3_327 = arith.constant 3 : index
    %616 = memref.load %arg4[%c13_326, %c3_327] : memref<15x4xf32, #tpu.memory_space<smem>>
    %617 = vector.broadcast %616 : f32 to vector<8x8xf32>
    %618 = arith.addf %615, %617 : vector<8x8xf32>
    %619 = arith.select %612, %618, %610 : vector<8x8xi1>, vector<8x8xf32>
    %c14_i32_328 = arith.constant 14 : i32
    %620 = vector.broadcast %c14_i32_328 : i32 to vector<8x8xi32>
    %621 = arith.cmpi eq, %0, %620 : vector<8x8xi32>
    %c14_329 = arith.constant 14 : index
    %c3_330 = arith.constant 3 : index
    %622 = memref.load %arg3[%c14_329, %c3_330] : memref<15x4xf32, #tpu.memory_space<smem>>
    %623 = vector.broadcast %622 : f32 to vector<8x8xf32>
    %624 = arith.mulf %493, %623 : vector<8x8xf32>
    %c14_331 = arith.constant 14 : index
    %c3_332 = arith.constant 3 : index
    %625 = memref.load %arg4[%c14_331, %c3_332] : memref<15x4xf32, #tpu.memory_space<smem>>
    %626 = vector.broadcast %625 : f32 to vector<8x8xf32>
    %627 = arith.addf %624, %626 : vector<8x8xf32>
    %628 = arith.select %621, %627, %619 : vector<8x8xi1>, vector<8x8xf32>
    %c0_333 = arith.constant 0 : index
    %c3_334 = arith.constant 3 : index
    %c0_335 = arith.constant 0 : index
    %c0_336 = arith.constant 0 : index
    %629 = vector.load %arg5[%c0_333, %c3_334, %c0_335, %c0_336] : memref<1x4x8x8xbf16, #tpu.memory_space<vmem>>, vector<1x1x8x8xbf16>
    %630 = vector.shape_cast %629 : vector<1x1x8x8xbf16> to vector<8x8xbf16>
    %631 = arith.extf %630 : vector<8x8xbf16> to vector<8x8xf32>
    %632 = arith.addf %628, %631 : vector<8x8xf32>
    %633 = arith.truncf %632 : vector<8x8xf32> to vector<8x8xbf16>
    %c0_337 = arith.constant 0 : index
    %c3_338 = arith.constant 3 : index
    %c0_339 = arith.constant 0 : index
    %c0_340 = arith.constant 0 : index
    %634 = vector.load %arg7[%c0_337, %c3_338, %c0_339, %c0_340] : memref<1x4x8x8xbf16, #tpu.memory_space<vmem>>, vector<1x1x8x8xbf16>
    %635 = vector.shape_cast %634 : vector<1x1x8x8xbf16> to vector<8x8xbf16>
    %636 = vector.shape_cast %633 : vector<8x8xbf16> to vector<1x1x8x8xbf16>
    tpu.vector_store %arg7[%c0_337, %c3_338, %c0_339, %c0_340], %636 {strides = array<i32>} : memref<1x4x8x8xbf16, #tpu.memory_space<vmem>>, vector<1x1x8x8xbf16>,
    %cst_341 = arith.constant dense<0xFF800000> : vector<8xf32>
    %637 = vector.multi_reduction <maximumf>, %632, %cst_341 [1] : vector<8x8xf32> to vector<8xf32>
    %638 = vector.shape_cast %637 : vector<8xf32> to vector<8x1xf32>
    %639 = vector.broadcast %638 : vector<8x1xf32> to vector<8x8xf32>
    %640 = arith.subf %632, %639 : vector<8x8xf32>
    %641 = math.exp %640 : vector<8x8xf32>
    %cst_342 = arith.constant dense<0.000000e+00> : vector<8xf32>
    %642 = vector.multi_reduction <add>, %641, %cst_342 [1] : vector<8x8xf32> to vector<8xf32>
    %643 = vector.shape_cast %642 : vector<8xf32> to vector<8x1xf32>
    %644 = tpu.reciprocal %643 {approx = true} : vector<8x1xf32> -> vector<8x1xf32>
    %645 = vector.broadcast %644 : vector<8x1xf32> to vector<8x8xf32>
    %646 = arith.mulf %641, %645 : vector<8x8xf32>
    %647 = arith.truncf %646 : vector<8x8xf32> to vector<8x8xbf16>
    %cst_343 = arith.constant dense<0.000000e+00> : vector<8x64xf32>
    %648 = tpu.matmul %647, %492, %cst_343 {dimension_numbers = #tpu.dot_dimension_numbers<[1], [0], [0], [1], [0, 0, 1, 1], [], []>} : vector<8x8xbf16>, vector<8x64xbf16>, vector<8x64xf32> -> vector<8x64xf32>
    %649 = tpu.concatenate %162, %324, %486, %648 in 1 : vector<8x64xf32>, vector<8x64xf32>, vector<8x64xf32>, vector<8x64xf32> -> vector<8x256xf32>
    %650 = arith.truncf %649 : vector<8x256xf32> to vector<8x256xbf16>
    %c0_344 = arith.constant 0 : index
    %c0_345 = arith.constant 0 : index
    %c0_346 = arith.constant 0 : index
    %651 = vector.load %arg6[%c0_344, %c0_345, %c0_346] : memref<1x8x256xbf16, #tpu.memory_space<vmem>>, vector<1x8x256xbf16>
    %652 = vector.shape_cast %651 : vector<1x8x256xbf16> to vector<8x256xbf16>
    %653 = vector.shape_cast %650 : vector<8x256xbf16> to vector<1x8x256xbf16>
    tpu.vector_store %arg6[%c0_344, %c0_345, %c0_346], %653 {strides = array<i32>} : memref<1x8x256xbf16, #tpu.memory_space<vmem>>, vector<1x8x256xbf16>,
    return
  }
  func.func @transform_0(%arg0: i32) -> (i32, i32, i32) {
    %c0_i32 = arith.constant 0 : i32
    %c0_i32_0 = arith.constant 0 : i32
    %c0_i32_1 = arith.constant 0 : i32
    return %arg0, %c0_i32, %c0_i32_0 : i32, i32, i32
  }
  func.func @transform_1(%arg0: i32) -> (i32, i32) {
    %c0_i32 = arith.constant 0 : i32
    %c0_i32_0 = arith.constant 0 : i32
    %c0_i32_1 = arith.constant 0 : i32
    return %c0_i32, %c0_i32_0 : i32, i32
  }
  func.func @transform_2(%arg0: i32) -> (i32, i32) {
    %c0_i32 = arith.constant 0 : i32
    %c0_i32_0 = arith.constant 0 : i32
    %c0_i32_1 = arith.constant 0 : i32
    return %c0_i32, %c0_i32_0 : i32, i32
  }
  func.func @transform_3(%arg0: i32) -> (i32, i32) {
    %c0_i32 = arith.constant 0 : i32
    %c0_i32_0 = arith.constant 0 : i32
    %c0_i32_1 = arith.constant 0 : i32
    return %c0_i32, %c0_i32_0 : i32, i32
  }
  func.func @transform_4(%arg0: i32) -> (i32, i32, i32, i32) {
    %c0_i32 = arith.constant 0 : i32
    %c0_i32_0 = arith.constant 0 : i32
    %c0_i32_1 = arith.constant 0 : i32
    %c0_i32_2 = arith.constant 0 : i32
    return %arg0, %c0_i32, %c0_i32_0, %c0_i32_1 : i32, i32, i32, i32
  }
  func.func @transform_5(%arg0: i32) -> (i32, i32, i32) {
    %c0_i32 = arith.constant 0 : i32
    %c0_i32_0 = arith.constant 0 : i32
    %c0_i32_1 = arith.constant 0 : i32
    return %arg0, %c0_i32, %c0_i32_0 : i32, i32, i32
  }
  func.func @transform_6(%arg0: i32) -> (i32, i32, i32, i32) {
    %c0_i32 = arith.constant 0 : i32
    %c0_i32_0 = arith.constant 0 : i32
    %c0_i32_1 = arith.constant 0 : i32
    %c0_i32_2 = arith.constant 0 : i32
    return %arg0, %c0_i32, %c0_i32_0, %c0_i32_1 : i32, i32, i32, i32
  }
}

module attributes {stable_mosaic.version = 11 : i64} {
  func.func @_head_kernel(%arg0: i32, %arg1: memref<2x8x64xbf16, #tpu.memory_space<vmem>>, %arg2: memref<64x6xf32, #tpu.memory_space<vmem>>, %arg3: memref<1x6xf32, #tpu.memory_space<vmem>>, %arg4: memref<64x1xf32, #tpu.memory_space<vmem>>, %arg5: memref<1x1xf32, #tpu.memory_space<vmem>>, %arg6: memref<2x1x64xf32, #tpu.memory_space<vmem>>, %arg7: memref<2x6x1xf32, #tpu.memory_space<vmem>>, %arg8: memref<2x8x6xf32, #tpu.memory_space<vmem>>) attributes {dimension_semantics = [#tpu.dimension_semantics<parallel>], iteration_bounds = array<i64: 1>, scalar_prefetch = 0 : i64, scratch_operands = 0 : i64, tpu.core_type = #tpu.core_type<tc>, window_params = [{transform_indices = @transform_0, window_bounds = array<i64: 2, 8, 64>}, {pipeline_mode = #tpu.pipeline_mode<synchronous>, transform_indices = @transform_1, window_bounds = array<i64: 64, 6>}, {pipeline_mode = #tpu.pipeline_mode<synchronous>, transform_indices = @transform_2, window_bounds = array<i64: 1, 6>}, {pipeline_mode = #tpu.pipeline_mode<synchronous>, transform_indices = @transform_3, window_bounds = array<i64: 64, 1>}, {pipeline_mode = #tpu.pipeline_mode<synchronous>, transform_indices = @transform_4, window_bounds = array<i64: 1, 1>}, {transform_indices = @transform_5, window_bounds = array<i64: 2, 1, 64>}, {transform_indices = @transform_6, window_bounds = array<i64: 2, 6, 1>}, {transform_indices = @transform_7, window_bounds = array<i64: 2, 8, 6>}]} {
    %c0 = arith.constant 0 : index
    %c0_0 = arith.constant 0 : index
    %c0_1 = arith.constant 0 : index
    %0 = vector.load %arg1[%c0, %c0_0, %c0_1] : memref<2x8x64xbf16, #tpu.memory_space<vmem>>, vector<2x8x64xbf16>
    %1 = arith.extf %0 : vector<2x8x64xbf16> to vector<2x8x64xf32>
    %cst = arith.constant dense<0.000000e+00> : vector<2x64xf32>
    %2 = vector.multi_reduction <add>, %1, %cst [1] : vector<2x8x64xf32> to vector<2x64xf32>
    %3 = vector.shape_cast %2 : vector<2x64xf32> to vector<2x1x64xf32>
    %cst_2 = arith.constant 8.000000e+00 : f32
    %4 = vector.broadcast %cst_2 : f32 to vector<2x1x64xf32>
    %5 = arith.divf %3, %4 : vector<2x1x64xf32>
    %6 = arith.mulf %5, %5 : vector<2x1x64xf32>
    %cst_3 = arith.constant dense<0.000000e+00> : vector<2x1xf32>
    %7 = vector.multi_reduction <add>, %6, %cst_3 [2] : vector<2x1x64xf32> to vector<2x1xf32>
    %8 = vector.shape_cast %7 : vector<2x1xf32> to vector<2x1x1xf32>
    %9 = math.sqrt %8 : vector<2x1x1xf32>
    %cst_4 = arith.constant 9.99999996E-13 : f32
    %10 = vector.broadcast %cst_4 : f32 to vector<2x1x1xf32>
    %11 = arith.maximumf %9, %10 : vector<2x1x1xf32>
    %12 = vector.broadcast %11 : vector<2x1x1xf32> to vector<2x1x64xf32>
    %13 = arith.divf %5, %12 : vector<2x1x64xf32>
    %c0_5 = arith.constant 0 : index
    %c0_6 = arith.constant 0 : index
    %c0_7 = arith.constant 0 : index
    %14 = vector.load %arg6[%c0_5, %c0_6, %c0_7] : memref<2x1x64xf32, #tpu.memory_space<vmem>>, vector<2x1x64xf32>
    tpu.vector_store %arg6[%c0_5, %c0_6, %c0_7], %13 {strides = array<i32>} : memref<2x1x64xf32, #tpu.memory_space<vmem>>, vector<2x1x64xf32>,
    %c0_8 = arith.constant 0 : index
    %c0_9 = arith.constant 0 : index
    %15 = vector.load %arg2[%c0_8, %c0_9] : memref<64x6xf32, #tpu.memory_space<vmem>>, vector<64x6xf32>
    "tpu.trace_start"() <{level = 10 : i32, message = "ble,ec->blc"}> : () -> ()
    %cst_10 = arith.constant dense<0.000000e+00> : vector<2x8x6xf32>
    %16 = tpu.matmul %1, %15, %cst_10 {dimension_numbers = #tpu.dot_dimension_numbers<[2], [0], [0, 1], [1], [0, 0, 0, 1, 1, 1], [], []>} : vector<2x8x64xf32>, vector<64x6xf32>, vector<2x8x6xf32> -> vector<2x8x6xf32>
    "tpu.trace_stop"() : () -> ()
    %c0_11 = arith.constant 0 : index
    %c0_12 = arith.constant 0 : index
    %17 = vector.load %arg3[%c0_11, %c0_12] : memref<1x6xf32, #tpu.memory_space<vmem>>, vector<1x6xf32>
    %18 = vector.shape_cast %17 : vector<1x6xf32> to vector<1x1x6xf32>
    %19 = vector.broadcast %18 : vector<1x1x6xf32> to vector<2x8x6xf32>
    %20 = arith.addf %16, %19 : vector<2x8x6xf32>
    %cst_13 = arith.constant dense<0xFF800000> : vector<2x6xf32>
    %21 = vector.multi_reduction <maximumf>, %20, %cst_13 [1] : vector<2x8x6xf32> to vector<2x6xf32>
    %22 = vector.shape_cast %21 : vector<2x6xf32> to vector<2x1x6xf32>
    %23 = vector.broadcast %22 : vector<2x1x6xf32> to vector<2x8x6xf32>
    %24 = arith.subf %20, %23 : vector<2x8x6xf32>
    %25 = math.exp %24 : vector<2x8x6xf32>
    %cst_14 = arith.constant dense<0.000000e+00> : vector<2x6xf32>
    %26 = vector.multi_reduction <add>, %25, %cst_14 [1] : vector<2x8x6xf32> to vector<2x6xf32>
    %27 = vector.shape_cast %26 : vector<2x6xf32> to vector<2x1x6xf32>
    %28 = tpu.reciprocal %27 {approx = true} : vector<2x1x6xf32> -> vector<2x1x6xf32>
    %29 = vector.broadcast %28 : vector<2x1x6xf32> to vector<2x8x6xf32>
    %30 = arith.mulf %25, %29 : vector<2x8x6xf32>
    %c0_15 = arith.constant 0 : index
    %c0_16 = arith.constant 0 : index
    %c0_17 = arith.constant 0 : index
    %31 = vector.load %arg8[%c0_15, %c0_16, %c0_17] : memref<2x8x6xf32, #tpu.memory_space<vmem>>, vector<2x8x6xf32>
    tpu.vector_store %arg8[%c0_15, %c0_16, %c0_17], %30 {strides = array<i32>} : memref<2x8x6xf32, #tpu.memory_space<vmem>>, vector<2x8x6xf32>,
    "tpu.trace_start"() <{level = 10 : i32, message = "blc,ble->bce"}> : () -> ()
    %cst_18 = arith.constant dense<0.000000e+00> : vector<2x6x64xf32>
    %32 = tpu.matmul %30, %1, %cst_18 {dimension_numbers = #tpu.dot_dimension_numbers<[1], [1], [2], [2], [0, 0, 0, 2, 1, 2], [0], [0]>} : vector<2x8x6xf32>, vector<2x8x64xf32>, vector<2x6x64xf32> -> vector<2x6x64xf32>
    "tpu.trace_stop"() : () -> ()
    %c0_19 = arith.constant 0 : index
    %c0_20 = arith.constant 0 : index
    %33 = vector.load %arg4[%c0_19, %c0_20] : memref<64x1xf32, #tpu.memory_space<vmem>>, vector<64x1xf32>
    "tpu.trace_start"() <{level = 10 : i32, message = "bce,eo->bco"}> : () -> ()
    %cst_21 = arith.constant dense<0.000000e+00> : vector<2x6x1xf32>
    %34 = tpu.matmul %32, %33, %cst_21 {dimension_numbers = #tpu.dot_dimension_numbers<[2], [0], [0, 1], [1], [0, 0, 0, 1, 1, 1], [], []>} : vector<2x6x64xf32>, vector<64x1xf32>, vector<2x6x1xf32> -> vector<2x6x1xf32>
    "tpu.trace_stop"() : () -> ()
    %c0_22 = arith.constant 0 : index
    %c0_23 = arith.constant 0 : index
    %35 = vector.load %arg5[%c0_22, %c0_23] : memref<1x1xf32, #tpu.memory_space<vmem>>, vector<1x1xf32>
    %36 = vector.shape_cast %35 : vector<1x1xf32> to vector<1x1x1xf32>
    %37 = vector.broadcast %36 : vector<1x1x1xf32> to vector<2x6x1xf32>
    %38 = arith.addf %34, %37 : vector<2x6x1xf32>
    %c0_24 = arith.constant 0 : index
    %c0_25 = arith.constant 0 : index
    %c0_26 = arith.constant 0 : index
    %39 = vector.load %arg7[%c0_24, %c0_25, %c0_26] : memref<2x6x1xf32, #tpu.memory_space<vmem>>, vector<2x6x1xf32>
    tpu.vector_store %arg7[%c0_24, %c0_25, %c0_26], %38 {strides = array<i32>} : memref<2x6x1xf32, #tpu.memory_space<vmem>>, vector<2x6x1xf32>,
    return
  }
  func.func @transform_0(%arg0: i32) -> (i32, i32, i32) {
    %c0_i32 = arith.constant 0 : i32
    %c0_i32_0 = arith.constant 0 : i32
    %c0_i32_1 = arith.constant 0 : i32
    return %arg0, %c0_i32, %c0_i32_0 : i32, i32, i32
  }
  func.func @transform_1(%arg0: i32) -> (i32, i32) {
    %c0_i32 = arith.constant 0 : i32
    %c0_i32_0 = arith.constant 0 : i32
    %c0_i32_1 = arith.constant 0 : i32
    return %c0_i32, %c0_i32_0 : i32, i32
  }
  func.func @transform_2(%arg0: i32) -> (i32, i32) {
    %c0_i32 = arith.constant 0 : i32
    %c0_i32_0 = arith.constant 0 : i32
    %c0_i32_1 = arith.constant 0 : i32
    return %c0_i32, %c0_i32_0 : i32, i32
  }
  func.func @transform_3(%arg0: i32) -> (i32, i32) {
    %c0_i32 = arith.constant 0 : i32
    %c0_i32_0 = arith.constant 0 : i32
    %c0_i32_1 = arith.constant 0 : i32
    return %c0_i32, %c0_i32_0 : i32, i32
  }
  func.func @transform_4(%arg0: i32) -> (i32, i32) {
    %c0_i32 = arith.constant 0 : i32
    %c0_i32_0 = arith.constant 0 : i32
    %c0_i32_1 = arith.constant 0 : i32
    return %c0_i32, %c0_i32_0 : i32, i32
  }
  func.func @transform_5(%arg0: i32) -> (i32, i32, i32) {
    %c0_i32 = arith.constant 0 : i32
    %c0_i32_0 = arith.constant 0 : i32
    %c0_i32_1 = arith.constant 0 : i32
    return %arg0, %c0_i32, %c0_i32_0 : i32, i32, i32
  }
  func.func @transform_6(%arg0: i32) -> (i32, i32, i32) {
    %c0_i32 = arith.constant 0 : i32
    %c0_i32_0 = arith.constant 0 : i32
    %c0_i32_1 = arith.constant 0 : i32
    return %arg0, %c0_i32, %c0_i32_0 : i32, i32, i32
  }
  func.func @transform_7(%arg0: i32) -> (i32, i32, i32) {
    %c0_i32 = arith.constant 0 : i32
    %c0_i32_0 = arith.constant 0 : i32
    %c0_i32_1 = arith.constant 0 : i32
    return %arg0, %c0_i32, %c0_i32_0 : i32, i32, i32
  }
}

</mosaic_0001>

<bundles_post_ra>
// kernel: kgpdplam_forward.15
= control target key start
LH: loop header
LB: loop body
LE: loop exit
PB: predicated region body
PF: predicated region fallthrough
CT: control target
= control target key end

     0   :  { %8 = vsyncpa [#allocation4], 0  ;;  %s888_s0 = inlined_call_operand.vmem [shape: bf16[16,64], index: 0, kind: input, shape index: {}]   ;;  %s889_s1 = inlined_call_operand.hbm [shape: bf16[64,768], index: 1, kind: input, shape index: {}]   ;;  %s890_s2 = inlined_call_operand.vmem [shape: f32[1,768], index: 2, kind: input, shape index: {}]   ;;  %s891_s3 = inlined_call_operand.vmem [shape: bf16[16,768], index: 3, kind: output, shape index: {}]  }
   0x1   :  { %10 = vsyncpa [#allocation4 + $0x1], 0  ;;  %s783_s12 = smov 0   ;;  %s785_s13 = smov 0  }
   0x2   :  { %s787_s14 = smov 0   ;;  %s789_s15 = smov 0  }
   0x3   :  { %s791_s16 = smov 0   ;;  %s793_s17 = smov 0  }
   0x4 LB: > { %s554_s18 = sadd.s32 4294967295, %s758_s17   ;;  %s31_s19 = sadd.s32 1, %s754_s16  ;;  %s758_s17 = sphi %s793_s17, %s16_s17   ;;  %s754_s16 = sphi %s791_s16, %s899_s16   ;;  %s750_s15 = sphi %s789_s15, %s898_s15   ;;  %s746_s14 = sphi %s787_s14, %s897_s14   ;;  %s742_s13 = sphi %s785_s13, %s896_s13   ;;  %s738_s12 = sphi %s783_s12, %s895_s12  }
   0x5   : > { %p33_p0 = scmp.ge.s32.totalorder %s31_s19, 3  ;;  %s72_s20 = sadd.s32 1, %s746_s14 }
   0x6   : > { %p79_p1 = scmp.ne.s32.totalorder %s746_s14, %s742_s13  ;;  %p80_p2 = scmp.eq.s32.totalorder %s758_s17, 0 }
   0x7   : > { %s901_s19 = smov (%p33_p0, %s31_s19), 0  ;;  %p85_p4 = scmp.ne.s32.totalorder %s742_s13, %s738_s12 }
   0x8   : > { %p819_p3 = por %p80_p2, %p79_p1  ;;  %s68_s22 = ssub.s32 %s754_s16, %s901_s19 }
   0x9   : > { %p86_p5 = scmp.eq.s32.totalorder %s554_s18, 0  ;;  %p70_p6 = scmp.eq.s32.totalorder %s68_s22, 0 }
   0xa   : > { %p137_p7 = scmp.eq.s32.totalorder %s554_s18, 2  ;;  %p626_p10 = scmp.lt.s32.totalorder %s758_s17, 3 }
   0xb   : > { %p826_p8 = por %p86_p5, %p85_p4  ;;  %s175_s26 = sand.u32 1, %s746_s14  }
   0xc   : > { %s831_s24 = scalar_select %p70_p6, %s746_s14, %s72_s20  }
   0xd   : > { %p833_p9 = por %p137_p7, %p79_p1  ;;  %s609_s27 = sshll.u32 %s754_s16, 3 }
   0xe   : > { %s559_s28 = sshll.u32 %s175_s26, 6  ;;  %s187_s4 = scalar_lea.hbm %s889_s1, %s609_s27 }
   0xf   : > { %s188_s5 = sshll.u32 %s187_s4, 4  ;;  %s179_s6 = scalar_lea.vmem [#allocation3], %s559_s28  ;;  %s189_s5 = int_to_ptr.hbm [resolvable:$true] %s188_s5 }
  0x10   : > { %s190_s7 = sshll.u32 %s179_s6, 4  ;;  %p623_p11 = pnand %p626_p10, %p819_p3  ;;  %s191_s7 = int_to_ptr.vmem [resolvable:$true] %s190_s7 }
  0x11   : > { %p562_p12 = scmp.ge.s32.totalorder %s758_s17, 1  ;;  %s176_s8 = scalar_lea.sflag [#allocation4], %s175_s26 }
  0x12   : > { %s760_s9 = smov 384   ;;  %s761_s10 = smov 128  }
  0x13   : > { %s762_s11 = smov 8   ;;  %p206_p13 = scmp.lt.s32.totalorder %s758_s17, 4 }
  0x14   : > { %625 = dma.hbm_to_vmem [thread:$0]  (!%p623_p11), %s189_s5, 1024, %s191_s7, %s176_s8, %s760_s9, %s761_s10, %s762_s11  }
  0x15   : > { %p207_p0 = pnand %p562_p12, %p206_p13 }
  0x16   : > { %s848_s12 = sand.u32 (!%p207_p0), 1, %s742_s13  }
  0x17   : > { %210 = sbr.rel (%p207_p0) target bundleno = 195 (0xc3), region = 32  ;;  %s563_s18 = sshll.u32 (!%p207_p0), %s848_s12, 6 }
  0x18   : > { %s213_s20 = scalar_lea.sflag (!%p207_p0), [#allocation4], %s848_s12  ;;  %s216_s22 = scalar_lea.vmem (!%p207_p0), [#allocation3], %s563_s18 }
  0x1c   : > { %733 = dma.done.wait (%p826_p8), %s213_s20, 1024  }
  0x1d   : > { %735 = vsyncadd (%p826_p8), %s213_s20, 4294966272  ;;  %v596_v0 = vld [vmem:[%s216_s22 + $0x30] sm:$0xf]  ;;  %v618_v1 = vld [vmem:[%s216_s22 + $0x34] sm:$0xf0]  ;;  %vm337_vm0 = vcmask 523264  }
  0x1e   : > { %v617_v2 = vld [vmem:[%s216_s22 + $0x34] sm:$0xf]  ;;  %v597_v3 = vor.u32 %v618_v1, %v596_v0  ;;  %v598_v4 = vld [vmem:[%s216_s22 + $0x38] sm:$0xf0]  ;;  %v588_v5 = vld [vmem:[%s216_s22 + $0x20] sm:$0xf] }
  0x1f   : > { %v616_v6 = vld [vmem:[%s216_s22 + $0x24] sm:$0xf0]  ;;  %v601_v7 = vor.u32 %v617_v2, %v598_v4  ;;  %v615_v8 = vld [vmem:[%s216_s22 + $0x24] sm:$0xf]  ;;  %v590_v9 = vld [vmem:[%s216_s22 + $0x28] sm:$0xf0] }
  0x20   : > { %345 = vmatpush.bf16.msra.mxu0 %v597_v3  ;;  %v589_v10 = vor.u32 %v616_v6, %v588_v5  ;;  %v593_v11 = vor.u32 %v615_v8, %v590_v9  ;;  %v580_v12 = vld [vmem:[%s216_s22 + $0x10] sm:$0xf]  ;;  %v614_v13 = vld [vmem:[%s216_s22 + $0x14] sm:$0xf0]  ;;  %v613_v14 = vld [vmem:[%s216_s22 + $0x14] sm:$0xf] }
  0x21   : > { %359 = vmatpush.bf16.msra.mxu1 %v601_v7  ;;  %v582_v15 = vld [vmem:[%s216_s22 + $0x18] sm:$0xf0]  ;;  %v581_v16 = vor.u32 %v614_v13, %v580_v12  ;;  %v572_v18 = vld [vmem:[%s216_s22] sm:$0xf]  ;;  %v612_v19 = vld [vmem:[%s216_s22 + $0x4] sm:$0xf0] }
  0x22   : > { %v585_v17 = vor.u32 %v613_v14, %v582_v15  ;;  %v611_v20 = vld [vmem:[%s216_s22 + $0x4] sm:$0xf]  ;;  %v574_v21 = vld [vmem:[%s216_s22 + $0x8] sm:$0xf0]  ;;  %v573_v22 = vor.u32 %v612_v19, %v572_v18  ;;  %s565_s26 = sshll.u32 %s750_s15, 1  ;;  %s564_s30 = sshll.u32 %s848_s12, 4 }
  0x23   : > { %v577_v23 = vor.u32 %v611_v20, %v574_v21  ;;  %v610_v24 = vld [vmem:[%s888_s0] sm:$0xff]  ;;  %p263_p1 = scmp.lt.s32.totalorder %s565_s26, 5  ;;  %s250_s4 = scalar_lea.vmem [#allocation5], %s564_s30 }
  0x24   : > { %346 = vmatpush.bf16.msra.mxu0 %v589_v10  ;;  %s619_s5 = sshll.u32 (%p833_p9), %s750_s15, 3 }
  0x25   : > { %360 = vmatpush.bf16.msra.mxu1 %v593_v11  ;;  %s903_s26 = smov (!%p263_p1, %s565_s26), 5  ;;  %s410_s8 = scalar_lea.vmem (%p833_p9), %s891_s3, %s619_s5 }
  0x26   : > { %s265_s29 = scalar_lea.vmem %s890_s2, %s903_s26 }
  0x27   : > { %v384_v25 = vld [vmem:[%s265_s29] sm:$0x3] }
  0x28   : > { %347 = vmatpush.bf16.msra.mxu0 %v581_v16  ;;  %v386_v26 = vperm.slane %v384_v25, 0  ;;  %v387_v27 = vperm.slane %v384_v25, 1 }
  0x29   : > { %361 = vmatpush.bf16.msra.mxu1 %v585_v17 }
  0x2c   : > { %348 = vmatpush.bf16.msra.mxu0 %v573_v22 }
  0x2d   : > { %362 = vmatpush.bf16.msra.mxu1 %v577_v23 }
  0x2f   : > { %602 = vmatmul.msk.bf16.vlgmr.msra.gmra.mxu0 %vm337_vm0, %v610_v24 }
  0x30   : > { %603 = vmatmul.msk.bf16.vlgmr.msra.gmra.mxu1 %vm337_vm0, %v610_v24 }
  0xac   : > { %v350_v28 = vpop.f32.mrf.mxu0 }
  0xad   : > { %v390_v29 = vadd.f32 %v386_v26, %v350_v28  ;;  %v364_v30 = vpop.f32.mrf.mxu1 }
  0xae   : > { %v391_v31 = vadd.f32 %v387_v27, %v364_v30 }
  0xb0   : > { %v394_v32 = vpack.c.bf16 %v391_v31, %v390_v29 }
  0xb2   : > { %396 = vst [vmem:[%s250_s4] sm:$0xff] %v394_v32 }
  0xb4   : > { %v352_v33 = vpop.f32.mrf.mxu0 }
  0xb5   : > { %v392_v34 = vadd.f32 %v386_v26, %v352_v33  ;;  %v366_v35 = vpop.f32.mrf.mxu1 }
  0xb6   : > { %v393_v36 = vadd.f32 %v387_v27, %v366_v35  ;;  %404 = sbr.rel (!%p833_p9) target bundleno = 195 (0xc3), region = 48 }
  0xb8   : > { %v395_v37 = vpack.c.bf16 %v393_v36, %v392_v34 }
  0xb9   : > { %v441_v38 = vld [vmem:[%s250_s4] sm:$0xff] (%p833_p9) }
  0xba   : > { %397 = vst [vmem:[%s250_s4 + $0x8] sm:$0xff] %v395_v37 }
  0xbb   : > { %442 = vst [vmem:[%s410_s8] sm:$0xff] %v441_v38 }
  0xc1   : > { %v443_v39 = vld [vmem:[%s250_s4 + $0x8] sm:$0xff] }
  0xc2   : > { %444 = vst [vmem:[%s410_s8 + $0x18] sm:$0xff] %v443_v39 }
  0xc3 PF: > { %s16_s17 = sadd.s32 1, %s758_s17   ;;  %s895_s12 = smov %s742_s13 }
  0xc4   : > { %p13_p2 = scmp.ge.s32.totalorder %s16_s17, 5   ;;  %s896_s13 = smov %s746_s14 }
  0xc5   : > { %s897_s14 = smov %s831_s24  ;;  %s898_s15 = smov %s754_s16 }
  0xc6   : > { %s899_s16 = smov %s901_s19  ;;  %15 = sbr.rel (!%p13_p2) target bundleno = 4 (0x4), region = 124 }
  0xcb   :  { %460 = vsyncpa [#allocation4], 1 }
  0xcc   :  { %462 = vsyncpa [#allocation4 + $0x1], 1 }

// kernel: kgpdplam_forward.14
= control target key start
LH: loop header
LB: loop body
LE: loop exit
PB: predicated region body
PF: predicated region fallthrough
CT: control target
= control target key end

     0   :  { %vm19_vm0 = vcmask 523264   ;;  %v108_v1 = vmov 0.0   ;;  %vm47_vm1 = vcmask 261120   ;;  %vm83_vm2 = vcmask 519168   ;;  %s151_s1 = inlined_call_operand.vmem [shape: bf16[32,64], index: 1, kind: input, shape index: {}]   ;;  %s152_s2 = inlined_call_operand.vmem [shape: f32[1,64], index: 2, kind: input, shape index: {}]   ;;  %s153_s0 = inlined_call_operand.vmem [shape: bf16[16,32], index: 0, kind: input, shape index: {}]   ;;  %s154_s3 = inlined_call_operand.vmem [shape: bf16[16,64], index: 3, kind: output, shape index: {}]  }
   0x1   :  { %v105_v0 = vld [vmem:[%s151_s1 + $0x8] sm:$0xff]  ;;  %20 = vst.msk [vmem:[#allocation2] sm:$0xff] %vm19_vm0, %v108_v1  ;;  %v104_v2 = vld [vmem:[%s151_s1] sm:$0xff] }
   0x2   :  { %21 = vst.msk [vmem:[#allocation2 + $0x8] sm:$0xff] %vm19_vm0, %v108_v1  ;;  %57 = vmatpush.bf16.msra.mxu0 %v105_v0  ;;  %v103_v3 = vld [vmem:[%s153_s0] sm:$0xff] }
   0x3   :  { %v107_v8 = vld [vmem:[%s152_s2] ss:$0 sm:$0xff] }
   0x6   :  { %58 = vmatpush.bf16.msra.mxu0 %v104_v2 }
   0x8   :  { %v22_v4 = vld [vmem:[#allocation2] sm:$0xff] }
   0x9   :  { %102 = vmatmul.msk.bf16.vlgmr.msra.gmra.mxu0 %vm47_vm1, %v103_v3  ;;  %v23_v7 = vld [vmem:[#allocation2 + $0x8] sm:$0xff] }
  0x86   :  { %v60_v5 = vpop.f32.mrf.mxu0 }
  0x87   :  { %v65_v6 = vadd.f32 %v60_v5, %v22_v4 }
  0x89   :  { %68 = vst.msk [vmem:[#allocation2] sm:$0xff] %vm19_vm0, %v65_v6 }
  0x8e   :  { %v62_v9 = vpop.f32.mrf.mxu0 }
  0x8f   :  { %v66_v10 = vadd.f32 %v62_v9, %v23_v7 }
  0x90   :  { %v73_v11 = vld [vmem:[#allocation2] sm:$0xff] }
  0x91   :  { %v79_v12 = vadd.f32 %v107_v8, %v73_v11  ;;  %69 = vst.msk [vmem:[#allocation2 + $0x8] sm:$0xff] %vm19_vm0, %v66_v10 }
  0x93   :  { %v81_v13 = vpack.c.bf16 %v79_v12, %v79_v12 }
  0x95   :  { %84 = vst.msk [vmem:[%s154_s3] sm:$0xf] %vm83_vm2, %v81_v13 }
  0x98   :  { %v74_v14 = vld [vmem:[#allocation2 + $0x8] sm:$0xff] }
  0x99   :  { %v80_v15 = vadd.f32 %v107_v8, %v74_v14 }
  0x9b   :  { %v82_v16 = vpack.c.bf16 %v80_v15, %v80_v15 }
  0x9d   :  { %85 = vst.msk [vmem:[%s154_s3 + $0x4] sm:$0xf] %vm83_vm2, %v82_v16 }

// kernel: kgpdplam_forward.17
= control target key start
LH: loop header
LB: loop body
LE: loop exit
PB: predicated region body
PF: predicated region fallthrough
CT: control target
= control target key end

     0   :  { %vm222_vm0 = vcmask 523264   ;;  %v836_v38 = vmov 64.0   ;;  %vm596_vm12 = vcmask 519168   ;;  %s1118_s2 = inlined_call_operand.vmem [shape: bf16[256,64], index: 2, kind: input, shape index: {}]   ;;  %s1119_s3 = inlined_call_operand.vmem [shape: f32[1,64], index: 3, kind: input, shape index: {}]   ;;  %s1120_s1 = inlined_call_operand.vmem [shape: bf16[16,256], index: 1, kind: input, shape index: {}]   ;;  %s1121_s0 = inlined_call_operand.vmem [shape: bf16[16,64], index: 0, kind: input, shape index: {}]   ;;  %s1122_s4 = inlined_call_operand.vmem [shape: f32[1,64], index: 4, kind: input, shape index: {}]   ;;  %s1123_s5 = inlined_call_operand.vmem [shape: f32[1,64], index: 5, kind: input, shape index: {}]   ;;  %s1124_s6 = inlined_call_operand.vmem [shape: bf16[64,256], index: 6, kind: input, shape index: {}]   ;;  %s1125_s8 = inlined_call_operand.vmem [shape: bf16[256,64], index: 8, kind: input, shape index: {}]   ;;  %s1126_s9 = inlined_call_operand.vmem [shape: f32[1,64], index: 9, kind: input, shape index: {}]   ;;  %s1127_s7 = inlined_call_operand.vmem [shape: f32[1,256], index: 7, kind: input, shape index: {}]   ;;  %s1128_s10 = inlined_call_operand.vmem [shape: f32[1,64], index: 10, kind: input, shape index: {}]   ;;  %s1129_s11 = inlined_call_operand.vmem [shape: f32[1,64], index: 11, kind: input, shape index: {}]   ;;  %s1130_s12 = inlined_call_operand.vmem [shape: bf16[16,64], index: 12, kind: output, shape index: {}]  }
   0x1   :  { %v782_v0 = vld [vmem:[%s1118_s2 + $0x38] sm:$0xff]  ;;  %v781_v2 = vld [vmem:[%s1118_s2 + $0x30] sm:$0xff]  ;;  %v780_v4 = vld [vmem:[%s1118_s2 + $0x28] sm:$0xff]  ;;  %826 = vrcp.f32 %v836_v38 }
   0x2   :  { %v790_v1 = vld [vmem:[%s1118_s2 + $0x78] sm:$0xff]  ;;  %186 = vmatpush.bf16.msra.mxu0 %v782_v0  ;;  %v789_v3 = vld [vmem:[%s1118_s2 + $0x70] sm:$0xff]  ;;  %v788_v5 = vld [vmem:[%s1118_s2 + $0x68] sm:$0xff] }
   0x3   :  { %200 = vmatpush.bf16.msra.mxu1 %v790_v1  ;;  %v779_v6 = vld [vmem:[%s1118_s2 + $0x20] sm:$0xff]  ;;  %v778_v8 = vld [vmem:[%s1118_s2 + $0x18] sm:$0xff]  ;;  %v777_v10 = vld [vmem:[%s1118_s2 + $0x10] sm:$0xff] }
   0x4   :  { %v787_v7 = vld [vmem:[%s1118_s2 + $0x60] sm:$0xff]  ;;  %v786_v9 = vld [vmem:[%s1118_s2 + $0x58] sm:$0xff]  ;;  %v785_v11 = vld [vmem:[%s1118_s2 + $0x50] sm:$0xff] }
   0x5   :  { %v776_v12 = vld [vmem:[%s1118_s2 + $0x8] sm:$0xff]  ;;  %v775_v14 = vld [vmem:[%s1118_s2] sm:$0xff]  ;;  %v701_v55 = vld [vmem:[%s1124_s6 + $0x30] sm:$0xf] }
   0x6   :  { %187 = vmatpush.bf16.msra.mxu0 %v781_v2  ;;  %v784_v13 = vld [vmem:[%s1118_s2 + $0x48] sm:$0xff]  ;;  %v783_v15 = vld [vmem:[%s1118_s2 + $0x40] sm:$0xff]  ;;  %v798_v56 = vld [vmem:[%s1124_s6 + $0x34] sm:$0xf0] }
   0x7   :  { %201 = vmatpush.bf16.msra.mxu1 %v789_v3  ;;  %v605_v16 = vld [vmem:[%s1120_s1] sm:$0xf]  ;;  %v774_v17 = vld [vmem:[%s1120_s1 + $0x4] sm:$0xf0]  ;;  %v773_v18 = vld [vmem:[%s1120_s1 + $0x4] sm:$0xf]  ;;  %v827_v39 = vpop.eup %826  ;;  %v702_v58 = vor.u32 %v798_v56, %v701_v55 }
   0x8   :  { %v607_v19 = vld [vmem:[%s1120_s1 + $0x8] sm:$0xf0]  ;;  %v606_v20 = vor.u32 %v774_v17, %v605_v16  ;;  %v820_v22 = vld [vmem:[%s1119_s3] ss:$0 sm:$0xff]  ;;  %v230_v40 = vmul.f32 64.0, %v827_v39  ;;  %vm234_vm1 = vweird.f32 %v827_v39  ;;  %v801_v55 = vld [vmem:[%s1125_s8 + $0x10] sm:$0xff] }
   0x9   :  { %v610_v21 = vor.u32 %v773_v18, %v607_v19  ;;  %v816_v23 = vld [vmem:[%s1121_s0] sm:$0xff]   ;;  %v797_v57 = vld [vmem:[%s1124_s6 + $0x34] sm:$0xf]  ;;  %v703_v59 = vld [vmem:[%s1124_s6 + $0x38] sm:$0xf0]  ;;  %346 = vmatpush.bf16.msra.mxu2 %v702_v58 }
   0xa   :  { %188 = vmatpush.bf16.msra.mxu0 %v780_v4  ;;  %v817_v27 = vunpack.c.l.bf16 %v816_v23  ;;  %v818_v33 = vunpack.c.h.bf16 %v816_v23  ;;  %v231_v41 = vsub.f32 1.0, %v230_v40  ;;  %v706_v60 = vor.u32 %v797_v57, %v703_v59  ;;  %v693_v61 = vld [vmem:[%s1124_s6 + $0x20] sm:$0xf]  ;;  %v796_v62 = vld [vmem:[%s1124_s6 + $0x24] sm:$0xf0]  ;;  %v806_v18 = vld [vmem:[%s1125_s8 + $0x38] sm:$0xff] }
   0xb   :  { %202 = vmatpush.bf16.msra.mxu1 %v788_v5  ;;  %v795_v63 = vld [vmem:[%s1124_s6 + $0x24] sm:$0xf]  ;;  %v694_v0 = vor.u32 %v796_v62, %v693_v61  ;;  %v695_v1 = vld [vmem:[%s1124_s6 + $0x28] sm:$0xf0]  ;;  %v685_v3 = vld [vmem:[%s1124_s6 + $0x10] sm:$0xf] }
   0xc   :  { %v232_v42 = vmul.f32 %v827_v39, %v231_v41  ;;  %360 = vmatpush.bf16.msra.mxu3 %v706_v60  ;;  %v698_v2 = vor.u32 %v795_v63, %v695_v1  ;;  %v794_v4 = vld [vmem:[%s1124_s6 + $0x14] sm:$0xf0]  ;;  %v793_v5 = vld [vmem:[%s1124_s6 + $0x14] sm:$0xf]  ;;  %v800_v57 = vld [vmem:[%s1125_s8 + $0x8] sm:$0xff] }
   0xd   :  { %347 = vmatpush.bf16.msra.mxu2 %v694_v0  ;;  %v814_v19 = vld [vmem:[%s1125_s8 + $0x78] sm:$0xff]  ;;  %v813_v23 = vld [vmem:[%s1125_s8 + $0x70] sm:$0xff]  ;;  %v808_v58 = vld [vmem:[%s1125_s8 + $0x48] sm:$0xff] }
   0xe   :  { %189 = vmatpush.bf16.msra.mxu0 %v779_v6  ;;  %v233_v43 = vadd.f32 %v827_v39, %v232_v42  ;;  %v686_v6 = vor.u32 %v794_v4, %v685_v3  ;;  %v821_v42 = vld [vmem:[%s1122_s4] ss:$0 sm:$0xff]  ;;  %v809_v56 = vld [vmem:[%s1125_s8 + $0x50] sm:$0xff] }
   0xf   :  { %203 = vmatpush.bf16.msra.mxu1 %v787_v7  ;;  %v687_v7 = vld [vmem:[%s1124_s6 + $0x18] sm:$0xf0]  ;;  %v799_v59 = vld [vmem:[%s1125_s8] sm:$0xff] }
  0x10   :  { %v970_v44 = vsel %vm234_vm1, %v827_v39, %v233_v43  ;;  %361 = vmatpush.bf16.msra.mxu3 %v698_v2  ;;  %v807_v60 = vld [vmem:[%s1125_s8 + $0x40] sm:$0xff] }
  0x11   :  { %348 = vmatpush.bf16.msra.mxu2 %v686_v6  ;;  %v293_v61 = vld [vmem:[%s1127_s7] sm:$0x3] }
  0x12   :  { %190 = vmatpush.bf16.msra.mxu0 %v778_v8  ;;  %v690_v8 = vor.u32 %v793_v5, %v687_v7  ;;  %v295_v0 = vperm.slane %v293_v61, 0  ;;  %v296_v1 = vperm.slane %v293_v61, 1 }
  0x13   :  { %204 = vmatpush.bf16.msra.mxu1 %v786_v9  ;;  %v677_v9 = vld [vmem:[%s1124_s6] sm:$0xf] }
  0x14   :  { %362 = vmatpush.bf16.msra.mxu3 %v690_v8 }
  0x16   :  { %191 = vmatpush.bf16.msra.mxu0 %v777_v10  ;;  %v792_v10 = vld [vmem:[%s1124_s6 + $0x4] sm:$0xf0] }
  0x17   :  { %205 = vmatpush.bf16.msra.mxu1 %v785_v11  ;;  %v791_v11 = vld [vmem:[%s1124_s6 + $0x4] sm:$0xf] }
  0x1a   :  { %192 = vmatpush.bf16.msra.mxu0 %v776_v12 }
  0x1b   :  { %206 = vmatpush.bf16.msra.mxu1 %v784_v13  ;;  %v678_v13 = vor.u32 %v792_v10, %v677_v9 }
  0x1d   :  { %349 = vmatpush.bf16.msra.mxu2 %v678_v13 }
  0x1e   :  { %193 = vmatpush.bf16.msra.mxu0 %v775_v14  ;;  %v679_v14 = vld [vmem:[%s1124_s6 + $0x8] sm:$0xf0] }
  0x1f   :  { %207 = vmatpush.bf16.msra.mxu1 %v783_v15  ;;  %v682_v16 = vor.u32 %v791_v11, %v679_v14  ;;  %v823_v14 = vld [vmem:[%s1126_s9] ss:$0 sm:$0xff] }
  0x21   :  { %194 = vmatmul.bf16.vlgmr.msra.gmra.mxu0 %v606_v20  ;;  %363 = vmatpush.bf16.msra.mxu3 %v682_v16 }
  0x22   :  { %208 = vmatmul.bf16.vlgmr.msra.gmra.mxu1 %v610_v21  ;;  %508 = vmatpush.bf16.msrb.mxu2 %v806_v18 }
  0x25   :  { %522 = vmatpush.bf16.msrb.mxu3 %v814_v19 }
  0x29   :  { %523 = vmatpush.bf16.msrb.mxu3 %v813_v23 }
  0x9e   :  { %v195_v24 = vpop.f32.mrf.mxu0 }
  0x9f   :  { %v209_v25 = vpop.f32.mrf.mxu1  ;;  %v196_v26 = vadd.f32 %v820_v22, %v195_v24 }
  0xa1   :  { %v210_v28 = vadd.f32 %v209_v25, %v196_v26 }
  0xa3   :  { %v218_v29 = vadd.f32 %v817_v27, %v210_v28  ;;  %v804_v27 = vld [vmem:[%s1125_s8 + $0x28] sm:$0xff] }
  0xa4   :  { %v812_v28 = vld [vmem:[%s1125_s8 + $0x68] sm:$0xff] }
  0xa5   :  { %v223_v30 = vsel %vm222_vm0, %v218_v29, 0.0  ;;  %524 = vmatpush.bf16.msrb.mxu3 %v812_v28 }
  0xa6   :  { %v197_v31 = vpop.f32.mrf.mxu0  ;;  %224 = vadd.xlane.f32.xlu0 %v223_v30 }
  0xa7   :  { %v198_v32 = vadd.f32 %v820_v22, %v197_v31  ;;  %v211_v34 = vpop.f32.mrf.mxu1  ;;  %v805_v22 = vld [vmem:[%s1125_s8 + $0x30] sm:$0xff]  ;;  %v803_v31 = vld [vmem:[%s1125_s8 + $0x20] sm:$0xff] }
  0xa8   :  { %509 = vmatpush.bf16.msrb.mxu2 %v805_v22 }
  0xa9   :  { %v212_v35 = vadd.f32 %v211_v34, %v198_v32  ;;  %v811_v32 = vld [vmem:[%s1125_s8 + $0x60] sm:$0xff] }
  0xaa   :  { %525 = vmatpush.bf16.msrb.mxu3 %v811_v32 }
  0xab   :  { %v219_v36 = vadd.f32 %v818_v33, %v212_v35 }
  0xac   :  { %510 = vmatpush.bf16.msrb.mxu2 %v804_v27 }
  0xad   :  { %v226_v37 = vsel %vm222_vm0, %v219_v36, 0.0 }
  0xae   :  { %227 = vadd.xlane.f32.xlu0 %v226_v37 }
  0xb0   :  { %511 = vmatpush.bf16.msrb.mxu2 %v803_v31 }
 0x119   :  { %v225_v45 = vpop.xlane.xlu0 %224 }
 0x11a   :  { %v236_v46 = vmul.f32 %v970_v44, %v225_v45 }
 0x11c   :  { %v973_v47 = vsub.f32 %v218_v29, %v236_v46 }
 0x11e   :  { %v240_v48 = vmul.f32 %v973_v47, %v973_v47 }
 0x120   :  { %v242_v49 = vsel %vm222_vm0, %v240_v48, 0.0 }
 0x121   :  { %243 = vadd.xlane.f32.xlu1 %v242_v49  ;;  %v228_v50 = vpop.xlane.xlu0 %227  ;;  %v822_v49 = vld [vmem:[%s1123_s5] ss:$0 sm:$0xff] }
 0x122   :  { %v237_v51 = vmul.f32 %v970_v44, %v228_v50 }
 0x124   :  { %v979_v52 = vsub.f32 %v219_v36, %v237_v51 }
 0x126   :  { %v241_v53 = vmul.f32 %v979_v52, %v979_v52 }
 0x128   :  { %v245_v54 = vsel %vm222_vm0, %v241_v53, 0.0 }
 0x129   :  { %246 = vadd.xlane.f32.xlu1 %v245_v54 }
 0x194   :  { %v244_v12 = vpop.xlane.xlu1 %243 }
 0x195   :  { %v248_v15 = vmul.f32 %v244_v12, %v970_v44 }
 0x197   :  { %v250_v17 = vadd.f32 1e-05, %v248_v15 }
 0x199   :  { %828 = vrsqrt.f32 %v250_v17  ;;  %vm258_vm3 = vweird.f32 %v250_v17 }
 0x19c   :  { %v247_v20 = vpop.xlane.xlu1 %246 }
 0x19d   :  { %v249_v21 = vmul.f32 %v247_v20, %v970_v44 }
 0x19f   :  { %v829_v24 = vpop.eup %828  ;;  %v251_v25 = vadd.f32 1e-05, %v249_v21 }
 0x1a0   :  { %v253_v26 = vmul.f32 %v829_v24, %v250_v17  ;;  %vm259_vm2 = vweird.f32 %v829_v24 }
 0x1a1   :  { %830 = vrsqrt.f32 %v251_v25  ;;  %vm260_vm4 = vmor %vm258_vm3, %vm259_vm2  ;;  %vm268_vm6 = vweird.f32 %v251_v25 }
 0x1a2   :  { %v254_v29 = vmul.f32 %v829_v24, %v253_v26 }
 0x1a4   :  { %v255_v30 = vmul.f32 0.5, %v254_v29 }
 0x1a6   :  { %v256_v33 = vsub.f32 1.5, %v255_v30 }
 0x1a7   :  { %v831_v34 = vpop.eup %830 }
 0x1a8   :  { %v257_v35 = vmul.f32 %v829_v24, %v256_v33  ;;  %v263_v36 = vmul.f32 %v831_v34, %v251_v25  ;;  %vm269_vm5 = vweird.f32 %v831_v34 }
 0x1a9   :  { %vm270_vm7 = vmor %vm268_vm6, %vm269_vm5 }
 0x1aa   :  { %v264_v37 = vmul.f32 %v831_v34, %v263_v36  ;;  %v261_v38 = vsel %vm260_vm4, %v829_v24, %v257_v35 }
 0x1ab   :  { %v272_v41 = vmul.f32 %v261_v38, %v973_v47  ;;  %v802_v47 = vld [vmem:[%s1125_s8 + $0x18] sm:$0xff] }
 0x1ac   :  { %v265_v39 = vmul.f32 0.5, %v264_v37  ;;  %512 = vmatpush.bf16.msrb.mxu2 %v802_v47 }
 0x1ad   :  { %v277_v48 = vmul.f32 %v821_v42, %v272_v41 }
 0x1ae   :  { %v266_v40 = vsub.f32 1.5, %v265_v39 }
 0x1af   :  { %v282_v51 = vadd.f32 %v822_v49, %v277_v48 }
 0x1b0   :  { %v267_v43 = vmul.f32 %v831_v34, %v266_v40  ;;  %513 = vmatpush.bf16.msrb.mxu2 %v801_v55 }
 0x1b2   :  { %v271_v45 = vsel %vm270_vm7, %v831_v34, %v267_v43 }
 0x1b3   :  { %v273_v46 = vmul.f32 %v271_v45, %v979_v52  ;;  %v810_v52 = vld [vmem:[%s1125_s8 + $0x58] sm:$0xff] }
 0x1b4   :  { %526 = vmatpush.bf16.msrb.mxu3 %v810_v52  ;;  %514 = vmatpush.bf16.msrb.mxu2 %v800_v57 }
 0x1b5   :  { %v278_v50 = vmul.f32 %v821_v42, %v273_v46 }
 0x1b7   :  { %v283_v53 = vadd.f32 %v822_v49, %v278_v50 }
 0x1b8   :  { %527 = vmatpush.bf16.msrb.mxu3 %v809_v56  ;;  %515 = vmatpush.bf16.msrb.mxu2 %v799_v59 }
 0x1b9   :  { %v284_v54 = vpack.c.bf16 %v283_v53, %v282_v51 }
 0x1bb   :  { %707 = vmatmul.msk.bf16.vlgmr.msra.gmra.mxu2 %vm222_vm0, %v284_v54  ;;  %708 = vmatmul.msk.bf16.vlgmr.msra.gmra.mxu3 %vm222_vm0, %v284_v54  ;;  %v824_v54 = vld [vmem:[%s1128_s10] ss:$0 sm:$0xff] }
 0x1bc   :  { %528 = vmatpush.bf16.msrb.mxu3 %v808_v58 }
 0x1c0   :  { %529 = vmatpush.bf16.msrb.mxu3 %v807_v60 }
 0x23e   :  { %v351_v62 = vpop.f32.mrf.mxu2  ;;  %v365_v63 = vpop.f32.mrf.mxu3 }
 0x23f   :  { %v352_v2 = vadd.f32 %v351_v62, %v295_v0  ;;  %v366_v3 = vadd.f32 %v365_v63, %v296_v1 }
 0x241   :  { %v370_v8 = vmax.f32 %v352_v2, 0.0  ;;  %v371_v9 = vmax.f32 %v366_v3, 0.0 }
 0x246   :  { %v353_v4 = vpop.f32.mrf.mxu2  ;;  %v367_v5 = vpop.f32.mrf.mxu3 }
 0x247   :  { %v354_v6 = vadd.f32 %v353_v4, %v295_v0  ;;  %v368_v7 = vadd.f32 %v367_v5, %v296_v1 }
 0x249   :  { %v372_v10 = vmax.f32 %v354_v6, 0.0  ;;  %v373_v11 = vmax.f32 %v368_v7, 0.0 }
 0x24b   :  { %v374_v12 = vpack.c.bf16 %v372_v10, %v370_v8  ;;  %v375_v13 = vpack.c.bf16 %v373_v11, %v371_v9 }
 0x24d   :  { %516 = vmatmul.bf16.vlgmr.msrb.gmra.mxu2 %v374_v12  ;;  %530 = vmatmul.bf16.vlgmr.msrb.gmra.mxu3 %v375_v13 }
 0x2d0   :  { %v517_v15 = vpop.f32.mrf.mxu2  ;;  %v531_v16 = vpop.f32.mrf.mxu3 }
 0x2d1   :  { %v518_v17 = vadd.f32 %v823_v14, %v517_v15 }
 0x2d3   :  { %v532_v18 = vadd.f32 %v531_v16, %v518_v17 }
 0x2d5   :  { %v536_v19 = vadd.f32 %v532_v18, %v282_v51 }
 0x2d7   :  { %v540_v20 = vsel %vm222_vm0, %v536_v19, 0.0 }
 0x2d8   :  { %v519_v21 = vpop.f32.mrf.mxu2  ;;  %541 = vadd.xlane.f32.xlu2 %v540_v20  ;;  %v533_v23 = vpop.f32.mrf.mxu3 }
 0x2d9   :  { %v520_v22 = vadd.f32 %v823_v14, %v519_v21 }
 0x2db   :  { %v534_v24 = vadd.f32 %v533_v23, %v520_v22 }
 0x2dd   :  { %v537_v25 = vadd.f32 %v534_v24, %v283_v53 }
 0x2df   :  { %v543_v26 = vsel %vm222_vm0, %v537_v25, 0.0 }
 0x2e0   :  { %544 = vadd.xlane.f32.xlu2 %v543_v26 }
 0x34b   :  { %v542_v27 = vpop.xlane.xlu2 %541 }
 0x34c   :  { %v546_v28 = vmul.f32 %v542_v27, %v970_v44 }
 0x34e   :  { %v548_v29 = vsub.f32 %v536_v19, %v546_v28 }
 0x350   :  { %v550_v30 = vmul.f32 %v548_v29, %v548_v29 }
 0x352   :  { %v552_v31 = vsel %vm222_vm0, %v550_v30, 0.0 }
 0x353   :  { %553 = vadd.xlane.f32.xlu0 %v552_v31  ;;  %v545_v32 = vpop.xlane.xlu2 %544 }
 0x354   :  { %v547_v33 = vmul.f32 %v545_v32, %v970_v44 }
 0x356   :  { %v549_v34 = vsub.f32 %v537_v25, %v547_v33 }
 0x358   :  { %v551_v35 = vmul.f32 %v549_v34, %v549_v34 }
 0x35a   :  { %v555_v36 = vsel %vm222_vm0, %v551_v35, 0.0 }
 0x35b   :  { %556 = vadd.xlane.f32.xlu1 %v555_v36 }
 0x3c6   :  { %v554_v37 = vpop.xlane.xlu0 %553 }
 0x3c7   :  { %v558_v38 = vmul.f32 %v554_v37, %v970_v44 }
 0x3c9   :  { %v560_v39 = vadd.f32 1e-05, %v558_v38 }
 0x3cb   :  { %832 = vrsqrt.f32 %v560_v39  ;;  %vm568_vm9 = vweird.f32 %v560_v39 }
 0x3ce   :  { %v557_v40 = vpop.xlane.xlu1 %556 }
 0x3cf   :  { %v559_v41 = vmul.f32 %v557_v40, %v970_v44  ;;  %v825_v44 = vld [vmem:[%s1129_s11] ss:$0 sm:$0xff] }
 0x3d1   :  { %v833_v42 = vpop.eup %832  ;;  %v561_v43 = vadd.f32 1e-05, %v559_v41 }
 0x3d2   :  { %v563_v45 = vmul.f32 %v833_v42, %v560_v39  ;;  %vm569_vm8 = vweird.f32 %v833_v42 }
 0x3d3   :  { %834 = vrsqrt.f32 %v561_v43  ;;  %vm570_vm10 = vmor %vm568_vm9, %vm569_vm8  ;;  %vm578_vm13 = vweird.f32 %v561_v43 }
 0x3d4   :  { %v564_v46 = vmul.f32 %v833_v42, %v563_v45 }
 0x3d6   :  { %v565_v48 = vmul.f32 0.5, %v564_v46 }
 0x3d8   :  { %v566_v49 = vsub.f32 1.5, %v565_v48 }
 0x3d9   :  { %v835_v50 = vpop.eup %834 }
 0x3da   :  { %v567_v51 = vmul.f32 %v833_v42, %v566_v49  ;;  %v573_v53 = vmul.f32 %v835_v50, %v561_v43  ;;  %vm579_vm11 = vweird.f32 %v835_v50 }
 0x3db   :  { %vm580_vm14 = vmor %vm578_vm13, %vm579_vm11 }
 0x3dc   :  { %v571_v47 = vsel %vm570_vm10, %v833_v42, %v567_v51  ;;  %v574_v52 = vmul.f32 %v835_v50, %v573_v53 }
 0x3dd   :  { %v582_v55 = vmul.f32 %v571_v47, %v548_v29 }
 0x3de   :  { %v575_v56 = vmul.f32 0.5, %v574_v52 }
 0x3df   :  { %v587_v57 = vmul.f32 %v824_v54, %v582_v55 }
 0x3e0   :  { %v576_v58 = vsub.f32 1.5, %v575_v56 }
 0x3e1   :  { %v592_v59 = vadd.f32 %v825_v44, %v587_v57 }
 0x3e2   :  { %v577_v60 = vmul.f32 %v835_v50, %v576_v58 }
 0x3e3   :  { %v594_v61 = vpack.c.bf16 %v592_v59, %v592_v59 }
 0x3e4   :  { %v581_v62 = vsel %vm580_vm14, %v835_v50, %v577_v60 }
 0x3e5   :  { %597 = vst.msk [vmem:[%s1130_s12] sm:$0xf] %vm596_vm12, %v594_v61  ;;  %v583_v63 = vmul.f32 %v581_v62, %v549_v34 }
 0x3e7   :  { %v588_v0 = vmul.f32 %v824_v54, %v583_v63 }
 0x3e9   :  { %v593_v1 = vadd.f32 %v825_v44, %v588_v0 }
 0x3eb   :  { %v595_v2 = vpack.c.bf16 %v593_v1, %v593_v1 }
 0x3ed   :  { %598 = vst.msk [vmem:[%s1130_s12 + $0x4] sm:$0xf] %vm596_vm12, %v595_v2 }

// kernel: kgpdplam_forward.18
= control target key start
LH: loop header
LB: loop body
LE: loop exit
PB: predicated region body
PF: predicated region fallthrough
CT: control target
= control target key end

     0   :  { %s757_s12 = smov 0   ;;  %s759_s13 = smov 0   ;;  %s840_s0 = inlined_call_operand.vmem [shape: bf16[16,64], index: 0, kind: input, shape index: {}]   ;;  %s841_s1 = inlined_call_operand.vmem [shape: bf16[64,768], index: 1, kind: input, shape index: {}]   ;;  %s842_s2 = inlined_call_operand.vmem [shape: f32[1,768], index: 2, kind: input, shape index: {}]   ;;  %s843_s3 = inlined_call_operand.vmem [shape: bf16[16,768], index: 3, kind: output, shape index: {}]  }
   0x1   :  { %s761_s14 = smov 0   ;;  %s763_s15 = smov 0  }
   0x2   :  { %s765_s16 = smov 0  }
   0x3 LB: > { %s28_s17 = sadd.s32 1, %s731_s15  ;;  %s591_s18 = sadd.s32 4294967295, %s735_s16   ;;  %s735_s16 = sphi %s765_s16, %s13_s16   ;;  %s731_s15 = sphi %s763_s15, %s848_s15   ;;  %s727_s14 = sphi %s761_s14, %s847_s14   ;;  %s723_s13 = sphi %s759_s13, %s846_s13   ;;  %s719_s12 = sphi %s757_s12, %s845_s12  }
   0x4   : > { %p30_p0 = scmp.ge.s32.totalorder %s28_s17, 3  ;;  %p76_p1 = scmp.ne.s32.totalorder %s723_s13, %s719_s12 }
   0x5   : > { %p77_p2 = scmp.eq.s32.totalorder %s735_s16, 0  ;;  %p134_p4 = scmp.eq.s32.totalorder %s591_s18, 2 }
   0x6   : > { %s850_s17 = smov (%p30_p0, %s28_s17), 0  ;;  %s69_s20 = sadd.s32 1, %s723_s13 }
   0x7   : > { %p78_p3 = por %p77_p2, %p76_p1  ;;  %s65_s19 = ssub.s32 %s731_s15, %s850_s17 }
   0x8   : > { %p67_p5 = scmp.eq.s32.totalorder %s65_s19, 0  ;;  %p792_p6 = por %p134_p4, %p76_p1 }
   0x9   : > { %p595_p7 = scmp.ge.s32.totalorder %s735_s16, 3 }
   0xa   : > { %s797_s22 = scalar_select %p67_p5, %s723_s13, %s69_s20  }
   0xb   : > { %168 = sbr.rel (%p595_p7) target bundleno = 28 (0x1c), region = 20 }
  0x10   : > { %171 = sbr.rel (!%p78_p3) target bundleno = 28 (0x1c), region = 24  ;;  %s173_s23 = sand.u32 (%p78_p3), 1, %s723_s13  }
  0x11   : > { %s646_s24 = sshll.u32 (%p78_p3), %s731_s15, 3  ;;  %s596_s25 = sshll.u32 (%p78_p3), %s173_s23, 6 }
  0x12   : > { %s181_s28 = scalar_lea.vmem (%p78_p3), %s841_s1, %s646_s24  ;;  %s175_s29 = scalar_lea.vmem (%p78_p3), [#allocation3], %s596_s25 }
  0x13   : > { %v224_v0 = vld [vmem:[%s181_s28] sm:$0xff] (%p78_p3)  ;;  %v226_v1 = vld [vmem:[%s181_s28 + $0x18] sm:$0xff] (%p78_p3)  ;;  %v228_v2 = vld [vmem:[%s181_s28 + $0x30] sm:$0xff] (%p78_p3) }
  0x14   : > { %225 = vst [vmem:[%s175_s29] sm:$0xff] (%p78_p3), %v224_v0  ;;  %v230_v3 = vld [vmem:[%s181_s28 + $0x48] sm:$0xff] (%p78_p3)  ;;  %v232_v4 = vld [vmem:[%s181_s28 + $0x60] sm:$0xff] (%p78_p3)  ;;  %v234_v5 = vld [vmem:[%s181_s28 + $0x78] sm:$0xff] (%p78_p3) }
  0x15   : > { %227 = vst [vmem:[%s175_s29 + $0x8] sm:$0xff] %v226_v1  ;;  %v236_v6 = vld [vmem:[%s181_s28 + $0x90] sm:$0xff]  ;;  %v238_v7 = vld [vmem:[%s181_s28 + $0xa8] sm:$0xff] }
  0x16   : > { %229 = vst [vmem:[%s175_s29 + $0x10] sm:$0xff] %v228_v2 }
  0x17   : > { %231 = vst [vmem:[%s175_s29 + $0x18] sm:$0xff] %v230_v3 }
  0x18   : > { %233 = vst [vmem:[%s175_s29 + $0x20] sm:$0xff] %v232_v4 }
  0x19   : > { %235 = vst [vmem:[%s175_s29 + $0x28] sm:$0xff] %v234_v5 }
  0x1a   : > { %237 = vst [vmem:[%s175_s29 + $0x30] sm:$0xff] %v236_v6 }
  0x1b   : > { %239 = vst [vmem:[%s175_s29 + $0x38] sm:$0xff] %v238_v7 }
  0x1c PF: > { %p599_p8 = scmp.ge.s32.totalorder %s735_s16, 1  ;;  %p252_p9 = scmp.lt.s32.totalorder %s735_s16, 4 }
  0x1e   : > { %p253_p10 = pnand %p599_p8, %p252_p9 }
  0x1f   : > { %s259_s30 = sand.u32 (!%p253_p10), 1, %s719_s12   ;;  %s602_s8 = sshll.u32 (!%p253_p10), %s727_s14, 1 }
  0x20   : > { %256 = sbr.rel (%p253_p10) target bundleno = 203 (0xcb), region = 66  ;;  %s600_s4 = sshll.u32 (!%p253_p10), %s259_s30, 6 }
  0x21   : > { %s261_s5 = scalar_lea.vmem (!%p253_p10), [#allocation3], %s600_s4  ;;  %p305_p11 = scmp.lt.s32.totalorder (!%p253_p10), %s602_s8, 5 }
  0x22   : > { %s601_s18 = sshll.u32 (!%p253_p10), %s259_s30, 4 }
  0x23   : > { %s292_s19 = scalar_lea.vmem (!%p253_p10), [#allocation4], %s601_s18 }
  0x25   : > { %v633_v8 = vld [vmem:[%s261_s5 + $0x30] sm:$0xf]  ;;  %v655_v9 = vld [vmem:[%s261_s5 + $0x34] sm:$0xf0]  ;;  %v654_v10 = vld [vmem:[%s261_s5 + $0x34] sm:$0xf] }
  0x26   : > { %v634_v11 = vor.u32 %v655_v9, %v633_v8  ;;  %v635_v12 = vld [vmem:[%s261_s5 + $0x38] sm:$0xf0]  ;;  %v625_v13 = vld [vmem:[%s261_s5 + $0x20] sm:$0xf]  ;;  %v653_v14 = vld [vmem:[%s261_s5 + $0x24] sm:$0xf0] }
  0x27   : > { %v638_v15 = vor.u32 %v654_v10, %v635_v12  ;;  %v652_v16 = vld [vmem:[%s261_s5 + $0x24] sm:$0xf]  ;;  %v627_v17 = vld [vmem:[%s261_s5 + $0x28] sm:$0xf0]  ;;  %v626_v18 = vor.u32 %v653_v14, %v625_v13  ;;  %v617_v20 = vld [vmem:[%s261_s5 + $0x10] sm:$0xf] }
  0x28   : > { %387 = vmatpush.bf16.msra.mxu0 %v634_v11  ;;  %v630_v19 = vor.u32 %v652_v16, %v627_v17  ;;  %v651_v21 = vld [vmem:[%s261_s5 + $0x14] sm:$0xf0]  ;;  %v650_v22 = vld [vmem:[%s261_s5 + $0x14] sm:$0xf]  ;;  %v619_v23 = vld [vmem:[%s261_s5 + $0x18] sm:$0xf0] }
  0x29   : > { %401 = vmatpush.bf16.msra.mxu1 %v638_v15  ;;  %v618_v24 = vor.u32 %v651_v21, %v617_v20  ;;  %v622_v25 = vor.u32 %v650_v22, %v619_v23  ;;  %v609_v26 = vld [vmem:[%s261_s5] sm:$0xf]  ;;  %v649_v27 = vld [vmem:[%s261_s5 + $0x4] sm:$0xf0]  ;;  %v648_v28 = vld [vmem:[%s261_s5 + $0x4] sm:$0xf] }
  0x2a   : > { %v611_v29 = vld [vmem:[%s261_s5 + $0x8] sm:$0xf0]  ;;  %v610_v30 = vor.u32 %v649_v27, %v609_v26  ;;  %v647_v32 = vld [vmem:[%s840_s0] sm:$0xff]  ;;  %vm379_vm0 = vcmask 523264   ;;  %s852_s8 = smov (!%p305_p11, %s602_s8), 5  ;;  %s656_s20 = sshll.u32 (%p792_p6), %s727_s14, 3 }
  0x2b   : > { %v614_v31 = vor.u32 %v648_v28, %v611_v29  ;;  %s307_s11 = scalar_lea.vmem %s842_s2, %s852_s8  ;;  %s452_s24 = scalar_lea.vmem (%p792_p6), %s843_s3, %s656_s20 }
  0x2c   : > { %388 = vmatpush.bf16.msra.mxu0 %v626_v18  ;;  %v426_v33 = vld [vmem:[%s307_s11] sm:$0x3] }
  0x2d   : > { %402 = vmatpush.bf16.msra.mxu1 %v630_v19  ;;  %v428_v34 = vperm.slane %v426_v33, 0  ;;  %v429_v35 = vperm.slane %v426_v33, 1 }
  0x30   : > { %389 = vmatpush.bf16.msra.mxu0 %v618_v24 }
  0x31   : > { %403 = vmatpush.bf16.msra.mxu1 %v622_v25 }
  0x34   : > { %390 = vmatpush.bf16.msra.mxu0 %v610_v30 }
  0x35   : > { %404 = vmatpush.bf16.msra.mxu1 %v614_v31 }
  0x37   : > { %639 = vmatmul.msk.bf16.vlgmr.msra.gmra.mxu0 %vm379_vm0, %v647_v32 }
  0x38   : > { %640 = vmatmul.msk.bf16.vlgmr.msra.gmra.mxu1 %vm379_vm0, %v647_v32 }
  0xb4   : > { %v392_v36 = vpop.f32.mrf.mxu0 }
  0xb5   : > { %v432_v37 = vadd.f32 %v428_v34, %v392_v36  ;;  %v406_v38 = vpop.f32.mrf.mxu1 }
  0xb6   : > { %v433_v39 = vadd.f32 %v429_v35, %v406_v38 }
  0xb8   : > { %v436_v40 = vpack.c.bf16 %v433_v39, %v432_v37 }
  0xba   : > { %438 = vst [vmem:[%s292_s19] sm:$0xff] %v436_v40 }
  0xbc   : > { %v394_v41 = vpop.f32.mrf.mxu0 }
  0xbd   : > { %v434_v42 = vadd.f32 %v428_v34, %v394_v41  ;;  %v408_v43 = vpop.f32.mrf.mxu1 }
  0xbe   : > { %v435_v44 = vadd.f32 %v429_v35, %v408_v43  ;;  %446 = sbr.rel (!%p792_p6) target bundleno = 203 (0xcb), region = 82 }
  0xc0   : > { %v437_v45 = vpack.c.bf16 %v435_v44, %v434_v42 }
  0xc1   : > { %v483_v46 = vld [vmem:[%s292_s19] sm:$0xff] (%p792_p6) }
  0xc2   : > { %439 = vst [vmem:[%s292_s19 + $0x8] sm:$0xff] %v437_v45 }
  0xc3   : > { %484 = vst [vmem:[%s452_s24] sm:$0xff] %v483_v46 }
  0xc9   : > { %v485_v47 = vld [vmem:[%s292_s19 + $0x8] sm:$0xff] }
  0xca   : > { %486 = vst [vmem:[%s452_s24 + $0x18] sm:$0xff] %v485_v47 }
  0xcb PF: > { %s13_s16 = sadd.s32 1, %s735_s16   ;;  %s845_s12 = smov %s723_s13 }
  0xcc   : > { %p10_p12 = scmp.ge.s32.totalorder %s13_s16, 5   ;;  %s846_s13 = smov %s797_s22 }
  0xcd   : > { %s847_s14 = smov %s731_s15  ;;  %s848_s15 = smov %s850_s17 }
  0xce   :  { %12 = sbr.rel (!%p10_p12) target bundleno = 3 (0x3), region = 157 }

// kernel: kgpdplam_forward.16
= control target key start
LH: loop header
LB: loop body
LE: loop exit
PB: predicated region body
PF: predicated region fallthrough
CT: control target
= control target key end

     0   :  { %s2024_s0 = inlined_call_operand.vmem [shape: bf16[2,8,768], index: 0, kind: input, shape index: {}]   ;;  %s2025_s1 = inlined_call_operand.vmem [shape: s32[8,8], index: 1, kind: input, shape index: {}]   ;;  %s2026_s2 = inlined_call_operand.vmem [shape: f32[15,4], index: 2, kind: input, shape index: {}]   ;;  %s2027_s3 = inlined_call_operand.vmem [shape: f32[15,4], index: 3, kind: input, shape index: {}]   ;;  %s2028_s4 = inlined_call_operand.vmem [shape: bf16[2,8,256], index: 4, kind: output, shape index: {0}]   ;;  %s2029_s5 = inlined_call_operand.vmem [shape: bf16[2,4,8,8], index: 5, kind: output, shape index: {1}]  }
   0x1   :  { %2044 = sst [smem:[#allocation11_spill]] %s2024_s0 }
   0x2   :  { %2045 = sst [smem:[#allocation12_spill]] %s2026_s2 }
   0x3   :  { %2046 = sst [smem:[#allocation13_spill]] %s2027_s3 }
   0x4   :  { %2047 = sst [smem:[#allocation14_spill]] %s2028_s4 }
   0x5   :  { %2048 = sst [smem:[#allocation15_spill]] %s2029_s5 }
   0x6   :  { %11 = vsyncpa [#allocation3], 0 }
   0x7   :  { %12 = vsyncpa [#allocation5], 0  ;;  %s1367_s18 = smov 0  }
   0x8 LB: > { %2049 = sst [smem:[#allocation8_spill]] %s1330_s18  ;;  %s1085_s22 = sadd.s32 4294967295, %s1330_s18   ;;  %s1330_s18 = sphi %s1367_s18, %s18_s18  }
   0x9   : > { %s2050_s2 = sld [smem:[#allocation12_spill]]  ;;  %p1087_p0 = scmp.ge.s32.totalorder %s1330_s18, 1 }
   0xa   : > { %p164_p1 = scmp.lt.s32.totalorder %s1330_s18, 3  ;;  %p1248_p3 = scmp.eq.s32.totalorder %s1085_s22, 0 }
   0xb   : > { %s2051_s3 = sld [smem:[#allocation13_spill]]  ;;  %s1332_s26 = smov [#allocation2]  }
   0xc   : > { %p165_p2 = pnand %p1087_p0, %p164_p1  ;;  %s1333_s27 = smov 128  }
   0xd   : > { %s1334_s28 = smov 8   ;;  %s1335_s29 = smov [#allocation4]  }
   0xe   : > { %p1241_p4 = pneg %p165_p2 }
   0xf   : > { %s178_s21 = sshll.u32 %s2050_s2, 4  ;;  %214 = sbr.rel (%p165_p2) target bundleno = 1013 (0x3f5), region = 36  ;;  %s179_s21 = int_to_ptr.vmem [resolvable:$true] %s178_s21 }
  0x10   : > { %p1242_p5 = pnand %p1248_p3, %p1241_p4 }
  0x11   : > { %s190_s25 = sshll.u32 %s2051_s3, 4  ;;  %s191_s25 = int_to_ptr.vmem [resolvable:$true] %s190_s25 }
  0x12   : > { %1244 = dma.vmem_to_smem (!%p1242_p5), %s179_s21, 256, %s1332_s26, [#allocation3], %s1333_s27, %s1333_s27, %s1334_s28  }
  0x13   : > { %1247 = dma.vmem_to_smem (!%p1242_p5), %s191_s25, 256, %s1335_s29, [#allocation5], %s1333_s27, %s1333_s27, %s1334_s28  }
  0x14   : > { %1321 = dma.done.wait (%p1248_p3), [#allocation3], 256  }
  0x15   : > { %1323 = vsyncadd (%p1248_p3), [#allocation3], 4294967040 }
  0x16   : > { %1325 = dma.done.wait (%p1248_p3), [#allocation5], 256  }
  0x17   : > { %1327 = vsyncadd (%p1248_p3), [#allocation5], 4294967040 }
  0x18   : > { %226 = sfence }
  0x19   : > { %p254_p6 = scmp.lt.s32.totalorder %s1085_s22, 1  ;;  %vm2037_vm0 = vcmask 523264   ;;  %s2053_s0 = sld [smem:[#allocation11_spill]]  ;;  %v1466_v14 = vld [vmem:[%s2025_s1] sm:$0xff] }
  0x1a   : > { %s2030_s9 = smov 64   ;;  %s1405_s10 = sld [smem:[#allocation2]]  ;;  %vm294_vm1 = vcmp.eq.s32.totalorder %v1466_v14, 0  ;;  %vm302_vm2 = vcmp.eq.s32.totalorder %v1466_v14, 1  ;;  %vm310_vm3 = vcmp.eq.s32.totalorder %v1466_v14, 2  ;;  %vm318_vm4 = vcmp.eq.s32.totalorder %v1466_v14, 3 }
  0x1b   : > { %s2082_s22 = smov (!%p254_p6, %s1085_s22), 1  ;;  %s1407_s11 = sld [smem:[#allocation4]]  ;;  %vm326_vm5 = vcmp.eq.s32.totalorder %v1466_v14, 4  ;;  %vm334_vm6 = vcmp.eq.s32.totalorder %v1466_v14, 5  ;;  %vm342_vm7 = vcmp.eq.s32.totalorder %v1466_v14, 6  ;;  %vm350_vm8 = vcmp.eq.s32.totalorder %v1466_v14, 7 }
  0x1c   : > { %2052 = sst [smem:[#allocation9_spill]] %s2082_s22  ;;  %s1232_s30 = smul.u32 24, %s2082_s22  ;;  %vm2039_vm9 = vcmp.eq.s32.totalorder %v1466_v14, 8  ;;  %vm366_vm10 = vcmp.eq.s32.totalorder %v1466_v14, 9  ;;  %vm374_vm11 = vcmp.eq.s32.totalorder %v1466_v14, 10  ;;  %vm2038_vm12 = vcmp.eq.s32.totalorder %v1466_v14, 11 }
  0x1d   : > { %s1409_s12 = sld [smem:[#allocation2 + $0x80]]  ;;  %vm2041_vm13 = vcmp.eq.s32.totalorder %v1466_v14, 12  ;;  %vm2040_vm14 = vcmp.eq.s32.totalorder %v1466_v14, 13  ;;  %vm2042_vm15 = vcmp.eq.s32.totalorder %v1466_v14, 14 }
  0x1e   : > { %s1411_s13 = sld [smem:[#allocation4 + $0x80]] }
  0x1f   : > { %s1392_s8 = scalar_lea.vmem %s2053_s0, %s1232_s30  ;;  %s1413_s14 = sld [smem:[#allocation2 + $0x100]] }
  0x20   : > { %2054 = sst [smem:[#allocation10_spill]] %s1392_s8  ;;  %v272_v0 = vld [vmem:[%s1392_s8 + $0x8] sm:$0xf]  ;;  %v788_v1 = vld [vmem:[%s1392_s8 + $0xc] sm:$0xf]  ;;  %v296_v11 = vstv %s1405_s10 }
  0x21   : > { %v279_v2 = vsel %vm2037_vm0, %v272_v0, 0  ;;  %v796_v3 = vunpack.c.l.b16 %v788_v1  ;;  %v1398_v4 = vld [vmem:[%s1392_s8 + $0x4] sm:$0xff]   ;;  %v271_v8 = vld [vmem:[%s1392_s8] sm:$0xf]  ;;  %s1415_s15 = sld [smem:[#allocation4 + $0x100]]  ;;  %v299_v19 = vstv %s1407_s11 }
  0x22   : > { %288 = vmatpush.bf16.xpose.msra.mxu0 %v279_v2  ;;  %v791_v5 = vunpack.c.l.b16 %v1398_v4  ;;  %s1417_s16 = sld [smem:[#allocation2 + $0x180]] }
  0x23   : > { %v797_v6 = vpack.c.b16 %v796_v3, %v796_v3  ;;  %s1419_s17 = sld [smem:[#allocation4 + $0x180]]  ;;  %v304_v12 = vstv %s1409_s12 }
  0x24   : > { %v792_v7 = vpack.c.b16 %v791_v5, %v791_v5  ;;  %s1421_s19 = sld [smem:[#allocation2 + $0x200]]  ;;  %v307_v20 = vstv %s1411_s13 }
  0x25   : > { %798 = vrot.lane.b32.xlu1 %v797_v6, %s2030_s9  ;;  %s1423_s20 = sld [smem:[#allocation4 + $0x200]]  ;;  %v312_v13 = vstv %s1413_s14 }
  0x26   : > { %793 = vrot.lane.b32.xlu2 %v792_v7, %s2030_s9  ;;  %s1425_s21 = sld [smem:[#allocation2 + $0x280]] }
  0x27   : > { %s1427_s23 = sld [smem:[#allocation4 + $0x280]]  ;;  %v315_v23 = vstv %s1415_s15 }
  0x28   : > { %s1429_s24 = sld [smem:[#allocation2 + $0x300]]  ;;  %v320_v15 = vstv %s1417_s16 }
  0x29   : > { %1099 = vmatmul.msk.bf16.vlgmr.msra.gmra.mxu0 %vm2037_vm0, %v271_v8  ;;  %s1431_s25 = sld [smem:[#allocation4 + $0x300]]  ;;  %v323_v24 = vstv %s1419_s17 }
  0x2a   : > { %s1433_s26 = sld [smem:[#allocation2 + $0x380]]  ;;  %v328_v16 = vstv %s1421_s19 }
  0x2b   : > { %s1435_s27 = sld [smem:[#allocation4 + $0x380]]  ;;  %v331_v25 = vstv %s1423_s20 }
  0x2c   : > { %s1437_s28 = sld [smem:[#allocation2 + $0x400]]  ;;  %v336_v17 = vstv %s1425_s21 }
  0x2d   : > { %s1439_s29 = sld [smem:[#allocation4 + $0x400]]  ;;  %v339_v26 = vstv %s1427_s23 }
  0x2e   : > { %s1441_s30 = sld [smem:[#allocation2 + $0x480]]  ;;  %v344_v21 = vstv %s1429_s24 }
  0x2f   : > { %s1443_s6 = sld [smem:[#allocation4 + $0x480]]  ;;  %v347_v27 = vstv %s1431_s25 }
  0x30   : > { %s1445_s7 = sld [smem:[#allocation2 + $0x500]]  ;;  %v352_v22 = vstv %s1433_s26 }
  0x31   : > { %s1447_s9 = sld [smem:[#allocation4 + $0x500]]  ;;  %v355_v28 = vstv %s1435_s27 }
  0x32   : > { %s1449_s0 = sld [smem:[#allocation2 + $0x580]]  ;;  %v360_v29 = vstv %s1437_s28 }
  0x33   : > { %s1452_s2 = sld [smem:[#allocation4 + $0x580]]  ;;  %v363_v34 = vstv %s1439_s29 }
  0x34   : > { %s1454_s3 = sld [smem:[#allocation2 + $0x600]]  ;;  %v368_v30 = vstv %s1441_s30 }
  0x35   : > { %s1456_s18 = sld [smem:[#allocation4 + $0x600]]  ;;  %v371_v35 = vstv %s1443_s6 }
  0x36   : > { %s1461_s4 = sld [smem:[#allocation2 + $0x680]]  ;;  %v376_v31 = vstv %s1445_s7 }
  0x37   : > { %s1471_s8 = sld [smem:[#allocation4 + $0x680]]  ;;  %v379_v40 = vstv %s1447_s9 }
  0x38   : > { %s1477_s10 = sld [smem:[#allocation2 + $0x700]]  ;;  %v384_v32 = vstv %s1449_s0 }
  0x39   : > { %v387_v42 = vstv %s1452_s2  ;;  %s2055_s0 = sld [smem:[#allocation10_spill]] }
  0x3a   : > { %v392_v36 = vstv %s1454_s3  ;;  %s1510_s2 = sld [smem:[#allocation4 + $0x700]] }
  0x3b   : > { %v395_v43 = vstv %s1456_s18  ;;  %s2056_s3 = sld [smem:[#allocation9_spill]] }
  0x3c   : > { %v400_v47 = vstv %s1461_s4  ;;  %s2057_s4 = smov 64   ;;  %s1196_s11 = sld [smem:[#allocation2 + $0x3]] }
  0x3d   : > { %v403_v49 = vstv %s1471_s8  ;;  %s2058_s8 = sld [smem:[#allocation15_spill]] }
  0x3e   : > { %v408_v50 = vstv %s1477_s10  ;;  %s1565_s12 = sld [smem:[#allocation4 + $0x3]] }
  0x3f   : > { %v450_v3 = vld [vmem:[%s2055_s0] sm:$0xf]  ;;  %s1198_s13 = sld [smem:[#allocation2 + $0x83]] }
  0x40   : > { %v454_v8 = vunpack.c.l.b16 %v450_v3  ;;  %s1567_s14 = sld [smem:[#allocation4 + $0x83]] }
  0x41   : > { %s1231_s5 = sshll.u32 %s2056_s3, 4  ;;  %s1200_s15 = sld [smem:[#allocation2 + $0x103]] }
  0x42   : > { %s1569_s16 = sld [smem:[#allocation4 + $0x103]] }
  0x43   : > { %s1551_s9 = scalar_lea.vmem %s2058_s8, %s1231_s5  ;;  %s1571_s17 = sld [smem:[#allocation2 + $0x183]] }
  0x44   : > { %s1573_s19 = sld [smem:[#allocation4 + $0x183]] }
  0x45   : > { %s1575_s20 = sld [smem:[#allocation2 + $0x203]] }
  0x46   : > { %s1577_s21 = sld [smem:[#allocation4 + $0x203]] }
  0x47   : > { %s1579_s23 = sld [smem:[#allocation2 + $0x283]] }
  0x48   : > { %s1583_s24 = sld [smem:[#allocation4 + $0x283]] }
  0x49   : > { %s1585_s25 = sld [smem:[#allocation2 + $0x303]] }
  0x4a   : > { %s1587_s26 = sld [smem:[#allocation4 + $0x303]] }
  0x4b   : > { %s1589_s27 = sld [smem:[#allocation2 + $0x383]] }
  0x4c   : > { %s1591_s28 = sld [smem:[#allocation4 + $0x383]] }
  0x4d   : > { %s1593_s29 = sld [smem:[#allocation2 + $0x403]] }
  0x4e   : > { %s1595_s30 = sld [smem:[#allocation4 + $0x403]] }
  0x4f   : > { %s1597_s6 = sld [smem:[#allocation2 + $0x483]] }
  0x50   : > { %s1599_s7 = sld [smem:[#allocation4 + $0x483]] }
  0x51   : > { %s1603_s10 = sld [smem:[#allocation2 + $0x503]] }
  0x52   : > { %s1614_s5 = sld [smem:[#allocation2 + $0x583]] }
  0x53   : > { %s1618_s18 = sld [smem:[#allocation4 + $0x583]] }
  0x54   : > { %s1623_s22 = sld [smem:[#allocation2 + $0x603]] }
  0x55   : > { %s1629_s8 = sld [smem:[#allocation4 + $0x603]] }
  0x80   : > { %v794_v18 = vpop.permute.xlu2 %793 }
  0x97   : > { %v799_v9 = vpop.permute.xlu1 %798 }
  0x98   : > { %v804_v10 = vsel %vm2037_vm0, %v799_v9, 0 }
  0x99   : > { %813 = vmatpush.bf16.xpose.msrb.mxu0 %v804_v10 }
  0xa0   : > { %1195 = vmatmul.msk.bf16.vlgmr.msrb.gmra.mxu0 %vm2037_vm0, %v794_v18  ;;  %vm417_vm0 = vcmask 64512  }
  0xa6   : > { %v290_v33 = vpop.f32.mrf.mxu0 }
  0xa7   : > { %v297_v37 = vmul.f32 %v296_v11, %v290_v33  ;;  %v305_v38 = vmul.f32 %v304_v12, %v290_v33  ;;  %v313_v39 = vmul.f32 %v312_v13, %v290_v33  ;;  %v321_v41 = vmul.f32 %v320_v15, %v290_v33 }
  0xa8   : > { %v329_v46 = vmul.f32 %v328_v16, %v290_v33  ;;  %v337_v48 = vmul.f32 %v336_v17, %v290_v33  ;;  %v345_v53 = vmul.f32 %v344_v21, %v290_v33  ;;  %v353_v56 = vmul.f32 %v352_v22, %v290_v33 }
  0xa9   : > { %v300_v44 = vadd.f32 %v299_v19, %v297_v37  ;;  %v308_v45 = vadd.f32 %v307_v20, %v305_v38  ;;  %v316_v52 = vadd.f32 %v315_v23, %v313_v39  ;;  %v324_v55 = vadd.f32 %v323_v24, %v321_v41 }
  0xaa   : > { %v332_v58 = vadd.f32 %v331_v25, %v329_v46  ;;  %v361_v59 = vmul.f32 %v360_v29, %v290_v33  ;;  %v340_v62 = vadd.f32 %v339_v26, %v337_v48  ;;  %v369_v63 = vmul.f32 %v368_v30, %v290_v33 }
  0xab   : > { %v301_v51 = vsel %vm294_vm1, %v300_v44, %v290_v33  ;;  %v348_v1 = vadd.f32 %v347_v27, %v345_v53  ;;  %v377_v2 = vmul.f32 %v376_v31, %v290_v33  ;;  %v356_v6 = vadd.f32 %v355_v28, %v353_v56 }
  0xac   : > { %v309_v54 = vsel %vm302_vm2, %v308_v45, %v301_v51  ;;  %v385_v7 = vmul.f32 %v384_v32, %v290_v33  ;;  %v364_v10 = vadd.f32 %v363_v34, %v361_v59  ;;  %v393_v11 = vmul.f32 %v392_v36, %v290_v33 }
  0xad   : > { %v317_v57 = vsel %vm310_vm3, %v316_v52, %v309_v54  ;;  %v372_v13 = vadd.f32 %v371_v35, %v369_v63  ;;  %v401_v15 = vmul.f32 %v400_v47, %v290_v33  ;;  %v455_v16 = vpack.c.b16 %v454_v8, %v454_v8 }
  0xae   : > { %v292_v60 = vpop.f32.mrf.mxu0  ;;  %v325_v61 = vsel %vm318_vm4, %v324_v55, %v317_v57  ;;  %v380_v18 = vadd.f32 %v379_v40, %v377_v2  ;;  %v409_v19 = vmul.f32 %v408_v50, %v290_v33  ;;  %v388_v21 = vadd.f32 %v387_v42, %v385_v7 }
  0xaf   : > { %v333_v0 = vsel %vm326_vm5, %v332_v58, %v325_v61  ;;  %v411_v22 = vstv %s1510_s2  ;;  %456 = vrot.lane.b32.xlu1 %v455_v16, %s2057_s4  ;;  %v396_v24 = vadd.f32 %v395_v43, %v393_v11  ;;  %v404_v26 = vadd.f32 %v403_v49, %v401_v15  ;;  %s1608_s2 = sld [smem:[#allocation4 + $0x503]] }
  0xb0   : > { %v341_v5 = vsel %vm334_vm6, %v340_v62, %v333_v0  ;;  %v412_v28 = vadd.f32 %v411_v22, %v409_v19  ;;  %v459_v33 = vunpack.c.h.b16 %v1398_v4  ;;  %v820_v36 = vstv %s1196_s11  ;;  %s1636_s11 = sld [smem:[#allocation2 + $0x683]] }
  0xb1   : > { %v349_v9 = vsel %vm342_vm7, %v348_v1, %v341_v5  ;;  %v823_v37 = vstv %s1565_s12  ;;  %v827_v38 = vstv %s1198_s13  ;;  %v830_v39 = vstv %s1567_s14  ;;  %s1642_s12 = sld [smem:[#allocation4 + $0x683]] }
  0xb2   : > { %v357_v12 = vsel %vm350_vm8, %v356_v6, %v349_v9  ;;  %v460_v34 = vpack.c.b16 %v459_v33, %v459_v33  ;;  %v834_v42 = vstv %s1200_s15  ;;  %v837_v43 = vstv %s1569_s16  ;;  %s1648_s13 = sld [smem:[#allocation2 + $0x703]] }
  0xb3   : > { %v365_v17 = vsel %vm2039_vm9, %v364_v10, %v357_v12  ;;  %v841_v45 = vstv %s1571_s17  ;;  %v844_v46 = vstv %s1573_s19  ;;  %v848_v47 = vstv %s1575_s20  ;;  %s1653_s14 = sld [smem:[#allocation4 + $0x703]] }
  0xb4   : > { %v373_v20 = vsel %vm366_vm10, %v372_v13, %v365_v17  ;;  %v851_v54 = vstv %s1577_s21  ;;  %v855_v55 = vstv %s1579_s23  ;;  %v858_v56 = vstv %s1583_s24  ;;  %s1710_s15 = sld [smem:[#allocation2 + $0x1]] }
  0xb5   : > { %v381_v23 = vsel %vm374_vm11, %v380_v18, %v373_v20  ;;  %v862_v63 = vstv %s1585_s25  ;;  %v865_v0 = vstv %s1587_s26  ;;  %v869_v5 = vstv %s1589_s27  ;;  %s1712_s16 = sld [smem:[#allocation2 + $0x81]] }
  0xb6   : > { %v389_v25 = vsel %vm2038_vm12, %v388_v21, %v381_v23  ;;  %vm415_vm12 = vcmask 60416   ;;  %v872_v9 = vstv %s1591_s28  ;;  %v876_v12 = vstv %s1593_s29  ;;  %s1714_s17 = sld [smem:[#allocation4 + $0x1]] }
  0xb7   : > { %v397_v27 = vsel %vm2041_vm13, %v396_v24, %v389_v25  ;;  %v879_v17 = vstv %s1595_s30  ;;  %v883_v19 = vstv %s1597_s6  ;;  %v886_v20 = vstv %s1599_s7  ;;  %s1716_s19 = sld [smem:[#allocation4 + $0x81]] }
  0xb8   : > { %v405_v29 = vsel %vm2040_vm14, %v404_v26, %v397_v27  ;;  %v890_v21 = vstv %s1603_s10  ;;  %v893_v26 = vstv %s1608_s2  ;;  %v897_v27 = vstv %s1614_s5  ;;  %s1719_s20 = sld [smem:[#allocation2 + $0x101]] }
  0xb9   : > { %v1555_v30 = vsel %vm2042_vm15, %v412_v28, %v405_v29  ;;  %v900_v28 = vstv %s1618_s18  ;;  %v904_v29 = vstv %s1623_s22  ;;  %s1721_s21 = sld [smem:[#allocation4 + $0x101]] }
  0xba   : > { %v418_v31 = vsel %vm417_vm0, %v1555_v30, -inf  ;;  %v414_v32 = vpack.c.bf16 %v1555_v30, %v1555_v30  ;;  %s1723_s23 = sld [smem:[#allocation2 + $0x181]] }
  0xbb   : > { %419 = vmax.xlane.f32.xlu0 %v418_v31  ;;  %s1725_s24 = sld [smem:[#allocation4 + $0x181]] }
  0xbc   : > { %416 = vst.msk [vmem:[%s1551_s9] sm:$0xf] %vm415_vm12, %v414_v32  ;;  %s1727_s25 = sld [smem:[#allocation2 + $0x201]] }
  0xbd   : > { %s1729_s26 = sld [smem:[#allocation4 + $0x201]] }
  0xbe   : > { %s1731_s27 = sld [smem:[#allocation2 + $0x281]] }
  0xbf   : > { %s1733_s28 = sld [smem:[#allocation4 + $0x281]] }
  0xc0   : > { %s1735_s29 = sld [smem:[#allocation2 + $0x301]] }
  0xc1   : > { %s1737_s30 = sld [smem:[#allocation4 + $0x301]] }
  0xc2   : > { %s1739_s6 = sld [smem:[#allocation2 + $0x381]] }
  0xc3   : > { %s1741_s7 = sld [smem:[#allocation4 + $0x381]] }
  0xc4   : > { %s1743_s10 = sld [smem:[#allocation2 + $0x401]] }
  0xc5   : > { %s1746_s2 = sld [smem:[#allocation4 + $0x401]] }
  0xc6   : > { %s1748_s5 = sld [smem:[#allocation2 + $0x481]] }
  0xc7   : > { %s1752_s18 = sld [smem:[#allocation4 + $0x481]] }
  0xc8   : > { %s1756_s22 = sld [smem:[#allocation2 + $0x501]] }
  0xcf   : > { %461 = vrot.lane.b32.xlu0 %v460_v34, %s2057_s4 }
 0x11d   : > { %v1581_v4 = vpop.f32.mrf.mxu0 }
 0x11e   : > { %v821_v40 = vmul.f32 %v820_v36, %v1581_v4  ;;  %v828_v41 = vmul.f32 %v827_v38, %v1581_v4  ;;  %v835_v44 = vmul.f32 %v834_v42, %v1581_v4  ;;  %v842_v50 = vmul.f32 %v841_v45, %v1581_v4 }
 0x11f   : > { %v849_v51 = vmul.f32 %v848_v47, %v1581_v4  ;;  %v856_v62 = vmul.f32 %v855_v55, %v1581_v4  ;;  %v863_v3 = vmul.f32 %v862_v63, %v1581_v4  ;;  %v870_v8 = vmul.f32 %v869_v5, %v1581_v4 }
 0x120   : > { %v824_v48 = vadd.f32 %v823_v37, %v821_v40  ;;  %v831_v49 = vadd.f32 %v830_v39, %v828_v41  ;;  %v838_v53 = vadd.f32 %v837_v43, %v835_v44  ;;  %v845_v59 = vadd.f32 %v844_v46, %v842_v50 }
 0x121   : > { %v852_v60 = vadd.f32 %v851_v54, %v849_v51  ;;  %v859_v7 = vadd.f32 %v858_v56, %v856_v62  ;;  %v866_v11 = vadd.f32 %v865_v0, %v863_v3  ;;  %v873_v15 = vadd.f32 %v872_v9, %v870_v8 }
 0x122   : > { %v825_v58 = vsel %vm294_vm1, %v824_v48, %v1581_v4  ;;  %v877_v16 = vmul.f32 %v876_v12, %v1581_v4  ;;  %v884_v24 = vmul.f32 %v883_v19, %v1581_v4  ;;  %v891_v25 = vmul.f32 %v890_v21, %v1581_v4 }
 0x123   : > { %v832_v61 = vsel %vm302_vm2, %v831_v49, %v825_v58  ;;  %v898_v33 = vmul.f32 %v897_v27, %v1581_v4  ;;  %v907_v36 = vstv %s1629_s8  ;;  %v911_v37 = vstv %s1636_s11  ;;  %v273_v58 = vld [vmem:[%s2055_s0 + $0x10] sm:$0xf]  ;;  %s1762_s8 = sld [smem:[#allocation4 + $0x501]] }
 0x124   : > { %v839_v2 = vsel %vm310_vm3, %v838_v53, %v832_v61  ;;  %v880_v23 = vadd.f32 %v879_v17, %v877_v16  ;;  %v887_v31 = vadd.f32 %v886_v20, %v884_v24  ;;  %v894_v32 = vadd.f32 %v893_v26, %v891_v25  ;;  %s1769_s11 = sld [smem:[#allocation2 + $0x581]] }
 0x125   : > { %v817_v35 = vpop.f32.mrf.mxu0  ;;  %v846_v6 = vsel %vm318_vm4, %v845_v59, %v839_v2  ;;  %v914_v38 = vstv %s1642_s12  ;;  %v901_v41 = vadd.f32 %v900_v28, %v898_v33  ;;  %v912_v42 = vmul.f32 %v911_v37, %v1581_v4  ;;  %v626_v2 = vld [vmem:[%s2055_s0 + $0x4] sm:$0xf]  ;;  %s1777_s12 = sld [smem:[#allocation2 + $0x601]] }
 0x126   : > { %v853_v10 = vsel %vm326_vm5, %v852_v60, %v846_v6  ;;  %v905_v35 = vmul.f32 %v904_v29, %v1581_v4  ;;  %v918_v45 = vstv %s1648_s13  ;;  %v921_v46 = vstv %s1653_s14  ;;  %v627_v60 = vld [vmem:[%s2055_s0 + $0xc] sm:$0xf]  ;;  %s1783_s13 = sld [smem:[#allocation2 + $0x681]] }
 0x127   : > { %v860_v13 = vsel %vm334_vm6, %v859_v7, %v853_v10  ;;  %v915_v48 = vadd.f32 %v914_v38, %v912_v42  ;;  %v919_v49 = vmul.f32 %v918_v45, %v1581_v4  ;;  %v483_v5 = vstv %s1710_s15  ;;  %s1789_s14 = sld [smem:[#allocation2 + $0x701]] }
 0x128   : > { %v867_v18 = vsel %vm342_vm7, %v866_v11, %v860_v13  ;;  %v908_v44 = vadd.f32 %v907_v36, %v905_v35  ;;  %v486_v6 = vstv %s1714_s17  ;;  %v490_v7 = vstv %s1712_s16  ;;  %s1793_s15 = sld [smem:[#allocation4 + $0x581]] }
 0x129   : > { %v874_v22 = vsel %vm350_vm8, %v873_v15, %v867_v18  ;;  %v493_v8 = vstv %s1716_s19  ;;  %v497_v9 = vstv %s1719_s20  ;;  %v500_v11 = vstv %s1721_s21  ;;  %s1799_s16 = sld [smem:[#allocation4 + $0x601]] }
 0x12a   : > { %v504_v12 = vstv %s1723_s23  ;;  %v507_v13 = vstv %s1725_s24  ;;  %v511_v16 = vstv %s1727_s25  ;;  %v514_v17 = vstv %s1729_s26  ;;  %s1806_s17 = sld [smem:[#allocation4 + $0x681]] }
 0x12b   : > { %v518_v18 = vstv %s1731_s27  ;;  %v521_v19 = vstv %s1733_s28  ;;  %v528_v25 = vstv %s1737_s30  ;;  %v532_v26 = vstv %s1739_s6  ;;  %s1812_s19 = sld [smem:[#allocation4 + $0x701]] }
 0x12c   : > { %v535_v27 = vstv %s1741_s7  ;;  %v542_v33 = vstv %s1746_s2  ;;  %v549_v35 = vstv %s1752_s18  ;;  %s1875_s20 = sld [smem:[#allocation2 + $0x2]] }
 0x12d   : > { %s1877_s21 = sld [smem:[#allocation2 + $0x82]] }
 0x12e   : > { %v420_v52 = vpop.xlane.xlu0 %419  ;;  %s1879_s23 = sld [smem:[#allocation4 + $0x2]] }
 0x12f   : > { %v421_v57 = vsub.f32 %v1555_v30, %v420_v52  ;;  %v881_v30 = vsel %vm2039_vm9, %v880_v23, %v874_v22  ;;  %vm2059_vm9 = vcmp.eq.s32.totalorder %v1466_v14, 11  ;;  %v922_v52 = vadd.f32 %v921_v46, %v919_v49  ;;  %s1881_s24 = sld [smem:[#allocation4 + $0x82]] }
 0x130   : > { %v888_v40 = vsel %vm366_vm10, %v887_v31, %v881_v30  ;;  %v525_v23 = vstv %s1735_s29  ;;  %v539_v31 = vstv %s1743_s10  ;;  %s1883_s25 = sld [smem:[#allocation2 + $0x102]] }
 0x131   : > { %v422_v1 = vmul.f32 1.442695, %v421_v57  ;;  %v895_v43 = vsel %vm374_vm11, %v894_v32, %v888_v40  ;;  %v457_v57 = vpop.permute.xlu1 %456  ;;  %s1885_s26 = sld [smem:[#allocation4 + $0x102]] }
 0x132   : > { %v902_v47 = vsel %vm2059_vm9, %v901_v41, %v895_v43  ;;  %vm2060_vm9 = vcmask 523264   ;;  %v556_v43 = vstv %s1762_s8  ;;  %s1887_s27 = sld [smem:[#allocation2 + $0x182]] }
 0x133   : > { %1270 = vpow2.f32 %v422_v1  ;;  %v909_v50 = vsel %vm2041_vm13, %v908_v44, %v902_v47  ;;  %vm2043_vm13 = vcmask 1043456   ;;  %v560_v47 = vstv %s1769_s11  ;;  %s1889_s28 = sld [smem:[#allocation4 + $0x182]] }
 0x134   : > { %v916_v51 = vsel %vm2040_vm14, %v915_v48, %v909_v50  ;;  %vm2061_vm14 = vmmov %vm2060_vm9  ;;  %v435_v59 = vsel %vm2043_vm13, %v273_v58, 0  ;;  %vm2068_vm13 = vcmp.eq.s32.totalorder %v1466_v14, 14  ;;  %s1891_s29 = sld [smem:[#allocation2 + $0x202]] }
 0x135   : > { %v1696_v53 = vsel %vm2042_vm15, %v922_v52, %v916_v51  ;;  %444 = vmatpush.bf16.msra.mxu1 %v435_v59  ;;  %vm2062_vm15 = vmmov %vm2060_vm9  ;;  %v567_v52 = vstv %s1777_s12  ;;  %s1895_s30 = sld [smem:[#allocation4 + $0x202]] }
 0x136   : > { %v927_v55 = vsel %vm417_vm0, %v1696_v53, -inf  ;;  %v924_v56 = vpack.c.bf16 %v1696_v53, %v1696_v53  ;;  %v633_v61 = vsel %vm2062_vm15, %v627_v60, 0  ;;  %v581_v60 = vstv %s1789_s14  ;;  %s1897_s6 = sld [smem:[#allocation2 + $0x282]] }
 0x137   : > { %928 = vmax.xlane.f32.xlu0 %v927_v55  ;;  %vm2064_vm15 = vcmp.eq.s32.totalorder %v1466_v14, 8  ;;  %s1899_s7 = sld [smem:[#allocation4 + $0x282]] }
 0x138   : > { %1226 = vst.msk [vmem:[%s1551_s9 + $0xc] sm:$0xf] %vm415_vm12, %v924_v56  ;;  %s1901_s10 = sld [smem:[#allocation2 + $0x302]] }
 0x139   : > { %v1271_v34 = vpop.eup %1270  ;;  %642 = vmatpush.bf16.xpose.msrb.mxu1 %v633_v61  ;;  %s1903_s2 = sld [smem:[#allocation4 + $0x302]] }
 0x13a   : > { %v424_v39 = vsel %vm417_vm0, %v1271_v34, 0.0  ;;  %s1907_s18 = sld [smem:[#allocation4 + $0x382]] }
 0x13b   : > { %425 = vadd.xlane.f32.xlu2 %v424_v39  ;;  %v553_v39 = vstv %s1756_s22  ;;  %s1909_s22 = sld [smem:[#allocation2 + $0x402]] }
 0x13c   : > { %s1911_s8 = sld [smem:[#allocation2 + $0x482]] }
 0x13d   : > { %s1913_s11 = sld [smem:[#allocation4 + $0x402]] }
 0x13e   : > { %s1915_s12 = sld [smem:[#allocation2 + $0x502]] }
 0x13f   : > { %s1921_s14 = sld [smem:[#allocation2 + $0x582]] }
 0x141   : > { %v462_v54 = vpop.permute.xlu0 %461 }
 0x142   : > { %v467_v4 = vsel %vm2060_vm9, %v462_v54, 0 }
 0x143   : > { %476 = vmatpush.bf16.xpose.msra.mxu2 %v467_v4  ;;  %v574_v4 = vstv %s1783_s13  ;;  %s1917_s13 = sld [smem:[#allocation4 + $0x482]] }
 0x14a   : > { %1129 = vmatmul.msk.bf16.vlgmr.msra.gmra.mxu2 %vm2061_vm14, %v457_v57  ;;  %vm2063_vm14 = vmmov %vm2060_vm9  ;;  %vm2065_vm9 = vcmp.eq.s32.totalorder %v1466_v14, 11 }
 0x1aa   : > { %v1750_v3 = vpop.xlane.xlu0 %928 }
 0x1ab   : > { %v930_v10 = vsub.f32 %v1696_v53, %v1750_v3 }
 0x1ae   : > { %v426_v62 = vpop.xlane.xlu2 %425 }
 0x1af   : > { %1272 = vrcp.f32 %v426_v62 }
 0x1b5   : > { %v1273_v63 = vpop.eup %1272 }
 0x1b6   : > { %v428_v0 = vmul.f32 %v1273_v63, %v1271_v34  ;;  %v546_v34 = vstv %s1748_s5  ;;  %v563_v63 = vstv %s1793_s15  ;;  %s1905_s5 = sld [smem:[#allocation2 + $0x382]] }
 0x1b7   : > { %s1927_s15 = sld [smem:[#allocation4 + $0x502]] }
 0x1b8   : > { %v429_v1 = vpack.c.bf16 %v428_v0, %v428_v0 }
 0x1ba   : > { %1128 = vmatmul.msk.bf16.vlgmr.msra.gmra.mxu1 %vm417_vm0, %v429_v1 }
 0x1ca   : > { %1162 = vmatmul.msk.bf16.vlgmr.msrb.gmra.mxu1 %vm2063_vm14, %v626_v2  ;;  %vm2066_vm14 = vcmp.eq.s32.totalorder %v1466_v14, 12 }
 0x1cd   : > { %v1771_v15 = vpop.f32.mrf.mxu2 }
 0x1ce   : > { %v484_v20 = vmul.f32 %v483_v5, %v1771_v15  ;;  %v491_v21 = vmul.f32 %v490_v7, %v1771_v15  ;;  %v498_v22 = vmul.f32 %v497_v9, %v1771_v15  ;;  %v505_v24 = vmul.f32 %v504_v12, %v1771_v15 }
 0x1cf   : > { %v512_v30 = vmul.f32 %v511_v16, %v1771_v15  ;;  %v519_v32 = vmul.f32 %v518_v18, %v1771_v15  ;;  %v526_v38 = vmul.f32 %v525_v23, %v1771_v15  ;;  %v533_v42 = vmul.f32 %v532_v26, %v1771_v15  ;;  %v1871_v26 = vld [vmem:[%s2055_s0 + $0x10] sm:$0xff]  }
 0x1d0   : > { %v487_v28 = vadd.f32 %v486_v6, %v484_v20  ;;  %v494_v29 = vadd.f32 %v493_v8, %v491_v21  ;;  %v501_v37 = vadd.f32 %v500_v11, %v498_v22  ;;  %v508_v41 = vadd.f32 %v507_v13, %v505_v24 }
 0x1d1   : > { %v515_v45 = vadd.f32 %v514_v17, %v512_v30  ;;  %v540_v46 = vmul.f32 %v539_v31, %v1771_v15  ;;  %v522_v50 = vadd.f32 %v521_v19, %v519_v32  ;;  %v547_v51 = vmul.f32 %v546_v34, %v1771_v15 }
 0x1d2   : > { %v488_v36 = vsel %vm294_vm1, %v487_v28, %v1771_v15  ;;  %v529_v55 = vadd.f32 %v528_v25, %v526_v38  ;;  %v554_v56 = vmul.f32 %v553_v39, %v1771_v15  ;;  %v536_v58 = vadd.f32 %v535_v27, %v533_v42 }
 0x1d3   : > { %v495_v40 = vsel %vm302_vm2, %v494_v29, %v488_v36  ;;  %v561_v59 = vmul.f32 %v560_v47, %v1771_v15  ;;  %v543_v62 = vadd.f32 %v542_v33, %v540_v46  ;;  %v568_v0 = vmul.f32 %v567_v52, %v1771_v15 }
 0x1d4   : > { %v502_v44 = vsel %vm310_vm3, %v501_v37, %v495_v40  ;;  %v550_v2 = vadd.f32 %v549_v35, %v547_v51  ;;  %v570_v5 = vstv %s1799_s16  ;;  %v575_v6 = vmul.f32 %v574_v4, %v1771_v15  ;;  %s1933_s16 = sld [smem:[#allocation2 + $0x602]] }
 0x1d5   : > { %v480_v48 = vpop.f32.mrf.mxu2  ;;  %v509_v49 = vsel %vm318_vm4, %v508_v41, %v502_v44  ;;  %v557_v8 = vadd.f32 %v556_v43, %v554_v56  ;;  %v577_v9 = vstv %s1806_s17  ;;  %v582_v11 = vmul.f32 %v581_v60, %v1771_v15  ;;  %s1939_s17 = sld [smem:[#allocation2 + $0x682]] }
 0x1d6   : > { %v516_v54 = vsel %vm326_vm5, %v515_v45, %v509_v49  ;;  %v564_v13 = vadd.f32 %v563_v63, %v561_v59  ;;  %v584_v16 = vstv %s1812_s19  ;;  %v931_v17 = vmul.f32 1.442695, %v930_v10  ;;  %s1945_s19 = sld [smem:[#allocation2 + $0x702]] }
 0x1d7   : > { %v523_v57 = vsel %vm334_vm6, %v522_v50, %v516_v54  ;;  %v571_v19 = vadd.f32 %v570_v5, %v568_v0  ;;  %v578_v21 = vadd.f32 %v577_v9, %v575_v6  ;;  %v585_v22 = vadd.f32 %v584_v16, %v582_v11 }
 0x1d8   : > { %v530_v61 = vsel %vm342_vm7, %v529_v55, %v523_v57  ;;  %1274 = vpow2.f32 %v931_v17  ;;  %v940_v27 = vunpack.c.h.b16 %v1871_v26  ;;  %v649_v31 = vstv %s1875_s20  ;;  %s1947_s20 = sld [smem:[#allocation4 + $0x582]] }
 0x1d9   : > { %v537_v1 = vsel %vm350_vm8, %v536_v58, %v530_v61  ;;  %v656_v32 = vstv %s1877_s21  ;;  %v652_v33 = vstv %s1879_s23  ;;  %v659_v34 = vstv %s1881_s24  ;;  %s1951_s21 = sld [smem:[#allocation4 + $0x602]] }
 0x1da   : > { %v544_v7 = vsel %vm2064_vm15, %v543_v62, %v537_v1  ;;  %vm2067_vm15 = vcmp.eq.s32.totalorder %v1466_v14, 13  ;;  %v941_v28 = vpack.c.b16 %v940_v27, %v940_v27  ;;  %v663_v35 = vstv %s1883_s25  ;;  %s1953_s23 = sld [smem:[#allocation4 + $0x682]] }
 0x1db   : > { %v551_v12 = vsel %vm366_vm10, %v550_v2, %v544_v7  ;;  %v670_v36 = vstv %s1887_s27  ;;  %v666_v37 = vstv %s1885_s26  ;;  %v673_v38 = vstv %s1889_s28  ;;  %s1957_s24 = sld [smem:[#allocation4 + $0x702]] }
 0x1dc   : > { %v558_v18 = vsel %vm374_vm11, %v557_v8, %v551_v12  ;;  %v677_v39 = vstv %s1891_s29  ;;  %v684_v40 = vstv %s1897_s6  ;;  %v680_v41 = vstv %s1895_s30  ;;  %s2077_s26 = sld [smem:[#allocation14_spill]] }
 0x1dd   : > { %v565_v20 = vsel %vm2065_vm9, %v564_v13, %v558_v18  ;;  %v687_v42 = vstv %s1899_s7  ;;  %v691_v43 = vstv %s1901_s10  ;;  %v698_v44 = vstv %s1905_s5 }
 0x1de   : > { %v572_v15 = vsel %vm2066_vm14, %v571_v19, %v565_v20  ;;  %v1866_v24 = vpop.eup %1274  ;;  %v694_v46 = vstv %s1903_s2  ;;  %v701_v47 = vstv %s1907_s18  ;;  %v705_v48 = vstv %s1909_s22 }
 0x1df   : > { %v579_v23 = vsel %vm2067_vm15, %v578_v21, %v572_v15  ;;  %v933_v25 = vsel %vm417_vm0, %v1866_v24, 0.0  ;;  %v712_v49 = vstv %s1911_s8  ;;  %v708_v4 = vstv %s1913_s11 }
 0x1e0   : > { %v1858_v53 = vsel %vm2068_vm13, %v585_v22, %v579_v23  ;;  %v719_v57 = vstv %s1915_s12  ;;  %v715_v0 = vstv %s1917_s13  ;;  %v726_v1 = vstv %s1921_s14 }
 0x1e1   : > { %v590_v3 = vsel %vm417_vm0, %v1858_v53, -inf  ;;  %v587_v10 = vpack.c.bf16 %v1858_v53, %v1858_v53  ;;  %v722_v7 = vstv %s1927_s15  ;;  %v733_v12 = vstv %s1933_s16 }
 0x1e2   : > { %591 = vmax.xlane.f32.xlu1 %v590_v3  ;;  %v740_v18 = vstv %s1939_s17  ;;  %v747_v22 = vstv %s1945_s19 }
 0x1e3   : > { %1160 = vst.msk [vmem:[%s1551_s9 + $0x4] sm:$0xf] %vm415_vm12, %v587_v10  ;;  %v729_v10 = vstv %s1947_s20 }
 0x1ea   : > { %934 = vadd.xlane.f32.xlu1 %v933_v25 }
 0x203   : > { %942 = vrot.lane.b32.xlu1 %v941_v28, %s2057_s4 }
 0x237   : > { %v1893_v29 = vpop.f32.mrf.mxu1 }
 0x23f   : > { %v448_v30 = vpop.f32.mrf.mxu1 }
 0x240   : > { %v736_v30 = vstv %s1951_s21 }
 0x247   : > { %v644_v45 = vpop.f32.mrf.mxu1 }
 0x248   : > { %v650_v50 = vmul.f32 %v649_v31, %v644_v45  ;;  %v657_v51 = vmul.f32 %v656_v32, %v644_v45  ;;  %v664_v52 = vmul.f32 %v663_v35, %v644_v45  ;;  %v671_v54 = vmul.f32 %v670_v36, %v644_v45 }
 0x249   : > { %v678_v55 = vmul.f32 %v677_v39, %v644_v45  ;;  %v685_v56 = vmul.f32 %v684_v40, %v644_v45  ;;  %v692_v61 = vmul.f32 %v691_v43, %v644_v45  ;;  %v699_v63 = vmul.f32 %v698_v44, %v644_v45 }
 0x24a   : > { %v653_v58 = vadd.f32 %v652_v33, %v650_v50  ;;  %v660_v59 = vadd.f32 %v659_v34, %v657_v51  ;;  %v667_v60 = vadd.f32 %v666_v37, %v664_v52  ;;  %v674_v62 = vadd.f32 %v673_v38, %v671_v54 }
 0x24b   : > { %v681_v5 = vadd.f32 %v680_v41, %v678_v55  ;;  %v706_v6 = vmul.f32 %v705_v48, %v644_v45  ;;  %v688_v9 = vadd.f32 %v687_v42, %v685_v56  ;;  %v713_v11 = vmul.f32 %v712_v49, %v644_v45 }
 0x24c   : > { %v654_v2 = vsel %vm294_vm1, %v653_v58, %v644_v45  ;;  %v695_v16 = vadd.f32 %v694_v46, %v692_v61  ;;  %v720_v17 = vmul.f32 %v719_v57, %v644_v45  ;;  %v702_v21 = vadd.f32 %v701_v47, %v699_v63 }
 0x24d   : > { %v661_v8 = vsel %vm302_vm2, %v660_v59, %v654_v2  ;;  %v727_v15 = vmul.f32 %v726_v1, %v644_v45  ;;  %v709_v3 = vadd.f32 %v708_v4, %v706_v6  ;;  %v734_v25 = vmul.f32 %v733_v12, %v644_v45  ;;  %vm2070_vm2 = vmmov %vm2065_vm9  ;;  %v628_v6 = vld [vmem:[%s2055_s0 + $0x14] sm:$0xf]  ;;  %s1230_s0 = sshll.u32 %s2056_s3, 3 }
 0x24e   : > { %v668_v13 = vsel %vm310_vm3, %v667_v60, %v661_v8  ;;  %v716_v28 = vadd.f32 %v715_v0, %v713_v11  ;;  %v741_v31 = vmul.f32 %v740_v18, %v644_v45  ;;  %v723_v33 = vadd.f32 %v722_v7, %v720_v17  ;;  %vm2071_vm3 = vmmov %vm2066_vm14  ;;  %s263_s27 = scalar_lea.vmem %s2077_s26, %s1230_s0 }
 0x24f   : > { %v646_v19 = vpop.f32.mrf.mxu1  ;;  %v675_v20 = vsel %vm318_vm4, %v674_v62, %v668_v13  ;;  %v743_v34 = vstv %s1953_s23  ;;  %v748_v35 = vmul.f32 %v747_v22, %v644_v45  ;;  %v730_v37 = vadd.f32 %v729_v10, %v727_v15  ;;  %vm2072_vm4 = vmmov %vm2067_vm15 }
 0x250   : > { %v682_v23 = vsel %vm326_vm5, %v681_v5, %v675_v20  ;;  %v750_v38 = vstv %s1957_s24  ;;  %vm2069_vm1 = vcmp.eq.s32.totalorder %v1466_v14, 8  ;;  %v737_v40 = vadd.f32 %v736_v30, %v734_v25  ;;  %vm2073_vm5 = vmmov %vm2068_vm13 }
 0x251   : > { %v689_v27 = vsel %vm334_vm6, %v688_v9, %v682_v23  ;;  %v744_v43 = vadd.f32 %v743_v34, %v741_v31  ;;  %v751_v46 = vadd.f32 %v750_v38, %v748_v35  ;;  %vm2074_vm6 = vcmask 1043456  }
 0x252   : > { %v696_v32 = vsel %vm342_vm7, %v695_v16, %v689_v27  ;;  %v603_v60 = vunpack.c.l.b16 %v1871_v26  ;;  %vm2075_vm7 = vmmov %vm2074_vm6 }
 0x253   : > { %v703_v36 = vsel %vm350_vm8, %v702_v21, %v696_v32  ;;  %vm2076_vm8 = vmmov %vm2074_vm6 }
 0x254   : > { %v710_v39 = vsel %vm2069_vm1, %v709_v3, %v703_v36  ;;  %v604_v61 = vpack.c.b16 %v603_v60, %v603_v60  ;;  %v772_v8 = vsel %vm2076_vm8, %v628_v6, 0 }
 0x255   : > { %v592_v41 = vpop.xlane.xlu1 %591  ;;  %v717_v42 = vsel %vm366_vm10, %v716_v28, %v710_v39  ;;  %vm2078_vm10 = vcmask 523264  }
 0x256   : > { %v593_v44 = vsub.f32 %v1858_v53, %v592_v41  ;;  %v724_v45 = vsel %vm374_vm11, %v723_v33, %v717_v42  ;;  %vm2079_vm11 = vmmov %vm2078_vm10 }
 0x257   : > { %v731_v47 = vsel %vm2070_vm2, %v730_v37, %v724_v45 }
 0x258   : > { %v594_v48 = vmul.f32 1.442695, %v593_v44  ;;  %v738_v49 = vsel %vm2071_vm3, %v737_v40, %v731_v47 }
 0x259   : > { %v745_v50 = vsel %vm2072_vm4, %v744_v43, %v738_v49 }
 0x25a   : > { %1276 = vpow2.f32 %v594_v48  ;;  %v752_v51 = vsel %vm2073_vm5, %v751_v46, %v745_v50 }
 0x25b   : > { %v753_v52 = vpack.c.bf16 %v752_v51, %v752_v51  ;;  %v756_v56 = vsel %vm417_vm0, %v752_v51, -inf }
 0x25d   : > { %1193 = vst.msk [vmem:[%s1551_s9 + $0x8] sm:$0xf] %vm415_vm12, %v753_v52  ;;  %v935_v55 = vpop.xlane.xlu1 %934 }
 0x25e   : > { %1278 = vrcp.f32 %v935_v55 }
 0x260   : > { %v1277_v53 = vpop.eup %1276 }
 0x261   : > { %v596_v54 = vsel %vm417_vm0, %v1277_v53, 0.0 }
 0x262   : > { %597 = vadd.xlane.f32.xlu2 %v596_v54 }
 0x264   : > { %v1279_v4 = vpop.eup %1278 }
 0x265   : > { %v937_v57 = vmul.f32 %v1279_v4, %v1866_v24 }
 0x267   : > { %v938_v14 = vpack.c.bf16 %v937_v57, %v937_v57 }
 0x26a   : > { %757 = vmax.xlane.f32.xlu2 %v756_v56 }
 0x275   : > { %v943_v58 = vpop.permute.xlu1 %942 }
 0x276   : > { %v948_v59 = vsel %vm2074_vm6, %v943_v58, 0 }
 0x277   : > { %957 = vmatpush.bf16.msrb.mxu2 %v948_v59 }
 0x27a   : > { %1227 = vmatmul.msk.bf16.vlgmr.msrb.gmra.mxu2 %vm417_vm0, %v938_v14 }
 0x282   : > { %605 = vrot.lane.b32.xlu2 %v604_v61, %s2057_s4 }
 0x2d5   : > { %v598_v62 = vpop.xlane.xlu2 %597 }
 0x2d6   : > { %1280 = vrcp.f32 %v598_v62 }
 0x2dc   : > { %v1281_v2 = vpop.eup %1280 }
 0x2dd   : > { %v758_v63 = vpop.xlane.xlu2 %757  ;;  %v600_v24 = vmul.f32 %v1281_v2, %v1277_v53 }
 0x2de   : > { %v759_v0 = vsub.f32 %v752_v51, %v758_v63 }
 0x2df   : > { %v601_v26 = vpack.c.bf16 %v600_v24, %v600_v24 }
 0x2e0   : > { %v760_v1 = vmul.f32 1.442695, %v759_v0 }
 0x2e2   : > { %1282 = vpow2.f32 %v760_v1 }
 0x2e5   : > { %v606_v5 = vpop.permute.xlu2 %605 }
 0x2e6   : > { %v611_v7 = vsel %vm2075_vm7, %v606_v5, 0 }
 0x2e7   : > { %620 = vmatpush.bf16.msra.mxu3 %v611_v7 }
 0x2e8   : > { %v1283_v9 = vpop.eup %1282 }
 0x2e9   : > { %v762_v11 = vsel %vm417_vm0, %v1283_v9, 0.0 }
 0x2ea   : > { %1161 = vmatmul.msk.bf16.vlgmr.msra.gmra.mxu3 %vm417_vm0, %v601_v26  ;;  %763 = vadd.xlane.f32.xlu0 %v762_v11 }
 0x2eb   : > { %781 = vmatpush.bf16.msrb.mxu3 %v772_v8 }
 0x2fd   : > { %v959_v12 = vpop.f32.mrf.mxu2 }
 0x305   : > { %v961_v13 = vpop.f32.mrf.mxu2 }
 0x35d   : > { %v764_v16 = vpop.xlane.xlu0 %763 }
 0x35e   : > { %1284 = vrcp.f32 %v764_v16 }
 0x364   : > { %v1285_v17 = vpop.eup %1284 }
 0x365   : > { %v766_v18 = vmul.f32 %v1285_v17, %v1283_v9 }
 0x367   : > { %v767_v19 = vpack.c.bf16 %v766_v18, %v766_v18 }
 0x369   : > { %1194 = vmatmul.msk.bf16.vlgmr.msrb.gmra.mxu3 %vm417_vm0, %v767_v19 }
 0x36d   : > { %v622_v20 = vpop.f32.mrf.mxu3 }
 0x36e   : > { %v1265_v21 = vpack.i.bf16 %v959_v12, %v622_v20 }
 0x370   : > { %1266 = vrot.lane.b32.xlu0 %v1265_v21, %s2057_s4 }
 0x375   : > { %v624_v15 = vpop.f32.mrf.mxu3 }
 0x3e2   : > { %v1267_v22 = vpop.permute.xlu0 %1266 }
 0x3e3   : > { %v1268_v23 = vunpack.i.l.bf16 %v1267_v22  ;;  %v1269_v3 = vunpack.i.h.bf16 %v1267_v22 }
 0x3e5   : > { %v971_v25 = vsel %vm2078_vm10, %v1893_v29, %v1268_v23 }
 0x3ec   : > { %v783_v10 = vpop.f32.mrf.mxu3 }
 0x3ed   : > { %v972_v27 = vsel %vm2079_vm11, %v783_v10, %v1269_v3 }
 0x3ee   : > { %v973_v28 = vpack.c.bf16 %v972_v27, %v971_v25 }
 0x3f0   : > { %974 = vst [vmem:[%s263_s27] sm:$0xff] %v973_v28 }
 0x3f4   : > { %v785_v30 = vpop.f32.mrf.mxu3 }
 0x3f5 PF: > { %s2080_s4 = sld [smem:[#allocation8_spill]] }
 0x3fb   : > { %s18_s18 = sadd.s32 1, %s2080_s4  }
 0x3fc   : > { %p15_p7 = scmp.ge.s32.totalorder %s18_s18, 4  }
 0x3fe   :  { %17 = sbr.rel (!%p15_p7) target bundleno = 8 (0x8), region = 90 }
 0x403   :  { %1012 = vsyncpa [#allocation3], 1 }
 0x404   :  { %1014 = vsyncpa [#allocation3 + $0x1], 1 }
 0x405   :  { %1015 = vsyncpa [#allocation5], 1 }

// kernel: kgpdplam_forward.19
= control target key start
LH: loop header
LB: loop body
LE: loop exit
PB: predicated region body
PF: predicated region fallthrough
CT: control target
= control target key end

     0   :  { %s2125_s0 = inlined_call_operand.vmem [shape: bf16[2,8,768], index: 0, kind: input, shape index: {}]   ;;  %s2126_s1 = inlined_call_operand.vmem [shape: s32[8,8], index: 1, kind: input, shape index: {}]   ;;  %s2127_s2 = inlined_call_operand.vmem [shape: f32[15,4], index: 2, kind: input, shape index: {}]   ;;  %s2128_s3 = inlined_call_operand.vmem [shape: f32[15,4], index: 3, kind: input, shape index: {}]   ;;  %s2129_s4 = inlined_call_operand.vmem [shape: bf16[2,4,8,8], index: 4, kind: input, shape index: {}]   ;;  %s2130_s5 = inlined_call_operand.vmem [shape: bf16[2,8,256], index: 5, kind: output, shape index: {0}]   ;;  %s2131_s6 = inlined_call_operand.vmem [shape: bf16[2,4,8,8], index: 6, kind: output, shape index: {1}]  }
   0x1   :  { %2145 = sst [smem:[#allocation11_spill]] %s2125_s0 }
   0x2   :  { %2146 = sst [smem:[#allocation12_spill]] %s2127_s2 }
   0x3   :  { %2147 = sst [smem:[#allocation13_spill]] %s2128_s3 }
   0x4   :  { %2148 = sst [smem:[#allocation14_spill]] %s2129_s4 }
   0x5   :  { %2149 = sst [smem:[#allocation15_spill]] %s2130_s5 }
   0x6   :  { %2150 = sst [smem:[#allocation16_spill]] %s2131_s6 }
   0x7   :  { %12 = vsyncpa [#allocation3], 0 }
   0x8   :  { %13 = vsyncpa [#allocation5], 0  ;;  %s1452_s21 = smov 0  }
   0x9 LB: > { %2151 = sst [smem:[#allocation8_spill]] %s1410_s21  ;;  %s1159_s25 = sadd.s32 4294967295, %s1410_s21   ;;  %s1410_s21 = sphi %s1452_s21, %s19_s21  }
   0xa   : > { %s2152_s2 = sld [smem:[#allocation12_spill]]  ;;  %p1161_p0 = scmp.ge.s32.totalorder %s1410_s21, 1 }
   0xb   : > { %p191_p1 = scmp.lt.s32.totalorder %s1410_s21, 3  ;;  %p1328_p3 = scmp.eq.s32.totalorder %s1159_s25, 0 }
   0xc   : > { %s2153_s3 = sld [smem:[#allocation13_spill]]  ;;  %s1412_s29 = smov [#allocation2]  }
   0xd   : > { %p192_p2 = pnand %p1161_p0, %p191_p1  ;;  %s1413_s30 = smov 128  }
   0xe   : > { %s1414_s7 = smov 8   ;;  %s1415_s8 = smov [#allocation4]  }
   0xf   : > { %p1321_p4 = pneg %p192_p2 }
  0x10   : > { %s205_s24 = sshll.u32 %s2152_s2, 4  ;;  %249 = sbr.rel (%p192_p2) target bundleno = 1018 (0x3fa), region = 40  ;;  %s206_s24 = int_to_ptr.vmem [resolvable:$true] %s205_s24 }
  0x11   : > { %p1322_p5 = pnand %p1328_p3, %p1321_p4 }
  0x12   : > { %s217_s28 = sshll.u32 %s2153_s3, 4  ;;  %s218_s28 = int_to_ptr.vmem [resolvable:$true] %s217_s28 }
  0x13   : > { %1324 = dma.vmem_to_smem (!%p1322_p5), %s206_s24, 256, %s1412_s29, [#allocation3], %s1413_s30, %s1413_s30, %s1414_s7  }
  0x14   : > { %1327 = dma.vmem_to_smem (!%p1322_p5), %s218_s28, 256, %s1415_s8, [#allocation5], %s1413_s30, %s1413_s30, %s1414_s7  }
  0x15   : > { %1401 = dma.done.wait (%p1328_p3), [#allocation3], 256  }
  0x16   : > { %1403 = vsyncadd (%p1328_p3), [#allocation3], 4294967040 }
  0x17   : > { %1405 = dma.done.wait (%p1328_p3), [#allocation5], 256  }
  0x18   : > { %1407 = vsyncadd (%p1328_p3), [#allocation5], 4294967040 }
  0x19   : > { %261 = sfence }
  0x1a   : > { %p296_p6 = scmp.lt.s32.totalorder %s1159_s25, 1  ;;  %vm2139_vm0 = vcmask 523264   ;;  %s2155_s0 = sld [smem:[#allocation11_spill]]  ;;  %v1551_v14 = vld [vmem:[%s2126_s1] sm:$0xff] }
  0x1b   : > { %s2132_s13 = smov 64   ;;  %s1490_s14 = sld [smem:[#allocation2]]  ;;  %vm341_vm1 = vcmp.eq.s32.totalorder %v1551_v14, 0  ;;  %vm349_vm2 = vcmp.eq.s32.totalorder %v1551_v14, 1  ;;  %vm357_vm3 = vcmp.eq.s32.totalorder %v1551_v14, 2  ;;  %vm365_vm4 = vcmp.eq.s32.totalorder %v1551_v14, 3 }
  0x1c   : > { %s2182_s25 = smov (!%p296_p6, %s1159_s25), 1  ;;  %s1492_s15 = sld [smem:[#allocation4]]  ;;  %vm373_vm5 = vcmp.eq.s32.totalorder %v1551_v14, 4  ;;  %vm381_vm6 = vcmp.eq.s32.totalorder %v1551_v14, 5  ;;  %vm389_vm7 = vcmp.eq.s32.totalorder %v1551_v14, 6  ;;  %vm397_vm8 = vcmp.eq.s32.totalorder %v1551_v14, 7 }
  0x1d   : > { %2154 = sst [smem:[#allocation9_spill]] %s2182_s25  ;;  %s1312_s9 = smul.u32 24, %s2182_s25  ;;  %vm2141_vm9 = vcmp.eq.s32.totalorder %v1551_v14, 8  ;;  %vm413_vm10 = vcmp.eq.s32.totalorder %v1551_v14, 9  ;;  %vm421_vm11 = vcmp.eq.s32.totalorder %v1551_v14, 10  ;;  %vm2140_vm12 = vcmp.eq.s32.totalorder %v1551_v14, 11 }
  0x1e   : > { %s1494_s16 = sld [smem:[#allocation2 + $0x80]]  ;;  %vm437_vm13 = vcmp.eq.s32.totalorder %v1551_v14, 12  ;;  %vm2142_vm14 = vcmp.eq.s32.totalorder %v1551_v14, 13  ;;  %vm2143_vm15 = vcmp.eq.s32.totalorder %v1551_v14, 14 }
  0x1f   : > { %s1496_s17 = sld [smem:[#allocation4 + $0x80]] }
  0x20   : > { %s1477_s12 = scalar_lea.vmem %s2155_s0, %s1312_s9  ;;  %s1498_s18 = sld [smem:[#allocation2 + $0x100]] }
  0x21   : > { %2156 = sst [smem:[#allocation10_spill]] %s1477_s12  ;;  %v319_v0 = vld [vmem:[%s1477_s12 + $0x8] sm:$0xf]  ;;  %v846_v1 = vld [vmem:[%s1477_s12 + $0xc] sm:$0xf]  ;;  %v343_v11 = vstv %s1490_s14 }
  0x22   : > { %v326_v2 = vsel %vm2139_vm0, %v319_v0, 0  ;;  %v854_v3 = vunpack.c.l.b16 %v846_v1  ;;  %v1483_v4 = vld [vmem:[%s1477_s12 + $0x4] sm:$0xff]   ;;  %v318_v8 = vld [vmem:[%s1477_s12] sm:$0xf]  ;;  %s1500_s19 = sld [smem:[#allocation4 + $0x100]]  ;;  %v346_v18 = vstv %s1492_s15  ;;  %s2160_s12 = smov 64  }
  0x23   : > { %335 = vmatpush.bf16.xpose.msra.mxu0 %v326_v2  ;;  %v849_v5 = vunpack.c.l.b16 %v1483_v4  ;;  %s1502_s20 = sld [smem:[#allocation2 + $0x180]] }
  0x24   : > { %v855_v6 = vpack.c.b16 %v854_v3, %v854_v3  ;;  %s1504_s22 = sld [smem:[#allocation4 + $0x180]]  ;;  %v351_v12 = vstv %s1494_s16 }
  0x25   : > { %v850_v7 = vpack.c.b16 %v849_v5, %v849_v5  ;;  %s1506_s23 = sld [smem:[#allocation2 + $0x200]]  ;;  %v354_v19 = vstv %s1496_s17 }
  0x26   : > { %856 = vrot.lane.b32.xlu1 %v855_v6, %s2132_s13  ;;  %s1508_s24 = sld [smem:[#allocation4 + $0x200]]  ;;  %v359_v13 = vstv %s1498_s18 }
  0x27   : > { %851 = vrot.lane.b32.xlu2 %v850_v7, %s2132_s13  ;;  %s1510_s26 = sld [smem:[#allocation2 + $0x280]] }
  0x28   : > { %s1512_s27 = sld [smem:[#allocation4 + $0x280]]  ;;  %v362_v22 = vstv %s1500_s19 }
  0x29   : > { %s1514_s28 = sld [smem:[#allocation2 + $0x300]]  ;;  %v367_v15 = vstv %s1502_s20 }
  0x2a   : > { %1175 = vmatmul.msk.bf16.vlgmr.msra.gmra.mxu0 %vm2139_vm0, %v318_v8  ;;  %s1516_s29 = sld [smem:[#allocation4 + $0x300]]  ;;  %v370_v23 = vstv %s1504_s22 }
  0x2b   : > { %s1518_s30 = sld [smem:[#allocation2 + $0x380]]  ;;  %v375_v16 = vstv %s1506_s23 }
  0x2c   : > { %s1520_s7 = sld [smem:[#allocation4 + $0x380]]  ;;  %v378_v24 = vstv %s1508_s24 }
  0x2d   : > { %s1522_s8 = sld [smem:[#allocation2 + $0x400]]  ;;  %v383_v17 = vstv %s1510_s26 }
  0x2e   : > { %s1524_s9 = sld [smem:[#allocation4 + $0x400]]  ;;  %v386_v25 = vstv %s1512_s27 }
  0x2f   : > { %s1526_s10 = sld [smem:[#allocation2 + $0x480]]  ;;  %v391_v20 = vstv %s1514_s28 }
  0x30   : > { %s1528_s11 = sld [smem:[#allocation4 + $0x480]]  ;;  %v394_v27 = vstv %s1516_s29 }
  0x31   : > { %s1530_s13 = sld [smem:[#allocation2 + $0x500]]  ;;  %v399_v21 = vstv %s1518_s30 }
  0x32   : > { %s1532_s0 = sld [smem:[#allocation4 + $0x500]]  ;;  %v402_v28 = vstv %s1520_s7 }
  0x33   : > { %s1534_s2 = sld [smem:[#allocation2 + $0x580]]  ;;  %v407_v29 = vstv %s1522_s8 }
  0x34   : > { %s1536_s3 = sld [smem:[#allocation4 + $0x580]]  ;;  %v410_v34 = vstv %s1524_s9 }
  0x35   : > { %s1538_s21 = sld [smem:[#allocation2 + $0x600]]  ;;  %v415_v30 = vstv %s1526_s10 }
  0x36   : > { %s1541_s5 = sld [smem:[#allocation4 + $0x600]]  ;;  %v418_v35 = vstv %s1528_s11 }
  0x37   : > { %s1546_s6 = sld [smem:[#allocation2 + $0x680]]  ;;  %v423_v31 = vstv %s1530_s13 }
  0x38   : > { %s1556_s25 = sld [smem:[#allocation4 + $0x680]]  ;;  %v426_v40 = vstv %s1532_s0 }
  0x39   : > { %s1562_s14 = sld [smem:[#allocation2 + $0x700]]  ;;  %v431_v32 = vstv %s1534_s2 }
  0x3a   : > { %s1576_s4 = sld [smem:[#allocation4 + $0x700]]  ;;  %v434_v42 = vstv %s1536_s3 }
  0x3b   : > { %v439_v36 = vstv %s1538_s21  ;;  %s2157_s2 = sld [smem:[#allocation9_spill]] }
  0x3c   : > { %v442_v43 = vstv %s1541_s5  ;;  %s2158_s3 = sld [smem:[#allocation10_spill]] }
  0x3d   : > { %v447_v47 = vstv %s1546_s6  ;;  %s2159_s21 = sld [smem:[#allocation14_spill]] }
  0x3e   : > { %v450_v49 = vstv %s1556_s25  ;;  %s2161_s16 = sld [smem:[#allocation16_spill]] }
  0x3f   : > { %v455_v50 = vstv %s1562_s14  ;;  %s1274_s18 = sld [smem:[#allocation2 + $0x3]] }
  0x40   : > { %v458_v60 = vstv %s1576_s4  ;;  %s1660_s19 = sld [smem:[#allocation4 + $0x3]] }
  0x41   : > { %s1309_s0 = sshll.u32 %s2157_s2, 4  ;;  %s1276_s20 = sld [smem:[#allocation2 + $0x83]] }
  0x42   : > { %s1662_s22 = sld [smem:[#allocation4 + $0x83]] }
  0x43   : > { %s1612_s25 = scalar_lea.vmem %s2159_s21, %s1309_s0  ;;  %s1278_s23 = sld [smem:[#allocation2 + $0x103]] }
  0x44   : > { %s1650_s17 = scalar_lea.vmem %s2161_s16, %s1309_s0  ;;  %s1664_s24 = sld [smem:[#allocation4 + $0x103]] }
  0x45   : > { %s1666_s26 = sld [smem:[#allocation2 + $0x183]] }
  0x46   : > { %s1668_s27 = sld [smem:[#allocation4 + $0x183]] }
  0x47   : > { %s1670_s28 = sld [smem:[#allocation2 + $0x203]] }
  0x48   : > { %s1672_s29 = sld [smem:[#allocation4 + $0x203]] }
  0x49   : > { %s1674_s30 = sld [smem:[#allocation2 + $0x283]] }
  0x4a   : > { %s1678_s7 = sld [smem:[#allocation4 + $0x283]] }
  0x4b   : > { %s1680_s8 = sld [smem:[#allocation2 + $0x303]] }
  0x4c   : > { %s1682_s9 = sld [smem:[#allocation4 + $0x303]] }
  0x4d   : > { %s1684_s10 = sld [smem:[#allocation2 + $0x383]] }
  0x4e   : > { %s1686_s11 = sld [smem:[#allocation4 + $0x383]] }
  0x4f   : > { %s1688_s14 = sld [smem:[#allocation2 + $0x403]] }
  0x50   : > { %s1690_s4 = sld [smem:[#allocation4 + $0x403]] }
  0x51   : > { %s1692_s0 = sld [smem:[#allocation2 + $0x483]] }
  0x52   : > { %s1694_s5 = sld [smem:[#allocation4 + $0x483]] }
  0x53   : > { %s1698_s6 = sld [smem:[#allocation2 + $0x503]] }
  0x54   : > { %s1703_s21 = sld [smem:[#allocation4 + $0x503]] }
  0x55   : > { %s1709_s13 = sld [smem:[#allocation2 + $0x583]] }
  0x56   : > { %s1713_s15 = sld [smem:[#allocation4 + $0x583]] }
  0x57   : > { %s1718_s16 = sld [smem:[#allocation2 + $0x603]] }
  0x81   : > { %v852_v26 = vpop.permute.xlu2 %851 }
  0x98   : > { %v857_v9 = vpop.permute.xlu1 %856 }
  0x99   : > { %v862_v10 = vsel %vm2139_vm0, %v857_v9, 0 }
  0x9a   : > { %871 = vmatpush.bf16.xpose.msrb.mxu0 %v862_v10 }
  0xa1   : > { %1273 = vmatmul.msk.bf16.vlgmr.msrb.gmra.mxu0 %vm2139_vm0, %v852_v26  ;;  %vm467_vm0 = vcmask 64512  }
  0xa7   : > { %v337_v33 = vpop.f32.mrf.mxu0 }
  0xa8   : > { %v344_v37 = vmul.f32 %v343_v11, %v337_v33  ;;  %v352_v38 = vmul.f32 %v351_v12, %v337_v33  ;;  %v360_v39 = vmul.f32 %v359_v13, %v337_v33  ;;  %v368_v41 = vmul.f32 %v367_v15, %v337_v33  ;;  %v500_v11 = vld [vmem:[%s2158_s3] sm:$0xf] }
  0xa9   : > { %v376_v46 = vmul.f32 %v375_v16, %v337_v33  ;;  %v384_v48 = vmul.f32 %v383_v17, %v337_v33  ;;  %v392_v53 = vmul.f32 %v391_v20, %v337_v33  ;;  %v400_v56 = vmul.f32 %v399_v21, %v337_v33  ;;  %v461_v20 = vld [vmem:[%s1612_s25] sm:$0xf] }
  0xaa   : > { %v347_v44 = vadd.f32 %v346_v18, %v344_v37  ;;  %v355_v45 = vadd.f32 %v354_v19, %v352_v38  ;;  %v363_v52 = vadd.f32 %v362_v22, %v360_v39  ;;  %v371_v55 = vadd.f32 %v370_v23, %v368_v41 }
  0xab   : > { %v379_v58 = vadd.f32 %v378_v24, %v376_v46  ;;  %v408_v59 = vmul.f32 %v407_v29, %v337_v33  ;;  %v387_v63 = vadd.f32 %v386_v25, %v384_v48  ;;  %v416_v0 = vmul.f32 %v415_v30, %v337_v33 }
  0xac   : > { %v348_v51 = vsel %vm341_vm1, %v347_v44, %v337_v33  ;;  %v395_v2 = vadd.f32 %v394_v27, %v392_v53  ;;  %v424_v3 = vmul.f32 %v423_v31, %v337_v33  ;;  %v403_v6 = vadd.f32 %v402_v28, %v400_v56 }
  0xad   : > { %v356_v54 = vsel %vm349_vm2, %v355_v45, %v348_v51  ;;  %v432_v7 = vmul.f32 %v431_v32, %v337_v33  ;;  %v411_v9 = vadd.f32 %v410_v34, %v408_v59  ;;  %v440_v10 = vmul.f32 %v439_v36, %v337_v33 }
  0xae   : > { %v364_v57 = vsel %vm357_vm3, %v363_v52, %v356_v54  ;;  %v419_v13 = vadd.f32 %v418_v35, %v416_v0  ;;  %v448_v15 = vmul.f32 %v447_v47, %v337_v33  ;;  %v504_v16 = vunpack.c.l.b16 %v500_v11 }
  0xaf   : > { %v339_v61 = vpop.f32.mrf.mxu0  ;;  %v372_v62 = vsel %vm365_vm4, %v371_v55, %v364_v57  ;;  %v427_v18 = vadd.f32 %v426_v40, %v424_v3  ;;  %v456_v19 = vmul.f32 %v455_v50, %v337_v33  ;;  %v435_v22 = vadd.f32 %v434_v42, %v432_v7 }
  0xb0   : > { %v380_v1 = vsel %vm373_vm5, %v379_v58, %v372_v62  ;;  %v505_v23 = vpack.c.b16 %v504_v16, %v504_v16  ;;  %v443_v25 = vadd.f32 %v442_v43, %v440_v10  ;;  %v451_v27 = vadd.f32 %v450_v49, %v448_v15 }
  0xb1   : > { %v388_v5 = vsel %vm381_vm6, %v387_v63, %v380_v1  ;;  %v462_v28 = vunpack.c.l.bf16 %v461_v20  ;;  %v459_v30 = vadd.f32 %v458_v60, %v456_v19  ;;  %v509_v36 = vunpack.c.h.b16 %v1483_v4 }
  0xb2   : > { %v396_v8 = vsel %vm389_vm7, %v395_v2, %v388_v5  ;;  %506 = vrot.lane.b32.xlu1 %v505_v23, %s2160_s12  ;;  %v878_v39 = vstv %s1274_s18  ;;  %v881_v40 = vstv %s1660_s19  ;;  %v885_v41 = vstv %s1276_s20  ;;  %s1724_s18 = sld [smem:[#allocation4 + $0x603]] }
  0xb3   : > { %v404_v12 = vsel %vm397_vm8, %v403_v6, %v396_v8  ;;  %v510_v37 = vpack.c.b16 %v509_v36, %v509_v36  ;;  %v888_v42 = vstv %s1662_s22  ;;  %v892_v45 = vstv %s1278_s23  ;;  %s1731_s19 = sld [smem:[#allocation2 + $0x683]] }
  0xb4   : > { %v412_v17 = vsel %vm2141_vm9, %v411_v9, %v404_v12  ;;  %v895_v46 = vstv %s1664_s24  ;;  %v899_v48 = vstv %s1666_s26  ;;  %v902_v49 = vstv %s1668_s27  ;;  %s1737_s20 = sld [smem:[#allocation4 + $0x683]] }
  0xb5   : > { %v420_v21 = vsel %vm413_vm10, %v419_v13, %v412_v17  ;;  %v906_v50 = vstv %s1670_s28  ;;  %v909_v57 = vstv %s1672_s29  ;;  %v913_v58 = vstv %s1674_s30  ;;  %s1743_s22 = sld [smem:[#allocation2 + $0x703]] }
  0xb6   : > { %v428_v24 = vsel %vm421_vm11, %v427_v18, %v420_v21  ;;  %v916_v59 = vstv %s1678_s7  ;;  %v920_v2 = vstv %s1680_s8  ;;  %v923_v3 = vstv %s1682_s9  ;;  %s1748_s23 = sld [smem:[#allocation4 + $0x703]] }
  0xb7   : > { %v436_v26 = vsel %vm2140_vm12, %v435_v22, %v428_v24  ;;  %vm465_vm12 = vcmask 60416   ;;  %v927_v8 = vstv %s1684_s10  ;;  %v930_v12 = vstv %s1686_s11  ;;  %s1806_s24 = sld [smem:[#allocation2 + $0x1]] }
  0xb8   : > { %v444_v29 = vsel %vm437_vm13, %v443_v25, %v436_v26  ;;  %v934_v16 = vstv %s1688_s14  ;;  %v937_v20 = vstv %s1690_s4  ;;  %v941_v22 = vstv %s1692_s0  ;;  %s1808_s26 = sld [smem:[#allocation2 + $0x81]] }
  0xb9   : > { %v452_v31 = vsel %vm2142_vm14, %v451_v27, %v444_v29  ;;  %v944_v23 = vstv %s1694_s5  ;;  %v948_v24 = vstv %s1698_s6  ;;  %v951_v29 = vstv %s1703_s21  ;;  %s1810_s27 = sld [smem:[#allocation4 + $0x1]] }
  0xba   : > { %v460_v32 = vsel %vm2143_vm15, %v459_v30, %v452_v31  ;;  %v955_v30 = vstv %s1709_s13  ;;  %v958_v31 = vstv %s1713_s15  ;;  %s1812_s28 = sld [smem:[#allocation4 + $0x81]] }
  0xbb   : > { %v1643_v33 = vadd.f32 %v462_v28, %v460_v32  ;;  %v962_v32 = vstv %s1718_s16  ;;  %s1815_s29 = sld [smem:[#allocation2 + $0x101]] }
  0xbc   : > { %s1817_s30 = sld [smem:[#allocation4 + $0x101]] }
  0xbd   : > { %v468_v34 = vsel %vm467_vm0, %v1643_v33, -inf  ;;  %v464_v35 = vpack.c.bf16 %v1643_v33, %v1643_v33  ;;  %s1819_s7 = sld [smem:[#allocation2 + $0x181]] }
  0xbe   : > { %469 = vmax.xlane.f32.xlu0 %v468_v34  ;;  %s1821_s8 = sld [smem:[#allocation4 + $0x181]] }
  0xbf   : > { %466 = vst.msk [vmem:[%s1650_s17] sm:$0xf] %vm465_vm12, %v464_v35  ;;  %s1823_s9 = sld [smem:[#allocation2 + $0x201]] }
  0xc0   : > { %s1825_s10 = sld [smem:[#allocation4 + $0x201]] }
  0xc1   : > { %s1827_s11 = sld [smem:[#allocation2 + $0x281]] }
  0xc2   : > { %s1829_s14 = sld [smem:[#allocation4 + $0x281]] }
  0xc3   : > { %s1831_s4 = sld [smem:[#allocation2 + $0x301]] }
  0xc4   : > { %s1833_s0 = sld [smem:[#allocation4 + $0x301]] }
  0xc5   : > { %s1835_s5 = sld [smem:[#allocation2 + $0x381]] }
  0xc6   : > { %s1837_s6 = sld [smem:[#allocation4 + $0x381]] }
  0xc7   : > { %s1839_s21 = sld [smem:[#allocation2 + $0x401]] }
  0xc8   : > { %s1842_s13 = sld [smem:[#allocation4 + $0x401]] }
  0xc9   : > { %s1844_s15 = sld [smem:[#allocation2 + $0x481]] }
  0xca   : > { %s1846_s16 = sld [smem:[#allocation4 + $0x481]] }
  0xd2   : > { %511 = vrot.lane.b32.xlu0 %v510_v37, %s2160_s12 }
 0x11e   : > { %v1676_v4 = vpop.f32.mrf.mxu0 }
 0x11f   : > { %v879_v43 = vmul.f32 %v878_v39, %v1676_v4  ;;  %v886_v44 = vmul.f32 %v885_v41, %v1676_v4  ;;  %v893_v47 = vmul.f32 %v892_v45, %v1676_v4  ;;  %v900_v53 = vmul.f32 %v899_v48, %v1676_v4 }
 0x120   : > { %v907_v54 = vmul.f32 %v906_v50, %v1676_v4  ;;  %v914_v1 = vmul.f32 %v913_v58, %v1676_v4  ;;  %v921_v7 = vmul.f32 %v920_v2, %v1676_v4  ;;  %v928_v11 = vmul.f32 %v927_v8, %v1676_v4  ;;  %v681_v2 = vld [vmem:[%s2158_s3 + $0xc] sm:$0xf] }
 0x121   : > { %v882_v51 = vadd.f32 %v881_v40, %v879_v43  ;;  %v889_v52 = vadd.f32 %v888_v42, %v886_v44  ;;  %v896_v56 = vadd.f32 %v895_v46, %v893_v47  ;;  %v903_v62 = vadd.f32 %v902_v49, %v900_v53  ;;  %v1304_v46 = vld [vmem:[%s1612_s25 + $0xc] sm:$0xf] }
 0x122   : > { %v910_v63 = vadd.f32 %v909_v57, %v907_v54  ;;  %v917_v10 = vadd.f32 %v916_v59, %v914_v1  ;;  %v924_v15 = vadd.f32 %v923_v3, %v921_v7  ;;  %v931_v18 = vadd.f32 %v930_v12, %v928_v11 }
 0x123   : > { %v883_v61 = vsel %vm341_vm1, %v882_v51, %v1676_v4  ;;  %v935_v19 = vmul.f32 %v934_v16, %v1676_v4  ;;  %v942_v27 = vmul.f32 %v941_v22, %v1676_v4  ;;  %v949_v28 = vmul.f32 %v948_v24, %v1676_v4 }
 0x124   : > { %v890_v0 = vsel %vm349_vm2, %v889_v52, %v883_v61  ;;  %v956_v36 = vmul.f32 %v955_v30, %v1676_v4  ;;  %v965_v39 = vstv %s1724_s18  ;;  %v969_v40 = vstv %s1731_s19  ;;  %s1852_s18 = sld [smem:[#allocation2 + $0x501]] }
 0x125   : > { %v897_v6 = vsel %vm357_vm3, %v896_v56, %v890_v0  ;;  %v938_v26 = vadd.f32 %v937_v20, %v935_v19  ;;  %v945_v34 = vadd.f32 %v944_v23, %v942_v27  ;;  %v952_v35 = vadd.f32 %v951_v29, %v949_v28  ;;  %v320_v0 = vld [vmem:[%s2158_s3 + $0x10] sm:$0xf]  ;;  %s1858_s19 = sld [smem:[#allocation4 + $0x501]] }
 0x126   : > { %v875_v38 = vpop.f32.mrf.mxu0  ;;  %v904_v9 = vsel %vm365_vm4, %v903_v62, %v897_v6  ;;  %v972_v41 = vstv %s1737_s20  ;;  %v959_v44 = vadd.f32 %v958_v31, %v956_v36  ;;  %v970_v45 = vmul.f32 %v969_v40, %v1676_v4  ;;  %s1864_s20 = sld [smem:[#allocation2 + $0x581]] }
 0x127   : > { %v911_v13 = vsel %vm373_vm5, %v910_v63, %v904_v9  ;;  %v963_v38 = vmul.f32 %v962_v32, %v1676_v4  ;;  %v976_v49 = vstv %s1743_s22  ;;  %v979_v50 = vstv %s1748_s23  ;;  %v507_v63 = vpop.permute.xlu1 %506  ;;  %v680_v9 = vld [vmem:[%s2158_s3 + $0x4] sm:$0xf]  ;;  %s1873_s22 = sld [smem:[#allocation2 + $0x601]] }
 0x128   : > { %v918_v17 = vsel %vm381_vm6, %v917_v10, %v911_v13  ;;  %v973_v52 = vadd.f32 %v972_v41, %v970_v45  ;;  %v977_v53 = vmul.f32 %v976_v49, %v1676_v4  ;;  %v533_v11 = vstv %s1806_s24  ;;  %s1879_s23 = sld [smem:[#allocation2 + $0x681]] }
 0x129   : > { %v925_v21 = vsel %vm389_vm7, %v924_v15, %v918_v17  ;;  %v966_v48 = vadd.f32 %v965_v39, %v963_v38  ;;  %v536_v12 = vstv %s1810_s27  ;;  %v540_v13 = vstv %s1808_s26  ;;  %s1885_s24 = sld [smem:[#allocation2 + $0x701]] }
 0x12a   : > { %v932_v25 = vsel %vm397_vm8, %v931_v18, %v925_v21  ;;  %v980_v57 = vadd.f32 %v979_v50, %v977_v53  ;;  %v543_v15 = vstv %s1812_s28  ;;  %v547_v16 = vstv %s1815_s29  ;;  %s1889_s26 = sld [smem:[#allocation4 + $0x581]] }
 0x12b   : > { %v550_v17 = vstv %s1817_s30  ;;  %v554_v18 = vstv %s1819_s7  ;;  %v557_v19 = vstv %s1821_s8  ;;  %v561_v20 = vstv %s1823_s9  ;;  %s1895_s27 = sld [smem:[#allocation4 + $0x601]] }
 0x12c   : > { %v564_v23 = vstv %s1825_s10  ;;  %v568_v24 = vstv %s1827_s11  ;;  %v575_v29 = vstv %s1831_s4  ;;  %v578_v31 = vstv %s1833_s0  ;;  %s1902_s28 = sld [smem:[#allocation4 + $0x681]] }
 0x12d   : > { %v582_v32 = vstv %s1835_s5  ;;  %v592_v39 = vstv %s1842_s13  ;;  %v596_v40 = vstv %s1844_s15  ;;  %v599_v41 = vstv %s1846_s16  ;;  %s1908_s29 = sld [smem:[#allocation4 + $0x701]] }
 0x12e   : > { %v603_v45 = vstv %s1852_s18  ;;  %v606_v49 = vstv %s1858_s19  ;;  %v610_v53 = vstv %s1864_s20  ;;  %s1977_s30 = sld [smem:[#allocation2 + $0x82]] }
 0x12f   : > { %s1979_s7 = sld [smem:[#allocation4 + $0x2]] }
 0x130   : > { %s1981_s8 = sld [smem:[#allocation4 + $0x82]] }
 0x131   : > { %v470_v55 = vpop.xlane.xlu0 %469  ;;  %s1983_s9 = sld [smem:[#allocation2 + $0x102]] }
 0x132   : > { %v471_v60 = vsub.f32 %v1643_v33, %v470_v55  ;;  %v939_v33 = vsel %vm2141_vm9, %v938_v26, %v932_v25  ;;  %vm2162_vm9 = vcmp.eq.s32.totalorder %v1551_v14, 11  ;;  %v984_v55 = vunpack.c.l.bf16 %v1304_v46  ;;  %s1985_s10 = sld [smem:[#allocation4 + $0x102]] }
 0x133   : > { %v946_v43 = vsel %vm413_vm10, %v945_v34, %v939_v33  ;;  %v571_v25 = vstv %s1829_s14  ;;  %v585_v33 = vstv %s1837_s6  ;;  %s1987_s11 = sld [smem:[#allocation2 + $0x182]] }
 0x134   : > { %v472_v5 = vmul.f32 1.442695, %v471_v60  ;;  %v953_v47 = vsel %vm421_vm11, %v952_v35, %v946_v43  ;;  %s1989_s14 = sld [smem:[#allocation4 + $0x182]] }
 0x135   : > { %v960_v51 = vsel %vm2162_vm9, %v959_v44, %v953_v47  ;;  %vm2163_vm9 = vcmask 523264   ;;  %s1991_s4 = sld [smem:[#allocation2 + $0x202]] }
 0x136   : > { %1350 = vpow2.f32 %v472_v5  ;;  %v967_v54 = vsel %vm437_vm13, %v966_v48, %v960_v51  ;;  %v687_v3 = vsel %vm2163_vm9, %v681_v2, 0  ;;  %v631_v2 = vstv %s1885_s24  ;;  %s1995_s0 = sld [smem:[#allocation4 + $0x202]] }
 0x137   : > { %v974_v56 = vsel %vm2142_vm14, %v973_v52, %v967_v54  ;;  %vm2164_vm14 = vmmov %vm2163_vm9  ;;  %s1997_s5 = sld [smem:[#allocation2 + $0x282]] }
 0x138   : > { %v981_v58 = vsel %vm2143_vm15, %v980_v57, %v974_v56  ;;  %vm2144_vm15 = vcmask 1043456   ;;  %s1999_s6 = sld [smem:[#allocation4 + $0x282]] }
 0x139   : > { %v1792_v60 = vadd.f32 %v984_v55, %v981_v58  ;;  %v485_v1 = vsel %vm2144_vm15, %v320_v0, 0  ;;  %v617_v58 = vstv %s1873_s22  ;;  %vm2169_vm15 = vcmp.eq.s32.totalorder %v1551_v14, 14  ;;  %s2003_s13 = sld [smem:[#allocation4 + $0x302]] }
 0x13a   : > { %494 = vmatpush.bf16.msra.mxu1 %v485_v1  ;;  %s2005_s15 = sld [smem:[#allocation2 + $0x382]] }
 0x13b   : > { %v989_v4 = vsel %vm467_vm0, %v1792_v60, -inf  ;;  %v986_v62 = vpack.c.bf16 %v1792_v60, %v1792_v60  ;;  %s2007_s16 = sld [smem:[#allocation4 + $0x382]] }
 0x13c   : > { %v1351_v37 = vpop.eup %1350  ;;  %990 = vmax.xlane.f32.xlu0 %v989_v4  ;;  %s2009_s18 = sld [smem:[#allocation2 + $0x402]] }
 0x13d   : > { %v474_v42 = vsel %vm467_vm0, %v1351_v37, 0.0  ;;  %1305 = vst.msk [vmem:[%s1650_s17 + $0xc] sm:$0xf] %vm465_vm12, %v986_v62  ;;  %v624_v62 = vstv %s1879_s23  ;;  %s2011_s19 = sld [smem:[#allocation2 + $0x482]] }
 0x13e   : > { %475 = vadd.xlane.f32.xlu2 %v474_v42  ;;  %696 = vmatpush.bf16.xpose.msrb.mxu1 %v687_v3  ;;  %s2013_s20 = sld [smem:[#allocation4 + $0x402]] }
 0x13f   : > { %s2015_s22 = sld [smem:[#allocation2 + $0x502]] }
 0x140   : > { %s2017_s23 = sld [smem:[#allocation4 + $0x482]] }
 0x141   : > { %s2021_s24 = sld [smem:[#allocation2 + $0x582]] }
 0x144   : > { %v512_v59 = vpop.permute.xlu0 %511 }
 0x145   : > { %v517_v61 = vsel %vm2163_vm9, %v512_v59, 0 }
 0x146   : > { %526 = vmatpush.bf16.xpose.msra.mxu2 %v517_v61 }
 0x14d   : > { %1205 = vmatmul.msk.bf16.vlgmr.msra.gmra.mxu2 %vm2164_vm14, %v507_v63  ;;  %vm2165_vm14 = vmmov %vm2163_vm9  ;;  %vm2166_vm9 = vcmp.eq.s32.totalorder %v1551_v14, 8 }
 0x1af   : > { %v1849_v10 = vpop.xlane.xlu0 %990 }
 0x1b0   : > { %v992_v21 = vsub.f32 %v1792_v60, %v1849_v10 }
 0x1b1   : > { %v476_v5 = vpop.xlane.xlu2 %475 }
 0x1b2   : > { %1352 = vrcp.f32 %v476_v5 }
 0x1b8   : > { %v1353_v6 = vpop.eup %1352 }
 0x1b9   : > { %v478_v7 = vmul.f32 %v1353_v6, %v1351_v37  ;;  %v589_v37 = vstv %s1839_s21  ;;  %v613_v6 = vstv %s1889_s26  ;;  %s2001_s21 = sld [smem:[#allocation2 + $0x302]] }
 0x1ba   : > { %s2027_s26 = sld [smem:[#allocation4 + $0x502]] }
 0x1bb   : > { %v479_v8 = vpack.c.bf16 %v478_v7, %v478_v7 }
 0x1bd   : > { %1204 = vmatmul.msk.bf16.vlgmr.msra.gmra.mxu1 %vm467_vm0, %v479_v8 }
 0x1cd   : > { %1239 = vmatmul.msk.bf16.vlgmr.msrb.gmra.mxu1 %vm2165_vm14, %v680_v9  ;;  %vm2167_vm14 = vcmp.eq.s32.totalorder %v1551_v14, 11 }
 0x1d0   : > { %v1868_v22 = vpop.f32.mrf.mxu2 }
 0x1d1   : > { %v534_v26 = vmul.f32 %v533_v11, %v1868_v22  ;;  %v541_v27 = vmul.f32 %v540_v13, %v1868_v22  ;;  %v548_v28 = vmul.f32 %v547_v16, %v1868_v22  ;;  %v555_v30 = vmul.f32 %v554_v18, %v1868_v22  ;;  %v1939_v18 = vld [vmem:[%s1612_s25 + $0x4] sm:$0xff]   ;;  %s1975_s25 = sld [smem:[#allocation2 + $0x2]] }
 0x1d2   : > { %v562_v36 = vmul.f32 %v561_v20, %v1868_v22  ;;  %v569_v38 = vmul.f32 %v568_v24, %v1868_v22  ;;  %v576_v44 = vmul.f32 %v575_v29, %v1868_v22  ;;  %v583_v48 = vmul.f32 %v582_v32, %v1868_v22 }
 0x1d3   : > { %v537_v34 = vadd.f32 %v536_v12, %v534_v26  ;;  %v544_v35 = vadd.f32 %v543_v15, %v541_v27  ;;  %v551_v43 = vadd.f32 %v550_v17, %v548_v28  ;;  %v558_v47 = vadd.f32 %v557_v19, %v555_v30 }
 0x1d4   : > { %v565_v51 = vadd.f32 %v564_v23, %v562_v36  ;;  %v590_v52 = vmul.f32 %v589_v37, %v1868_v22  ;;  %v572_v56 = vadd.f32 %v571_v25, %v569_v38  ;;  %v597_v57 = vmul.f32 %v596_v40, %v1868_v22 }
 0x1d5   : > { %v538_v42 = vsel %vm341_vm1, %v537_v34, %v1868_v22  ;;  %v579_v61 = vadd.f32 %v578_v31, %v576_v44  ;;  %v604_v4 = vmul.f32 %v603_v45, %v1868_v22  ;;  %v586_v0 = vadd.f32 %v585_v33, %v583_v48 }
 0x1d6   : > { %v545_v46 = vsel %vm349_vm2, %v544_v35, %v538_v42  ;;  %v611_v1 = vmul.f32 %v610_v53, %v1868_v22  ;;  %v593_v5 = vadd.f32 %v592_v39, %v590_v52  ;;  %v618_v7 = vmul.f32 %v617_v58, %v1868_v22  ;;  %v1971_v35 = vld [vmem:[%s2158_s3 + $0x10] sm:$0xff]  }
 0x1d7   : > { %v552_v50 = vsel %vm357_vm3, %v551_v43, %v545_v46  ;;  %v600_v9 = vadd.f32 %v599_v41, %v597_v57  ;;  %v620_v11 = vstv %s1895_s27  ;;  %v625_v12 = vmul.f32 %v624_v62, %v1868_v22  ;;  %s2033_s27 = sld [smem:[#allocation2 + $0x602]] }
 0x1d8   : > { %v530_v54 = vpop.f32.mrf.mxu2  ;;  %v559_v55 = vsel %vm365_vm4, %v558_v47, %v552_v50  ;;  %v607_v15 = vadd.f32 %v606_v49, %v604_v4  ;;  %v627_v16 = vstv %s1902_s28  ;;  %v632_v17 = vmul.f32 %v631_v2, %v1868_v22  ;;  %s2039_s28 = sld [smem:[#allocation2 + $0x682]] }
 0x1d9   : > { %v566_v59 = vsel %vm373_vm5, %v565_v51, %v559_v55  ;;  %v614_v20 = vadd.f32 %v613_v6, %v611_v1  ;;  %v634_v23 = vstv %s1908_s29  ;;  %v621_v25 = vadd.f32 %v620_v11, %v618_v7  ;;  %s2045_s29 = sld [smem:[#allocation2 + $0x702]] }
 0x1da   : > { %v573_v63 = vsel %vm381_vm6, %v572_v56, %v566_v59  ;;  %v628_v27 = vadd.f32 %v627_v16, %v625_v12  ;;  %v639_v28 = vunpack.c.l.bf16 %v1939_v18  ;;  %v993_v22 = vmul.f32 1.442695, %v992_v21 }
 0x1db   : > { %v580_v3 = vsel %vm389_vm7, %v579_v61, %v573_v63  ;;  %v635_v30 = vadd.f32 %v634_v23, %v632_v17  ;;  %v1002_v36 = vunpack.c.h.b16 %v1971_v35  ;;  %v703_v40 = vstv %s1975_s25  ;;  %s2047_s25 = sld [smem:[#allocation4 + $0x582]] }
 0x1dc   : > { %v587_v8 = vsel %vm397_vm8, %v586_v0, %v580_v3  ;;  %1354 = vpow2.f32 %v993_v22  ;;  %v710_v41 = vstv %s1977_s30  ;;  %v706_v42 = vstv %s1979_s7  ;;  %s2051_s30 = sld [smem:[#allocation4 + $0x602]] }
 0x1dd   : > { %v594_v13 = vsel %vm2166_vm9, %v593_v5, %v587_v8  ;;  %vm2168_vm9 = vcmp.eq.s32.totalorder %v1551_v14, 13  ;;  %v1003_v37 = vpack.c.b16 %v1002_v36, %v1002_v36  ;;  %v713_v43 = vstv %s1981_s8  ;;  %s2053_s7 = sld [smem:[#allocation4 + $0x682]] }
 0x1de   : > { %v601_v19 = vsel %vm413_vm10, %v600_v9, %v594_v13  ;;  %v717_v44 = vstv %s1983_s9  ;;  %v724_v45 = vstv %s1987_s11  ;;  %v720_v46 = vstv %s1985_s10  ;;  %s2057_s8 = sld [smem:[#allocation4 + $0x702]] }
 0x1df   : > { %v608_v24 = vsel %vm421_vm11, %v607_v15, %v601_v19  ;;  %v727_v47 = vstv %s1989_s14  ;;  %v731_v48 = vstv %s1991_s4  ;;  %v738_v49 = vstv %s1997_s5  ;;  %s2177_s10 = sld [smem:[#allocation15_spill]] }
 0x1e0   : > { %v615_v26 = vsel %vm2167_vm14, %v614_v20, %v608_v24  ;;  %v734_v50 = vstv %s1995_s0  ;;  %v741_v51 = vstv %s1999_s6  ;;  %v745_v52 = vstv %s2001_s21 }
 0x1e1   : > { %v622_v29 = vsel %vm437_vm13, %v621_v25, %v615_v26  ;;  %v752_v53 = vstv %s2005_s15  ;;  %v748_v55 = vstv %s2003_s13  ;;  %v755_v56 = vstv %s2007_s16 }
 0x1e2   : > { %v629_v31 = vsel %vm2168_vm9, %v628_v27, %v622_v29  ;;  %v1966_v10 = vpop.eup %1354  ;;  %v759_v57 = vstv %s2009_s18  ;;  %v766_v58 = vstv %s2011_s19  ;;  %v762_v1 = vstv %s2013_s20 }
 0x1e3   : > { %v636_v32 = vsel %vm2169_vm15, %v635_v30, %v629_v31  ;;  %v995_v21 = vsel %vm467_vm0, %v1966_v10, 0.0  ;;  %v773_v2 = vstv %s2015_s22  ;;  %v769_v11 = vstv %s2017_s23 }
 0x1e4   : > { %v1958_v33 = vadd.f32 %v639_v28, %v636_v32  ;;  %v780_v12 = vstv %s2021_s24  ;;  %v776_v17 = vstv %s2027_s26  ;;  %v787_v24 = vstv %s2033_s27 }
 0x1e5   : > { %v794_v28 = vstv %s2039_s28  ;;  %v801_v32 = vstv %s2045_s29 }
 0x1e6   : > { %v644_v34 = vsel %vm467_vm0, %v1958_v33, -inf  ;;  %v641_v60 = vpack.c.bf16 %v1958_v33, %v1958_v33 }
 0x1e7   : > { %645 = vmax.xlane.f32.xlu1 %v644_v34 }
 0x1e8   : > { %1237 = vst.msk [vmem:[%s1650_s17 + $0x4] sm:$0xf] %vm465_vm12, %v641_v60 }
 0x1ef   : > { %996 = vadd.xlane.f32.xlu1 %v995_v21  ;;  %v783_v21 = vstv %s2047_s25 }
 0x208   : > { %1004 = vrot.lane.b32.xlu1 %v1003_v37, %s2160_s12 }
 0x23a   : > { %v1993_v38 = vpop.f32.mrf.mxu1 }
 0x242   : > { %v498_v39 = vpop.f32.mrf.mxu1 }
 0x24a   : > { %v698_v54 = vpop.f32.mrf.mxu1 }
 0x24b   : > { %v704_v59 = vmul.f32 %v703_v40, %v698_v54  ;;  %v711_v61 = vmul.f32 %v710_v41, %v698_v54  ;;  %v718_v4 = vmul.f32 %v717_v44, %v698_v54  ;;  %v725_v62 = vmul.f32 %v724_v45, %v698_v54 }
 0x24c   : > { %v732_v63 = vmul.f32 %v731_v48, %v698_v54  ;;  %v739_v0 = vmul.f32 %v738_v49, %v698_v54  ;;  %v746_v7 = vmul.f32 %v745_v52, %v698_v54  ;;  %v753_v9 = vmul.f32 %v752_v53, %v698_v54 }
 0x24d   : > { %v707_v3 = vadd.f32 %v706_v42, %v704_v59  ;;  %v714_v5 = vadd.f32 %v713_v43, %v711_v61  ;;  %v721_v6 = vadd.f32 %v720_v46, %v718_v4  ;;  %v728_v8 = vadd.f32 %v727_v47, %v725_v62 }
 0x24e   : > { %v735_v15 = vadd.f32 %v734_v50, %v732_v63  ;;  %v760_v16 = vmul.f32 %v759_v57, %v698_v54  ;;  %v742_v20 = vadd.f32 %v741_v51, %v739_v0  ;;  %v767_v23 = vmul.f32 %v766_v58, %v698_v54 }
 0x24f   : > { %v708_v13 = vsel %vm341_vm1, %v707_v3, %v698_v54  ;;  %v749_v26 = vadd.f32 %v748_v55, %v746_v7  ;;  %v774_v27 = vmul.f32 %v773_v2, %v698_v54  ;;  %v756_v30 = vadd.f32 %v755_v56, %v753_v9 }
 0x250   : > { %v715_v19 = vsel %vm349_vm2, %v714_v5, %v708_v13  ;;  %v781_v31 = vmul.f32 %v780_v12, %v698_v54  ;;  %v763_v60 = vadd.f32 %v762_v1, %v760_v16  ;;  %v788_v36 = vmul.f32 %v787_v24, %v698_v54  ;;  %vm2171_vm2 = vmmov %vm2167_vm14 }
 0x251   : > { %v722_v25 = vsel %vm357_vm3, %v721_v6, %v715_v19  ;;  %v770_v39 = vadd.f32 %v769_v11, %v767_v23  ;;  %v790_v40 = vstv %s2051_s30  ;;  %v795_v41 = vmul.f32 %v794_v28, %v698_v54  ;;  %vm2172_vm3 = vmmov %vm2168_vm9  ;;  %v682_v19 = vld [vmem:[%s2158_s3 + $0x14] sm:$0xf]  ;;  %s1310_s3 = sshll.u32 %s2157_s2, 3 }
 0x252   : > { %v700_v22 = vpop.f32.mrf.mxu1  ;;  %v729_v29 = vsel %vm365_vm4, %v728_v8, %v722_v25  ;;  %v777_v43 = vadd.f32 %v776_v17, %v774_v27  ;;  %v797_v44 = vstv %s2053_s7  ;;  %v802_v45 = vmul.f32 %v801_v32, %v698_v54  ;;  %vm2173_vm4 = vmmov %vm2169_vm15  ;;  %s310_s11 = scalar_lea.vmem %s2177_s10, %s1310_s3 }
 0x253   : > { %v736_v34 = vsel %vm373_vm5, %v735_v15, %v729_v29  ;;  %v784_v47 = vadd.f32 %v783_v21, %v781_v31  ;;  %v804_v48 = vstv %s2057_s8  ;;  %vm2170_vm1 = vcmp.eq.s32.totalorder %v1551_v14, 8 }
 0x254   : > { %v743_v37 = vsel %vm381_vm6, %v742_v20, %v736_v34  ;;  %v791_v50 = vadd.f32 %v790_v40, %v788_v36  ;;  %v798_v52 = vadd.f32 %v797_v44, %v795_v41  ;;  %v805_v55 = vadd.f32 %v804_v48, %v802_v45 }
 0x255   : > { %v750_v42 = vsel %vm389_vm7, %v749_v26, %v743_v37  ;;  %v809_v57 = vunpack.c.h.bf16 %v1939_v18  ;;  %vm2174_vm5 = vcmask 1043456   ;;  %v657_v8 = vunpack.c.l.b16 %v1971_v35 }
 0x256   : > { %v757_v46 = vsel %vm397_vm8, %v756_v30, %v750_v42  ;;  %vm2175_vm6 = vmmov %vm2174_vm5  ;;  %vm2178_vm8 = vcmask 523264  }
 0x257   : > { %v764_v49 = vsel %vm2170_vm1, %v763_v60, %v757_v46  ;;  %v658_v9 = vpack.c.b16 %v657_v8, %v657_v8  ;;  %vm2176_vm7 = vmmov %vm2174_vm5 }
 0x258   : > { %v771_v51 = vsel %vm413_vm10, %v770_v39, %v764_v49  ;;  %v830_v23 = vsel %vm2176_vm7, %v682_v19, 0  ;;  %vm2179_vm10 = vmmov %vm2178_vm8 }
 0x259   : > { %v778_v53 = vsel %vm421_vm11, %v777_v43, %v771_v51 }
 0x25a   : > { %v646_v56 = vpop.xlane.xlu1 %645  ;;  %v785_v54 = vsel %vm2171_vm2, %v784_v47, %v778_v53 }
 0x25b   : > { %v647_v58 = vsub.f32 %v1958_v33, %v646_v56  ;;  %v792_v59 = vsel %vm437_vm13, %v791_v50, %v785_v54 }
 0x25c   : > { %v799_v61 = vsel %vm2172_vm3, %v798_v52, %v792_v59 }
 0x25d   : > { %v648_v4 = vmul.f32 1.442695, %v647_v58  ;;  %v806_v62 = vsel %vm2173_vm4, %v805_v55, %v799_v61 }
 0x25e   : > { %v810_v63 = vadd.f32 %v809_v57, %v806_v62 }
 0x25f   : > { %1356 = vpow2.f32 %v648_v4 }
 0x260   : > { %v811_v0 = vpack.c.bf16 %v810_v63, %v810_v63  ;;  %v814_v2 = vsel %vm467_vm0, %v810_v63, -inf }
 0x262   : > { %1271 = vst.msk [vmem:[%s1650_s17 + $0x8] sm:$0xf] %vm465_vm12, %v811_v0  ;;  %v997_v33 = vpop.xlane.xlu1 %996 }
 0x263   : > { %1358 = vrcp.f32 %v997_v33 }
 0x265   : > { %v1357_v1 = vpop.eup %1356 }
 0x266   : > { %v650_v18 = vsel %vm467_vm0, %v1357_v1, 0.0 }
 0x267   : > { %651 = vadd.xlane.f32.xlu2 %v650_v18 }
 0x269   : > { %v1359_v3 = vpop.eup %1358 }
 0x26a   : > { %v999_v5 = vmul.f32 %v1359_v3, %v1966_v10 }
 0x26c   : > { %v1000_v7 = vpack.c.bf16 %v999_v5, %v999_v5 }
 0x26f   : > { %815 = vmax.xlane.f32.xlu2 %v814_v2 }
 0x27a   : > { %v1005_v6 = vpop.permute.xlu1 %1004 }
 0x27b   : > { %v1010_v14 = vsel %vm2174_vm5, %v1005_v6, 0 }
 0x27c   : > { %1019 = vmatpush.bf16.msrb.mxu2 %v1010_v14 }
 0x27f   : > { %1306 = vmatmul.msk.bf16.vlgmr.msrb.gmra.mxu2 %vm467_vm0, %v1000_v7 }
 0x287   : > { %659 = vrot.lane.b32.xlu2 %v658_v9, %s2160_s12 }
 0x2da   : > { %v652_v11 = vpop.xlane.xlu2 %651 }
 0x2db   : > { %1360 = vrcp.f32 %v652_v11 }
 0x2e1   : > { %v1361_v16 = vpop.eup %1360 }
 0x2e2   : > { %v816_v12 = vpop.xlane.xlu2 %815  ;;  %v654_v10 = vmul.f32 %v1361_v16, %v1357_v1 }
 0x2e3   : > { %v817_v13 = vsub.f32 %v810_v63, %v816_v12 }
 0x2e4   : > { %v655_v35 = vpack.c.bf16 %v654_v10, %v654_v10 }
 0x2e5   : > { %v818_v15 = vmul.f32 1.442695, %v817_v13 }
 0x2e7   : > { %1362 = vpow2.f32 %v818_v15 }
 0x2ea   : > { %v660_v17 = vpop.permute.xlu2 %659 }
 0x2eb   : > { %v665_v20 = vsel %vm2175_vm6, %v660_v17, 0 }
 0x2ec   : > { %674 = vmatpush.bf16.msra.mxu3 %v665_v20 }
 0x2ed   : > { %v1363_v24 = vpop.eup %1362 }
 0x2ee   : > { %v820_v25 = vsel %vm467_vm0, %v1363_v24, 0.0 }
 0x2ef   : > { %1238 = vmatmul.msk.bf16.vlgmr.msra.gmra.mxu3 %vm467_vm0, %v655_v35  ;;  %821 = vadd.xlane.f32.xlu0 %v820_v25 }
 0x2f0   : > { %839 = vmatpush.bf16.msrb.mxu3 %v830_v23 }
 0x302   : > { %v1021_v26 = vpop.f32.mrf.mxu2 }
 0x30a   : > { %v1023_v27 = vpop.f32.mrf.mxu2 }
 0x362   : > { %v822_v28 = vpop.xlane.xlu0 %821 }
 0x363   : > { %1364 = vrcp.f32 %v822_v28 }
 0x369   : > { %v1365_v22 = vpop.eup %1364 }
 0x36a   : > { %v824_v29 = vmul.f32 %v1365_v22, %v1363_v24 }
 0x36c   : > { %v825_v30 = vpack.c.bf16 %v824_v29, %v824_v29 }
 0x36e   : > { %1272 = vmatmul.msk.bf16.vlgmr.msrb.gmra.mxu3 %vm467_vm0, %v825_v30 }
 0x372   : > { %v676_v31 = vpop.f32.mrf.mxu3 }
 0x373   : > { %v1345_v32 = vpack.i.bf16 %v1021_v26, %v676_v31 }
 0x375   : > { %1346 = vrot.lane.b32.xlu0 %v1345_v32, %s2160_s12 }
 0x37a   : > { %v678_v34 = vpop.f32.mrf.mxu3 }
 0x3e7   : > { %v1347_v60 = vpop.permute.xlu0 %1346 }
 0x3e8   : > { %v1348_v21 = vunpack.i.l.bf16 %v1347_v60  ;;  %v1349_v36 = vunpack.i.h.bf16 %v1347_v60 }
 0x3ea   : > { %v1033_v39 = vsel %vm2178_vm8, %v1993_v38, %v1348_v21 }
 0x3f1   : > { %v841_v37 = vpop.f32.mrf.mxu3 }
 0x3f2   : > { %v1034_v40 = vsel %vm2179_vm10, %v841_v37, %v1349_v36 }
 0x3f3   : > { %v1035_v41 = vpack.c.bf16 %v1034_v40, %v1033_v39 }
 0x3f5   : > { %1036 = vst [vmem:[%s310_s11] sm:$0xff] %v1035_v41 }
 0x3f9   : > { %v843_v42 = vpop.f32.mrf.mxu3 }
 0x3fa PF: > { %s2180_s12 = sld [smem:[#allocation8_spill]] }
 0x400   : > { %s19_s21 = sadd.s32 1, %s2180_s12  }
 0x401   : > { %p16_p7 = scmp.ge.s32.totalorder %s19_s21, 4  }
 0x403   :  { %18 = sbr.rel (!%p16_p7) target bundleno = 9 (0x9), region = 100 }
 0x408   :  { %1074 = vsyncpa [#allocation3], 1 }
 0x409   :  { %1076 = vsyncpa [#allocation3 + $0x1], 1 }
 0x40a   :  { %1077 = vsyncpa [#allocation5], 1 }

// kernel: kgpdplam_forward.27
= control target key start
LH: loop header
LB: loop body
LE: loop exit
PB: predicated region body
PF: predicated region fallthrough
CT: control target
= control target key end

     0   :  { %s651_s0 = inlined_call_operand.vmem [shape: bf16[2,8,64], index: 0, kind: input, shape index: {}]   ;;  %s652_s1 = inlined_call_operand.vmem [shape: f32[64,6], index: 1, kind: input, shape index: {}]   ;;  %s653_s2 = inlined_call_operand.vmem [shape: f32[1,6], index: 2, kind: input, shape index: {}]   ;;  %s654_s3 = inlined_call_operand.vmem [shape: f32[64,1], index: 3, kind: input, shape index: {}]   ;;  %s655_s4 = inlined_call_operand.<no memory space> [shape: f32[1,1], index: 4, kind: input, shape index: {}]   ;;  %s656_s5 = inlined_call_operand.hbm [shape: f32[2,1,64], index: 5, kind: output, shape index: {0}]   ;;  %s657_s6 = inlined_call_operand.vmem [shape: f32[2,6,1], index: 6, kind: output, shape index: {1}]   ;;  %s658_s7 = inlined_call_operand.vmem [shape: f32[2,8,6], index: 7, kind: output, shape index: {2}]  }
   0x1   :  { %v13_v0 = vstv %s655_s4 }
   0x2   :  { %14 = vst [vmem:[#allocation2] sm:$0x1] %v13_v0 }
   0x3   :  { %v128_v1 = vld [vmem:[%s652_s1 + $0x38] sm:$0xff]  ;;  %v127_v2 = vld [vmem:[%s652_s1 + $0x30] sm:$0xff]  ;;  %v126_v3 = vld [vmem:[%s652_s1 + $0x28] sm:$0xff] }
   0x4   :  { %147 = vmatpush.msra.mxu0 %v128_v1  ;;  %v445_v4 = vld [vmem:[%s651_s0] sm:$0xff]  }
   0x5   :  { %v558_v5 = vunpack.c.h.bf16 %v445_v4  ;;  %v125_v6 = vld [vmem:[%s652_s1 + $0x20] sm:$0xff]  ;;  %v563_v7 = vunpack.c.l.bf16 %v445_v4 }
   0x6   :  { %148 = vmatpush.msra.mxu0 %v127_v2 }
   0x7   :  { %15 = vsyncpa [#allocation4], 0  ;;  %309 = vmatpush.msra.mxu2 %v558_v5  ;;  %v124_v8 = vld [vmem:[%s652_s1 + $0x18] sm:$0xff]  ;;  %254 = vmatpush.msra.mxu1 %v563_v7  ;;  %v123_v9 = vld [vmem:[%s652_s1 + $0x10] sm:$0xff]  ;;  %vm30_vm0 = vcmask 523264   ;;  %vm162_vm1 = vcmask 48128  }
   0x8   :  { %149 = vmatpush.msra.mxu0 %v126_v3  ;;  %v122_v10 = vld [vmem:[%s652_s1 + $0x8] sm:$0xff]  ;;  %v121_v11 = vld [vmem:[%s652_s1] sm:$0xff]  ;;  %v31_v55 = vsel %vm30_vm0, %v563_v7, 0.0  ;;  %v38_v56 = vsel %vm30_vm0, %v558_v5, 0.0  ;;  %v321_v61 = vld [vmem:[%s654_s3 + $0x38] sm:$0xff]  ;;  %v499_v63 = vmov 8.0  }
   0x9   :  { %v453_v12 = vld [vmem:[%s653_s2] ss:$0 sm:$0xff]  ;;  %v32_v57 = vrot.slane %v31_v55, 4  ;;  %v39_v58 = vrot.slane %v38_v56, 4  ;;  %373 = vmatpush.msra.mxu3 %v321_v61  ;;  %vm235_vm3 = vcmask 64512   ;;  %vm118_vm12 = vcmask 516096  }
   0xa   :  { %150 = vmatpush.msra.mxu0 %v125_v6  ;;  %s418_s16 = sshll.u32 %s656_s5, 4  ;;  %s501_s17 = smov 16   ;;  %s419_s16 = int_to_ptr.hbm [resolvable:$true] %s418_s16 }
   0xb   :  { %v33_v59 = vadd.f32 %v32_v57, %v31_v55  ;;  %v40_v60 = vadd.f32 %v39_v58, %v38_v56  ;;  %s502_s18 = smov 1  }
   0xc   :  { %151 = vmatpush.msra.mxu0 %v124_v8 }
   0xd   :  { %v34_v62 = vrot.slane %v33_v59, 2  ;;  %v41_v0 = vrot.slane %v40_v60, 2 }
   0xe   :  { %152 = vmatpush.msra.mxu0 %v123_v9 }
   0xf   :  { %v35_v1 = vadd.f32 %v34_v62, %v33_v59  ;;  %v42_v3 = vadd.f32 %v41_v0, %v40_v60 }
  0x10   :  { %153 = vmatpush.msra.mxu0 %v122_v10 }
  0x11   :  { %v36_v6 = vrot.slane %v35_v1, 1 }
  0x12   :  { %154 = vmatpush.msra.mxu0 %v121_v11 }
  0x13   :  { %438 = vmatmul.msk.f32.vlgmr.msra.gmra.mxu0 %vm30_vm0, %v563_v7  ;;  %v37_v9 = vadd.f32 %v36_v6, %v35_v1 }
  0x1b   :  { %439 = vmatmul.msk.f32.gmra.mxu0 %vm30_vm0, %v558_v5  ;;  %v43_v5 = vrot.slane %v42_v3, 1 }
  0x1d   :  { %v44_v11 = vadd.f32 %v43_v5, %v42_v3 }
  0x90   :  { %v156_v13 = vpop.f32.mrf.mxu0 }
  0x91   :  { %v157_v14 = vadd.f32 %v453_v12, %v156_v13 }
  0x93   :  { %v163_v15 = vsel %vm162_vm1, %v157_v14, -inf }
  0x94   :  { %v164_v16 = vrot.slane %v163_v15, 4 }
  0x96   :  { %v165_v17 = vmax.f32 %v163_v15, %v164_v16 }
  0x98   :  { %v166_v18 = vrot.slane %v165_v17, 2  ;;  %v159_v19 = vpop.f32.mrf.mxu0 }
  0x99   :  { %v160_v20 = vadd.f32 %v453_v12, %v159_v19 }
  0x9a   :  { %v167_v21 = vmax.f32 %v165_v17, %v166_v18 }
  0x9b   :  { %v170_v22 = vsel %vm162_vm1, %v160_v20, -inf }
  0x9c   :  { %v168_v23 = vrot.slane %v167_v21, 1  ;;  %v171_v24 = vrot.slane %v170_v22, 4 }
  0x9e   :  { %v169_v25 = vmax.f32 %v167_v21, %v168_v23  ;;  %v172_v26 = vmax.f32 %v170_v22, %v171_v24  ;;  %v320_v21 = vld [vmem:[%s654_s3 + $0x30] sm:$0xff]  ;;  %v319_v22 = vld [vmem:[%s654_s3 + $0x28] sm:$0xff]  ;;  %v318_v23 = vld [vmem:[%s654_s3 + $0x20] sm:$0xff] }
  0x9f   :  { %374 = vmatpush.msra.mxu3 %v320_v21  ;;  %v317_v24 = vld [vmem:[%s654_s3 + $0x18] sm:$0xff] }
  0xa0   :  { %v177_v27 = vsub.f32 %v157_v14, %v169_v25  ;;  %v173_v28 = vrot.slane %v172_v26, 2  ;;  %v316_v25 = vld [vmem:[%s654_s3 + $0x10] sm:$0xff] }
  0xa1   :  { %375 = vmatpush.msra.mxu3 %v319_v22 }
  0xa2   :  { %v179_v29 = vmul.f32 1.442695, %v177_v27  ;;  %v174_v30 = vmax.f32 %v172_v26, %v173_v28  ;;  %v315_v26 = vld [vmem:[%s654_s3 + $0x8] sm:$0xff]  ;;  %v314_v27 = vld [vmem:[%s654_s3] sm:$0xff]  ;;  %s500_s3 = smov [#allocation3]  }
  0xa3   :  { %376 = vmatpush.msra.mxu3 %v318_v23  ;;  %s416_s0 = sshll.u32 %s500_s3, 4  ;;  %s417_s0 = int_to_ptr.vmem [resolvable:$true] %s416_s0 }
  0xa4   :  { %455 = vpow2.f32 %v179_v29  ;;  %v175_v31 = vrot.slane %v174_v30, 1 }
  0xa5   :  { %377 = vmatpush.msra.mxu3 %v317_v24 }
  0xa6   :  { %v176_v32 = vmax.f32 %v174_v30, %v175_v31 }
  0xa7   :  { %378 = vmatpush.msra.mxu3 %v316_v25 }
  0xa8   :  { %v178_v33 = vsub.f32 %v160_v20, %v176_v32 }
  0xa9   :  { %379 = vmatpush.msra.mxu3 %v315_v26 }
  0xaa   :  { %v456_v34 = vpop.eup %455  ;;  %v181_v35 = vmul.f32 1.442695, %v178_v33 }
  0xab   :  { %v183_v36 = vsel %vm162_vm1, %v456_v34, 0.0  ;;  %380 = vmatpush.msra.mxu3 %v314_v27 }
  0xac   :  { %v184_v37 = vrot.slane %v183_v36, 4  ;;  %457 = vpow2.f32 %v181_v35 }
  0xae   :  { %v185_v38 = vadd.f32 %v184_v37, %v183_v36 }
  0xb0   :  { %v186_v39 = vrot.slane %v185_v38, 2 }
  0xb2   :  { %v458_v40 = vpop.eup %457  ;;  %v187_v41 = vadd.f32 %v186_v39, %v185_v38 }
  0xb3   :  { %v190_v42 = vsel %vm162_vm1, %v458_v40, 0.0 }
  0xb4   :  { %v191_v43 = vrot.slane %v190_v42, 4  ;;  %v188_v44 = vrot.slane %v187_v41, 1 }
  0xb6   :  { %v192_v45 = vadd.f32 %v191_v43, %v190_v42  ;;  %v189_v46 = vadd.f32 %v188_v44, %v187_v41 }
  0xb8   :  { %v193_v47 = vrot.slane %v192_v45, 2  ;;  %459 = vrcp.f32 %v189_v46 }
  0xba   :  { %v194_v48 = vadd.f32 %v193_v47, %v192_v45 }
  0xbc   :  { %v195_v49 = vrot.slane %v194_v48, 1 }
  0xbe   :  { %v460_v50 = vpop.eup %459  ;;  %v196_v51 = vadd.f32 %v195_v49, %v194_v48 }
  0xbf   :  { %v199_v52 = vmul.f32 %v460_v50, %v456_v34  ;;  %v454_v34 = vld [vmem:[#allocation2] ss:$0 sm:$0xff] }
  0xc0   :  { %461 = vrcp.f32 %v196_v51  ;;  %v331_v35 = vrot.slane %v454_v34, 2  ;;  %v332_v36 = vrot.slane %v454_v34, 4 }
  0xc1   :  { %201 = vst.msk [vmem:[%s658_s7] sm:$0xff] %vm162_vm1, %v199_v52  ;;  %463 = vrcp.f32 %v499_v63 }
  0xc6   :  { %v462_v53 = vpop.eup %461 }
  0xc7   :  { %v200_v54 = vmul.f32 %v462_v53, %v458_v40  ;;  %v464_v2 = vpop.eup %463 }
  0xc8   :  { %v46_v4 = vmul.f32 8.0, %v464_v2  ;;  %vm50_vm2 = vweird.f32 %v464_v2 }
  0xc9   :  { %259 = vxpose.xlu0.b32.start.end [1/1] (short) (narrow) %v200_v54, 8  ;;  %202 = vst.msk [vmem:[%s658_s7 + $0x8] sm:$0xff] %vm162_vm1, %v200_v54  ;;  %vm409_vm1 = vcmask 5120  }
  0xca   :  { %v47_v7 = vsub.f32 1.0, %v46_v4 }
  0xcc   :  { %v48_v8 = vmul.f32 %v464_v2, %v47_v7 }
  0xce   :  { %v49_v10 = vadd.f32 %v464_v2, %v48_v8 }
  0xd0   :  { %v51_v12 = vsel %vm50_vm2, %v464_v2, %v49_v10 }
  0xd1   :  { %203 = vxpose.xlu0.b32.start.end [1/1] (short) (narrow) %v199_v52, 8  ;;  %v605_v13 = vmul.f32 %v51_v12, %v37_v9  ;;  %v609_v15 = vmul.f32 %v51_v12, %v44_v11 }
  0xd3   :  { %v54_v14 = vmul.f32 %v605_v13, %v605_v13  ;;  %v55_v18 = vmul.f32 %v609_v15, %v609_v15 }
  0xd5   :  { %v56_v16 = vsel %vm30_vm0, %v54_v14, 0.0  ;;  %v59_v19 = vsel %vm30_vm0, %v55_v18, 0.0 }
  0xd6   :  { %57 = vadd.xlane.f32.xlu1 %v56_v16 }
  0xde   :  { %60 = vadd.xlane.f32.xlu1 %v59_v19 }
 0x149   :  { %v58_v39 = vpop.xlane.xlu1 %57 }
 0x14a   :  { %465 = vrsqrt.f32 %v58_v39  ;;  %vm69_vm4 = vcmp.eq.f32.partialorder %v58_v39, inf  ;;  %v72_v53 = vand.u32 2147483648, %v58_v39  ;;  %vm71_vm5 = vcmp.eq.f32.partialorder %v58_v39, 0.0 }
 0x150   :  { %v466_v41 = vpop.eup %465 }
 0x151   :  { %v61_v40 = vpop.xlane.xlu1 %60  ;;  %v63_v42 = vmul.f32 %v466_v41, %v58_v39 }
 0x152   :  { %467 = vrsqrt.f32 %v61_v40  ;;  %vm81_vm6 = vcmp.eq.f32.partialorder %v61_v40, inf  ;;  %v84_v59 = vand.u32 2147483648, %v61_v40  ;;  %vm83_vm7 = vcmp.eq.f32.partialorder %v61_v40, 0.0 }
 0x153   :  { %v64_v43 = vmul.f32 %v466_v41, %v63_v42 }
 0x155   :  { %v65_v45 = vmul.f32 0.5, %v64_v43 }
 0x157   :  { %v66_v47 = vsub.f32 1.5, %v65_v45 }
 0x158   :  { %v468_v44 = vpop.eup %467 }
 0x159   :  { %v75_v46 = vmul.f32 %v468_v44, %v61_v40  ;;  %v67_v49 = vmul.f32 %v466_v41, %v66_v47 }
 0x15b   :  { %v76_v48 = vmul.f32 %v468_v44, %v75_v46  ;;  %v68_v51 = vmul.f32 %v67_v49, %v58_v39 }
 0x15d   :  { %v77_v50 = vmul.f32 0.5, %v76_v48  ;;  %v70_v54 = vsel %vm69_vm4, %v58_v39, %v68_v51 }
 0x15e   :  { %v73_v56 = vsel %vm71_vm5, %v72_v53, %v70_v54 }
 0x15f   :  { %v78_v52 = vsub.f32 1.5, %v77_v50  ;;  %v86_v58 = vmax.f32 %v73_v56, 1e-12 }
 0x161   :  { %v79_v55 = vmul.f32 %v468_v44, %v78_v52  ;;  %469 = vrcp.f32 %v86_v58  ;;  %v99_v4 = vand.u32 2147483648, %v86_v58  ;;  %vm93_vm8 = vweird.f32 %v86_v58 }
 0x162   :  { %v97_v7 = vand.u32 2147483647, %v86_v58 }
 0x163   :  { %v80_v57 = vmul.f32 %v79_v55, %v61_v40  ;;  %v100_v5 = vor.u32 1.1754944e-38, %v99_v4 }
 0x164   :  { %vm98_vm11 = vcmp.eq.f32.partialorder %v97_v7, 8.507059e+37 }
 0x165   :  { %v82_v60 = vsel %vm81_vm6, %v61_v40, %v80_v57 }
 0x166   :  { %v85_v61 = vsel %vm83_vm7, %v84_v59, %v82_v60 }
 0x167   :  { %v87_v62 = vmax.f32 %v85_v61, 1e-12  ;;  %v470_v63 = vpop.eup %469 }
 0x168   :  { %v89_v0 = vmul.f32 %v470_v63, %v86_v58  ;;  %vm94_vm9 = vweird.f32 %v470_v63 }
 0x169   :  { %471 = vrcp.f32 %v87_v62  ;;  %vm95_vm10 = vmor %vm93_vm8, %vm94_vm9  ;;  %v114_v16 = vand.u32 2147483648, %v87_v62  ;;  %vm108_vm13 = vweird.f32 %v87_v62  ;;  %v112_v18 = vand.u32 2147483647, %v87_v62 }
 0x16a   :  { %v90_v1 = vsub.f32 1.0, %v89_v0 }
 0x16b   :  { %v115_v19 = vor.u32 1.1754944e-38, %v114_v16 }
 0x16c   :  { %v91_v2 = vmul.f32 %v470_v63, %v90_v1 }
 0x16d   :  { %v275_v17 = vpop.trf.xlu0 }
 0x16e   :  { %441 = vmatmul.msk.f32.vlgmr.msra.gmra.mxu2 %vm235_vm3, %v275_v17  ;;  %v92_v6 = vadd.f32 %v470_v63, %v91_v2 }
 0x16f   :  { %v472_v3 = vpop.eup %471 }
 0x170   :  { %v96_v8 = vsel %vm95_vm10, %v470_v63, %v92_v6  ;;  %v104_v9 = vmul.f32 %v472_v3, %v87_v62  ;;  %vm109_vm14 = vweird.f32 %v472_v3 }
 0x171   :  { %v101_v10 = vsel %vm98_vm11, %v100_v5, %v96_v8  ;;  %vm110_vm15 = vmor %vm108_vm13, %vm109_vm14 }
 0x172   :  { %v102_v11 = vmul.f32 %v101_v10, %v605_v13  ;;  %v105_v12 = vsub.f32 1.0, %v104_v9 }
 0x174   :  { %v106_v14 = vmul.f32 %v472_v3, %v105_v12  ;;  %119 = vst.msk [vmem:[#allocation3] sm:$0x1] %vm118_vm12, %v102_v11 }
 0x175   :  { %v219_v20 = vpop.trf.xlu0 }
 0x176   :  { %440 = vmatmul.msk.f32.vlgmr.msra.gmra.mxu1 %vm235_vm3, %v219_v20  ;;  %v107_v17 = vadd.f32 %v472_v3, %v106_v14 }
 0x178   :  { %v111_v20 = vsel %vm110_vm15, %v472_v3, %v107_v17 }
 0x1f1   :  { %v311_v28 = vpop.f32.mrf.mxu2 }
 0x1f2   :  { %v329_v29 = vrot.slane %v311_v28, 2  ;;  %v330_v30 = vrot.slane %v311_v28, 4  ;;  %339 = vst [vmem:[#allocation1 + $0x3] ss:$4 sm:$0xff] %v311_v28 }
 0x1f3   :  { %v256_v31 = vpop.f32.mrf.mxu1 }
 0x1f4   :  { %341 = vst [vmem:[#allocation1 + $0x20] ss:$4 sm:$0xff] %v329_v29  ;;  %v327_v32 = vrot.slane %v256_v31, 2  ;;  %v328_v33 = vrot.slane %v256_v31, 4 }
 0x1f5   :  { %343 = vst [vmem:[#allocation1 + $0x21] ss:$4 sm:$0xff] %v330_v30 }
 0x1f6   :  { %333 = vst [vmem:[#allocation1] ss:$4 sm:$0xff] %v256_v31 }
 0x1f7   :  { %335 = vst [vmem:[#allocation1 + $0x1] ss:$4 sm:$0xff] %v327_v32 }
 0x1f8   :  { %337 = vst [vmem:[#allocation1 + $0x2] ss:$4 sm:$0xff] %v328_v33 }
 0x1fc   :  { %v345_v37 = vld.sshfl [vmem:[#allocation1 + $0x20] sm:$0xff pattern:$0x73625140] }
 0x1fd   :  { %354 = vst [vmem:[#allocation1 + $0x20] ss:$4 sm:$0xff] %v331_v35 }
 0x1fe   :  { %356 = vst [vmem:[#allocation1 + $0x21] ss:$4 sm:$0xff] %v332_v36 }
 0x1ff   :  { %v344_v38 = vld.sshfl [vmem:[#allocation1] sm:$0xff pattern:$0x73625140] }
 0x200   :  { %346 = vst [vmem:[#allocation1] ss:$4 sm:$0xff] %v454_v34  ;;  %442 = vmatmul.msk.f32.vlgmr.msra.gmra.mxu3 %vm30_vm0, %v344_v38 }
 0x201   :  { %348 = vst [vmem:[#allocation1 + $0x1] ss:$4 sm:$0xff] %v331_v35 }
 0x202   :  { %350 = vst [vmem:[#allocation1 + $0x2] ss:$4 sm:$0xff] %v332_v36 }
 0x203   :  { %352 = vst [vmem:[#allocation1 + $0x3] ss:$4 sm:$0xff] %v454_v34 }
 0x205   :  { %v358_v28 = vld.sshfl [vmem:[#allocation1 + $0x20] sm:$0xff pattern:$0x73625140] }
 0x208   :  { %443 = vmatmul.msk.f32.gmra.mxu3 %vm30_vm0, %v345_v37  ;;  %vm113_vm0 = vcmp.eq.f32.partialorder %v112_v18, 8.507059e+37 }
 0x209   :  { %v116_v13 = vsel %vm113_vm0, %v115_v19, %v111_v20 }
 0x20a   :  { %v117_v21 = vmul.f32 %v116_v13, %v609_v15  ;;  %v357_v22 = vld.sshfl [vmem:[#allocation1] sm:$0xff pattern:$0x73625140] }
 0x20c   :  { %120 = vst.msk [vmem:[#allocation3 + $0x1] sm:$0x1] %vm118_vm12, %v117_v21 }
 0x20d   :  { %424 = dma.vmem_to_hbm [thread:$0]  %s417_s0, 32, %s419_s16, [#allocation4], %s501_s17, %s501_s17, %s502_s18  }
 0x283   :  { %v382_v23 = vpop.f32.mrf.mxu3 }
 0x284   :  { %v383_v24 = vadd.f32 %v382_v23, %v357_v22 }
 0x286   :  { %v390_v25 = vrot.slane %v383_v24, 2  ;;  %v391_v26 = vrot.slane %v383_v24, 4  ;;  %v392_v27 = vrot.slane %v383_v24, 6  ;;  %394 = vst [vmem:[#allocation1] ss:$4 sm:$0xff] %v383_v24 }
 0x288   :  { %396 = vst [vmem:[#allocation1 + $0x1] ss:$4 sm:$0xff] %v390_v25 }
 0x289   :  { %398 = vst [vmem:[#allocation1 + $0x2] ss:$4 sm:$0xff] %v391_v26 }
 0x28a   :  { %401 = vst [vmem:[#allocation1 + $0x20] ss:$4 sm:$0xff] %v392_v27 }
 0x28b   :  { %v385_v29 = vpop.f32.mrf.mxu3 }
 0x28c   :  { %v386_v30 = vadd.f32 %v385_v29, %v358_v28 }
 0x28e   :  { %v393_v31 = vrot.slane %v386_v30, 2  ;;  %403 = vst [vmem:[#allocation1 + $0x21] ss:$4 sm:$0xff] %v386_v30 }
 0x290   :  { %v399_v15 = vld.sshfl [vmem:[#allocation1] sm:$0xff pattern:$0x73625140]  ;;  %405 = vst [vmem:[#allocation1 + $0x22] ss:$4 sm:$0xff] %v393_v31 }
 0x291   :  { %410 = vst.msk [vmem:[%s657_s6] sm:$0x3f] %vm409_vm1, %v399_v15 }
 0x297   :  { %v406_v32 = vld.sshfl [vmem:[#allocation1 + $0x20] sm:$0xff pattern:$0x73625140] }
 0x298   :  { %411 = vst.msk [vmem:[%s657_s6 + $0x8] sm:$0x3f] %vm409_vm1, %v406_v32 }
 0x299   :  { %497 = dma.done.wait [#allocation4], 32  }
 0x29a   :  { %498 = vsyncadd [#allocation4], 4294967264 }
 0x29b   :  { %437 = vsyncpa [#allocation4], 1 }

// kernel: kgpdplam_forward.25
= control target key start
LH: loop header
LB: loop body
LE: loop exit
PB: predicated region body
PF: predicated region fallthrough
CT: control target
= control target key end

     0   :  { %s2313_s0 = inlined_call_operand.vmem [shape: bf16[2,8,768], index: 0, kind: input, shape index: {}]   ;;  %s2314_s1 = inlined_call_operand.vmem [shape: s32[8,8], index: 1, kind: input, shape index: {}]   ;;  %s2315_s2 = inlined_call_operand.vmem [shape: f32[15,4], index: 2, kind: input, shape index: {}]   ;;  %s2316_s3 = inlined_call_operand.vmem [shape: f32[15,4], index: 3, kind: input, shape index: {}]   ;;  %s2317_s4 = inlined_call_operand.vmem [shape: bf16[2,4,8,8], index: 4, kind: input, shape index: {}]   ;;  %s2318_s5 = inlined_call_operand.vmem [shape: bf16[2,8,256], index: 5, kind: output, shape index: {0}]   ;;  %s2319_s6 = inlined_call_operand.hbm [shape: bf16[2,4,8,8], index: 6, kind: output, shape index: {1}]  }
   0x1   :  { %2344 = sst [smem:[#allocation22_spill]] %s2313_s0 }
   0x2   :  { %2345 = sst [smem:[#allocation23_spill]] %s2315_s2 }
   0x3   :  { %2346 = sst [smem:[#allocation24_spill]] %s2316_s3 }
   0x4   :  { %2347 = sst [smem:[#allocation25_spill]] %s2317_s4 }
   0x5   :  { %2348 = sst [smem:[#allocation26_spill]] %s2318_s5 }
   0x6   :  { %2349 = sst [smem:[#allocation27_spill]] %s2319_s6 }
   0x7   :  { %12 = vsyncpa [#allocation4], 0 }
   0x8   :  { %13 = vsyncpa [#allocation6], 0 }
   0x9   :  { %14 = vsyncpa [#allocation3], 0 }
   0xa   :  { %16 = vsyncpa [#allocation3 + $0x1], 0  ;;  %s1563_s21 = smov 0   ;;  %s1565_s22 = smov 0  }
   0xb   :  { %s1567_s23 = smov 0   ;;  %s1569_s24 = smov 0  }
   0xc LB: > { %2350 = sst [smem:[#allocation11_spill]] %s1508_s21  ;;  %s1584_s25 = sadd.s32 4294967295, %s1520_s24   ;;  %s1520_s24 = sphi %s1569_s24, %s2395_s24   ;;  %s1516_s23 = sphi %s1567_s23, %s2398_s23   ;;  %s1512_s22 = sphi %s1565_s22, %s2397_s22   ;;  %s1508_s21 = sphi %s1563_s21, %s2396_s21  }
   0xd   : > { %2351 = sst [smem:[#allocation12_spill]] %s1512_s22  ;;  %s1180_s26 = sadd.s32 4294967294, %s1520_s24  }
   0xe   : > { %2352 = sst [smem:[#allocation13_spill]] %s1516_s23  ;;  %s1588_s27 = sadd.s32 1, %s1520_s24  }
   0xf   : > { %2353 = sst [smem:[#allocation14_spill]] %s1520_s24  ;;  %s170_s28 = sadd.s32 1, %s1516_s23 }
  0x10   : > { %2354 = sst [smem:[#allocation15_spill]] %s1584_s25  ;;  %s167_s29 = ssub.s32 %s1520_s24, %s1588_s27 }
  0x11   : > { %2355 = sst [smem:[#allocation16_spill]] %s1588_s27  ;;  %p180_p0 = scmp.ne.s32.totalorder %s1516_s23, %s1512_s22 }
  0x12   : > { %p168_p1 = scmp.eq.s32.totalorder %s167_s29, 0  ;;  %p181_p2 = scmp.eq.s32.totalorder %s1584_s25, 1 }
  0x13   : > { %p186_p3 = scmp.ne.s32.totalorder %s1512_s22, %s1508_s21  ;;  %p187_p4 = scmp.eq.s32.totalorder %s1180_s26, 1 }
  0x14   : > { %s1599_s30 = scalar_select %p168_p1, %s1516_s23, %s170_s28  }
  0x15   : > { %p1601_p5 = por %p181_p2, %p180_p0  ;;  %p1605_p6 = por %p187_p4, %p186_p3 }
  0x16   : > { %2356 = sst [smem:[#allocation17_spill]] %s1599_s30  ;;  %p1181_p7 = scmp.ge.s32.totalorder %s1520_s24, 1 }
  0x17   : > { %s2357_s7 = scalar_select %p1601_p5, 1, 0 }
  0x18   : > { %s2359_s8 = scalar_select %p1605_p6, 1, 0 }
  0x19   : > { %2358 = sst [smem:[#allocation18_spill]] %s2357_s7  ;;  %p194_p8 = scmp.lt.s32.totalorder %s1520_s24, 3 }
  0x1a   : > { %2360 = sst [smem:[#allocation19_spill]] %s2359_s8  ;;  %p1356_p9 = scmp.eq.s32.totalorder %s1584_s25, 0 }
  0x1b   : > { %p195_p10 = pnand %p1181_p7, %p194_p8  ;;  %s2361_s2 = sld [smem:[#allocation23_spill]] }
  0x1c   : > { %s2362_s3 = sld [smem:[#allocation24_spill]]  ;;  %s1522_s15 = smov [#allocation2]  }
  0x1d   : > { %p1345_p11 = pneg %p195_p10  ;;  %s1523_s16 = smov 128  }
  0x1e   : > { %s1524_s17 = smov 8   ;;  %s1525_s18 = smov [#allocation5]  }
  0x1f   : > { %p1346_p12 = pnand %p1356_p9, %p1345_p11 }
  0x20   : > { %252 = sbr.rel (%p195_p10) target bundleno = 1034 (0x40a), region = 40 }
  0x21   : > { %s208_s11 = sshll.u32 %s2361_s2, 4  ;;  %s209_s11 = int_to_ptr.vmem [resolvable:$true] %s208_s11 }
  0x22   : > { %s220_s14 = sshll.u32 %s2362_s3, 4  ;;  %s221_s14 = int_to_ptr.vmem [resolvable:$true] %s220_s14 }
  0x23   : > { %1348 = dma.vmem_to_smem (!%p1346_p12), %s209_s11, 256, %s1522_s15, [#allocation4], %s1523_s16, %s1523_s16, %s1524_s17  }
  0x24   : > { %1351 = dma.vmem_to_smem (!%p1346_p12), %s221_s14, 256, %s1525_s18, [#allocation6], %s1523_s16, %s1523_s16, %s1524_s17  }
  0x25   : > { %1495 = dma.done.wait (%p1356_p9), [#allocation4], 256  }
  0x26   : > { %1497 = vsyncadd (%p1356_p9), [#allocation4], 4294967040 }
  0x27   : > { %1499 = dma.done.wait (%p1356_p9), [#allocation6], 256  }
  0x28   : > { %1501 = vsyncadd (%p1356_p9), [#allocation6], 4294967040 }
  0x29   : > { %264 = sfence }
  0x2a   : > { %p299_p13 = scmp.lt.s32.totalorder %s1584_s25, 1  ;;  %vm2338_vm0 = vcmask 523264   ;;  %s2364_s0 = sld [smem:[#allocation22_spill]]  ;;  %v1710_v14 = vld [vmem:[%s2314_s1] sm:$0xff] }
  0x2b   : > { %s2320_s9 = smov 64   ;;  %s1649_s10 = sld [smem:[#allocation2]]  ;;  %vm339_vm1 = vcmp.eq.s32.totalorder %v1710_v14, 0  ;;  %vm347_vm2 = vcmp.eq.s32.totalorder %v1710_v14, 1  ;;  %vm355_vm3 = vcmp.eq.s32.totalorder %v1710_v14, 2  ;;  %vm363_vm4 = vcmp.eq.s32.totalorder %v1710_v14, 3 }
  0x2c   : > { %s1630_s19 = scalar_select %p299_p13, %s1584_s25, 1  ;;  %vm371_vm5 = vcmp.eq.s32.totalorder %v1710_v14, 4  ;;  %vm379_vm6 = vcmp.eq.s32.totalorder %v1710_v14, 5  ;;  %vm387_vm7 = vcmp.eq.s32.totalorder %v1710_v14, 6  ;;  %vm395_vm8 = vcmp.eq.s32.totalorder %v1710_v14, 7 }
  0x2d   : > { %s1651_s11 = sld [smem:[#allocation5]]  ;;  %vm2340_vm9 = vcmp.eq.s32.totalorder %v1710_v14, 8  ;;  %vm411_vm10 = vcmp.eq.s32.totalorder %v1710_v14, 9  ;;  %vm419_vm11 = vcmp.eq.s32.totalorder %v1710_v14, 10  ;;  %vm2339_vm12 = vcmp.eq.s32.totalorder %v1710_v14, 11 }
  0x2e   : > { %2363 = sst [smem:[#allocation20_spill]] %s1630_s19  ;;  %s1334_s20 = smul.u32 24, %s1630_s19  ;;  %vm435_vm13 = vcmp.eq.s32.totalorder %v1710_v14, 12  ;;  %vm2341_vm14 = vcmp.eq.s32.totalorder %v1710_v14, 13  ;;  %vm2342_vm15 = vcmp.eq.s32.totalorder %v1710_v14, 14 }
  0x2f   : > { %s1653_s12 = sld [smem:[#allocation2 + $0x80]] }
  0x30   : > { %s1636_s29 = scalar_lea.vmem %s2364_s0, %s1334_s20  ;;  %s1655_s13 = sld [smem:[#allocation5 + $0x80]] }
  0x31   : > { %2365 = sst [smem:[#allocation21_spill]] %s1636_s29  ;;  %v317_v0 = vld [vmem:[%s1636_s29 + $0x8] sm:$0xf]  ;;  %v844_v1 = vld [vmem:[%s1636_s29 + $0xc] sm:$0xf]  ;;  %v341_v11 = vstv %s1649_s10 }
  0x32   : > { %v324_v2 = vsel %vm2338_vm0, %v317_v0, 0  ;;  %v852_v3 = vunpack.c.l.b16 %v844_v1  ;;  %v1642_v4 = vld [vmem:[%s1636_s29 + $0x4] sm:$0xff]   ;;  %v316_v8 = vld [vmem:[%s1636_s29] sm:$0xf]  ;;  %s1657_s14 = sld [smem:[#allocation2 + $0x100]] }
  0x33   : > { %333 = vmatpush.bf16.xpose.msra.mxu0 %v324_v2  ;;  %v847_v5 = vunpack.c.l.b16 %v1642_v4  ;;  %s1659_s15 = sld [smem:[#allocation5 + $0x100]]  ;;  %v344_v18 = vstv %s1651_s11 }
  0x34   : > { %v853_v6 = vpack.c.b16 %v852_v3, %v852_v3  ;;  %s1661_s16 = sld [smem:[#allocation2 + $0x180]] }
  0x35   : > { %v848_v7 = vpack.c.b16 %v847_v5, %v847_v5  ;;  %s1663_s17 = sld [smem:[#allocation5 + $0x180]]  ;;  %v349_v12 = vstv %s1653_s12 }
  0x36   : > { %854 = vrot.lane.b32.xlu1 %v853_v6, %s2320_s9  ;;  %s1665_s18 = sld [smem:[#allocation2 + $0x200]]  ;;  %v352_v19 = vstv %s1655_s13 }
  0x37   : > { %849 = vrot.lane.b32.xlu2 %v848_v7, %s2320_s9  ;;  %s1667_s20 = sld [smem:[#allocation5 + $0x200]] }
  0x38   : > { %s1669_s26 = sld [smem:[#allocation2 + $0x280]]  ;;  %v357_v13 = vstv %s1657_s14 }
  0x39   : > { %s1671_s28 = sld [smem:[#allocation5 + $0x280]]  ;;  %v360_v22 = vstv %s1659_s15 }
  0x3a   : > { %1194 = vmatmul.msk.bf16.vlgmr.msra.gmra.mxu0 %vm2338_vm0, %v316_v8  ;;  %s1673_s9 = sld [smem:[#allocation2 + $0x300]]  ;;  %v365_v15 = vstv %s1661_s16 }
  0x3b   : > { %s1675_s0 = sld [smem:[#allocation5 + $0x300]]  ;;  %v368_v23 = vstv %s1663_s17 }
  0x3c   : > { %s1677_s2 = sld [smem:[#allocation2 + $0x380]]  ;;  %v373_v16 = vstv %s1665_s18 }
  0x3d   : > { %s1679_s3 = sld [smem:[#allocation5 + $0x380]]  ;;  %v376_v24 = vstv %s1667_s20 }
  0x3e   : > { %s1681_s30 = sld [smem:[#allocation2 + $0x400]]  ;;  %v381_v17 = vstv %s1669_s26 }
  0x3f   : > { %s1683_s23 = sld [smem:[#allocation5 + $0x400]]  ;;  %v384_v25 = vstv %s1671_s28 }
  0x40   : > { %s1685_s27 = sld [smem:[#allocation2 + $0x480]]  ;;  %v389_v20 = vstv %s1673_s9 }
  0x41   : > { %s1687_s8 = sld [smem:[#allocation5 + $0x480]]  ;;  %v392_v27 = vstv %s1675_s0 }
  0x42   : > { %s1689_s21 = sld [smem:[#allocation2 + $0x500]]  ;;  %v397_v21 = vstv %s1677_s2 }
  0x43   : > { %s1691_s24 = sld [smem:[#allocation5 + $0x500]]  ;;  %v400_v28 = vstv %s1679_s3 }
  0x44   : > { %s1693_s5 = sld [smem:[#allocation2 + $0x580]]  ;;  %v405_v29 = vstv %s1681_s30 }
  0x45   : > { %s1695_s6 = sld [smem:[#allocation5 + $0x580]]  ;;  %v408_v34 = vstv %s1683_s23 }
  0x46   : > { %s1697_s7 = sld [smem:[#allocation2 + $0x600]]  ;;  %v413_v30 = vstv %s1685_s27 }
  0x47   : > { %s1700_s25 = sld [smem:[#allocation5 + $0x600]]  ;;  %v416_v35 = vstv %s1687_s8 }
  0x48   : > { %s1705_s22 = sld [smem:[#allocation2 + $0x680]]  ;;  %v421_v31 = vstv %s1689_s21 }
  0x49   : > { %s1715_s19 = sld [smem:[#allocation5 + $0x680]]  ;;  %v424_v40 = vstv %s1691_s24 }
  0x4a   : > { %s1721_s10 = sld [smem:[#allocation2 + $0x700]]  ;;  %v429_v32 = vstv %s1693_s5 }
  0x4b   : > { %s1735_s2 = sld [smem:[#allocation5 + $0x700]]  ;;  %v432_v42 = vstv %s1695_s6 }
  0x4c   : > { %v437_v36 = vstv %s1697_s7  ;;  %s2366_s0 = sld [smem:[#allocation20_spill]] }
  0x4d   : > { %v440_v43 = vstv %s1700_s25  ;;  %s2367_s4 = sld [smem:[#allocation21_spill]]  ;;  %s2370_s25 = smov 64  }
  0x4e   : > { %v445_v47 = vstv %s1705_s22  ;;  %s2368_s21 = sld [smem:[#allocation25_spill]] }
  0x4f   : > { %v448_v49 = vstv %s1715_s19  ;;  %s2369_s23 = sld [smem:[#allocation12_spill]] }
  0x50   : > { %v453_v50 = vstv %s1721_s10  ;;  %s1293_s7 = sld [smem:[#allocation2 + $0x3]] }
  0x51   : > { %v456_v60 = vstv %s1735_s2  ;;  %s1815_s8 = sld [smem:[#allocation5 + $0x3]] }
  0x52   : > { %s1331_s3 = sshll.u32 %s2366_s0, 4  ;;  %s1295_s19 = sld [smem:[#allocation2 + $0x83]] }
  0x53   : > { %s1817_s29 = sld [smem:[#allocation5 + $0x83]] }
  0x54   : > { %s1769_s22 = scalar_lea.vmem %s2368_s21, %s1331_s3  ;;  %s1297_s9 = sld [smem:[#allocation2 + $0x103]] }
  0x55   : > { %s296_s24 = sand.u32 1, %s2369_s23   ;;  %s1819_s11 = sld [smem:[#allocation5 + $0x103]] }
  0x56   : > { %s1188_s27 = sshll.u32 %s296_s24, 4  ;;  %s1821_s12 = sld [smem:[#allocation2 + $0x183]] }
  0x57   : > { %s1809_s30 = scalar_lea.vmem [#allocation7], %s1188_s27  ;;  %s1823_s13 = sld [smem:[#allocation5 + $0x183]] }
  0x58   : > { %s1825_s14 = sld [smem:[#allocation2 + $0x203]] }
  0x59   : > { %s1827_s15 = sld [smem:[#allocation5 + $0x203]] }
  0x5a   : > { %s1829_s16 = sld [smem:[#allocation2 + $0x283]] }
  0x5b   : > { %s1833_s17 = sld [smem:[#allocation5 + $0x283]] }
  0x5c   : > { %s1835_s18 = sld [smem:[#allocation2 + $0x303]] }
  0x5d   : > { %s1837_s20 = sld [smem:[#allocation5 + $0x303]] }
  0x5e   : > { %s1839_s26 = sld [smem:[#allocation2 + $0x383]] }
  0x5f   : > { %s1841_s28 = sld [smem:[#allocation5 + $0x383]] }
  0x60   : > { %s1843_s10 = sld [smem:[#allocation2 + $0x403]] }
  0x61   : > { %s1845_s2 = sld [smem:[#allocation5 + $0x403]] }
  0x62   : > { %s1847_s3 = sld [smem:[#allocation2 + $0x483]] }
  0x63   : > { %s1849_s5 = sld [smem:[#allocation5 + $0x483]] }
  0x64   : > { %s1853_s6 = sld [smem:[#allocation2 + $0x503]] }
  0x65   : > { %s1858_s21 = sld [smem:[#allocation5 + $0x503]] }
  0x66   : > { %s1864_s27 = sld [smem:[#allocation2 + $0x583]] }
  0x91   : > { %v850_v26 = vpop.permute.xlu2 %849 }
  0xa8   : > { %v855_v9 = vpop.permute.xlu1 %854 }
  0xa9   : > { %v860_v10 = vsel %vm2338_vm0, %v855_v9, 0 }
  0xaa   : > { %869 = vmatpush.bf16.xpose.msrb.mxu0 %v860_v10 }
  0xb1   : > { %1292 = vmatmul.msk.bf16.vlgmr.msrb.gmra.mxu0 %vm2338_vm0, %v850_v26  ;;  %vm465_vm0 = vcmask 64512  }
  0xb7   : > { %v335_v33 = vpop.f32.mrf.mxu0 }
  0xb8   : > { %v342_v37 = vmul.f32 %v341_v11, %v335_v33  ;;  %v350_v38 = vmul.f32 %v349_v12, %v335_v33  ;;  %v358_v39 = vmul.f32 %v357_v13, %v335_v33  ;;  %v366_v41 = vmul.f32 %v365_v15, %v335_v33  ;;  %v498_v11 = vld [vmem:[%s2367_s4] sm:$0xf] }
  0xb9   : > { %v374_v46 = vmul.f32 %v373_v16, %v335_v33  ;;  %v382_v48 = vmul.f32 %v381_v17, %v335_v33  ;;  %v390_v53 = vmul.f32 %v389_v20, %v335_v33  ;;  %v398_v56 = vmul.f32 %v397_v21, %v335_v33  ;;  %v459_v20 = vld [vmem:[%s1769_s22] sm:$0xf] }
  0xba   : > { %v345_v44 = vadd.f32 %v344_v18, %v342_v37  ;;  %v353_v45 = vadd.f32 %v352_v19, %v350_v38  ;;  %v361_v52 = vadd.f32 %v360_v22, %v358_v39  ;;  %v369_v55 = vadd.f32 %v368_v23, %v366_v41 }
  0xbb   : > { %v377_v58 = vadd.f32 %v376_v24, %v374_v46  ;;  %v406_v59 = vmul.f32 %v405_v29, %v335_v33  ;;  %v385_v63 = vadd.f32 %v384_v25, %v382_v48  ;;  %v414_v0 = vmul.f32 %v413_v30, %v335_v33 }
  0xbc   : > { %v346_v51 = vsel %vm339_vm1, %v345_v44, %v335_v33  ;;  %v393_v2 = vadd.f32 %v392_v27, %v390_v53  ;;  %v422_v3 = vmul.f32 %v421_v31, %v335_v33  ;;  %v401_v6 = vadd.f32 %v400_v28, %v398_v56 }
  0xbd   : > { %v354_v54 = vsel %vm347_vm2, %v353_v45, %v346_v51  ;;  %v430_v7 = vmul.f32 %v429_v32, %v335_v33  ;;  %v409_v9 = vadd.f32 %v408_v34, %v406_v59  ;;  %v438_v10 = vmul.f32 %v437_v36, %v335_v33 }
  0xbe   : > { %v362_v57 = vsel %vm355_vm3, %v361_v52, %v354_v54  ;;  %v417_v13 = vadd.f32 %v416_v35, %v414_v0  ;;  %v446_v15 = vmul.f32 %v445_v47, %v335_v33  ;;  %v502_v16 = vunpack.c.l.b16 %v498_v11 }
  0xbf   : > { %v337_v61 = vpop.f32.mrf.mxu0  ;;  %v370_v62 = vsel %vm363_vm4, %v369_v55, %v362_v57  ;;  %v425_v18 = vadd.f32 %v424_v40, %v422_v3  ;;  %v454_v19 = vmul.f32 %v453_v50, %v335_v33  ;;  %v433_v22 = vadd.f32 %v432_v42, %v430_v7 }
  0xc0   : > { %v378_v1 = vsel %vm371_vm5, %v377_v58, %v370_v62  ;;  %v503_v23 = vpack.c.b16 %v502_v16, %v502_v16  ;;  %v441_v25 = vadd.f32 %v440_v43, %v438_v10  ;;  %v449_v27 = vadd.f32 %v448_v49, %v446_v15 }
  0xc1   : > { %v386_v5 = vsel %vm379_vm6, %v385_v63, %v378_v1  ;;  %v460_v28 = vunpack.c.l.bf16 %v459_v20  ;;  %v457_v30 = vadd.f32 %v456_v60, %v454_v19  ;;  %v507_v36 = vunpack.c.h.b16 %v1642_v4 }
  0xc2   : > { %v394_v8 = vsel %vm387_vm7, %v393_v2, %v386_v5  ;;  %504 = vrot.lane.b32.xlu1 %v503_v23, %s2370_s25  ;;  %v876_v39 = vstv %s1293_s7  ;;  %v879_v40 = vstv %s1815_s8  ;;  %v883_v41 = vstv %s1295_s19  ;;  %s1868_s7 = sld [smem:[#allocation5 + $0x583]] }
  0xc3   : > { %v402_v12 = vsel %vm395_vm8, %v401_v6, %v394_v8  ;;  %v508_v37 = vpack.c.b16 %v507_v36, %v507_v36  ;;  %v886_v42 = vstv %s1817_s29  ;;  %v890_v45 = vstv %s1297_s9  ;;  %s1873_s8 = sld [smem:[#allocation2 + $0x603]] }
  0xc4   : > { %v410_v17 = vsel %vm2340_vm9, %v409_v9, %v402_v12  ;;  %v893_v46 = vstv %s1819_s11  ;;  %v897_v48 = vstv %s1821_s12  ;;  %v900_v49 = vstv %s1823_s13  ;;  %s1879_s19 = sld [smem:[#allocation5 + $0x603]] }
  0xc5   : > { %v418_v21 = vsel %vm411_vm10, %v417_v13, %v410_v17  ;;  %v904_v50 = vstv %s1825_s14  ;;  %v907_v57 = vstv %s1827_s15  ;;  %v911_v58 = vstv %s1829_s16  ;;  %s1886_s29 = sld [smem:[#allocation2 + $0x683]] }
  0xc6   : > { %v426_v24 = vsel %vm419_vm11, %v425_v18, %v418_v21  ;;  %v914_v59 = vstv %s1833_s17  ;;  %v918_v2 = vstv %s1835_s18  ;;  %v921_v3 = vstv %s1837_s20  ;;  %s1892_s9 = sld [smem:[#allocation5 + $0x683]] }
  0xc7   : > { %v434_v26 = vsel %vm2339_vm12, %v433_v22, %v426_v24  ;;  %vm463_vm12 = vcmask 60416   ;;  %v925_v8 = vstv %s1839_s26  ;;  %v928_v12 = vstv %s1841_s28  ;;  %s1898_s11 = sld [smem:[#allocation2 + $0x703]] }
  0xc8   : > { %v442_v29 = vsel %vm435_vm13, %v441_v25, %v434_v26  ;;  %v932_v16 = vstv %s1843_s10  ;;  %s1903_s12 = sld [smem:[#allocation5 + $0x703]]  ;;  %v935_v20 = vstv %s1845_s2  ;;  %v939_v22 = vstv %s1847_s3 }
  0xc9   : > { %v450_v31 = vsel %vm2341_vm14, %v449_v27, %v442_v29  ;;  %v942_v23 = vstv %s1849_s5  ;;  %v946_v24 = vstv %s1853_s6  ;;  %v949_v29 = vstv %s1858_s21  ;;  %s1961_s13 = sld [smem:[#allocation2 + $0x1]] }
  0xca   : > { %v458_v32 = vsel %vm2342_vm15, %v457_v30, %v450_v31  ;;  %v953_v30 = vstv %s1864_s27  ;;  %v956_v31 = vstv %s1868_s7  ;;  %s1963_s14 = sld [smem:[#allocation2 + $0x81]] }
  0xcb   : > { %v1803_v33 = vadd.f32 %v460_v28, %v458_v32  ;;  %v960_v32 = vstv %s1873_s8  ;;  %s1965_s15 = sld [smem:[#allocation5 + $0x1]] }
  0xcc   : > { %s1967_s16 = sld [smem:[#allocation5 + $0x81]] }
  0xcd   : > { %v466_v34 = vsel %vm465_vm0, %v1803_v33, -inf  ;;  %v462_v35 = vpack.c.bf16 %v1803_v33, %v1803_v33  ;;  %s1970_s17 = sld [smem:[#allocation2 + $0x101]] }
  0xce   : > { %467 = vmax.xlane.f32.xlu0 %v466_v34  ;;  %s1972_s18 = sld [smem:[#allocation5 + $0x101]] }
  0xcf   : > { %464 = vst.msk [vmem:[%s1809_s30] sm:$0xf] %vm463_vm12, %v462_v35  ;;  %s1974_s20 = sld [smem:[#allocation2 + $0x181]] }
  0xd0   : > { %s1976_s26 = sld [smem:[#allocation5 + $0x181]] }
  0xd1   : > { %s1978_s28 = sld [smem:[#allocation2 + $0x201]] }
  0xd2   : > { %s1980_s10 = sld [smem:[#allocation5 + $0x201]] }
  0xd3   : > { %s1982_s2 = sld [smem:[#allocation2 + $0x281]] }
  0xd4   : > { %s1984_s3 = sld [smem:[#allocation5 + $0x281]] }
  0xd5   : > { %s1986_s5 = sld [smem:[#allocation2 + $0x301]] }
  0xd6   : > { %s1988_s6 = sld [smem:[#allocation5 + $0x301]] }
  0xd7   : > { %s1990_s21 = sld [smem:[#allocation2 + $0x381]] }
  0xd8   : > { %s1992_s27 = sld [smem:[#allocation5 + $0x381]] }
  0xd9   : > { %s1994_s7 = sld [smem:[#allocation2 + $0x401]] }
  0xda   : > { %s1997_s8 = sld [smem:[#allocation5 + $0x401]] }
  0xe2   : > { %509 = vrot.lane.b32.xlu0 %v508_v37, %s2370_s25 }
 0x12e   : > { %v1831_v4 = vpop.f32.mrf.mxu0 }
 0x12f   : > { %v877_v43 = vmul.f32 %v876_v39, %v1831_v4  ;;  %v884_v44 = vmul.f32 %v883_v41, %v1831_v4  ;;  %v891_v47 = vmul.f32 %v890_v45, %v1831_v4  ;;  %v898_v53 = vmul.f32 %v897_v48, %v1831_v4 }
 0x130   : > { %v905_v54 = vmul.f32 %v904_v50, %v1831_v4  ;;  %v912_v1 = vmul.f32 %v911_v58, %v1831_v4  ;;  %v919_v7 = vmul.f32 %v918_v2, %v1831_v4  ;;  %v926_v11 = vmul.f32 %v925_v8, %v1831_v4  ;;  %v679_v2 = vld [vmem:[%s2367_s4 + $0xc] sm:$0xf] }
 0x131   : > { %v880_v51 = vadd.f32 %v879_v40, %v877_v43  ;;  %v887_v52 = vadd.f32 %v886_v42, %v884_v44  ;;  %v894_v56 = vadd.f32 %v893_v46, %v891_v47  ;;  %v901_v62 = vadd.f32 %v900_v49, %v898_v53  ;;  %v1323_v46 = vld [vmem:[%s1769_s22 + $0xc] sm:$0xf] }
 0x132   : > { %v908_v63 = vadd.f32 %v907_v57, %v905_v54  ;;  %v915_v10 = vadd.f32 %v914_v59, %v912_v1  ;;  %v922_v15 = vadd.f32 %v921_v3, %v919_v7  ;;  %v929_v18 = vadd.f32 %v928_v12, %v926_v11 }
 0x133   : > { %v881_v61 = vsel %vm339_vm1, %v880_v51, %v1831_v4  ;;  %v933_v19 = vmul.f32 %v932_v16, %v1831_v4  ;;  %v940_v27 = vmul.f32 %v939_v22, %v1831_v4  ;;  %v947_v28 = vmul.f32 %v946_v24, %v1831_v4 }
 0x134   : > { %v888_v0 = vsel %vm347_vm2, %v887_v52, %v881_v61  ;;  %v954_v36 = vmul.f32 %v953_v30, %v1831_v4  ;;  %v963_v39 = vstv %s1879_s19  ;;  %v967_v40 = vstv %s1886_s29  ;;  %s1999_s19 = sld [smem:[#allocation2 + $0x481]] }
 0x135   : > { %v895_v6 = vsel %vm355_vm3, %v894_v56, %v888_v0  ;;  %v936_v26 = vadd.f32 %v935_v20, %v933_v19  ;;  %v943_v34 = vadd.f32 %v942_v23, %v940_v27  ;;  %v950_v35 = vadd.f32 %v949_v29, %v947_v28  ;;  %v318_v0 = vld [vmem:[%s2367_s4 + $0x10] sm:$0xf]  ;;  %s2001_s29 = sld [smem:[#allocation5 + $0x481]] }
 0x136   : > { %v873_v38 = vpop.f32.mrf.mxu0  ;;  %v902_v9 = vsel %vm363_vm4, %v901_v62, %v895_v6  ;;  %v970_v41 = vstv %s1892_s9  ;;  %v957_v44 = vadd.f32 %v956_v31, %v954_v36  ;;  %v968_v45 = vmul.f32 %v967_v40, %v1831_v4  ;;  %s2007_s9 = sld [smem:[#allocation2 + $0x501]] }
 0x137   : > { %v909_v13 = vsel %vm371_vm5, %v908_v63, %v902_v9  ;;  %v961_v38 = vmul.f32 %v960_v32, %v1831_v4  ;;  %v974_v49 = vstv %s1898_s11  ;;  %v977_v50 = vstv %s1903_s12  ;;  %v505_v63 = vpop.permute.xlu1 %504  ;;  %v678_v9 = vld [vmem:[%s2367_s4 + $0x4] sm:$0xf]  ;;  %s2013_s11 = sld [smem:[#allocation5 + $0x501]] }
 0x138   : > { %v916_v17 = vsel %vm379_vm6, %v915_v10, %v909_v13  ;;  %v971_v52 = vadd.f32 %v970_v41, %v968_v45  ;;  %v975_v53 = vmul.f32 %v974_v49, %v1831_v4  ;;  %v531_v11 = vstv %s1961_s13  ;;  %s2019_s12 = sld [smem:[#allocation2 + $0x581]] }
 0x139   : > { %v923_v21 = vsel %vm387_vm7, %v922_v15, %v916_v17  ;;  %v964_v48 = vadd.f32 %v963_v39, %v961_v38  ;;  %v534_v12 = vstv %s1965_s15  ;;  %v538_v13 = vstv %s1963_s14  ;;  %s2028_s13 = sld [smem:[#allocation2 + $0x601]] }
 0x13a   : > { %v930_v25 = vsel %vm395_vm8, %v929_v18, %v923_v21  ;;  %v978_v57 = vadd.f32 %v977_v50, %v975_v53  ;;  %v541_v15 = vstv %s1967_s16  ;;  %v545_v16 = vstv %s1970_s17  ;;  %s2034_s14 = sld [smem:[#allocation2 + $0x681]] }
 0x13b   : > { %v548_v17 = vstv %s1972_s18  ;;  %v552_v18 = vstv %s1974_s20  ;;  %v555_v19 = vstv %s1976_s26  ;;  %v559_v20 = vstv %s1978_s28  ;;  %s2040_s15 = sld [smem:[#allocation2 + $0x701]] }
 0x13c   : > { %v562_v23 = vstv %s1980_s10  ;;  %v566_v24 = vstv %s1982_s2  ;;  %v573_v29 = vstv %s1986_s5  ;;  %v576_v31 = vstv %s1988_s6  ;;  %s2044_s16 = sld [smem:[#allocation5 + $0x581]] }
 0x13d   : > { %v580_v32 = vstv %s1990_s21  ;;  %v590_v39 = vstv %s1997_s8  ;;  %v594_v40 = vstv %s1999_s19  ;;  %v597_v41 = vstv %s2001_s29  ;;  %s2050_s17 = sld [smem:[#allocation5 + $0x601]] }
 0x13e   : > { %v601_v45 = vstv %s2007_s9  ;;  %s2057_s18 = sld [smem:[#allocation5 + $0x681]]  ;;  %v604_v49 = vstv %s2013_s11  ;;  %v608_v53 = vstv %s2019_s12 }
 0x13f   : > { %s2063_s20 = sld [smem:[#allocation5 + $0x701]] }
 0x140   : > { %s2132_s26 = sld [smem:[#allocation2 + $0x82]] }
 0x141   : > { %v468_v55 = vpop.xlane.xlu0 %467  ;;  %s2134_s28 = sld [smem:[#allocation5 + $0x2]] }
 0x142   : > { %v469_v60 = vsub.f32 %v1803_v33, %v468_v55  ;;  %v937_v33 = vsel %vm2340_vm9, %v936_v26, %v930_v25  ;;  %vm2371_vm9 = vcmp.eq.s32.totalorder %v1710_v14, 11  ;;  %v982_v55 = vunpack.c.l.bf16 %v1323_v46  ;;  %s2136_s10 = sld [smem:[#allocation5 + $0x82]] }
 0x143   : > { %v944_v43 = vsel %vm411_vm10, %v943_v34, %v937_v33  ;;  %v569_v25 = vstv %s1984_s3  ;;  %v583_v33 = vstv %s1992_s27  ;;  %s2138_s2 = sld [smem:[#allocation2 + $0x102]] }
 0x144   : > { %v470_v5 = vmul.f32 1.442695, %v469_v60  ;;  %v951_v47 = vsel %vm419_vm11, %v950_v35, %v944_v43  ;;  %s2140_s3 = sld [smem:[#allocation5 + $0x102]] }
 0x145   : > { %v958_v51 = vsel %vm2371_vm9, %v957_v44, %v951_v47  ;;  %vm2372_vm9 = vcmask 523264   ;;  %s2142_s5 = sld [smem:[#allocation2 + $0x182]] }
 0x146   : > { %1404 = vpow2.f32 %v470_v5  ;;  %v965_v54 = vsel %vm435_vm13, %v964_v48, %v958_v51  ;;  %v685_v3 = vsel %vm2372_vm9, %v679_v2, 0  ;;  %v629_v2 = vstv %s2040_s15  ;;  %s2144_s6 = sld [smem:[#allocation5 + $0x182]] }
 0x147   : > { %v972_v56 = vsel %vm2341_vm14, %v971_v52, %v965_v54  ;;  %vm2373_vm14 = vmmov %vm2372_vm9  ;;  %s2146_s21 = sld [smem:[#allocation2 + $0x202]] }
 0x148   : > { %v979_v58 = vsel %vm2342_vm15, %v978_v57, %v972_v56  ;;  %vm2343_vm15 = vcmask 1043456   ;;  %s2150_s27 = sld [smem:[#allocation5 + $0x202]] }
 0x149   : > { %v1947_v60 = vadd.f32 %v982_v55, %v979_v58  ;;  %v483_v1 = vsel %vm2343_vm15, %v318_v0, 0  ;;  %v615_v58 = vstv %s2028_s13  ;;  %vm2378_vm15 = vcmp.eq.s32.totalorder %v1710_v14, 14  ;;  %s2154_s8 = sld [smem:[#allocation5 + $0x282]] }
 0x14a   : > { %492 = vmatpush.bf16.msra.mxu1 %v483_v1  ;;  %s2156_s19 = sld [smem:[#allocation2 + $0x302]] }
 0x14b   : > { %v987_v4 = vsel %vm465_vm0, %v1947_v60, -inf  ;;  %v984_v62 = vpack.c.bf16 %v1947_v60, %v1947_v60  ;;  %s2158_s29 = sld [smem:[#allocation5 + $0x302]] }
 0x14c   : > { %v1405_v37 = vpop.eup %1404  ;;  %988 = vmax.xlane.f32.xlu0 %v987_v4  ;;  %s2160_s9 = sld [smem:[#allocation2 + $0x382]] }
 0x14d   : > { %v472_v42 = vsel %vm465_vm0, %v1405_v37, 0.0  ;;  %1324 = vst.msk [vmem:[%s1809_s30 + $0xc] sm:$0xf] %vm463_vm12, %v984_v62  ;;  %v622_v62 = vstv %s2034_s14  ;;  %s2162_s11 = sld [smem:[#allocation5 + $0x382]] }
 0x14e   : > { %473 = vadd.xlane.f32.xlu2 %v472_v42  ;;  %694 = vmatpush.bf16.xpose.msrb.mxu1 %v685_v3  ;;  %s2164_s12 = sld [smem:[#allocation2 + $0x402]] }
 0x14f   : > { %s2166_s13 = sld [smem:[#allocation2 + $0x482]] }
 0x150   : > { %s2168_s14 = sld [smem:[#allocation5 + $0x402]] }
 0x151   : > { %s2170_s15 = sld [smem:[#allocation2 + $0x502]] }
 0x154   : > { %v510_v59 = vpop.permute.xlu0 %509 }
 0x155   : > { %v515_v61 = vsel %vm2372_vm9, %v510_v59, 0 }
 0x156   : > { %524 = vmatpush.bf16.xpose.msra.mxu2 %v515_v61 }
 0x15d   : > { %1224 = vmatmul.msk.bf16.vlgmr.msra.gmra.mxu2 %vm2373_vm14, %v505_v63  ;;  %vm2374_vm14 = vmmov %vm2372_vm9  ;;  %vm2375_vm9 = vcmp.eq.s32.totalorder %v1710_v14, 8 }
 0x1bf   : > { %v2004_v10 = vpop.xlane.xlu0 %988 }
 0x1c0   : > { %v990_v21 = vsub.f32 %v1947_v60, %v2004_v10 }
 0x1c1   : > { %v474_v5 = vpop.xlane.xlu2 %473 }
 0x1c2   : > { %1406 = vrcp.f32 %v474_v5 }
 0x1c8   : > { %v1407_v6 = vpop.eup %1406 }
 0x1c9   : > { %v476_v7 = vmul.f32 %v1407_v6, %v1405_v37  ;;  %v587_v37 = vstv %s1994_s7  ;;  %v611_v6 = vstv %s2044_s16  ;;  %s2152_s7 = sld [smem:[#allocation2 + $0x282]] }
 0x1ca   : > { %s2172_s16 = sld [smem:[#allocation5 + $0x482]] }
 0x1cb   : > { %v477_v8 = vpack.c.bf16 %v476_v7, %v476_v7 }
 0x1cd   : > { %1223 = vmatmul.msk.bf16.vlgmr.msra.gmra.mxu1 %vm465_vm0, %v477_v8 }
 0x1dd   : > { %1258 = vmatmul.msk.bf16.vlgmr.msrb.gmra.mxu1 %vm2374_vm14, %v678_v9  ;;  %vm2376_vm14 = vcmp.eq.s32.totalorder %v1710_v14, 11 }
 0x1e0   : > { %v2023_v22 = vpop.f32.mrf.mxu2 }
 0x1e1   : > { %v532_v26 = vmul.f32 %v531_v11, %v2023_v22  ;;  %v539_v27 = vmul.f32 %v538_v13, %v2023_v22  ;;  %v546_v28 = vmul.f32 %v545_v16, %v2023_v22  ;;  %v553_v30 = vmul.f32 %v552_v18, %v2023_v22  ;;  %v2094_v18 = vld [vmem:[%s1769_s22 + $0x4] sm:$0xff]   ;;  %s2130_s22 = sld [smem:[#allocation2 + $0x2]] }
 0x1e2   : > { %v560_v36 = vmul.f32 %v559_v20, %v2023_v22  ;;  %v567_v38 = vmul.f32 %v566_v24, %v2023_v22  ;;  %v574_v44 = vmul.f32 %v573_v29, %v2023_v22  ;;  %v581_v48 = vmul.f32 %v580_v32, %v2023_v22 }
 0x1e3   : > { %v535_v34 = vadd.f32 %v534_v12, %v532_v26  ;;  %v542_v35 = vadd.f32 %v541_v15, %v539_v27  ;;  %v549_v43 = vadd.f32 %v548_v17, %v546_v28  ;;  %v556_v47 = vadd.f32 %v555_v19, %v553_v30 }
 0x1e4   : > { %v563_v51 = vadd.f32 %v562_v23, %v560_v36  ;;  %v588_v52 = vmul.f32 %v587_v37, %v2023_v22  ;;  %v570_v56 = vadd.f32 %v569_v25, %v567_v38  ;;  %v595_v57 = vmul.f32 %v594_v40, %v2023_v22 }
 0x1e5   : > { %v536_v42 = vsel %vm339_vm1, %v535_v34, %v2023_v22  ;;  %v577_v61 = vadd.f32 %v576_v31, %v574_v44  ;;  %v602_v4 = vmul.f32 %v601_v45, %v2023_v22  ;;  %v584_v0 = vadd.f32 %v583_v33, %v581_v48 }
 0x1e6   : > { %v543_v46 = vsel %vm347_vm2, %v542_v35, %v536_v42  ;;  %v609_v1 = vmul.f32 %v608_v53, %v2023_v22  ;;  %v591_v5 = vadd.f32 %v590_v39, %v588_v52  ;;  %v616_v7 = vmul.f32 %v615_v58, %v2023_v22  ;;  %v2126_v35 = vld [vmem:[%s2367_s4 + $0x10] sm:$0xff]  }
 0x1e7   : > { %v550_v50 = vsel %vm355_vm3, %v549_v43, %v543_v46  ;;  %v598_v9 = vadd.f32 %v597_v41, %v595_v57  ;;  %v618_v11 = vstv %s2050_s17  ;;  %v623_v12 = vmul.f32 %v622_v62, %v2023_v22  ;;  %s2176_s17 = sld [smem:[#allocation2 + $0x582]] }
 0x1e8   : > { %v528_v54 = vpop.f32.mrf.mxu2  ;;  %v557_v55 = vsel %vm363_vm4, %v556_v47, %v550_v50  ;;  %v605_v15 = vadd.f32 %v604_v49, %v602_v4  ;;  %v625_v16 = vstv %s2057_s18  ;;  %v630_v17 = vmul.f32 %v629_v2, %v2023_v22  ;;  %s2182_s18 = sld [smem:[#allocation5 + $0x502]] }
 0x1e9   : > { %v564_v59 = vsel %vm371_vm5, %v563_v51, %v557_v55  ;;  %v612_v20 = vadd.f32 %v611_v6, %v609_v1  ;;  %v632_v23 = vstv %s2063_s20  ;;  %v619_v25 = vadd.f32 %v618_v11, %v616_v7  ;;  %s2188_s20 = sld [smem:[#allocation2 + $0x602]] }
 0x1ea   : > { %v571_v63 = vsel %vm379_vm6, %v570_v56, %v564_v59  ;;  %v626_v27 = vadd.f32 %v625_v16, %v623_v12  ;;  %v637_v28 = vunpack.c.l.bf16 %v2094_v18  ;;  %v991_v22 = vmul.f32 1.442695, %v990_v21 }
 0x1eb   : > { %v578_v3 = vsel %vm387_vm7, %v577_v61, %v571_v63  ;;  %v633_v30 = vadd.f32 %v632_v23, %v630_v17  ;;  %v1000_v36 = vunpack.c.h.b16 %v2126_v35  ;;  %v701_v40 = vstv %s2130_s22  ;;  %s2194_s22 = sld [smem:[#allocation2 + $0x682]] }
 0x1ec   : > { %v585_v8 = vsel %vm395_vm8, %v584_v0, %v578_v3  ;;  %1408 = vpow2.f32 %v991_v22  ;;  %v708_v41 = vstv %s2132_s26  ;;  %v704_v42 = vstv %s2134_s28  ;;  %s2200_s26 = sld [smem:[#allocation2 + $0x702]] }
 0x1ed   : > { %v592_v13 = vsel %vm2375_vm9, %v591_v5, %v585_v8  ;;  %vm2377_vm9 = vcmp.eq.s32.totalorder %v1710_v14, 13  ;;  %v1001_v37 = vpack.c.b16 %v1000_v36, %v1000_v36  ;;  %v711_v43 = vstv %s2136_s10  ;;  %s2202_s28 = sld [smem:[#allocation5 + $0x582]] }
 0x1ee   : > { %v599_v19 = vsel %vm411_vm10, %v598_v9, %v592_v13  ;;  %v715_v44 = vstv %s2138_s2  ;;  %v722_v45 = vstv %s2142_s5  ;;  %v718_v46 = vstv %s2140_s3  ;;  %s2206_s10 = sld [smem:[#allocation5 + $0x602]] }
 0x1ef   : > { %v606_v24 = vsel %vm419_vm11, %v605_v15, %v599_v19  ;;  %v725_v47 = vstv %s2144_s6  ;;  %v729_v48 = vstv %s2146_s21  ;;  %v736_v49 = vstv %s2152_s7  ;;  %s2208_s2 = sld [smem:[#allocation5 + $0x682]] }
 0x1f0   : > { %v613_v26 = vsel %vm2376_vm14, %v612_v20, %v606_v24  ;;  %v732_v50 = vstv %s2150_s27  ;;  %v739_v51 = vstv %s2154_s8  ;;  %v743_v52 = vstv %s2156_s19  ;;  %s2212_s3 = sld [smem:[#allocation5 + $0x702]]  ;;  %s1056_s19 = sshll.u32 %s1809_s30, 4  ;;  %s1057_s19 = int_to_ptr.vmem [resolvable:$true] %s1056_s19 }
 0x1f1   : > { %v620_v29 = vsel %vm435_vm13, %v619_v25, %v613_v26  ;;  %v750_v53 = vstv %s2160_s9  ;;  %v746_v55 = vstv %s2158_s29  ;;  %v753_v56 = vstv %s2162_s11  ;;  %s2386_s5 = sld [smem:[#allocation15_spill]]  ;;  %s1041_s9 = scalar_lea.sflag [#allocation3], %s296_s24 }
 0x1f2   : > { %v627_v31 = vsel %vm2377_vm9, %v626_v27, %v620_v29  ;;  %v2121_v10 = vpop.eup %1408  ;;  %v757_v57 = vstv %s2164_s12  ;;  %v764_v58 = vstv %s2166_s13  ;;  %v760_v1 = vstv %s2168_s14  ;;  %s2388_s7 = sld [smem:[#allocation27_spill]] }
 0x1f3   : > { %v634_v32 = vsel %vm2378_vm15, %v633_v30, %v627_v31  ;;  %v993_v21 = vsel %vm465_vm0, %v2121_v10, 0.0  ;;  %v771_v2 = vstv %s2170_s15  ;;  %v767_v11 = vstv %s2172_s16 }
 0x1f4   : > { %v2113_v33 = vadd.f32 %v637_v28, %v634_v32  ;;  %v778_v12 = vstv %s2176_s17  ;;  %v774_v17 = vstv %s2182_s18  ;;  %v785_v24 = vstv %s2188_s20 }
 0x1f5   : > { %v792_v28 = vstv %s2194_s22  ;;  %v799_v32 = vstv %s2200_s26 }
 0x1f6   : > { %v642_v34 = vsel %vm465_vm0, %v2113_v33, -inf  ;;  %v639_v60 = vpack.c.bf16 %v2113_v33, %v2113_v33 }
 0x1f7   : > { %643 = vmax.xlane.f32.xlu1 %v642_v34  ;;  %s1333_s6 = sshll.u32 %s2386_s5, 4 }
 0x1f8   : > { %1256 = vst.msk [vmem:[%s1809_s30 + $0x4] sm:$0xf] %vm463_vm12, %v639_v60  ;;  %s1055_s8 = scalar_lea.hbm %s2388_s7, %s1333_s6  ;;  %s1470_s15 = scalar_lea.hbm %s2388_s7, 32 }
 0x1f9   : > { %s1058_s29 = sshll.u32 %s1055_s8, 4  ;;  %s1059_s29 = int_to_ptr.hbm [resolvable:$true] %s1058_s29 }
 0x1fa   : > { %s1464_s11 = sshra.s32 %s1059_s29, 4  ;;  %s1465_s11 = int_to_ptr.hbm [resolvable:$true] %s1464_s11 }
 0x1fb   : > { %s1466_s12 = scalar_lea.hbm %s1465_s11, 16  ;;  %p1471_p3 = scmp.lt.s32.totalorder %s1465_s11, %s2388_s7 }
 0x1fc   : > { %p1467_p0 = scmp.ne.s32.totalorder %s1465_s11, %s1466_s12  ;;  %p1472_p4 = scmp.lt.s32.totalorder %s1470_s15, %s1466_s12 }
 0x1fe   : > { %p1468_p1 = pnand %p1467_p0, %p1601_p5  ;;  %p1473_p7 = por %p1472_p4, %p1471_p3 }
 0x1ff   : > { %994 = vadd.xlane.f32.xlu1 %v993_v21  ;;  %v781_v21 = vstv %s2202_s28 }
 0x200   : > { %p1469_p2 = pneg %p1468_p1 }
 0x202   : > { %p1474_p8 = pnand %p1473_p7, %p1469_p2 }
 0x218   : > { %1002 = vrot.lane.b32.xlu1 %v1001_v37, %s2370_s25 }
 0x24a   : > { %v2148_v38 = vpop.f32.mrf.mxu1 }
 0x252   : > { %v496_v39 = vpop.f32.mrf.mxu1 }
 0x25a   : > { %v696_v54 = vpop.f32.mrf.mxu1 }
 0x25b   : > { %v702_v59 = vmul.f32 %v701_v40, %v696_v54  ;;  %v709_v61 = vmul.f32 %v708_v41, %v696_v54  ;;  %v716_v4 = vmul.f32 %v715_v44, %v696_v54  ;;  %v723_v62 = vmul.f32 %v722_v45, %v696_v54 }
 0x25c   : > { %v730_v63 = vmul.f32 %v729_v48, %v696_v54  ;;  %v737_v0 = vmul.f32 %v736_v49, %v696_v54  ;;  %v744_v7 = vmul.f32 %v743_v52, %v696_v54  ;;  %v751_v9 = vmul.f32 %v750_v53, %v696_v54 }
 0x25d   : > { %v705_v3 = vadd.f32 %v704_v42, %v702_v59  ;;  %v712_v5 = vadd.f32 %v711_v43, %v709_v61  ;;  %v719_v6 = vadd.f32 %v718_v46, %v716_v4  ;;  %v726_v8 = vadd.f32 %v725_v47, %v723_v62 }
 0x25e   : > { %v733_v15 = vadd.f32 %v732_v50, %v730_v63  ;;  %v758_v16 = vmul.f32 %v757_v57, %v696_v54  ;;  %v740_v20 = vadd.f32 %v739_v51, %v737_v0  ;;  %v765_v23 = vmul.f32 %v764_v58, %v696_v54 }
 0x25f   : > { %v706_v13 = vsel %vm339_vm1, %v705_v3, %v696_v54  ;;  %v747_v26 = vadd.f32 %v746_v55, %v744_v7  ;;  %v772_v27 = vmul.f32 %v771_v2, %v696_v54  ;;  %v754_v30 = vadd.f32 %v753_v56, %v751_v9 }
 0x260   : > { %v713_v19 = vsel %vm347_vm2, %v712_v5, %v706_v13  ;;  %v779_v31 = vmul.f32 %v778_v12, %v696_v54  ;;  %v761_v60 = vadd.f32 %v760_v1, %v758_v16  ;;  %v786_v36 = vmul.f32 %v785_v24, %v696_v54  ;;  %vm2380_vm2 = vmmov %vm2376_vm14 }
 0x261   : > { %v720_v25 = vsel %vm355_vm3, %v719_v6, %v713_v19  ;;  %v768_v39 = vadd.f32 %v767_v11, %v765_v23  ;;  %v788_v40 = vstv %s2206_s10  ;;  %v793_v41 = vmul.f32 %v792_v28, %v696_v54  ;;  %vm2381_vm3 = vmmov %vm2377_vm9  ;;  %v680_v19 = vld [vmem:[%s2367_s4 + $0x14] sm:$0xf] }
 0x262   : > { %v698_v22 = vpop.f32.mrf.mxu1  ;;  %v727_v29 = vsel %vm363_vm4, %v726_v8, %v720_v25  ;;  %v775_v43 = vadd.f32 %v774_v17, %v772_v27  ;;  %v795_v44 = vstv %s2208_s2  ;;  %v800_v45 = vmul.f32 %v799_v32, %v696_v54  ;;  %vm2382_vm4 = vmmov %vm2378_vm15 }
 0x263   : > { %v734_v34 = vsel %vm371_vm5, %v733_v15, %v727_v29  ;;  %v782_v47 = vadd.f32 %v781_v21, %v779_v31  ;;  %v802_v48 = vstv %s2212_s3  ;;  %vm2379_vm1 = vcmp.eq.s32.totalorder %v1710_v14, 8 }
 0x264   : > { %v741_v37 = vsel %vm379_vm6, %v740_v20, %v734_v34  ;;  %v789_v50 = vadd.f32 %v788_v40, %v786_v36  ;;  %v796_v52 = vadd.f32 %v795_v44, %v793_v41  ;;  %v803_v55 = vadd.f32 %v802_v48, %v800_v45 }
 0x265   : > { %v748_v42 = vsel %vm387_vm7, %v747_v26, %v741_v37  ;;  %v807_v57 = vunpack.c.h.bf16 %v2094_v18  ;;  %vm2383_vm5 = vcmask 1043456   ;;  %v655_v8 = vunpack.c.l.b16 %v2126_v35 }
 0x266   : > { %v755_v46 = vsel %vm395_vm8, %v754_v30, %v748_v42  ;;  %vm2384_vm6 = vmmov %vm2383_vm5 }
 0x267   : > { %v762_v49 = vsel %vm2379_vm1, %v761_v60, %v755_v46  ;;  %v656_v9 = vpack.c.b16 %v655_v8, %v655_v8  ;;  %vm2385_vm7 = vmmov %vm2383_vm5 }
 0x268   : > { %v769_v51 = vsel %vm411_vm10, %v768_v39, %v762_v49  ;;  %v828_v23 = vsel %vm2385_vm7, %v680_v19, 0 }
 0x269   : > { %v776_v53 = vsel %vm419_vm11, %v775_v43, %v769_v51 }
 0x26a   : > { %v644_v56 = vpop.xlane.xlu1 %643  ;;  %v783_v54 = vsel %vm2380_vm2, %v782_v47, %v776_v53 }
 0x26b   : > { %v645_v58 = vsub.f32 %v2113_v33, %v644_v56  ;;  %v790_v59 = vsel %vm435_vm13, %v789_v50, %v783_v54 }
 0x26c   : > { %v797_v61 = vsel %vm2381_vm3, %v796_v52, %v790_v59 }
 0x26d   : > { %v646_v4 = vmul.f32 1.442695, %v645_v58  ;;  %v804_v62 = vsel %vm2382_vm4, %v803_v55, %v797_v61 }
 0x26e   : > { %v808_v63 = vadd.f32 %v807_v57, %v804_v62 }
 0x26f   : > { %1410 = vpow2.f32 %v646_v4 }
 0x270   : > { %v809_v0 = vpack.c.bf16 %v808_v63, %v808_v63  ;;  %v812_v2 = vsel %vm465_vm0, %v808_v63, -inf }
 0x272   : > { %1290 = vst.msk [vmem:[%s1809_s30 + $0x8] sm:$0xf] %vm463_vm12, %v809_v0  ;;  %v995_v33 = vpop.xlane.xlu1 %994 }
 0x273   : > { %1412 = vrcp.f32 %v995_v33 }
 0x275   : > { %v1411_v1 = vpop.eup %1410 }
 0x276   : > { %v648_v18 = vsel %vm465_vm0, %v1411_v1, 0.0 }
 0x277   : > { %649 = vadd.xlane.f32.xlu2 %v648_v18 }
 0x279   : > { %v1413_v3 = vpop.eup %1412 }
 0x27a   : > { %v997_v5 = vmul.f32 %v1413_v3, %v2121_v10 }
 0x27c   : > { %v998_v7 = vpack.c.bf16 %v997_v5, %v997_v5 }
 0x27f   : > { %813 = vmax.xlane.f32.xlu2 %v812_v2 }
 0x28a   : > { %v1003_v6 = vpop.permute.xlu1 %1002 }
 0x28b   : > { %v1008_v14 = vsel %vm2383_vm5, %v1003_v6, 0 }
 0x28c   : > { %1017 = vmatpush.bf16.msrb.mxu2 %v1008_v14 }
 0x28f   : > { %1325 = vmatmul.msk.bf16.vlgmr.msrb.gmra.mxu2 %vm465_vm0, %v998_v7 }
 0x297   : > { %657 = vrot.lane.b32.xlu2 %v656_v9, %s2370_s25 }
 0x2ea   : > { %v650_v11 = vpop.xlane.xlu2 %649 }
 0x2eb   : > { %1414 = vrcp.f32 %v650_v11 }
 0x2f1   : > { %v1415_v16 = vpop.eup %1414 }
 0x2f2   : > { %v814_v12 = vpop.xlane.xlu2 %813  ;;  %v652_v10 = vmul.f32 %v1415_v16, %v1411_v1 }
 0x2f3   : > { %v815_v13 = vsub.f32 %v808_v63, %v814_v12 }
 0x2f4   : > { %v653_v35 = vpack.c.bf16 %v652_v10, %v652_v10 }
 0x2f5   : > { %v816_v15 = vmul.f32 1.442695, %v815_v13 }
 0x2f7   : > { %1416 = vpow2.f32 %v816_v15 }
 0x2fa   : > { %v658_v17 = vpop.permute.xlu2 %657 }
 0x2fb   : > { %v663_v20 = vsel %vm2384_vm6, %v658_v17, 0 }
 0x2fc   : > { %672 = vmatpush.bf16.msra.mxu3 %v663_v20 }
 0x2fd   : > { %v1417_v24 = vpop.eup %1416 }
 0x2fe   : > { %v818_v25 = vsel %vm465_vm0, %v1417_v24, 0.0 }
 0x2ff   : > { %1257 = vmatmul.msk.bf16.vlgmr.msra.gmra.mxu3 %vm465_vm0, %v653_v35  ;;  %819 = vadd.xlane.f32.xlu0 %v818_v25 }
 0x300   : > { %837 = vmatpush.bf16.msrb.mxu3 %v828_v23 }
 0x312   : > { %v1019_v26 = vpop.f32.mrf.mxu2 }
 0x31a   : > { %v1021_v27 = vpop.f32.mrf.mxu2 }
 0x372   : > { %v820_v28 = vpop.xlane.xlu0 %819 }
 0x373   : > { %1418 = vrcp.f32 %v820_v28 }
 0x379   : > { %v1419_v22 = vpop.eup %1418 }
 0x37a   : > { %v822_v29 = vmul.f32 %v1419_v22, %v1417_v24 }
 0x37c   : > { %v823_v30 = vpack.c.bf16 %v822_v29, %v822_v29 }
 0x37e   : > { %1291 = vmatmul.msk.bf16.vlgmr.msrb.gmra.mxu3 %vm465_vm0, %v823_v30 }
 0x382   : > { %v674_v31 = vpop.f32.mrf.mxu3 }
 0x383   : > { %v1399_v32 = vpack.i.bf16 %v1019_v26, %v674_v31 }
 0x385   : > { %1400 = vrot.lane.b32.xlu0 %v1399_v32, %s2370_s25 }
 0x38a   : > { %v676_v34 = vpop.f32.mrf.mxu3 }
 0x38b   : > { %1477 = shalt.err (!%p1474_p8)
}
 0x38c   : > { %s1527_s23 = smov 4   ;;  %s1332_s24 = sshll.u32 %s2366_s0, 3  ;;  %vm2390_vm0 = vcmask 523264  }
 0x38d   : > { %1343 = dma.vmem_to_hbm [thread:$0]  (%p1601_p5), %s1057_s19, 256, %s1059_s29, %s1041_s9, %s2370_s25, %s2370_s25, %s1527_s23   ;;  %vm2391_vm8 = vmmov %vm2390_vm0 }
 0x38e   : > { %s2389_s20 = sld [smem:[#allocation26_spill]] }
 0x394   : > { %s313_s22 = scalar_lea.vmem %s2389_s20, %s1332_s24 }
 0x3f7   : > { %v1401_v60 = vpop.permute.xlu0 %1400 }
 0x3f8   : > { %v1402_v21 = vunpack.i.l.bf16 %v1401_v60  ;;  %v1403_v36 = vunpack.i.h.bf16 %v1401_v60 }
 0x3fa   : > { %v1031_v39 = vsel %vm2390_vm0, %v2148_v38, %v1402_v21 }
 0x401   : > { %v839_v37 = vpop.f32.mrf.mxu3 }
 0x402   : > { %v1032_v40 = vsel %vm2391_vm8, %v839_v37, %v1403_v36 }
 0x403   : > { %v1033_v41 = vpack.c.bf16 %v1032_v40, %v1031_v39 }
 0x405   : > { %1034 = vst [vmem:[%s313_s22] sm:$0xff] %v1033_v41 }
 0x409   : > { %v841_v42 = vpop.f32.mrf.mxu3 }
 0x40a PF: > { %s2392_s26 = sld [smem:[#allocation14_spill]] }
 0x40b   : > { %s2393_s25 = sld [smem:[#allocation11_spill]] }
 0x410   : > { %p1360_p5 = scmp.ge.s32.totalorder %s2392_s26, 2 }
 0x411   : > { %s1081_s0 = sand.u32 1, %s2393_s25  }
 0x412   : > { %p1353_p9 = pnand %p1360_p5, %p1605_p6  ;;  %s1082_s10 = scalar_lea.sflag [#allocation3], %s1081_s0 }
 0x414   : > { %p1354_p10 = pneg %p1353_p9 }
 0x416   : > { %1503 = dma.done.wait (%p1354_p10), %s1082_s10, 256  }
 0x417   : > { %1505 = vsyncadd (%p1354_p10), %s1082_s10, 4294967040  ;;  %s2395_s24 = sld [smem:[#allocation16_spill]] }
 0x418   : > { %s2396_s21 = sld [smem:[#allocation12_spill]] }
 0x419   : > { %s2397_s22 = sld [smem:[#allocation13_spill]] }
 0x41a   : > { %s2398_s23 = sld [smem:[#allocation17_spill]] }
 0x41d   : > { %p19_p11 = scmp.ge.s32.totalorder %s2395_s24, 4  }
 0x41f   :  { %21 = sbr.rel (!%p19_p11) target bundleno = 12 (0xc), region = 105 }
 0x424   :  { %1088 = vsyncpa [#allocation3], 1 }
 0x425   :  { %1090 = vsyncpa [#allocation3 + $0x1], 1 }
 0x426   :  { %1091 = vsyncpa [#allocation4], 1 }
 0x427   :  { %1093 = vsyncpa [#allocation4 + $0x1], 1 }
 0x428   :  { %1094 = vsyncpa [#allocation6], 1 }

</bundles_post_ra>
